<compile_context>
chip_gen: v7x
topology: tpu7x:2x2x1
jax: 0.10.0
libtpu: 0.0.40
codegen_flags: <defaults>
</compile_context>

<pallas_src>
import functools

import jax
import jax.numpy as jnp
from jax.experimental import pallas as pl
from jax.experimental.pallas import tpu as pltpu


# ----------------------------------------------------------------------------
# BlockSpec helper: whole array as a single block
# ----------------------------------------------------------------------------
def _full_spec(shape):
    nd = len(shape)
    return pl.BlockSpec(shape, lambda *i: (0,) * nd)


# ----------------------------------------------------------------------------
# Kernel A: conv1 + ReLU + maxpool(2x2), row-tiled over 8-image groups
#   cols_ref : (4, TM, 128)  four pool-phase im2col matrices (K padded 75->128)
#   w_ref    : (128, 128)    conv1 weight, (K, Cout) zero-padded
#   b_ref    : (1, 128)      conv1 bias, zero-padded
#   o_ref    : (TM, 128)     pooled activations, rows=(n, py, px), lanes=channels
# ----------------------------------------------------------------------------
def _conv_pool_kernel(cols_ref, w_ref, b_ref, o_ref):
    w = w_ref[...]
    s = jnp.dot(cols_ref[0], w, preferred_element_type=jnp.float32)
    for t in range(1, 4):
        s = jnp.maximum(s, jnp.dot(cols_ref[t], w,
                                   preferred_element_type=jnp.float32))
    o_ref[...] = jnp.maximum(s + b_ref[...], 0.0)


def conv_pool_call(cols, w, b):
    _, M, K = cols.shape
    C = w.shape[1]
    tm = 8 * 196                      # 8 images * 14*14 pooled positions
    assert M % tm == 0
    return pl.pallas_call(
        _conv_pool_kernel,
        out_shape=jax.ShapeDtypeStruct((M, C), jnp.float32),
        grid=(M // tm,),
        in_specs=[pl.BlockSpec((4, tm, K), lambda i: (0, i, 0)),
                  pl.BlockSpec((K, C), lambda i: (0, 0)),
                  pl.BlockSpec((1, C), lambda i: (0, 0))],
        out_specs=pl.BlockSpec((tm, C), lambda i: (i, 0)),
        compiler_params=pltpu.CompilerParams(
            dimension_semantics=("parallel",)),
    )(cols, w, b)


# ----------------------------------------------------------------------------
# Kernel B: conv2 + ReLU + maxpool(2x2) + fc1 + ReLU + fc2 + ReLU + fc3
#   cols_ref : (4, 25*N, 256) four pool-phase im2col matrices (K 150->256),
#              rows ordered (i3, j3, n) so the N rows of one spatial position
#              are contiguous (N is the padded batch, multiple of 8).
#   w2_ref   : (256, 128)  conv2 weight (K, Cout) zero-padded
#   b2_ref   : (1, 128)
#   wf1_ref  : (25, 128, 256)  fc1 weight per spatial position (hw, cin_pad, out)
#   bf1_ref  : (1, 256)
#   wf2_ref  : (256, 128),  bf2_ref: (1, 128)
#   wf3_ref  : (128, 128) (100 valid out cols), bf3_ref: (1, 128)
#   o_ref    : (N, 128) padded logits
# ----------------------------------------------------------------------------
def _conv_fc_kernel(cols_ref, w2_ref, b2_ref, wf1_ref, bf1_ref,
                    wf2_ref, bf2_ref, wf3_ref, bf3_ref, o_ref, *, n):
    w2 = w2_ref[...]
    s = jnp.dot(cols_ref[0], w2, preferred_element_type=jnp.float32)
    for t in range(1, 4):
        s = jnp.maximum(s, jnp.dot(cols_ref[t], w2,
                                   preferred_element_type=jnp.float32))
    p2 = jnp.maximum(s + b2_ref[...], 0.0)   # (25*n, 128); lanes >=16 are 0

    # fc1 == sum over the 25 spatial positions of (n,128)@(128,256); the padded
    # channel lanes (16..127) are exactly zero on both operands.
    acc = jnp.zeros((n, 256), jnp.float32)
    for hw in range(25):
        acc = acc + jnp.dot(p2[hw * n:(hw + 1) * n, :], wf1_ref[hw],
                            preferred_element_type=jnp.float32)
    h = jnp.maximum(acc + bf1_ref[...], 0.0)                       # (n, 256)
    h = jnp.maximum(jnp.dot(h, wf2_ref[...],
                            preferred_element_type=jnp.float32)
                    + bf2_ref[...], 0.0)                           # (n, 128)
    o_ref[...] = (jnp.dot(h, wf3_ref[...],
                          preferred_element_type=jnp.float32)
                  + bf3_ref[...])                                  # (n, 128)


def conv_fc_call(cols2, w2, b2, wf1, bf1, wf2, bf2, wf3, bf3, *, n):
    kernel = functools.partial(_conv_fc_kernel, n=n)
    args = (cols2, w2, b2, wf1, bf1, wf2, bf2, wf3, bf3)
    return pl.pallas_call(
        kernel,
        out_shape=jax.ShapeDtypeStruct((n, 128), jnp.float32),
        grid=(1,),
        in_specs=[_full_spec(a.shape) for a in args],
        out_specs=_full_spec((n, 128)),
        compiler_params=pltpu.CompilerParams(
            dimension_semantics=("arbitrary",)),
    )(*args)


# ----------------------------------------------------------------------------
# Parameters (deterministic, PyTorch-style uniform(-1/sqrt(fan_in), +))
# ----------------------------------------------------------------------------
def init_params(key, num_classes=100):
    def u(k, shape, fan_in):
        bound = 1.0 / (fan_in ** 0.5)
        return jax.random.uniform(k, shape, jnp.float32, -bound, bound)

    ks = jax.random.split(key, 10)
    p = {}
    p["conv1_w"] = u(ks[0], (6, 3, 5, 5), 3 * 5 * 5)
    p["conv1_b"] = u(ks[1], (6,), 3 * 5 * 5)
    p["conv2_w"] = u(ks[2], (16, 6, 5, 5), 6 * 5 * 5)
    p["conv2_b"] = u(ks[3], (16,), 6 * 5 * 5)
    p["fc1_w"] = u(ks[4], (256, 400), 400)
    p["fc1_b"] = u(ks[5], (256,), 400)
    p["fc2_w"] = u(ks[6], (128, 256), 256)
    p["fc2_b"] = u(ks[7], (128,), 256)
    p["fc3_w"] = u(ks[8], (num_classes, 128), 128)
    p["fc3_b"] = u(ks[9], (num_classes,), 128)
    return p


# ----------------------------------------------------------------------------
# One-time weight prep (hoisted out of the forward path): reshape / transpose /
# zero-pad every weight into the lane-dense layouts the kernels consume.
# ----------------------------------------------------------------------------
def prepare_params(params, num_classes=100):
    def padded(a, shape):
        out = jnp.zeros(shape, jnp.float32)
        return out.at[tuple(slice(0, s) for s in a.shape)].set(
            a.astype(jnp.float32))

    w1 = params["conv1_w"].reshape(6, 75).T            # (75, 6)  (cin,ky,kx) x cout
    w2 = params["conv2_w"].reshape(16, 150).T          # (150, 16)
    # fc1 weight: feature order is (c, h, w) -> split per spatial position hw.
    wf1 = params["fc1_w"].reshape(256, 16, 25).transpose(2, 1, 0)   # (25, 16, 256)

    return {
        "w1": padded(w1, (128, 128)),
        "b1": padded(params["conv1_b"].reshape(1, 6), (1, 128)),
        "w2": padded(w2, (256, 128)),
        "b2": padded(params["conv2_b"].reshape(1, 16), (1, 128)),
        "wf1": padded(wf1, (25, 128, 256)),
        "bf1": params["fc1_b"].reshape(1, 256).astype(jnp.float32),
        "wf2": params["fc2_w"].T.astype(jnp.float32),               # (256, 128)
        "bf2": params["fc2_b"].reshape(1, 128).astype(jnp.float32),
        "wf3": padded(params["fc3_w"].T, (128, 128)),
        "bf3": padded(params["fc3_b"].reshape(1, num_classes), (1, 128)),
    }


# ----------------------------------------------------------------------------
# Forward pass (all glue + both kernels under one jit)
# ----------------------------------------------------------------------------
@functools.partial(jax.jit, static_argnames=("num_classes",))
def _forward_logits(pp, x, num_classes=100):
    N, C, H, W = x.shape
    assert (C, H, W) == (3, 32, 32), "LeNet flatten size requires 3x32x32 input"

    # Pad batch to a multiple of 8 (>= 8) so all in-kernel row slices and output
    # tiles are sublane-aligned; padded rows are sliced away at the end.
    n_pad = max(8, -(-N // 8) * 8)
    if n_pad != N:
        x = jnp.pad(x, ((0, n_pad - N), (0, 0), (0, 0), (0, 0)))

    # --- conv1+pool1 prep: four pool-phase im2col matrices from the input ---
    xh = x.transpose(0, 2, 3, 1)                                   # (n,32,32,3)
    patches = [xh[:, ky:ky + 28, kx:kx + 28, :]
               for ky in range(5) for kx in range(5)]
    cols = jnp.stack(patches, axis=4).reshape(n_pad, 28, 28, 75)   # (c,ky,kx) order
    taps = [cols[:, dy::2, dx::2, :].reshape(n_pad * 196, 75)
            for dy in (0, 1) for dx in (0, 1)]
    cols1 = jnp.pad(jnp.stack(taps, axis=0), ((0, 0), (0, 0), (0, 128 - 75)))
    pooled1 = conv_pool_call(cols1, pp["w1"], pp["b1"])            # (n*196, 128)

    # --- conv2+pool2 prep from pooled1 (rows=(n,py,px), lanes=channels) ---
    p1 = pooled1[:, :6].reshape(n_pad, 14, 14, 6)
    patches2 = [p1[:, ky:ky + 10, kx:kx + 10, :]
                for ky in range(5) for kx in range(5)]
    cols2 = jnp.stack(patches2, axis=4).reshape(n_pad, 10, 10, 150)
    taps2 = [cols2[:, e::2, f::2, :].transpose(1, 2, 0, 3).reshape(25 * n_pad, 150)
             for e in (0, 1) for f in (0, 1)]                      # rows=(i3,j3,n)
    cols2s = jnp.pad(jnp.stack(taps2, axis=0), ((0, 0), (0, 0), (0, 256 - 150)))

    logits = conv_fc_call(cols2s, pp["w2"], pp["b2"], pp["wf1"], pp["bf1"],
                          pp["wf2"], pp["bf2"], pp["wf3"], pp["bf3"], n=n_pad)
    return logits[:N, :num_classes]


def lenet_forward(prepped, x, num_classes=100):
    logits = _forward_logits(prepped, x, num_classes=num_classes)
    N = x.shape[0]
    # Shapes mirror the PyTorch module's intermediates (layouts differ on-chip).
    shape_dict = {1: [N, 6, 14, 14], 2: [N, 16, 5, 5], 3: [N, 400],
                  4: [N, 256], 5: [N, 128], 6: [N, num_classes]}
    return logits, shape_dict


# ----------------------------------------------------------------------------
# Pure-JAX reference (numerical sanity check)
# ----------------------------------------------------------------------------
def lenet_reference(params, x):
    def conv(x, w, b):
        y = jax.lax.conv_general_dilated(
            x, w, window_strides=(1, 1), padding="VALID",
            dimension_numbers=("NCHW", "OIHW", "NCHW"))
        return jnp.maximum(y + b[None, :, None, None], 0.0)

    def pool(x):
        return jax.lax.reduce_window(
            x, -jnp.inf, jax.lax.max,
            window_dimensions=(1, 1, 2, 2), window_strides=(1, 1, 2, 2),
            padding="VALID")

    out = pool(conv(x, params["conv1_w"], params["conv1_b"]))
    out = pool(conv(out, params["conv2_w"], params["conv2_b"]))
    out = out.reshape(out.shape[0], -1)
    out = jnp.maximum(out @ params["fc1_w"].T + params["fc1_b"], 0.0)
    out = jnp.maximum(out @ params["fc2_w"].T + params["fc2_b"], 0.0)
    out = out @ params["fc3_w"].T + params["fc3_b"]
    return out


if __name__ == "__main__":
    num_classes = 100
    params = init_params(jax.random.PRNGKey(42), num_classes=num_classes)
    prepped = prepare_params(params, num_classes=num_classes)

    # LeNet's flatten size (16*5*5) requires 3x32x32 inputs.
    x = jax.random.normal(jax.random.PRNGKey(0), (2, 3, 32, 32), jnp.float32)

    logits, shape_dict = lenet_forward(prepped, x, num_classes=num_classes)
    logits = jax.block_until_ready(logits)

    ref = jax.block_until_ready(lenet_reference(params, x))
    assert logits.shape == (2, num_classes)
    assert shape_dict == {1: [2, 6, 14, 14], 2: [2, 16, 5, 5],
                          3: [2, 400], 4: [2, 256],
                          5: [2, 128], 6: [2, num_classes]}
    assert jnp.allclose(logits, ref, atol=1e-4, rtol=1e-4)

    print("KERNEL_OK")
</pallas_src>

<mosaic_0001>
module attributes {stable_mosaic.version = 11 : i64} {
  func.func @_conv_pool_kernel(%arg0: i32, %arg1: memref<4x1568x128xf32, #tpu.memory_space<vmem>>, %arg2: memref<128x128xf32, #tpu.memory_space<vmem>>, %arg3: memref<1x128xf32, #tpu.memory_space<vmem>>, %arg4: memref<1568x128xf32, #tpu.memory_space<vmem>>) attributes {dimension_semantics = [#tpu.dimension_semantics<parallel>], iteration_bounds = array<i64: 1>, scalar_prefetch = 0 : i64, scratch_operands = 0 : i64, tpu.core_type = #tpu.core_type<tc>, window_params = [{transform_indices = @transform_0, window_bounds = array<i64: 4, 1568, 128>}, {pipeline_mode = #tpu.pipeline_mode<synchronous>, transform_indices = @transform_1, window_bounds = array<i64: 128, 128>}, {pipeline_mode = #tpu.pipeline_mode<synchronous>, transform_indices = @transform_2, window_bounds = array<i64: 1, 128>}, {transform_indices = @transform_3, window_bounds = array<i64: 1568, 128>}]} {
    %c0 = arith.constant 0 : index
    %c0_0 = arith.constant 0 : index
    %0 = vector.load %arg2[%c0, %c0_0] : memref<128x128xf32, #tpu.memory_space<vmem>>, vector<128x128xf32>
    %c0_1 = arith.constant 0 : index
    %c0_2 = arith.constant 0 : index
    %c0_3 = arith.constant 0 : index
    %1 = vector.load %arg1[%c0_1, %c0_2, %c0_3] : memref<4x1568x128xf32, #tpu.memory_space<vmem>>, vector<1x1568x128xf32>
    %2 = vector.shape_cast %1 : vector<1x1568x128xf32> to vector<1568x128xf32>
    %cst = arith.constant dense<0.000000e+00> : vector<1568x128xf32>
    %3 = tpu.matmul %2, %0, %cst {dimension_numbers = #tpu.dot_dimension_numbers<[1], [0], [0], [1], [0, 0, 1, 1], [], []>} : vector<1568x128xf32>, vector<128x128xf32>, vector<1568x128xf32> -> vector<1568x128xf32>
    %c1 = arith.constant 1 : index
    %c0_4 = arith.constant 0 : index
    %c0_5 = arith.constant 0 : index
    %4 = vector.load %arg1[%c1, %c0_4, %c0_5] : memref<4x1568x128xf32, #tpu.memory_space<vmem>>, vector<1x1568x128xf32>
    %5 = vector.shape_cast %4 : vector<1x1568x128xf32> to vector<1568x128xf32>
    %cst_6 = arith.constant dense<0.000000e+00> : vector<1568x128xf32>
    %6 = tpu.matmul %5, %0, %cst_6 {dimension_numbers = #tpu.dot_dimension_numbers<[1], [0], [0], [1], [0, 0, 1, 1], [], []>} : vector<1568x128xf32>, vector<128x128xf32>, vector<1568x128xf32> -> vector<1568x128xf32>
    %7 = arith.maximumf %3, %6 : vector<1568x128xf32>
    %c2 = arith.constant 2 : index
    %c0_7 = arith.constant 0 : index
    %c0_8 = arith.constant 0 : index
    %8 = vector.load %arg1[%c2, %c0_7, %c0_8] : memref<4x1568x128xf32, #tpu.memory_space<vmem>>, vector<1x1568x128xf32>
    %9 = vector.shape_cast %8 : vector<1x1568x128xf32> to vector<1568x128xf32>
    %cst_9 = arith.constant dense<0.000000e+00> : vector<1568x128xf32>
    %10 = tpu.matmul %9, %0, %cst_9 {dimension_numbers = #tpu.dot_dimension_numbers<[1], [0], [0], [1], [0, 0, 1, 1], [], []>} : vector<1568x128xf32>, vector<128x128xf32>, vector<1568x128xf32> -> vector<1568x128xf32>
    %11 = arith.maximumf %7, %10 : vector<1568x128xf32>
    %c3 = arith.constant 3 : index
    %c0_10 = arith.constant 0 : index
    %c0_11 = arith.constant 0 : index
    %12 = vector.load %arg1[%c3, %c0_10, %c0_11] : memref<4x1568x128xf32, #tpu.memory_space<vmem>>, vector<1x1568x128xf32>
    %13 = vector.shape_cast %12 : vector<1x1568x128xf32> to vector<1568x128xf32>
    %cst_12 = arith.constant dense<0.000000e+00> : vector<1568x128xf32>
    %14 = tpu.matmul %13, %0, %cst_12 {dimension_numbers = #tpu.dot_dimension_numbers<[1], [0], [0], [1], [0, 0, 1, 1], [], []>} : vector<1568x128xf32>, vector<128x128xf32>, vector<1568x128xf32> -> vector<1568x128xf32>
    %15 = arith.maximumf %11, %14 : vector<1568x128xf32>
    %c0_13 = arith.constant 0 : index
    %c0_14 = arith.constant 0 : index
    %16 = vector.load %arg3[%c0_13, %c0_14] : memref<1x128xf32, #tpu.memory_space<vmem>>, vector<1x128xf32>
    %17 = vector.broadcast %16 : vector<1x128xf32> to vector<1568x128xf32>
    %18 = arith.addf %15, %17 : vector<1568x128xf32>
    %cst_15 = arith.constant 0.000000e+00 : f32
    %19 = vector.broadcast %cst_15 : f32 to vector<1568x128xf32>
    %20 = arith.maximumf %18, %19 : vector<1568x128xf32>
    %c0_16 = arith.constant 0 : index
    %c0_17 = arith.constant 0 : index
    %21 = vector.load %arg4[%c0_16, %c0_17] : memref<1568x128xf32, #tpu.memory_space<vmem>>, vector<1568x128xf32>
    tpu.vector_store %arg4[%c0_16, %c0_17], %20 {strides = array<i32>} : memref<1568x128xf32, #tpu.memory_space<vmem>>, vector<1568x128xf32>,
    return
  }
  func.func @transform_0(%arg0: i32) -> (i32, i32, i32) {
    %c0_i32 = arith.constant 0 : i32
    %c0_i32_0 = arith.constant 0 : i32
    %c0_i32_1 = arith.constant 0 : i32
    return %c0_i32, %arg0, %c0_i32_0 : i32, i32, i32
  }
  func.func @transform_1(%arg0: i32) -> (i32, i32) {
    %c0_i32 = arith.constant 0 : i32
    %c0_i32_0 = arith.constant 0 : i32
    %c0_i32_1 = arith.constant 0 : i32
    return %c0_i32, %c0_i32_0 : i32, i32
  }
  func.func @transform_2(%arg0: i32) -> (i32, i32) {
    %c0_i32 = arith.constant 0 : i32
    %c0_i32_0 = arith.constant 0 : i32
    %c0_i32_1 = arith.constant 0 : i32
    return %c0_i32, %c0_i32_0 : i32, i32
  }
  func.func @transform_3(%arg0: i32) -> (i32, i32) {
    %c0_i32 = arith.constant 0 : i32
    %c0_i32_0 = arith.constant 0 : i32
    return %arg0, %c0_i32 : i32, i32
  }
}

module attributes {stable_mosaic.version = 11 : i64} {
  func.func @_conv_fc_kernel(%arg0: i32, %arg1: memref<4x200x256xf32, #tpu.memory_space<vmem>>, %arg2: memref<256x128xf32, #tpu.memory_space<vmem>>, %arg3: memref<1x128xf32, #tpu.memory_space<vmem>>, %arg4: memref<25x128x256xf32, #tpu.memory_space<vmem>>, %arg5: memref<1x256xf32, #tpu.memory_space<vmem>>, %arg6: memref<256x128xf32, #tpu.memory_space<vmem>>, %arg7: memref<1x128xf32, #tpu.memory_space<vmem>>, %arg8: memref<128x128xf32, #tpu.memory_space<vmem>>, %arg9: memref<1x128xf32, #tpu.memory_space<vmem>>, %arg10: memref<8x128xf32, #tpu.memory_space<vmem>>) attributes {dimension_semantics = [#tpu.dimension_semantics<arbitrary>], iteration_bounds = array<i64: 1>, scalar_prefetch = 0 : i64, scratch_operands = 0 : i64, tpu.core_type = #tpu.core_type<tc>, window_params = [{pipeline_mode = #tpu.pipeline_mode<synchronous>, transform_indices = @transform_0, window_bounds = array<i64: 4, 200, 256>}, {pipeline_mode = #tpu.pipeline_mode<synchronous>, transform_indices = @transform_1, window_bounds = array<i64: 256, 128>}, {pipeline_mode = #tpu.pipeline_mode<synchronous>, transform_indices = @transform_2, window_bounds = array<i64: 1, 128>}, {pipeline_mode = #tpu.pipeline_mode<synchronous>, transform_indices = @transform_3, window_bounds = array<i64: 25, 128, 256>}, {pipeline_mode = #tpu.pipeline_mode<synchronous>, transform_indices = @transform_4, window_bounds = array<i64: 1, 256>}, {pipeline_mode = #tpu.pipeline_mode<synchronous>, transform_indices = @transform_5, window_bounds = array<i64: 256, 128>}, {pipeline_mode = #tpu.pipeline_mode<synchronous>, transform_indices = @transform_6, window_bounds = array<i64: 1, 128>}, {pipeline_mode = #tpu.pipeline_mode<synchronous>, transform_indices = @transform_7, window_bounds = array<i64: 128, 128>}, {pipeline_mode = #tpu.pipeline_mode<synchronous>, transform_indices = @transform_8, window_bounds = array<i64: 1, 128>}, {pipeline_mode = #tpu.pipeline_mode<synchronous>, transform_indices = @transform_9, window_bounds = array<i64: 8, 128>}]} {
    %c0 = arith.constant 0 : index
    %c0_0 = arith.constant 0 : index
    %0 = vector.load %arg2[%c0, %c0_0] : memref<256x128xf32, #tpu.memory_space<vmem>>, vector<256x128xf32>
    %c0_1 = arith.constant 0 : index
    %c0_2 = arith.constant 0 : index
    %c0_3 = arith.constant 0 : index
    %1 = vector.load %arg1[%c0_1, %c0_2, %c0_3] : memref<4x200x256xf32, #tpu.memory_space<vmem>>, vector<1x200x256xf32>
    %2 = vector.shape_cast %1 : vector<1x200x256xf32> to vector<200x256xf32>
    %cst = arith.constant dense<0.000000e+00> : vector<200x128xf32>
    %3 = tpu.matmul %2, %0, %cst {dimension_numbers = #tpu.dot_dimension_numbers<[1], [0], [0], [1], [0, 0, 1, 1], [], []>} : vector<200x256xf32>, vector<256x128xf32>, vector<200x128xf32> -> vector<200x128xf32>
    %c1 = arith.constant 1 : index
    %c0_4 = arith.constant 0 : index
    %c0_5 = arith.constant 0 : index
    %4 = vector.load %arg1[%c1, %c0_4, %c0_5] : memref<4x200x256xf32, #tpu.memory_space<vmem>>, vector<1x200x256xf32>
    %5 = vector.shape_cast %4 : vector<1x200x256xf32> to vector<200x256xf32>
    %cst_6 = arith.constant dense<0.000000e+00> : vector<200x128xf32>
    %6 = tpu.matmul %5, %0, %cst_6 {dimension_numbers = #tpu.dot_dimension_numbers<[1], [0], [0], [1], [0, 0, 1, 1], [], []>} : vector<200x256xf32>, vector<256x128xf32>, vector<200x128xf32> -> vector<200x128xf32>
    %7 = arith.maximumf %3, %6 : vector<200x128xf32>
    %c2 = arith.constant 2 : index
    %c0_7 = arith.constant 0 : index
    %c0_8 = arith.constant 0 : index
    %8 = vector.load %arg1[%c2, %c0_7, %c0_8] : memref<4x200x256xf32, #tpu.memory_space<vmem>>, vector<1x200x256xf32>
    %9 = vector.shape_cast %8 : vector<1x200x256xf32> to vector<200x256xf32>
    %cst_9 = arith.constant dense<0.000000e+00> : vector<200x128xf32>
    %10 = tpu.matmul %9, %0, %cst_9 {dimension_numbers = #tpu.dot_dimension_numbers<[1], [0], [0], [1], [0, 0, 1, 1], [], []>} : vector<200x256xf32>, vector<256x128xf32>, vector<200x128xf32> -> vector<200x128xf32>
    %11 = arith.maximumf %7, %10 : vector<200x128xf32>
    %c3 = arith.constant 3 : index
    %c0_10 = arith.constant 0 : index
    %c0_11 = arith.constant 0 : index
    %12 = vector.load %arg1[%c3, %c0_10, %c0_11] : memref<4x200x256xf32, #tpu.memory_space<vmem>>, vector<1x200x256xf32>
    %13 = vector.shape_cast %12 : vector<1x200x256xf32> to vector<200x256xf32>
    %cst_12 = arith.constant dense<0.000000e+00> : vector<200x128xf32>
    %14 = tpu.matmul %13, %0, %cst_12 {dimension_numbers = #tpu.dot_dimension_numbers<[1], [0], [0], [1], [0, 0, 1, 1], [], []>} : vector<200x256xf32>, vector<256x128xf32>, vector<200x128xf32> -> vector<200x128xf32>
    %15 = arith.maximumf %11, %14 : vector<200x128xf32>
    %c0_13 = arith.constant 0 : index
    %c0_14 = arith.constant 0 : index
    %16 = vector.load %arg3[%c0_13, %c0_14] : memref<1x128xf32, #tpu.memory_space<vmem>>, vector<1x128xf32>
    %17 = vector.broadcast %16 : vector<1x128xf32> to vector<200x128xf32>
    %18 = arith.addf %15, %17 : vector<200x128xf32>
    %cst_15 = arith.constant 0.000000e+00 : f32
    %19 = vector.broadcast %cst_15 : f32 to vector<200x128xf32>
    %20 = arith.maximumf %18, %19 : vector<200x128xf32>
    %cst_16 = arith.constant 0.000000e+00 : f32
    %21 = vector.broadcast %cst_16 : f32 to vector<8x256xf32>
    %22 = vector.extract_strided_slice %20 {offsets = [0, 0], sizes = [8, 128], strides = [1, 1]} : vector<200x128xf32> to vector<8x128xf32>
    %c0_17 = arith.constant 0 : index
    %c0_18 = arith.constant 0 : index
    %c0_19 = arith.constant 0 : index
    %23 = vector.load %arg4[%c0_17, %c0_18, %c0_19] : memref<25x128x256xf32, #tpu.memory_space<vmem>>, vector<1x128x256xf32>
    %24 = vector.shape_cast %23 : vector<1x128x256xf32> to vector<128x256xf32>
    %cst_20 = arith.constant dense<0.000000e+00> : vector<8x256xf32>
    %25 = tpu.matmul %22, %24, %cst_20 {dimension_numbers = #tpu.dot_dimension_numbers<[1], [0], [0], [1], [0, 0, 1, 1], [], []>} : vector<8x128xf32>, vector<128x256xf32>, vector<8x256xf32> -> vector<8x256xf32>
    %26 = arith.addf %21, %25 : vector<8x256xf32>
    %27 = vector.extract_strided_slice %20 {offsets = [8, 0], sizes = [8, 128], strides = [1, 1]} : vector<200x128xf32> to vector<8x128xf32>
    %c1_21 = arith.constant 1 : index
    %c0_22 = arith.constant 0 : index
    %c0_23 = arith.constant 0 : index
    %28 = vector.load %arg4[%c1_21, %c0_22, %c0_23] : memref<25x128x256xf32, #tpu.memory_space<vmem>>, vector<1x128x256xf32>
    %29 = vector.shape_cast %28 : vector<1x128x256xf32> to vector<128x256xf32>
    %cst_24 = arith.constant dense<0.000000e+00> : vector<8x256xf32>
    %30 = tpu.matmul %27, %29, %cst_24 {dimension_numbers = #tpu.dot_dimension_numbers<[1], [0], [0], [1], [0, 0, 1, 1], [], []>} : vector<8x128xf32>, vector<128x256xf32>, vector<8x256xf32> -> vector<8x256xf32>
    %31 = arith.addf %26, %30 : vector<8x256xf32>
    %32 = vector.extract_strided_slice %20 {offsets = [16, 0], sizes = [8, 128], strides = [1, 1]} : vector<200x128xf32> to vector<8x128xf32>
    %c2_25 = arith.constant 2 : index
    %c0_26 = arith.constant 0 : index
    %c0_27 = arith.constant 0 : index
    %33 = vector.load %arg4[%c2_25, %c0_26, %c0_27] : memref<25x128x256xf32, #tpu.memory_space<vmem>>, vector<1x128x256xf32>
    %34 = vector.shape_cast %33 : vector<1x128x256xf32> to vector<128x256xf32>
    %cst_28 = arith.constant dense<0.000000e+00> : vector<8x256xf32>
    %35 = tpu.matmul %32, %34, %cst_28 {dimension_numbers = #tpu.dot_dimension_numbers<[1], [0], [0], [1], [0, 0, 1, 1], [], []>} : vector<8x128xf32>, vector<128x256xf32>, vector<8x256xf32> -> vector<8x256xf32>
    %36 = arith.addf %31, %35 : vector<8x256xf32>
    %37 = vector.extract_strided_slice %20 {offsets = [24, 0], sizes = [8, 128], strides = [1, 1]} : vector<200x128xf32> to vector<8x128xf32>
    %c3_29 = arith.constant 3 : index
    %c0_30 = arith.constant 0 : index
    %c0_31 = arith.constant 0 : index
    %38 = vector.load %arg4[%c3_29, %c0_30, %c0_31] : memref<25x128x256xf32, #tpu.memory_space<vmem>>, vector<1x128x256xf32>
    %39 = vector.shape_cast %38 : vector<1x128x256xf32> to vector<128x256xf32>
    %cst_32 = arith.constant dense<0.000000e+00> : vector<8x256xf32>
    %40 = tpu.matmul %37, %39, %cst_32 {dimension_numbers = #tpu.dot_dimension_numbers<[1], [0], [0], [1], [0, 0, 1, 1], [], []>} : vector<8x128xf32>, vector<128x256xf32>, vector<8x256xf32> -> vector<8x256xf32>
    %41 = arith.addf %36, %40 : vector<8x256xf32>
    %42 = vector.extract_strided_slice %20 {offsets = [32, 0], sizes = [8, 128], strides = [1, 1]} : vector<200x128xf32> to vector<8x128xf32>
    %c4 = arith.constant 4 : index
    %c0_33 = arith.constant 0 : index
    %c0_34 = arith.constant 0 : index
    %43 = vector.load %arg4[%c4, %c0_33, %c0_34] : memref<25x128x256xf32, #tpu.memory_space<vmem>>, vector<1x128x256xf32>
    %44 = vector.shape_cast %43 : vector<1x128x256xf32> to vector<128x256xf32>
    %cst_35 = arith.constant dense<0.000000e+00> : vector<8x256xf32>
    %45 = tpu.matmul %42, %44, %cst_35 {dimension_numbers = #tpu.dot_dimension_numbers<[1], [0], [0], [1], [0, 0, 1, 1], [], []>} : vector<8x128xf32>, vector<128x256xf32>, vector<8x256xf32> -> vector<8x256xf32>
    %46 = arith.addf %41, %45 : vector<8x256xf32>
    %47 = vector.extract_strided_slice %20 {offsets = [40, 0], sizes = [8, 128], strides = [1, 1]} : vector<200x128xf32> to vector<8x128xf32>
    %c5 = arith.constant 5 : index
    %c0_36 = arith.constant 0 : index
    %c0_37 = arith.constant 0 : index
    %48 = vector.load %arg4[%c5, %c0_36, %c0_37] : memref<25x128x256xf32, #tpu.memory_space<vmem>>, vector<1x128x256xf32>
    %49 = vector.shape_cast %48 : vector<1x128x256xf32> to vector<128x256xf32>
    %cst_38 = arith.constant dense<0.000000e+00> : vector<8x256xf32>
    %50 = tpu.matmul %47, %49, %cst_38 {dimension_numbers = #tpu.dot_dimension_numbers<[1], [0], [0], [1], [0, 0, 1, 1], [], []>} : vector<8x128xf32>, vector<128x256xf32>, vector<8x256xf32> -> vector<8x256xf32>
    %51 = arith.addf %46, %50 : vector<8x256xf32>
    %52 = vector.extract_strided_slice %20 {offsets = [48, 0], sizes = [8, 128], strides = [1, 1]} : vector<200x128xf32> to vector<8x128xf32>
    %c6 = arith.constant 6 : index
    %c0_39 = arith.constant 0 : index
    %c0_40 = arith.constant 0 : index
    %53 = vector.load %arg4[%c6, %c0_39, %c0_40] : memref<25x128x256xf32, #tpu.memory_space<vmem>>, vector<1x128x256xf32>
    %54 = vector.shape_cast %53 : vector<1x128x256xf32> to vector<128x256xf32>
    %cst_41 = arith.constant dense<0.000000e+00> : vector<8x256xf32>
    %55 = tpu.matmul %52, %54, %cst_41 {dimension_numbers = #tpu.dot_dimension_numbers<[1], [0], [0], [1], [0, 0, 1, 1], [], []>} : vector<8x128xf32>, vector<128x256xf32>, vector<8x256xf32> -> vector<8x256xf32>
    %56 = arith.addf %51, %55 : vector<8x256xf32>
    %57 = vector.extract_strided_slice %20 {offsets = [56, 0], sizes = [8, 128], strides = [1, 1]} : vector<200x128xf32> to vector<8x128xf32>
    %c7 = arith.constant 7 : index
    %c0_42 = arith.constant 0 : index
    %c0_43 = arith.constant 0 : index
    %58 = vector.load %arg4[%c7, %c0_42, %c0_43] : memref<25x128x256xf32, #tpu.memory_space<vmem>>, vector<1x128x256xf32>
    %59 = vector.shape_cast %58 : vector<1x128x256xf32> to vector<128x256xf32>
    %cst_44 = arith.constant dense<0.000000e+00> : vector<8x256xf32>
    %60 = tpu.matmul %57, %59, %cst_44 {dimension_numbers = #tpu.dot_dimension_numbers<[1], [0], [0], [1], [0, 0, 1, 1], [], []>} : vector<8x128xf32>, vector<128x256xf32>, vector<8x256xf32> -> vector<8x256xf32>
    %61 = arith.addf %56, %60 : vector<8x256xf32>
    %62 = vector.extract_strided_slice %20 {offsets = [64, 0], sizes = [8, 128], strides = [1, 1]} : vector<200x128xf32> to vector<8x128xf32>
    %c8 = arith.constant 8 : index
    %c0_45 = arith.constant 0 : index
    %c0_46 = arith.constant 0 : index
    %63 = vector.load %arg4[%c8, %c0_45, %c0_46] : memref<25x128x256xf32, #tpu.memory_space<vmem>>, vector<1x128x256xf32>
    %64 = vector.shape_cast %63 : vector<1x128x256xf32> to vector<128x256xf32>
    %cst_47 = arith.constant dense<0.000000e+00> : vector<8x256xf32>
    %65 = tpu.matmul %62, %64, %cst_47 {dimension_numbers = #tpu.dot_dimension_numbers<[1], [0], [0], [1], [0, 0, 1, 1], [], []>} : vector<8x128xf32>, vector<128x256xf32>, vector<8x256xf32> -> vector<8x256xf32>
    %66 = arith.addf %61, %65 : vector<8x256xf32>
    %67 = vector.extract_strided_slice %20 {offsets = [72, 0], sizes = [8, 128], strides = [1, 1]} : vector<200x128xf32> to vector<8x128xf32>
    %c9 = arith.constant 9 : index
    %c0_48 = arith.constant 0 : index
    %c0_49 = arith.constant 0 : index
    %68 = vector.load %arg4[%c9, %c0_48, %c0_49] : memref<25x128x256xf32, #tpu.memory_space<vmem>>, vector<1x128x256xf32>
    %69 = vector.shape_cast %68 : vector<1x128x256xf32> to vector<128x256xf32>
    %cst_50 = arith.constant dense<0.000000e+00> : vector<8x256xf32>
    %70 = tpu.matmul %67, %69, %cst_50 {dimension_numbers = #tpu.dot_dimension_numbers<[1], [0], [0], [1], [0, 0, 1, 1], [], []>} : vector<8x128xf32>, vector<128x256xf32>, vector<8x256xf32> -> vector<8x256xf32>
    %71 = arith.addf %66, %70 : vector<8x256xf32>
    %72 = vector.extract_strided_slice %20 {offsets = [80, 0], sizes = [8, 128], strides = [1, 1]} : vector<200x128xf32> to vector<8x128xf32>
    %c10 = arith.constant 10 : index
    %c0_51 = arith.constant 0 : index
    %c0_52 = arith.constant 0 : index
    %73 = vector.load %arg4[%c10, %c0_51, %c0_52] : memref<25x128x256xf32, #tpu.memory_space<vmem>>, vector<1x128x256xf32>
    %74 = vector.shape_cast %73 : vector<1x128x256xf32> to vector<128x256xf32>
    %cst_53 = arith.constant dense<0.000000e+00> : vector<8x256xf32>
    %75 = tpu.matmul %72, %74, %cst_53 {dimension_numbers = #tpu.dot_dimension_numbers<[1], [0], [0], [1], [0, 0, 1, 1], [], []>} : vector<8x128xf32>, vector<128x256xf32>, vector<8x256xf32> -> vector<8x256xf32>
    %76 = arith.addf %71, %75 : vector<8x256xf32>
    %77 = vector.extract_strided_slice %20 {offsets = [88, 0], sizes = [8, 128], strides = [1, 1]} : vector<200x128xf32> to vector<8x128xf32>
    %c11 = arith.constant 11 : index
    %c0_54 = arith.constant 0 : index
    %c0_55 = arith.constant 0 : index
    %78 = vector.load %arg4[%c11, %c0_54, %c0_55] : memref<25x128x256xf32, #tpu.memory_space<vmem>>, vector<1x128x256xf32>
    %79 = vector.shape_cast %78 : vector<1x128x256xf32> to vector<128x256xf32>
    %cst_56 = arith.constant dense<0.000000e+00> : vector<8x256xf32>
    %80 = tpu.matmul %77, %79, %cst_56 {dimension_numbers = #tpu.dot_dimension_numbers<[1], [0], [0], [1], [0, 0, 1, 1], [], []>} : vector<8x128xf32>, vector<128x256xf32>, vector<8x256xf32> -> vector<8x256xf32>
    %81 = arith.addf %76, %80 : vector<8x256xf32>
    %82 = vector.extract_strided_slice %20 {offsets = [96, 0], sizes = [8, 128], strides = [1, 1]} : vector<200x128xf32> to vector<8x128xf32>
    %c12 = arith.constant 12 : index
    %c0_57 = arith.constant 0 : index
    %c0_58 = arith.constant 0 : index
    %83 = vector.load %arg4[%c12, %c0_57, %c0_58] : memref<25x128x256xf32, #tpu.memory_space<vmem>>, vector<1x128x256xf32>
    %84 = vector.shape_cast %83 : vector<1x128x256xf32> to vector<128x256xf32>
    %cst_59 = arith.constant dense<0.000000e+00> : vector<8x256xf32>
    %85 = tpu.matmul %82, %84, %cst_59 {dimension_numbers = #tpu.dot_dimension_numbers<[1], [0], [0], [1], [0, 0, 1, 1], [], []>} : vector<8x128xf32>, vector<128x256xf32>, vector<8x256xf32> -> vector<8x256xf32>
    %86 = arith.addf %81, %85 : vector<8x256xf32>
    %87 = vector.extract_strided_slice %20 {offsets = [104, 0], sizes = [8, 128], strides = [1, 1]} : vector<200x128xf32> to vector<8x128xf32>
    %c13 = arith.constant 13 : index
    %c0_60 = arith.constant 0 : index
    %c0_61 = arith.constant 0 : index
    %88 = vector.load %arg4[%c13, %c0_60, %c0_61] : memref<25x128x256xf32, #tpu.memory_space<vmem>>, vector<1x128x256xf32>
    %89 = vector.shape_cast %88 : vector<1x128x256xf32> to vector<128x256xf32>
    %cst_62 = arith.constant dense<0.000000e+00> : vector<8x256xf32>
    %90 = tpu.matmul %87, %89, %cst_62 {dimension_numbers = #tpu.dot_dimension_numbers<[1], [0], [0], [1], [0, 0, 1, 1], [], []>} : vector<8x128xf32>, vector<128x256xf32>, vector<8x256xf32> -> vector<8x256xf32>
    %91 = arith.addf %86, %90 : vector<8x256xf32>
    %92 = vector.extract_strided_slice %20 {offsets = [112, 0], sizes = [8, 128], strides = [1, 1]} : vector<200x128xf32> to vector<8x128xf32>
    %c14 = arith.constant 14 : index
    %c0_63 = arith.constant 0 : index
    %c0_64 = arith.constant 0 : index
    %93 = vector.load %arg4[%c14, %c0_63, %c0_64] : memref<25x128x256xf32, #tpu.memory_space<vmem>>, vector<1x128x256xf32>
    %94 = vector.shape_cast %93 : vector<1x128x256xf32> to vector<128x256xf32>
    %cst_65 = arith.constant dense<0.000000e+00> : vector<8x256xf32>
    %95 = tpu.matmul %92, %94, %cst_65 {dimension_numbers = #tpu.dot_dimension_numbers<[1], [0], [0], [1], [0, 0, 1, 1], [], []>} : vector<8x128xf32>, vector<128x256xf32>, vector<8x256xf32> -> vector<8x256xf32>
    %96 = arith.addf %91, %95 : vector<8x256xf32>
    %97 = vector.extract_strided_slice %20 {offsets = [120, 0], sizes = [8, 128], strides = [1, 1]} : vector<200x128xf32> to vector<8x128xf32>
    %c15 = arith.constant 15 : index
    %c0_66 = arith.constant 0 : index
    %c0_67 = arith.constant 0 : index
    %98 = vector.load %arg4[%c15, %c0_66, %c0_67] : memref<25x128x256xf32, #tpu.memory_space<vmem>>, vector<1x128x256xf32>
    %99 = vector.shape_cast %98 : vector<1x128x256xf32> to vector<128x256xf32>
    %cst_68 = arith.constant dense<0.000000e+00> : vector<8x256xf32>
    %100 = tpu.matmul %97, %99, %cst_68 {dimension_numbers = #tpu.dot_dimension_numbers<[1], [0], [0], [1], [0, 0, 1, 1], [], []>} : vector<8x128xf32>, vector<128x256xf32>, vector<8x256xf32> -> vector<8x256xf32>
    %101 = arith.addf %96, %100 : vector<8x256xf32>
    %102 = vector.extract_strided_slice %20 {offsets = [128, 0], sizes = [8, 128], strides = [1, 1]} : vector<200x128xf32> to vector<8x128xf32>
    %c16 = arith.constant 16 : index
    %c0_69 = arith.constant 0 : index
    %c0_70 = arith.constant 0 : index
    %103 = vector.load %arg4[%c16, %c0_69, %c0_70] : memref<25x128x256xf32, #tpu.memory_space<vmem>>, vector<1x128x256xf32>
    %104 = vector.shape_cast %103 : vector<1x128x256xf32> to vector<128x256xf32>
    %cst_71 = arith.constant dense<0.000000e+00> : vector<8x256xf32>
    %105 = tpu.matmul %102, %104, %cst_71 {dimension_numbers = #tpu.dot_dimension_numbers<[1], [0], [0], [1], [0, 0, 1, 1], [], []>} : vector<8x128xf32>, vector<128x256xf32>, vector<8x256xf32> -> vector<8x256xf32>
    %106 = arith.addf %101, %105 : vector<8x256xf32>
    %107 = vector.extract_strided_slice %20 {offsets = [136, 0], sizes = [8, 128], strides = [1, 1]} : vector<200x128xf32> to vector<8x128xf32>
    %c17 = arith.constant 17 : index
    %c0_72 = arith.constant 0 : index
    %c0_73 = arith.constant 0 : index
    %108 = vector.load %arg4[%c17, %c0_72, %c0_73] : memref<25x128x256xf32, #tpu.memory_space<vmem>>, vector<1x128x256xf32>
    %109 = vector.shape_cast %108 : vector<1x128x256xf32> to vector<128x256xf32>
    %cst_74 = arith.constant dense<0.000000e+00> : vector<8x256xf32>
    %110 = tpu.matmul %107, %109, %cst_74 {dimension_numbers = #tpu.dot_dimension_numbers<[1], [0], [0], [1], [0, 0, 1, 1], [], []>} : vector<8x128xf32>, vector<128x256xf32>, vector<8x256xf32> -> vector<8x256xf32>
    %111 = arith.addf %106, %110 : vector<8x256xf32>
    %112 = vector.extract_strided_slice %20 {offsets = [144, 0], sizes = [8, 128], strides = [1, 1]} : vector<200x128xf32> to vector<8x128xf32>
    %c18 = arith.constant 18 : index
    %c0_75 = arith.constant 0 : index
    %c0_76 = arith.constant 0 : index
    %113 = vector.load %arg4[%c18, %c0_75, %c0_76] : memref<25x128x256xf32, #tpu.memory_space<vmem>>, vector<1x128x256xf32>
    %114 = vector.shape_cast %113 : vector<1x128x256xf32> to vector<128x256xf32>
    %cst_77 = arith.constant dense<0.000000e+00> : vector<8x256xf32>
    %115 = tpu.matmul %112, %114, %cst_77 {dimension_numbers = #tpu.dot_dimension_numbers<[1], [0], [0], [1], [0, 0, 1, 1], [], []>} : vector<8x128xf32>, vector<128x256xf32>, vector<8x256xf32> -> vector<8x256xf32>
    %116 = arith.addf %111, %115 : vector<8x256xf32>
    %117 = vector.extract_strided_slice %20 {offsets = [152, 0], sizes = [8, 128], strides = [1, 1]} : vector<200x128xf32> to vector<8x128xf32>
    %c19 = arith.constant 19 : index
    %c0_78 = arith.constant 0 : index
    %c0_79 = arith.constant 0 : index
    %118 = vector.load %arg4[%c19, %c0_78, %c0_79] : memref<25x128x256xf32, #tpu.memory_space<vmem>>, vector<1x128x256xf32>
    %119 = vector.shape_cast %118 : vector<1x128x256xf32> to vector<128x256xf32>
    %cst_80 = arith.constant dense<0.000000e+00> : vector<8x256xf32>
    %120 = tpu.matmul %117, %119, %cst_80 {dimension_numbers = #tpu.dot_dimension_numbers<[1], [0], [0], [1], [0, 0, 1, 1], [], []>} : vector<8x128xf32>, vector<128x256xf32>, vector<8x256xf32> -> vector<8x256xf32>
    %121 = arith.addf %116, %120 : vector<8x256xf32>
    %122 = vector.extract_strided_slice %20 {offsets = [160, 0], sizes = [8, 128], strides = [1, 1]} : vector<200x128xf32> to vector<8x128xf32>
    %c20 = arith.constant 20 : index
    %c0_81 = arith.constant 0 : index
    %c0_82 = arith.constant 0 : index
    %123 = vector.load %arg4[%c20, %c0_81, %c0_82] : memref<25x128x256xf32, #tpu.memory_space<vmem>>, vector<1x128x256xf32>
    %124 = vector.shape_cast %123 : vector<1x128x256xf32> to vector<128x256xf32>
    %cst_83 = arith.constant dense<0.000000e+00> : vector<8x256xf32>
    %125 = tpu.matmul %122, %124, %cst_83 {dimension_numbers = #tpu.dot_dimension_numbers<[1], [0], [0], [1], [0, 0, 1, 1], [], []>} : vector<8x128xf32>, vector<128x256xf32>, vector<8x256xf32> -> vector<8x256xf32>
    %126 = arith.addf %121, %125 : vector<8x256xf32>
    %127 = vector.extract_strided_slice %20 {offsets = [168, 0], sizes = [8, 128], strides = [1, 1]} : vector<200x128xf32> to vector<8x128xf32>
    %c21 = arith.constant 21 : index
    %c0_84 = arith.constant 0 : index
    %c0_85 = arith.constant 0 : index
    %128 = vector.load %arg4[%c21, %c0_84, %c0_85] : memref<25x128x256xf32, #tpu.memory_space<vmem>>, vector<1x128x256xf32>
    %129 = vector.shape_cast %128 : vector<1x128x256xf32> to vector<128x256xf32>
    %cst_86 = arith.constant dense<0.000000e+00> : vector<8x256xf32>
    %130 = tpu.matmul %127, %129, %cst_86 {dimension_numbers = #tpu.dot_dimension_numbers<[1], [0], [0], [1], [0, 0, 1, 1], [], []>} : vector<8x128xf32>, vector<128x256xf32>, vector<8x256xf32> -> vector<8x256xf32>
    %131 = arith.addf %126, %130 : vector<8x256xf32>
    %132 = vector.extract_strided_slice %20 {offsets = [176, 0], sizes = [8, 128], strides = [1, 1]} : vector<200x128xf32> to vector<8x128xf32>
    %c22 = arith.constant 22 : index
    %c0_87 = arith.constant 0 : index
    %c0_88 = arith.constant 0 : index
    %133 = vector.load %arg4[%c22, %c0_87, %c0_88] : memref<25x128x256xf32, #tpu.memory_space<vmem>>, vector<1x128x256xf32>
    %134 = vector.shape_cast %133 : vector<1x128x256xf32> to vector<128x256xf32>
    %cst_89 = arith.constant dense<0.000000e+00> : vector<8x256xf32>
    %135 = tpu.matmul %132, %134, %cst_89 {dimension_numbers = #tpu.dot_dimension_numbers<[1], [0], [0], [1], [0, 0, 1, 1], [], []>} : vector<8x128xf32>, vector<128x256xf32>, vector<8x256xf32> -> vector<8x256xf32>
    %136 = arith.addf %131, %135 : vector<8x256xf32>
    %137 = vector.extract_strided_slice %20 {offsets = [184, 0], sizes = [8, 128], strides = [1, 1]} : vector<200x128xf32> to vector<8x128xf32>
    %c23 = arith.constant 23 : index
    %c0_90 = arith.constant 0 : index
    %c0_91 = arith.constant 0 : index
    %138 = vector.load %arg4[%c23, %c0_90, %c0_91] : memref<25x128x256xf32, #tpu.memory_space<vmem>>, vector<1x128x256xf32>
    %139 = vector.shape_cast %138 : vector<1x128x256xf32> to vector<128x256xf32>
    %cst_92 = arith.constant dense<0.000000e+00> : vector<8x256xf32>
    %140 = tpu.matmul %137, %139, %cst_92 {dimension_numbers = #tpu.dot_dimension_numbers<[1], [0], [0], [1], [0, 0, 1, 1], [], []>} : vector<8x128xf32>, vector<128x256xf32>, vector<8x256xf32> -> vector<8x256xf32>
    %141 = arith.addf %136, %140 : vector<8x256xf32>
    %142 = vector.extract_strided_slice %20 {offsets = [192, 0], sizes = [8, 128], strides = [1, 1]} : vector<200x128xf32> to vector<8x128xf32>
    %c24 = arith.constant 24 : index
    %c0_93 = arith.constant 0 : index
    %c0_94 = arith.constant 0 : index
    %143 = vector.load %arg4[%c24, %c0_93, %c0_94] : memref<25x128x256xf32, #tpu.memory_space<vmem>>, vector<1x128x256xf32>
    %144 = vector.shape_cast %143 : vector<1x128x256xf32> to vector<128x256xf32>
    %cst_95 = arith.constant dense<0.000000e+00> : vector<8x256xf32>
    %145 = tpu.matmul %142, %144, %cst_95 {dimension_numbers = #tpu.dot_dimension_numbers<[1], [0], [0], [1], [0, 0, 1, 1], [], []>} : vector<8x128xf32>, vector<128x256xf32>, vector<8x256xf32> -> vector<8x256xf32>
    %146 = arith.addf %141, %145 : vector<8x256xf32>
    %c0_96 = arith.constant 0 : index
    %c0_97 = arith.constant 0 : index
    %147 = vector.load %arg5[%c0_96, %c0_97] : memref<1x256xf32, #tpu.memory_space<vmem>>, vector<1x256xf32>
    %148 = vector.broadcast %147 : vector<1x256xf32> to vector<8x256xf32>
    %149 = arith.addf %146, %148 : vector<8x256xf32>
    %cst_98 = arith.constant 0.000000e+00 : f32
    %150 = vector.broadcast %cst_98 : f32 to vector<8x256xf32>
    %151 = arith.maximumf %149, %150 : vector<8x256xf32>
    %c0_99 = arith.constant 0 : index
    %c0_100 = arith.constant 0 : index
    %152 = vector.load %arg6[%c0_99, %c0_100] : memref<256x128xf32, #tpu.memory_space<vmem>>, vector<256x128xf32>
    %cst_101 = arith.constant dense<0.000000e+00> : vector<8x128xf32>
    %153 = tpu.matmul %151, %152, %cst_101 {dimension_numbers = #tpu.dot_dimension_numbers<[1], [0], [0], [1], [0, 0, 1, 1], [], []>} : vector<8x256xf32>, vector<256x128xf32>, vector<8x128xf32> -> vector<8x128xf32>
    %c0_102 = arith.constant 0 : index
    %c0_103 = arith.constant 0 : index
    %154 = vector.load %arg7[%c0_102, %c0_103] : memref<1x128xf32, #tpu.memory_space<vmem>>, vector<1x128xf32>
    %155 = vector.broadcast %154 : vector<1x128xf32> to vector<8x128xf32>
    %156 = arith.addf %153, %155 : vector<8x128xf32>
    %cst_104 = arith.constant 0.000000e+00 : f32
    %157 = vector.broadcast %cst_104 : f32 to vector<8x128xf32>
    %158 = arith.maximumf %156, %157 : vector<8x128xf32>
    %c0_105 = arith.constant 0 : index
    %c0_106 = arith.constant 0 : index
    %159 = vector.load %arg8[%c0_105, %c0_106] : memref<128x128xf32, #tpu.memory_space<vmem>>, vector<128x128xf32>
    %cst_107 = arith.constant dense<0.000000e+00> : vector<8x128xf32>
    %160 = tpu.matmul %158, %159, %cst_107 {dimension_numbers = #tpu.dot_dimension_numbers<[1], [0], [0], [1], [0, 0, 1, 1], [], []>} : vector<8x128xf32>, vector<128x128xf32>, vector<8x128xf32> -> vector<8x128xf32>
    %c0_108 = arith.constant 0 : index
    %c0_109 = arith.constant 0 : index
    %161 = vector.load %arg9[%c0_108, %c0_109] : memref<1x128xf32, #tpu.memory_space<vmem>>, vector<1x128xf32>
    %162 = vector.broadcast %161 : vector<1x128xf32> to vector<8x128xf32>
    %163 = arith.addf %160, %162 : vector<8x128xf32>
    %c0_110 = arith.constant 0 : index
    %c0_111 = arith.constant 0 : index
    %164 = vector.load %arg10[%c0_110, %c0_111] : memref<8x128xf32, #tpu.memory_space<vmem>>, vector<8x128xf32>
    tpu.vector_store %arg10[%c0_110, %c0_111], %163 {strides = array<i32>} : memref<8x128xf32, #tpu.memory_space<vmem>>, vector<8x128xf32>,
    return
  }
  func.func @transform_0(%arg0: i32) -> (i32, i32, i32) {
    %c0_i32 = arith.constant 0 : i32
    %c0_i32_0 = arith.constant 0 : i32
    %c0_i32_1 = arith.constant 0 : i32
    %c0_i32_2 = arith.constant 0 : i32
    return %c0_i32, %c0_i32_0, %c0_i32_1 : i32, i32, i32
  }
  func.func @transform_1(%arg0: i32) -> (i32, i32) {
    %c0_i32 = arith.constant 0 : i32
    %c0_i32_0 = arith.constant 0 : i32
    %c0_i32_1 = arith.constant 0 : i32
    return %c0_i32, %c0_i32_0 : i32, i32
  }
  func.func @transform_2(%arg0: i32) -> (i32, i32) {
    %c0_i32 = arith.constant 0 : i32
    %c0_i32_0 = arith.constant 0 : i32
    %c0_i32_1 = arith.constant 0 : i32
    return %c0_i32, %c0_i32_0 : i32, i32
  }
  func.func @transform_3(%arg0: i32) -> (i32, i32, i32) {
    %c0_i32 = arith.constant 0 : i32
    %c0_i32_0 = arith.constant 0 : i32
    %c0_i32_1 = arith.constant 0 : i32
    %c0_i32_2 = arith.constant 0 : i32
    return %c0_i32, %c0_i32_0, %c0_i32_1 : i32, i32, i32
  }
  func.func @transform_4(%arg0: i32) -> (i32, i32) {
    %c0_i32 = arith.constant 0 : i32
    %c0_i32_0 = arith.constant 0 : i32
    %c0_i32_1 = arith.constant 0 : i32
    return %c0_i32, %c0_i32_0 : i32, i32
  }
  func.func @transform_5(%arg0: i32) -> (i32, i32) {
    %c0_i32 = arith.constant 0 : i32
    %c0_i32_0 = arith.constant 0 : i32
    %c0_i32_1 = arith.constant 0 : i32
    return %c0_i32, %c0_i32_0 : i32, i32
  }
  func.func @transform_6(%arg0: i32) -> (i32, i32) {
    %c0_i32 = arith.constant 0 : i32
    %c0_i32_0 = arith.constant 0 : i32
    %c0_i32_1 = arith.constant 0 : i32
    return %c0_i32, %c0_i32_0 : i32, i32
  }
  func.func @transform_7(%arg0: i32) -> (i32, i32) {
    %c0_i32 = arith.constant 0 : i32
    %c0_i32_0 = arith.constant 0 : i32
    %c0_i32_1 = arith.constant 0 : i32
    return %c0_i32, %c0_i32_0 : i32, i32
  }
  func.func @transform_8(%arg0: i32) -> (i32, i32) {
    %c0_i32 = arith.constant 0 : i32
    %c0_i32_0 = arith.constant 0 : i32
    %c0_i32_1 = arith.constant 0 : i32
    return %c0_i32, %c0_i32_0 : i32, i32
  }
  func.func @transform_9(%arg0: i32) -> (i32, i32) {
    %c0_i32 = arith.constant 0 : i32
    %c0_i32_0 = arith.constant 0 : i32
    %c0_i32_1 = arith.constant 0 : i32
    return %c0_i32, %c0_i32_0 : i32, i32
  }
}

</mosaic_0001>

<bundles_post_ra>
// kernel: _forward_logits.2
= control target key start
LH: loop header
LB: loop body
LE: loop exit
PB: predicated region body
PF: predicated region fallthrough
CT: control target
= control target key end

     0   :  { %s14124_s1 = inlined_call_operand.vmem [shape: f32[128,128], index: 1, kind: input, shape index: {}]   ;;  %s14125_s0 = inlined_call_operand.vmem [shape: f32[4,1568,128], index: 0, kind: input, shape index: {}]   ;;  %s14126_s2 = inlined_call_operand.vmem [shape: f32[1,128], index: 2, kind: input, shape index: {}]   ;;  %s14127_s3 = inlined_call_operand.vmem [shape: f32[1568,128], index: 3, kind: output, shape index: {}]  }
   0x1   :  { %v14_v0 = vld [vmem:[%s14124_s1] sm:$0xff]  ;;  %v15_v1 = vld [vmem:[%s14124_s1 + $0x8] sm:$0xff]  ;;  %v16_v2 = vld [vmem:[%s14124_s1 + $0x10] sm:$0xff] }
   0x2   :  { %v9085_v3 = vpack.c.bf16 %v15_v1, %v14_v0  ;;  %v17_v4 = vld [vmem:[%s14124_s1 + $0x18] sm:$0xff]  ;;  %v18_v6 = vld [vmem:[%s14124_s1 + $0x20] sm:$0xff]  ;;  %v19_v7 = vld [vmem:[%s14124_s1 + $0x28] sm:$0xff] }
   0x3   :  { %v9090_v5 = vpack.c.bf16 %v17_v4, %v16_v2  ;;  %v9104_v8 = vpack.c.bf16 %v19_v7, %v18_v6  ;;  %v30_v9 = vld [vmem:[%s14125_s0] sm:$0xff]  ;;  %v20_v11 = vld [vmem:[%s14124_s1 + $0x30] sm:$0xff]  ;;  %v21_v12 = vld [vmem:[%s14124_s1 + $0x38] sm:$0xff] }
   0x4   :  { %8926 = vmatprep.subr.bf16.mxu0 %v9085_v3  ;;  %8958 = vmatprep.subr.bf16.mxu1 %v9085_v3  ;;  %v6184_v10 = vld [vmem:[%s14125_s0 + $0x620] sm:$0xff]  ;;  %v9122_v13 = vpack.c.bf16 %v21_v12, %v20_v11  ;;  %v23_v15 = vld [vmem:[%s14124_s1 + $0x48] sm:$0xff]  ;;  %v24_v17 = vld [vmem:[%s14124_s1 + $0x50] sm:$0xff] }
   0x5   :  { %8928 = vmatpush3.bf16.msra.mxu0 %v9085_v3  ;;  %8960 = vmatpush3.bf16.msra.mxu1 %v9085_v3  ;;  %v22_v14 = vld [vmem:[%s14124_s1 + $0x40] sm:$0xff]  ;;  %v25_v18 = vld [vmem:[%s14124_s1 + $0x58] sm:$0xff]  ;;  %v27_v21 = vld [vmem:[%s14124_s1 + $0x68] sm:$0xff] }
   0x6   :  { %8930 = vmatprep.subr.bf16.mxu0 %v9090_v5  ;;  %8962 = vmatprep.subr.bf16.mxu1 %v9090_v5  ;;  %v9134_v16 = vpack.c.bf16 %v23_v15, %v22_v14  ;;  %v9146_v19 = vpack.c.bf16 %v25_v18, %v24_v17  ;;  %v26_v20 = vld [vmem:[%s14124_s1 + $0x60] sm:$0xff]  ;;  %v28_v23 = vld [vmem:[%s14124_s1 + $0x70] sm:$0xff]  ;;  %v29_v24 = vld [vmem:[%s14124_s1 + $0x78] sm:$0xff] }
   0x7   :  { %7653 = vmatprep.mubr.f32.mxu0 %v30_v9  ;;  %7979 = vmatprep.mubr.f32.mxu1 %v6184_v10  ;;  %v9158_v22 = vpack.c.bf16 %v27_v21, %v26_v20  ;;  %v9170_v25 = vpack.c.bf16 %v29_v24, %v28_v23  ;;  %v31_v26 = vld [vmem:[%s14125_s0 + $0x8] sm:$0xff]  ;;  %v32_v28 = vld [vmem:[%s14125_s0 + $0x10] sm:$0xff]  ;;  %v33_v30 = vld [vmem:[%s14125_s0 + $0x18] sm:$0xff] }
   0x8   :  { %v6185_v27 = vld [vmem:[%s14125_s0 + $0x628] sm:$0xff]  ;;  %v6186_v29 = vld [vmem:[%s14125_s0 + $0x630] sm:$0xff]  ;;  %v6187_v31 = vld [vmem:[%s14125_s0 + $0x638] sm:$0xff] }
   0x9   :  { %8932 = vmatpush3.bf16.msra.mxu0 %v9090_v5  ;;  %8964 = vmatpush3.bf16.msra.mxu1 %v9090_v5  ;;  %v34_v32 = vld [vmem:[%s14125_s0 + $0x20] sm:$0xff]  ;;  %v35_v34 = vld [vmem:[%s14125_s0 + $0x28] sm:$0xff]  ;;  %v36_v36 = vld [vmem:[%s14125_s0 + $0x30] sm:$0xff] }
   0xa   :  { %8934 = vmatprep.subr.bf16.mxu0 %v9104_v8  ;;  %8966 = vmatprep.subr.bf16.mxu1 %v9104_v8  ;;  %v6188_v33 = vld [vmem:[%s14125_s0 + $0x640] sm:$0xff]  ;;  %v6189_v35 = vld [vmem:[%s14125_s0 + $0x648] sm:$0xff]  ;;  %v6190_v37 = vld [vmem:[%s14125_s0 + $0x650] sm:$0xff] }
   0xb   :  { %v37_v38 = vld [vmem:[%s14125_s0 + $0x38] sm:$0xff]  ;;  %v38_v40 = vld [vmem:[%s14125_s0 + $0x40] sm:$0xff]  ;;  %v39_v42 = vld [vmem:[%s14125_s0 + $0x48] sm:$0xff] }
   0xc   :  { %v6191_v39 = vld [vmem:[%s14125_s0 + $0x658] sm:$0xff]  ;;  %v6192_v41 = vld [vmem:[%s14125_s0 + $0x660] sm:$0xff]  ;;  %v6193_v43 = vld [vmem:[%s14125_s0 + $0x668] sm:$0xff] }
   0xd   :  { %8936 = vmatpush3.bf16.msra.mxu0 %v9104_v8  ;;  %8968 = vmatpush3.bf16.msra.mxu1 %v9104_v8  ;;  %v40_v44 = vld [vmem:[%s14125_s0 + $0x50] sm:$0xff]  ;;  %v41_v46 = vld [vmem:[%s14125_s0 + $0x58] sm:$0xff]  ;;  %v42_v48 = vld [vmem:[%s14125_s0 + $0x60] sm:$0xff] }
   0xe   :  { %8938 = vmatprep.subr.bf16.mxu0 %v9122_v13  ;;  %8970 = vmatprep.subr.bf16.mxu1 %v9122_v13  ;;  %v6194_v45 = vld [vmem:[%s14125_s0 + $0x670] sm:$0xff]  ;;  %v6195_v47 = vld [vmem:[%s14125_s0 + $0x678] sm:$0xff]  ;;  %v6196_v49 = vld [vmem:[%s14125_s0 + $0x680] sm:$0xff] }
   0xf   :  { %v43_v50 = vld [vmem:[%s14125_s0 + $0x68] sm:$0xff]  ;;  %v44_v52 = vld [vmem:[%s14125_s0 + $0x70] sm:$0xff]  ;;  %v45_v54 = vld [vmem:[%s14125_s0 + $0x78] sm:$0xff] }
  0x10   :  { %v6197_v51 = vld [vmem:[%s14125_s0 + $0x688] sm:$0xff]  ;;  %v6198_v53 = vld [vmem:[%s14125_s0 + $0x690] sm:$0xff]  ;;  %v6199_v55 = vld [vmem:[%s14125_s0 + $0x698] sm:$0xff] }
  0x11   :  { %8940 = vmatpush3.bf16.msra.mxu0 %v9122_v13  ;;  %8972 = vmatpush3.bf16.msra.mxu1 %v9122_v13  ;;  %v46_v56 = vld [vmem:[%s14125_s0 + $0x80] sm:$0xff]  ;;  %v47_v58 = vld [vmem:[%s14125_s0 + $0x88] sm:$0xff]  ;;  %v48_v60 = vld [vmem:[%s14125_s0 + $0x90] sm:$0xff] }
  0x12   :  { %8942 = vmatprep.subr.bf16.mxu0 %v9134_v16  ;;  %8974 = vmatprep.subr.bf16.mxu1 %v9134_v16  ;;  %v6200_v57 = vld [vmem:[%s14125_s0 + $0x6a0] sm:$0xff]  ;;  %v6201_v59 = vld [vmem:[%s14125_s0 + $0x6a8] sm:$0xff]  ;;  %v6202_v61 = vld [vmem:[%s14125_s0 + $0x6b0] sm:$0xff] }
  0x13   :  { %v49_v62 = vld [vmem:[%s14125_s0 + $0x98] sm:$0xff]  ;;  %v50_v0 = vld [vmem:[%s14125_s0 + $0xa0] sm:$0xff]  ;;  %v51_v2 = vld [vmem:[%s14125_s0 + $0xa8] sm:$0xff] }
  0x14   :  { %v6203_v63 = vld [vmem:[%s14125_s0 + $0x6b8] sm:$0xff]  ;;  %v6204_v1 = vld [vmem:[%s14125_s0 + $0x6c0] sm:$0xff]  ;;  %v52_v4 = vld [vmem:[%s14125_s0 + $0xb0] sm:$0xff] }
  0x15   :  { %8944 = vmatpush3.bf16.msra.mxu0 %v9134_v16  ;;  %8976 = vmatpush3.bf16.msra.mxu1 %v9134_v16  ;;  %v53_v6 = vld [vmem:[%s14125_s0 + $0xb8] sm:$0xff]  ;;  %v6208_v9 = vld [vmem:[%s14125_s0 + $0x6e0] sm:$0xff]  ;;  %v55_v10 = vld [vmem:[%s14125_s0 + $0xc8] sm:$0xff] }
  0x16   :  { %8946 = vmatprep.subr.bf16.mxu0 %v9146_v19  ;;  %8978 = vmatprep.subr.bf16.mxu1 %v9146_v19  ;;  %v6207_v7 = vld [vmem:[%s14125_s0 + $0x6d8] sm:$0xff]  ;;  %v6209_v11 = vld [vmem:[%s14125_s0 + $0x6e8] sm:$0xff]  ;;  %v56_v12 = vld [vmem:[%s14125_s0 + $0xd0] sm:$0xff] }
  0x17   :  { %v57_v14 = vld [vmem:[%s14125_s0 + $0xd8] sm:$0xff]  ;;  %v6212_v17 = vld [vmem:[%s14125_s0 + $0x700] sm:$0xff]  ;;  %v59_v18 = vld [vmem:[%s14125_s0 + $0xe8] sm:$0xff] }
  0x18   :  { %v6211_v15 = vld [vmem:[%s14125_s0 + $0x6f8] sm:$0xff]  ;;  %v60_v20 = vld [vmem:[%s14125_s0 + $0xf0] sm:$0xff]  ;;  %v62_v24 = vld [vmem:[%s14125_s0 + $0x100] sm:$0xff] }
  0x19   :  { %8948 = vmatpush3.bf16.msra.mxu0 %v9146_v19  ;;  %8980 = vmatpush3.bf16.msra.mxu1 %v9146_v19  ;;  %v6214_v21 = vld [vmem:[%s14125_s0 + $0x710] sm:$0xff]  ;;  %v6215_v23 = vld [vmem:[%s14125_s0 + $0x718] sm:$0xff] }
  0x1a   :  { %8950 = vmatprep.subr.bf16.mxu0 %v9158_v22  ;;  %8982 = vmatprep.subr.bf16.mxu1 %v9158_v22 }
  0x1d   :  { %8952 = vmatpush3.bf16.msra.mxu0 %v9158_v22  ;;  %8984 = vmatpush3.bf16.msra.mxu1 %v9158_v22 }
  0x1e   :  { %8954 = vmatprep.subr.bf16.mxu0 %v9170_v25  ;;  %8986 = vmatprep.subr.bf16.mxu1 %v9170_v25 }
  0x21   :  { %8956 = vmatpush3.bf16.msra.mxu0 %v9170_v25  ;;  %8988 = vmatpush3.bf16.msra.mxu1 %v9170_v25 }
  0x22   :  { %8990 = vmatprep.subr.bf16.mxu0 %v9085_v3  ;;  %9022 = vmatprep.subr.bf16.mxu1 %v9085_v3 }
  0x24   :  { %7654 = vmatmul.mubr.f32.vlgmr.msra.gmra.mrb[0].mxu0 %v31_v26  ;;  %7980 = vmatmul.mubr.f32.vlgmr.msra.gmra.mrb[0].mxu1 %v6185_v27  ;;  %v63_v26 = vld [vmem:[%s14125_s0 + $0x108] sm:$0xff] }
  0x25   :  { %8992 = vmatpush3.bf16.msra.mxu0 %v9085_v3  ;;  %7656 = vmatprep.mubr.f32.mxu0 %v32_v28  ;;  %v6217_v27 = vld [vmem:[%s14125_s0 + $0x728] sm:$0xff]  ;;  %v64_v28 = vld [vmem:[%s14125_s0 + $0x110] sm:$0xff] }
  0x26   :  { %7982 = vmatprep.mubr.f32.mxu1 %v6186_v29  ;;  %9024 = vmatpush3.bf16.msra.mxu1 %v9085_v3  ;;  %v6205_v3 = vld [vmem:[%s14125_s0 + $0x6c8] sm:$0xff]  ;;  %v6218_v29 = vld [vmem:[%s14125_s0 + $0x730] sm:$0xff] }
  0x27   :  { %8994 = vmatprep.subr.bf16.mxu0 %v9090_v5  ;;  %9026 = vmatprep.subr.bf16.mxu1 %v9090_v5 }
  0x28   :  { %7657 = vmatmul.mubr.f32.gmra.mrb[2].mxu0 %v33_v30  ;;  %7983 = vmatmul.mubr.f32.gmra.mrb[2].mxu1 %v6187_v31  ;;  %v65_v30 = vld [vmem:[%s14125_s0 + $0x118] sm:$0xff] }
  0x29   :  { %7659 = vmatprep.mubr.f32.mxu0 %v34_v32  ;;  %7985 = vmatprep.mubr.f32.mxu1 %v6188_v33  ;;  %v6219_v31 = vld [vmem:[%s14125_s0 + $0x738] sm:$0xff]  ;;  %v66_v32 = vld [vmem:[%s14125_s0 + $0x120] sm:$0xff] }
  0x2a   :  { %8996 = vmatpush3.bf16.msra.mxu0 %v9090_v5  ;;  %9028 = vmatpush3.bf16.msra.mxu1 %v9090_v5  ;;  %v6206_v5 = vld [vmem:[%s14125_s0 + $0x6d0] sm:$0xff]  ;;  %v6220_v33 = vld [vmem:[%s14125_s0 + $0x740] sm:$0xff] }
  0x2b   :  { %8998 = vmatprep.subr.bf16.mxu0 %v9104_v8  ;;  %9030 = vmatprep.subr.bf16.mxu1 %v9104_v8 }
  0x2c   :  { %7660 = vmatmul.mubr.f32.gmra.mrb[4].mxu0 %v35_v34  ;;  %7986 = vmatmul.mubr.f32.gmra.mrb[4].mxu1 %v6189_v35  ;;  %v67_v34 = vld [vmem:[%s14125_s0 + $0x128] sm:$0xff] }
  0x2d   :  { %7662 = vmatprep.mubr.f32.mxu0 %v36_v36  ;;  %7988 = vmatprep.mubr.f32.mxu1 %v6190_v37  ;;  %v6221_v35 = vld [vmem:[%s14125_s0 + $0x748] sm:$0xff]  ;;  %v68_v36 = vld [vmem:[%s14125_s0 + $0x130] sm:$0xff] }
  0x2e   :  { %9000 = vmatpush3.bf16.msra.mxu0 %v9104_v8  ;;  %9032 = vmatpush3.bf16.msra.mxu1 %v9104_v8  ;;  %v54_v8 = vld [vmem:[%s14125_s0 + $0xc0] sm:$0xff]  ;;  %v6222_v37 = vld [vmem:[%s14125_s0 + $0x750] sm:$0xff] }
  0x2f   :  { %9002 = vmatprep.subr.bf16.mxu0 %v9122_v13  ;;  %9034 = vmatprep.subr.bf16.mxu1 %v9122_v13 }
  0x30   :  { %7663 = vmatmul.mubr.f32.gmra.mrb[6].mxu0 %v37_v38  ;;  %7989 = vmatmul.mubr.f32.gmra.mrb[6].mxu1 %v6191_v39  ;;  %v69_v38 = vld [vmem:[%s14125_s0 + $0x138] sm:$0xff] }
  0x31   :  { %7665 = vmatprep.mubr.f32.mxu0 %v38_v40  ;;  %7991 = vmatprep.mubr.f32.mxu1 %v6192_v41  ;;  %v6223_v39 = vld [vmem:[%s14125_s0 + $0x758] sm:$0xff]  ;;  %v70_v40 = vld [vmem:[%s14125_s0 + $0x140] sm:$0xff] }
  0x32   :  { %9004 = vmatpush3.bf16.msra.mxu0 %v9122_v13  ;;  %9036 = vmatpush3.bf16.msra.mxu1 %v9122_v13  ;;  %v6210_v13 = vld [vmem:[%s14125_s0 + $0x6f0] sm:$0xff]  ;;  %v6224_v41 = vld [vmem:[%s14125_s0 + $0x760] sm:$0xff] }
  0x33   :  { %9006 = vmatprep.subr.bf16.mxu0 %v9134_v16  ;;  %9038 = vmatprep.subr.bf16.mxu1 %v9134_v16 }
  0x34   :  { %7666 = vmatmul.mubr.f32.gmra.mrb[8].mxu0 %v39_v42  ;;  %7992 = vmatmul.mubr.f32.gmra.mrb[8].mxu1 %v6193_v43  ;;  %v71_v42 = vld [vmem:[%s14125_s0 + $0x148] sm:$0xff] }
  0x35   :  { %7668 = vmatprep.mubr.f32.mxu0 %v40_v44  ;;  %7994 = vmatprep.mubr.f32.mxu1 %v6194_v45  ;;  %v6225_v43 = vld [vmem:[%s14125_s0 + $0x768] sm:$0xff]  ;;  %v72_v44 = vld [vmem:[%s14125_s0 + $0x150] sm:$0xff] }
  0x36   :  { %9008 = vmatpush3.bf16.msra.mxu0 %v9134_v16  ;;  %9040 = vmatpush3.bf16.msra.mxu1 %v9134_v16  ;;  %v58_v16 = vld [vmem:[%s14125_s0 + $0xe0] sm:$0xff]  ;;  %v6226_v45 = vld [vmem:[%s14125_s0 + $0x770] sm:$0xff] }
  0x37   :  { %9010 = vmatprep.subr.bf16.mxu0 %v9146_v19  ;;  %9042 = vmatprep.subr.bf16.mxu1 %v9146_v19 }
  0x38   :  { %7669 = vmatmul.mubr.f32.gmra.mrb[10].mxu0 %v41_v46  ;;  %7995 = vmatmul.mubr.f32.gmra.mrb[10].mxu1 %v6195_v47  ;;  %v73_v46 = vld [vmem:[%s14125_s0 + $0x158] sm:$0xff] }
  0x39   :  { %7671 = vmatprep.mubr.f32.mxu0 %v42_v48  ;;  %7997 = vmatprep.mubr.f32.mxu1 %v6196_v49  ;;  %v6227_v47 = vld [vmem:[%s14125_s0 + $0x778] sm:$0xff]  ;;  %v74_v48 = vld [vmem:[%s14125_s0 + $0x160] sm:$0xff] }
  0x3a   :  { %9012 = vmatpush3.bf16.msra.mxu0 %v9146_v19  ;;  %9044 = vmatpush3.bf16.msra.mxu1 %v9146_v19  ;;  %v6213_v19 = vld [vmem:[%s14125_s0 + $0x708] sm:$0xff]  ;;  %v6228_v49 = vld [vmem:[%s14125_s0 + $0x780] sm:$0xff] }
  0x3b   :  { %9014 = vmatprep.subr.bf16.mxu0 %v9158_v22  ;;  %9046 = vmatprep.subr.bf16.mxu1 %v9158_v22 }
  0x3c   :  { %7672 = vmatmul.mubr.f32.gmra.mrb[12].mxu0 %v43_v50  ;;  %7998 = vmatmul.mubr.f32.gmra.mrb[12].mxu1 %v6197_v51  ;;  %v75_v50 = vld [vmem:[%s14125_s0 + $0x168] sm:$0xff] }
  0x3d   :  { %7674 = vmatprep.mubr.f32.mxu0 %v44_v52  ;;  %8000 = vmatprep.mubr.f32.mxu1 %v6198_v53  ;;  %v6229_v51 = vld [vmem:[%s14125_s0 + $0x788] sm:$0xff]  ;;  %v76_v52 = vld [vmem:[%s14125_s0 + $0x170] sm:$0xff] }
  0x3e   :  { %9016 = vmatpush3.bf16.msra.mxu0 %v9158_v22  ;;  %9048 = vmatpush3.bf16.msra.mxu1 %v9158_v22  ;;  %v61_v22 = vld [vmem:[%s14125_s0 + $0xf8] sm:$0xff]  ;;  %v6230_v53 = vld [vmem:[%s14125_s0 + $0x790] sm:$0xff] }
  0x3f   :  { %9018 = vmatprep.subr.bf16.mxu0 %v9170_v25  ;;  %9050 = vmatprep.subr.bf16.mxu1 %v9170_v25 }
  0x40   :  { %7675 = vmatmul.mubr.f32.gmra.mrb[14].mxu0 %v45_v54  ;;  %8001 = vmatmul.mubr.f32.gmra.mrb[14].mxu1 %v6199_v55  ;;  %v77_v54 = vld [vmem:[%s14125_s0 + $0x178] sm:$0xff] }
  0x41   :  { %7677 = vmatprep.mubr.f32.mxu0 %v46_v56  ;;  %8003 = vmatprep.mubr.f32.mxu1 %v6200_v57  ;;  %v6231_v55 = vld [vmem:[%s14125_s0 + $0x798] sm:$0xff]  ;;  %v78_v56 = vld [vmem:[%s14125_s0 + $0x180] sm:$0xff] }
  0x42   :  { %9020 = vmatpush3.bf16.msra.mxu0 %v9170_v25  ;;  %9052 = vmatpush3.bf16.msra.mxu1 %v9170_v25  ;;  %v6216_v25 = vld [vmem:[%s14125_s0 + $0x720] sm:$0xff] }
  0x43   :  { %v6232_v57 = vld [vmem:[%s14125_s0 + $0x7a0] sm:$0xff] }
  0x44   :  { %7678 = vmatmul.mubr.f32.gmra.mrb[16].mxu0 %v47_v58  ;;  %8004 = vmatmul.mubr.f32.gmra.mrb[16].mxu1 %v6201_v59  ;;  %v79_v58 = vld [vmem:[%s14125_s0 + $0x188] sm:$0xff] }
  0x45   :  { %7680 = vmatprep.mubr.f32.mxu0 %v48_v60  ;;  %8006 = vmatprep.mubr.f32.mxu1 %v6202_v61  ;;  %v6233_v59 = vld [vmem:[%s14125_s0 + $0x7a8] sm:$0xff]  ;;  %v80_v60 = vld [vmem:[%s14125_s0 + $0x190] sm:$0xff] }
  0x46   :  { %v6234_v61 = vld [vmem:[%s14125_s0 + $0x7b0] sm:$0xff] }
  0x48   :  { %7681 = vmatmul.mubr.f32.gmra.mrb[18].mxu0 %v49_v62  ;;  %8007 = vmatmul.mubr.f32.gmra.mrb[18].mxu1 %v6203_v63  ;;  %v81_v62 = vld [vmem:[%s14125_s0 + $0x198] sm:$0xff] }
  0x49   :  { %7683 = vmatprep.mubr.f32.mxu0 %v50_v0  ;;  %8009 = vmatprep.mubr.f32.mxu1 %v6204_v1  ;;  %v6235_v63 = vld [vmem:[%s14125_s0 + $0x7b8] sm:$0xff]  ;;  %v82_v0 = vld [vmem:[%s14125_s0 + $0x1a0] sm:$0xff] }
  0x4a   :  { %v6236_v1 = vld [vmem:[%s14125_s0 + $0x7c0] sm:$0xff] }
  0x4c   :  { %7684 = vmatmul.mubr.f32.gmra.mrb[20].mxu0 %v51_v2  ;;  %8010 = vmatmul.mubr.f32.gmra.mrb[20].mxu1 %v6205_v3  ;;  %v83_v2 = vld [vmem:[%s14125_s0 + $0x1a8] sm:$0xff] }
  0x4d   :  { %7686 = vmatprep.mubr.f32.mxu0 %v52_v4  ;;  %8012 = vmatprep.mubr.f32.mxu1 %v6206_v5  ;;  %v6237_v3 = vld [vmem:[%s14125_s0 + $0x7c8] sm:$0xff]  ;;  %v84_v4 = vld [vmem:[%s14125_s0 + $0x1b0] sm:$0xff] }
  0x4e   :  { %v6238_v5 = vld [vmem:[%s14125_s0 + $0x7d0] sm:$0xff] }
  0x50   :  { %7687 = vmatmul.mubr.f32.gmra.mrb[22].mxu0 %v53_v6  ;;  %8013 = vmatmul.mubr.f32.gmra.mrb[22].mxu1 %v6207_v7  ;;  %v85_v6 = vld [vmem:[%s14125_s0 + $0x1b8] sm:$0xff] }
  0x51   :  { %7689 = vmatprep.mubr.f32.mxu0 %v54_v8  ;;  %8015 = vmatprep.mubr.f32.mxu1 %v6208_v9  ;;  %v6239_v7 = vld [vmem:[%s14125_s0 + $0x7d8] sm:$0xff]  ;;  %v86_v8 = vld [vmem:[%s14125_s0 + $0x1c0] sm:$0xff] }
  0x52   :  { %v6240_v9 = vld [vmem:[%s14125_s0 + $0x7e0] sm:$0xff] }
  0x54   :  { %7690 = vmatmul.mubr.f32.gmra.mrb[24].mxu0 %v55_v10  ;;  %8016 = vmatmul.mubr.f32.gmra.mrb[24].mxu1 %v6209_v11  ;;  %v87_v10 = vld [vmem:[%s14125_s0 + $0x1c8] sm:$0xff] }
  0x55   :  { %7692 = vmatprep.mubr.f32.mxu0 %v56_v12  ;;  %8018 = vmatprep.mubr.f32.mxu1 %v6210_v13  ;;  %v6241_v11 = vld [vmem:[%s14125_s0 + $0x7e8] sm:$0xff]  ;;  %v88_v12 = vld [vmem:[%s14125_s0 + $0x1d0] sm:$0xff] }
  0x56   :  { %v6242_v13 = vld [vmem:[%s14125_s0 + $0x7f0] sm:$0xff] }
  0x58   :  { %7693 = vmatmul.mubr.f32.gmra.mrb[26].mxu0 %v57_v14  ;;  %8019 = vmatmul.mubr.f32.gmra.mrb[26].mxu1 %v6211_v15  ;;  %v89_v14 = vld [vmem:[%s14125_s0 + $0x1d8] sm:$0xff] }
  0x59   :  { %7695 = vmatprep.mubr.f32.mxu0 %v58_v16  ;;  %8021 = vmatprep.mubr.f32.mxu1 %v6212_v17  ;;  %v6243_v15 = vld [vmem:[%s14125_s0 + $0x7f8] sm:$0xff]  ;;  %v90_v16 = vld [vmem:[%s14125_s0 + $0x1e0] sm:$0xff] }
  0x5a   :  { %v6244_v17 = vld [vmem:[%s14125_s0 + $0x800] sm:$0xff] }
  0x5c   :  { %7696 = vmatmul.mubr.f32.gmra.mrb[28].mxu0 %v59_v18  ;;  %8022 = vmatmul.mubr.f32.gmra.mrb[28].mxu1 %v6213_v19  ;;  %v91_v18 = vld [vmem:[%s14125_s0 + $0x1e8] sm:$0xff] }
  0x5d   :  { %7698 = vmatprep.mubr.f32.mxu0 %v60_v20  ;;  %8024 = vmatprep.mubr.f32.mxu1 %v6214_v21  ;;  %v6245_v19 = vld [vmem:[%s14125_s0 + $0x808] sm:$0xff]  ;;  %v92_v20 = vld [vmem:[%s14125_s0 + $0x1f0] sm:$0xff] }
  0x5e   :  { %v6246_v21 = vld [vmem:[%s14125_s0 + $0x810] sm:$0xff] }
  0x60   :  { %7699 = vmatmul.mubr.f32.gmra.mrb[30].mxu0 %v61_v22  ;;  %8025 = vmatmul.mubr.f32.gmra.mrb[30].mxu1 %v6215_v23  ;;  %v93_v22 = vld [vmem:[%s14125_s0 + $0x1f8] sm:$0xff] }
  0x61   :  { %7701 = vmatprep.mubr.f32.mxu0 %v62_v24  ;;  %8027 = vmatprep.mubr.f32.mxu1 %v6216_v25  ;;  %v6247_v23 = vld [vmem:[%s14125_s0 + $0x818] sm:$0xff]  ;;  %v94_v24 = vld [vmem:[%s14125_s0 + $0x200] sm:$0xff] }
  0x62   :  { %v6248_v25 = vld [vmem:[%s14125_s0 + $0x820] sm:$0xff] }
  0x64   :  { %7702 = vmatmul.mubr.f32.gmra.mrb[32].mxu0 %v63_v26  ;;  %8028 = vmatmul.mubr.f32.gmra.mrb[32].mxu1 %v6217_v27  ;;  %v95_v26 = vld [vmem:[%s14125_s0 + $0x208] sm:$0xff] }
  0x65   :  { %7704 = vmatprep.mubr.f32.mxu0 %v64_v28  ;;  %8030 = vmatprep.mubr.f32.mxu1 %v6218_v29  ;;  %v6249_v27 = vld [vmem:[%s14125_s0 + $0x828] sm:$0xff]  ;;  %v96_v28 = vld [vmem:[%s14125_s0 + $0x210] sm:$0xff] }
  0x66   :  { %v6250_v29 = vld [vmem:[%s14125_s0 + $0x830] sm:$0xff] }
  0x68   :  { %7705 = vmatmul.mubr.f32.gmra.mrb[34].mxu0 %v65_v30  ;;  %8031 = vmatmul.mubr.f32.gmra.mrb[34].mxu1 %v6219_v31  ;;  %v97_v30 = vld [vmem:[%s14125_s0 + $0x218] sm:$0xff] }
  0x69   :  { %7707 = vmatprep.mubr.f32.mxu0 %v66_v32  ;;  %8033 = vmatprep.mubr.f32.mxu1 %v6220_v33  ;;  %v6251_v31 = vld [vmem:[%s14125_s0 + $0x838] sm:$0xff]  ;;  %v98_v32 = vld [vmem:[%s14125_s0 + $0x220] sm:$0xff] }
  0x6a   :  { %v6252_v33 = vld [vmem:[%s14125_s0 + $0x840] sm:$0xff] }
  0x6c   :  { %7708 = vmatmul.mubr.f32.gmra.mrb[36].mxu0 %v67_v34  ;;  %8034 = vmatmul.mubr.f32.gmra.mrb[36].mxu1 %v6221_v35  ;;  %v99_v34 = vld [vmem:[%s14125_s0 + $0x228] sm:$0xff] }
  0x6d   :  { %7710 = vmatprep.mubr.f32.mxu0 %v68_v36  ;;  %8036 = vmatprep.mubr.f32.mxu1 %v6222_v37  ;;  %v6253_v35 = vld [vmem:[%s14125_s0 + $0x848] sm:$0xff]  ;;  %v100_v36 = vld [vmem:[%s14125_s0 + $0x230] sm:$0xff] }
  0x6e   :  { %v6254_v37 = vld [vmem:[%s14125_s0 + $0x850] sm:$0xff] }
  0x70   :  { %7711 = vmatmul.mubr.f32.gmra.mrb[38].mxu0 %v69_v38  ;;  %8037 = vmatmul.mubr.f32.gmra.mrb[38].mxu1 %v6223_v39  ;;  %v101_v38 = vld [vmem:[%s14125_s0 + $0x238] sm:$0xff] }
  0x71   :  { %7713 = vmatprep.mubr.f32.mxu0 %v70_v40  ;;  %8039 = vmatprep.mubr.f32.mxu1 %v6224_v41  ;;  %v6255_v39 = vld [vmem:[%s14125_s0 + $0x858] sm:$0xff]  ;;  %v102_v40 = vld [vmem:[%s14125_s0 + $0x240] sm:$0xff] }
  0x72   :  { %v6256_v41 = vld [vmem:[%s14125_s0 + $0x860] sm:$0xff] }
  0x74   :  { %7714 = vmatmul.mubr.f32.gmra.mrb[40].mxu0 %v71_v42  ;;  %8040 = vmatmul.mubr.f32.gmra.mrb[40].mxu1 %v6225_v43  ;;  %v103_v42 = vld [vmem:[%s14125_s0 + $0x248] sm:$0xff] }
  0x75   :  { %7716 = vmatprep.mubr.f32.mxu0 %v72_v44  ;;  %8042 = vmatprep.mubr.f32.mxu1 %v6226_v45  ;;  %v6257_v43 = vld [vmem:[%s14125_s0 + $0x868] sm:$0xff]  ;;  %v104_v44 = vld [vmem:[%s14125_s0 + $0x250] sm:$0xff] }
  0x76   :  { %v6258_v45 = vld [vmem:[%s14125_s0 + $0x870] sm:$0xff] }
  0x78   :  { %7717 = vmatmul.mubr.f32.gmra.mrb[42].mxu0 %v73_v46  ;;  %8043 = vmatmul.mubr.f32.gmra.mrb[42].mxu1 %v6227_v47  ;;  %v105_v46 = vld [vmem:[%s14125_s0 + $0x258] sm:$0xff] }
  0x79   :  { %7719 = vmatprep.mubr.f32.mxu0 %v74_v48  ;;  %8045 = vmatprep.mubr.f32.mxu1 %v6228_v49  ;;  %v6259_v47 = vld [vmem:[%s14125_s0 + $0x878] sm:$0xff]  ;;  %v106_v48 = vld [vmem:[%s14125_s0 + $0x260] sm:$0xff] }
  0x7a   :  { %v6260_v49 = vld [vmem:[%s14125_s0 + $0x880] sm:$0xff] }
  0x7c   :  { %7720 = vmatmul.mubr.f32.gmra.mrb[44].mxu0 %v75_v50  ;;  %8046 = vmatmul.mubr.f32.gmra.mrb[44].mxu1 %v6229_v51  ;;  %v107_v50 = vld [vmem:[%s14125_s0 + $0x268] sm:$0xff] }
  0x7d   :  { %7722 = vmatprep.mubr.f32.mxu0 %v76_v52  ;;  %8048 = vmatprep.mubr.f32.mxu1 %v6230_v53  ;;  %v6261_v51 = vld [vmem:[%s14125_s0 + $0x888] sm:$0xff]  ;;  %v108_v52 = vld [vmem:[%s14125_s0 + $0x270] sm:$0xff] }
  0x7e   :  { %v6262_v53 = vld [vmem:[%s14125_s0 + $0x890] sm:$0xff] }
  0x80   :  { %7723 = vmatmul.mubr.f32.gmra.mrb[46].mxu0 %v77_v54  ;;  %8049 = vmatmul.mubr.f32.gmra.mrb[46].mxu1 %v6231_v55  ;;  %v109_v54 = vld [vmem:[%s14125_s0 + $0x278] sm:$0xff] }
  0x81   :  { %7725 = vmatprep.mubr.f32.mxu0 %v78_v56  ;;  %8051 = vmatprep.mubr.f32.mxu1 %v6232_v57  ;;  %v6263_v55 = vld [vmem:[%s14125_s0 + $0x898] sm:$0xff]  ;;  %v110_v56 = vld [vmem:[%s14125_s0 + $0x280] sm:$0xff] }
  0x82   :  { %v6264_v57 = vld [vmem:[%s14125_s0 + $0x8a0] sm:$0xff] }
  0x84   :  { %7726 = vmatmul.mubr.f32.gmra.mrb[48].mxu0 %v79_v58  ;;  %8052 = vmatmul.mubr.f32.gmra.mrb[48].mxu1 %v6233_v59  ;;  %v111_v58 = vld [vmem:[%s14125_s0 + $0x288] sm:$0xff] }
  0x85   :  { %7728 = vmatprep.mubr.f32.mxu0 %v80_v60  ;;  %8054 = vmatprep.mubr.f32.mxu1 %v6234_v61  ;;  %v6265_v59 = vld [vmem:[%s14125_s0 + $0x8a8] sm:$0xff]  ;;  %v112_v60 = vld [vmem:[%s14125_s0 + $0x290] sm:$0xff] }
  0x86   :  { %v6266_v61 = vld [vmem:[%s14125_s0 + $0x8b0] sm:$0xff] }
  0x88   :  { %7729 = vmatmul.mubr.f32.gmra.mrb[50].mxu0 %v81_v62  ;;  %8055 = vmatmul.mubr.f32.gmra.mrb[50].mxu1 %v6235_v63  ;;  %v113_v62 = vld [vmem:[%s14125_s0 + $0x298] sm:$0xff] }
  0x89   :  { %7731 = vmatprep.mubr.f32.mxu0 %v82_v0  ;;  %8057 = vmatprep.mubr.f32.mxu1 %v6236_v1  ;;  %v6267_v63 = vld [vmem:[%s14125_s0 + $0x8b8] sm:$0xff]  ;;  %v114_v0 = vld [vmem:[%s14125_s0 + $0x2a0] sm:$0xff] }
  0x8a   :  { %v6268_v1 = vld [vmem:[%s14125_s0 + $0x8c0] sm:$0xff] }
  0x8c   :  { %7732 = vmatmul.mubr.f32.gmra.mrb[52].mxu0 %v83_v2  ;;  %8058 = vmatmul.mubr.f32.gmra.mrb[52].mxu1 %v6237_v3  ;;  %v115_v2 = vld [vmem:[%s14125_s0 + $0x2a8] sm:$0xff] }
  0x8d   :  { %7734 = vmatprep.mubr.f32.mxu0 %v84_v4  ;;  %8060 = vmatprep.mubr.f32.mxu1 %v6238_v5  ;;  %v6269_v3 = vld [vmem:[%s14125_s0 + $0x8c8] sm:$0xff]  ;;  %v116_v4 = vld [vmem:[%s14125_s0 + $0x2b0] sm:$0xff] }
  0x8e   :  { %v6270_v5 = vld [vmem:[%s14125_s0 + $0x8d0] sm:$0xff] }
  0x90   :  { %7735 = vmatmul.mubr.f32.gmra.mrb[54].mxu0 %v85_v6  ;;  %8061 = vmatmul.mubr.f32.gmra.mrb[54].mxu1 %v6239_v7  ;;  %v117_v6 = vld [vmem:[%s14125_s0 + $0x2b8] sm:$0xff] }
  0x91   :  { %7737 = vmatprep.mubr.f32.mxu0 %v86_v8  ;;  %8063 = vmatprep.mubr.f32.mxu1 %v6240_v9  ;;  %v6271_v7 = vld [vmem:[%s14125_s0 + $0x8d8] sm:$0xff]  ;;  %v118_v8 = vld [vmem:[%s14125_s0 + $0x2c0] sm:$0xff] }
  0x92   :  { %v6272_v9 = vld [vmem:[%s14125_s0 + $0x8e0] sm:$0xff] }
  0x94   :  { %7738 = vmatmul.mubr.f32.gmra.mrb[56].mxu0 %v87_v10  ;;  %8064 = vmatmul.mubr.f32.gmra.mrb[56].mxu1 %v6241_v11  ;;  %v119_v10 = vld [vmem:[%s14125_s0 + $0x2c8] sm:$0xff] }
  0x95   :  { %7740 = vmatprep.mubr.f32.mxu0 %v88_v12  ;;  %8066 = vmatprep.mubr.f32.mxu1 %v6242_v13  ;;  %v6273_v11 = vld [vmem:[%s14125_s0 + $0x8e8] sm:$0xff]  ;;  %v120_v12 = vld [vmem:[%s14125_s0 + $0x2d0] sm:$0xff] }
  0x96   :  { %v6274_v13 = vld [vmem:[%s14125_s0 + $0x8f0] sm:$0xff] }
  0x98   :  { %7741 = vmatmul.mubr.f32.gmra.mrb[58].mxu0 %v89_v14  ;;  %8067 = vmatmul.mubr.f32.gmra.mrb[58].mxu1 %v6243_v15  ;;  %v121_v14 = vld [vmem:[%s14125_s0 + $0x2d8] sm:$0xff] }
  0x99   :  { %7743 = vmatprep.mubr.f32.mxu0 %v90_v16  ;;  %8069 = vmatprep.mubr.f32.mxu1 %v6244_v17  ;;  %v6275_v15 = vld [vmem:[%s14125_s0 + $0x8f8] sm:$0xff]  ;;  %v122_v16 = vld [vmem:[%s14125_s0 + $0x2e0] sm:$0xff] }
  0x9a   :  { %v6276_v17 = vld [vmem:[%s14125_s0 + $0x900] sm:$0xff] }
  0x9c   :  { %7744 = vmatmul.mubr.f32.gmra.mrb[60].mxu0 %v91_v18  ;;  %8070 = vmatmul.mubr.f32.gmra.mrb[60].mxu1 %v6245_v19  ;;  %v123_v18 = vld [vmem:[%s14125_s0 + $0x2e8] sm:$0xff] }
  0x9d   :  { %7746 = vmatprep.mubr.f32.mxu0 %v92_v20  ;;  %8072 = vmatprep.mubr.f32.mxu1 %v6246_v21  ;;  %v6277_v19 = vld [vmem:[%s14125_s0 + $0x908] sm:$0xff]  ;;  %v124_v20 = vld [vmem:[%s14125_s0 + $0x2f0] sm:$0xff] }
  0x9e   :  { %v6278_v21 = vld [vmem:[%s14125_s0 + $0x910] sm:$0xff] }
  0xa0   :  { %7747 = vmatmul.mubr.f32.gmra.mrb[62].mxu0 %v93_v22  ;;  %8073 = vmatmul.mubr.f32.gmra.mrb[62].mxu1 %v6247_v23  ;;  %v125_v22 = vld [vmem:[%s14125_s0 + $0x2f8] sm:$0xff] }
  0xa1   :  { %7749 = vmatprep.mubr.f32.mxu0 %v94_v24  ;;  %8075 = vmatprep.mubr.f32.mxu1 %v6248_v25  ;;  %v6279_v23 = vld [vmem:[%s14125_s0 + $0x918] sm:$0xff]  ;;  %v126_v24 = vld [vmem:[%s14125_s0 + $0x300] sm:$0xff] }
  0xa2   :  { %v6280_v25 = vld [vmem:[%s14125_s0 + $0x920] sm:$0xff] }
  0xa4   :  { %7750 = vmatmul.mubr.f32.gmra.mrb[64].mxu0 %v95_v26  ;;  %8076 = vmatmul.mubr.f32.gmra.mrb[64].mxu1 %v6249_v27  ;;  %v127_v26 = vld [vmem:[%s14125_s0 + $0x308] sm:$0xff] }
  0xa5   :  { %7752 = vmatprep.mubr.f32.mxu0 %v96_v28  ;;  %8078 = vmatprep.mubr.f32.mxu1 %v6250_v29  ;;  %v6281_v27 = vld [vmem:[%s14125_s0 + $0x928] sm:$0xff]  ;;  %v128_v28 = vld [vmem:[%s14125_s0 + $0x310] sm:$0xff] }
  0xa6   :  { %v6282_v29 = vld [vmem:[%s14125_s0 + $0x930] sm:$0xff] }
  0xa8   :  { %7753 = vmatmul.mubr.f32.gmra.mrb[66].mxu0 %v97_v30  ;;  %8079 = vmatmul.mubr.f32.gmra.mrb[66].mxu1 %v6251_v31  ;;  %v129_v30 = vld [vmem:[%s14125_s0 + $0x318] sm:$0xff] }
  0xa9   :  { %7755 = vmatprep.mubr.f32.mxu0 %v98_v32  ;;  %8081 = vmatprep.mubr.f32.mxu1 %v6252_v33  ;;  %v6283_v31 = vld [vmem:[%s14125_s0 + $0x938] sm:$0xff]  ;;  %v130_v32 = vld [vmem:[%s14125_s0 + $0x320] sm:$0xff] }
  0xaa   :  { %v6284_v33 = vld [vmem:[%s14125_s0 + $0x940] sm:$0xff] }
  0xac   :  { %7756 = vmatmul.mubr.f32.gmra.mrb[68].mxu0 %v99_v34  ;;  %8082 = vmatmul.mubr.f32.gmra.mrb[68].mxu1 %v6253_v35  ;;  %v131_v34 = vld [vmem:[%s14125_s0 + $0x328] sm:$0xff] }
  0xad   :  { %7758 = vmatprep.mubr.f32.mxu0 %v100_v36  ;;  %8084 = vmatprep.mubr.f32.mxu1 %v6254_v37  ;;  %v6285_v35 = vld [vmem:[%s14125_s0 + $0x948] sm:$0xff]  ;;  %v132_v36 = vld [vmem:[%s14125_s0 + $0x330] sm:$0xff] }
  0xae   :  { %v6286_v37 = vld [vmem:[%s14125_s0 + $0x950] sm:$0xff] }
  0xb0   :  { %7759 = vmatmul.mubr.f32.gmra.mrb[70].mxu0 %v101_v38  ;;  %8085 = vmatmul.mubr.f32.gmra.mrb[70].mxu1 %v6255_v39  ;;  %v133_v38 = vld [vmem:[%s14125_s0 + $0x338] sm:$0xff] }
  0xb1   :  { %7761 = vmatprep.mubr.f32.mxu0 %v102_v40  ;;  %8087 = vmatprep.mubr.f32.mxu1 %v6256_v41  ;;  %v6287_v39 = vld [vmem:[%s14125_s0 + $0x958] sm:$0xff]  ;;  %v134_v40 = vld [vmem:[%s14125_s0 + $0x340] sm:$0xff] }
  0xb2   :  { %v6288_v41 = vld [vmem:[%s14125_s0 + $0x960] sm:$0xff] }
  0xb4   :  { %7762 = vmatmul.mubr.f32.gmra.mrb[72].mxu0 %v103_v42  ;;  %8088 = vmatmul.mubr.f32.gmra.mrb[72].mxu1 %v6257_v43  ;;  %v135_v42 = vld [vmem:[%s14125_s0 + $0x348] sm:$0xff] }
  0xb5   :  { %7764 = vmatprep.mubr.f32.mxu0 %v104_v44  ;;  %8090 = vmatprep.mubr.f32.mxu1 %v6258_v45  ;;  %v6289_v43 = vld [vmem:[%s14125_s0 + $0x968] sm:$0xff]  ;;  %v136_v44 = vld [vmem:[%s14125_s0 + $0x350] sm:$0xff] }
  0xb6   :  { %v6290_v45 = vld [vmem:[%s14125_s0 + $0x970] sm:$0xff] }
  0xb8   :  { %7765 = vmatmul.mubr.f32.gmra.mrb[74].mxu0 %v105_v46  ;;  %8091 = vmatmul.mubr.f32.gmra.mrb[74].mxu1 %v6259_v47  ;;  %v137_v46 = vld [vmem:[%s14125_s0 + $0x358] sm:$0xff] }
  0xb9   :  { %7767 = vmatprep.mubr.f32.mxu0 %v106_v48  ;;  %8093 = vmatprep.mubr.f32.mxu1 %v6260_v49  ;;  %v6291_v47 = vld [vmem:[%s14125_s0 + $0x978] sm:$0xff]  ;;  %v138_v48 = vld [vmem:[%s14125_s0 + $0x360] sm:$0xff] }
  0xba   :  { %v6292_v49 = vld [vmem:[%s14125_s0 + $0x980] sm:$0xff] }
  0xbc   :  { %7768 = vmatmul.mubr.f32.gmra.mrb[76].mxu0 %v107_v50  ;;  %8094 = vmatmul.mubr.f32.gmra.mrb[76].mxu1 %v6261_v51 }
  0xbd   :  { %7770 = vmatprep.mubr.f32.mxu0 %v108_v52  ;;  %8096 = vmatprep.mubr.f32.mxu1 %v6262_v53 }
  0xc0   :  { %7771 = vmatmul.mubr.f32.gmra.mrb[78].mxu0 %v109_v54  ;;  %8097 = vmatmul.mubr.f32.gmra.mrb[78].mxu1 %v6263_v55  ;;  %v139_v55 = vld [vmem:[%s14125_s0 + $0x368] sm:$0xff] }
  0xc1   :  { %7773 = vmatprep.mubr.f32.mxu0 %v110_v56  ;;  %8099 = vmatprep.mubr.f32.mxu1 %v6264_v57  ;;  %v6293_v56 = vld [vmem:[%s14125_s0 + $0x988] sm:$0xff]  ;;  %v6319_v57 = vld [vmem:[%s14125_s0 + $0xa58] sm:$0xff] }
  0xc4   :  { %7774 = vmatmul.mubr.f32.gmra.mrb[80].mxu0 %v111_v58  ;;  %8100 = vmatmul.mubr.f32.gmra.mrb[80].mxu1 %v6265_v59  ;;  %v140_v58 = vld [vmem:[%s14125_s0 + $0x370] sm:$0xff] }
  0xc5   :  { %7776 = vmatprep.mubr.f32.mxu0 %v112_v60  ;;  %8102 = vmatprep.mubr.f32.mxu1 %v6266_v61  ;;  %v6294_v59 = vld [vmem:[%s14125_s0 + $0x990] sm:$0xff] }
  0xc8   :  { %7777 = vmatmul.mubr.f32.gmra.mrb[82].mxu0 %v113_v62  ;;  %8103 = vmatmul.mubr.f32.gmra.mrb[82].mxu1 %v6267_v63 }
  0xc9   :  { %7779 = vmatprep.mubr.f32.mxu0 %v114_v0  ;;  %8105 = vmatprep.mubr.f32.mxu1 %v6268_v1  ;;  %v141_v1 = vld [vmem:[%s14125_s0 + $0x378] sm:$0xff] }
  0xca   :  { %v165_v0 = vld [vmem:[%s14125_s0 + $0x438] sm:$0xff] }
  0xcc   :  { %7780 = vmatmul.mubr.f32.gmra.mrb[84].mxu0 %v115_v2  ;;  %8106 = vmatmul.mubr.f32.gmra.mrb[84].mxu1 %v6269_v3  ;;  %v6295_v2 = vld [vmem:[%s14125_s0 + $0x998] sm:$0xff] }
  0xcd   :  { %7782 = vmatprep.mubr.f32.mxu0 %v116_v4  ;;  %8108 = vmatprep.mubr.f32.mxu1 %v6270_v5  ;;  %v142_v4 = vld [vmem:[%s14125_s0 + $0x380] sm:$0xff] }
  0xce   :  { %v6296_v5 = vld [vmem:[%s14125_s0 + $0x9a0] sm:$0xff] }
  0xd0   :  { %7783 = vmatmul.mubr.f32.gmra.mrb[86].mxu0 %v117_v6  ;;  %8109 = vmatmul.mubr.f32.gmra.mrb[86].mxu1 %v6271_v7 }
  0xd1   :  { %7785 = vmatprep.mubr.f32.mxu0 %v118_v8  ;;  %8111 = vmatprep.mubr.f32.mxu1 %v6272_v9 }
  0xd4   :  { %7786 = vmatmul.mubr.f32.gmra.mrb[88].mxu0 %v119_v10  ;;  %8112 = vmatmul.mubr.f32.gmra.mrb[88].mxu1 %v6273_v11  ;;  %v143_v11 = vld [vmem:[%s14125_s0 + $0x388] sm:$0xff] }
  0xd5   :  { %7788 = vmatprep.mubr.f32.mxu0 %v120_v12  ;;  %8114 = vmatprep.mubr.f32.mxu1 %v6274_v13  ;;  %v6297_v12 = vld [vmem:[%s14125_s0 + $0x9a8] sm:$0xff] }
  0xd6   :  { %v6317_v13 = vld [vmem:[%s14125_s0 + $0xa48] sm:$0xff] }
  0xd8   :  { %7789 = vmatmul.mubr.f32.gmra.mrb[90].mxu0 %v121_v14  ;;  %8115 = vmatmul.mubr.f32.gmra.mrb[90].mxu1 %v6275_v15  ;;  %v144_v14 = vld [vmem:[%s14125_s0 + $0x390] sm:$0xff] }
  0xd9   :  { %7791 = vmatprep.mubr.f32.mxu0 %v122_v16  ;;  %8117 = vmatprep.mubr.f32.mxu1 %v6276_v17  ;;  %v6298_v15 = vld [vmem:[%s14125_s0 + $0x9b0] sm:$0xff] }
  0xdc   :  { %7792 = vmatmul.mubr.f32.gmra.mrb[92].mxu0 %v123_v18  ;;  %8118 = vmatmul.mubr.f32.gmra.mrb[92].mxu1 %v6277_v19 }
  0xdd   :  { %7794 = vmatprep.mubr.f32.mxu0 %v124_v20  ;;  %8120 = vmatprep.mubr.f32.mxu1 %v6278_v21  ;;  %v145_v21 = vld [vmem:[%s14125_s0 + $0x398] sm:$0xff]  ;;  %v163_v20 = vld [vmem:[%s14125_s0 + $0x428] sm:$0xff] }
  0xe0   :  { %7795 = vmatmul.mubr.f32.gmra.mrb[94].mxu0 %v125_v22  ;;  %8121 = vmatmul.mubr.f32.gmra.mrb[94].mxu1 %v6279_v23  ;;  %v6299_v22 = vld [vmem:[%s14125_s0 + $0x9b8] sm:$0xff] }
  0xe1   :  { %7797 = vmatprep.mubr.f32.mxu0 %v126_v24  ;;  %8123 = vmatprep.mubr.f32.mxu1 %v6280_v25  ;;  %v146_v24 = vld [vmem:[%s14125_s0 + $0x3a0] sm:$0xff] }
  0xe2   :  { %v6300_v25 = vld [vmem:[%s14125_s0 + $0x9c0] sm:$0xff] }
  0xe4   :  { %7798 = vmatmul.mubr.f32.gmra.mrb[96].mxu0 %v127_v26  ;;  %8124 = vmatmul.mubr.f32.gmra.mrb[96].mxu1 %v6281_v27 }
  0xe5   :  { %7800 = vmatprep.mubr.f32.mxu0 %v128_v28  ;;  %8126 = vmatprep.mubr.f32.mxu1 %v6282_v29 }
  0xe8   :  { %7801 = vmatmul.mubr.f32.gmra.mrb[98].mxu0 %v129_v30  ;;  %8127 = vmatmul.mubr.f32.gmra.mrb[98].mxu1 %v6283_v31  ;;  %v147_v31 = vld [vmem:[%s14125_s0 + $0x3a8] sm:$0xff] }
  0xe9   :  { %7803 = vmatprep.mubr.f32.mxu0 %v130_v32  ;;  %8129 = vmatprep.mubr.f32.mxu1 %v6284_v33  ;;  %v6301_v32 = vld [vmem:[%s14125_s0 + $0x9c8] sm:$0xff]  ;;  %v6315_v33 = vld [vmem:[%s14125_s0 + $0xa38] sm:$0xff] }
  0xec   :  { %7804 = vmatmul.mubr.f32.gmra.mrb[100].mxu0 %v131_v34  ;;  %8130 = vmatmul.mubr.f32.gmra.mrb[100].mxu1 %v6285_v35  ;;  %v148_v34 = vld [vmem:[%s14125_s0 + $0x3b0] sm:$0xff] }
  0xed   :  { %7806 = vmatprep.mubr.f32.mxu0 %v132_v36  ;;  %8132 = vmatprep.mubr.f32.mxu1 %v6286_v37  ;;  %v6302_v35 = vld [vmem:[%s14125_s0 + $0x9d0] sm:$0xff] }
  0xf0   :  { %7807 = vmatmul.mubr.f32.gmra.mrb[102].mxu0 %v133_v38  ;;  %8133 = vmatmul.mubr.f32.gmra.mrb[102].mxu1 %v6287_v39 }
  0xf1   :  { %7809 = vmatprep.mubr.f32.mxu0 %v134_v40  ;;  %8135 = vmatprep.mubr.f32.mxu1 %v6288_v41  ;;  %v149_v41 = vld [vmem:[%s14125_s0 + $0x3b8] sm:$0xff] }
  0xf2   :  { %v161_v40 = vld [vmem:[%s14125_s0 + $0x418] sm:$0xff] }
  0xf4   :  { %7810 = vmatmul.mubr.f32.gmra.mrb[104].mxu0 %v135_v42  ;;  %8136 = vmatmul.mubr.f32.gmra.mrb[104].mxu1 %v6289_v43  ;;  %v6303_v42 = vld [vmem:[%s14125_s0 + $0x9d8] sm:$0xff] }
  0xf5   :  { %7812 = vmatprep.mubr.f32.mxu0 %v136_v44  ;;  %8138 = vmatprep.mubr.f32.mxu1 %v6290_v45  ;;  %v150_v44 = vld [vmem:[%s14125_s0 + $0x3c0] sm:$0xff] }
  0xf6   :  { %v6304_v45 = vld [vmem:[%s14125_s0 + $0x9e0] sm:$0xff] }
  0xf7   :  { %v9858_v50 = vpop.f32.mrb[0].mxu0  ;;  %v9860_v51 = vpop.f32.mrb[0].mxu1 }
  0xf8   :  { %v9862_v52 = vpop.f32.mrb[1].mxu0  ;;  %7813 = vmatmul.mubr.f32.gmra.mrb[106].mxu0 %v137_v46  ;;  %v9864_v53 = vpop.f32.mrb[1].mxu1  ;;  %8139 = vmatmul.mubr.f32.gmra.mrb[106].mxu1 %v6291_v47 }
  0xf9   :  { %7815 = vmatprep.mubr.f32.mxu0 %v138_v48  ;;  %8141 = vmatprep.mubr.f32.mxu1 %v6292_v49 }
  0xfb   :  { %v9882_v60 = vpop.f32.mrb[2].mxu0  ;;  %v9884_v61 = vpop.f32.mrb[2].mxu1 }
  0xfc   :  { %v9886_v62 = vpop.f32.mrb[3].mxu0  ;;  %7816 = vmatmul.mubr.f32.gmra.mrb[108].mxu0 %v139_v55  ;;  %v9888_v63 = vpop.f32.mrb[3].mxu1  ;;  %8142 = vmatmul.mubr.f32.gmra.mrb[108].mxu1 %v6293_v56  ;;  %v151_v56 = vld [vmem:[%s14125_s0 + $0x3c8] sm:$0xff] }
  0xfd   :  { %7818 = vmatprep.mubr.f32.mxu0 %v140_v58  ;;  %8144 = vmatprep.mubr.f32.mxu1 %v6294_v59  ;;  %v6305_v58 = vld [vmem:[%s14125_s0 + $0x9e8] sm:$0xff] }
  0xfe   :  { %v6313_v59 = vld [vmem:[%s14125_s0 + $0xa28] sm:$0xff] }
  0xff   :  { %v9906_v6 = vpop.f32.mrb[4].mxu0  ;;  %v9908_v7 = vpop.f32.mrb[4].mxu1 }
 0x100   :  { %v9910_v8 = vpop.f32.mrb[5].mxu0  ;;  %7819 = vmatmul.mubr.f32.gmra.mrb[110].mxu0 %v141_v1  ;;  %v9912_v9 = vpop.f32.mrb[5].mxu1  ;;  %8145 = vmatmul.mubr.f32.gmra.mrb[110].mxu1 %v6295_v2  ;;  %v152_v1 = vld [vmem:[%s14125_s0 + $0x3d0] sm:$0xff] }
 0x101   :  { %7821 = vmatprep.mubr.f32.mxu0 %v142_v4  ;;  %8147 = vmatprep.mubr.f32.mxu1 %v6296_v5  ;;  %v6306_v2 = vld [vmem:[%s14125_s0 + $0x9f0] sm:$0xff] }
 0x103   :  { %v9930_v16 = vpop.f32.mrb[6].mxu0  ;;  %v9932_v17 = vpop.f32.mrb[6].mxu1 }
 0x104   :  { %v9934_v18 = vpop.f32.mrb[7].mxu0  ;;  %7822 = vmatmul.mubr.f32.gmra.mrb[112].mxu0 %v143_v11  ;;  %v9936_v19 = vpop.f32.mrb[7].mxu1  ;;  %8148 = vmatmul.mubr.f32.gmra.mrb[112].mxu1 %v6297_v12 }
 0x105   :  { %7824 = vmatprep.mubr.f32.mxu0 %v144_v14  ;;  %8150 = vmatprep.mubr.f32.mxu1 %v6298_v15  ;;  %v153_v15 = vld [vmem:[%s14125_s0 + $0x3d8] sm:$0xff]  ;;  %v159_v14 = vld [vmem:[%s14125_s0 + $0x408] sm:$0xff] }
 0x107   :  { %v9954_v26 = vpop.f32.mrb[8].mxu0  ;;  %v9956_v27 = vpop.f32.mrb[8].mxu1 }
 0x108   :  { %v9958_v28 = vpop.f32.mrb[9].mxu0  ;;  %7825 = vmatmul.mubr.f32.gmra.mrb[114].mxu0 %v145_v21  ;;  %v9960_v29 = vpop.f32.mrb[9].mxu1  ;;  %8151 = vmatmul.mubr.f32.gmra.mrb[114].mxu1 %v6299_v22  ;;  %v6307_v21 = vld [vmem:[%s14125_s0 + $0x9f8] sm:$0xff] }
 0x109   :  { %7827 = vmatprep.mubr.f32.mxu0 %v146_v24  ;;  %8153 = vmatprep.mubr.f32.mxu1 %v6300_v25  ;;  %v154_v24 = vld [vmem:[%s14125_s0 + $0x3e0] sm:$0xff] }
 0x10a   :  { %v6308_v25 = vld [vmem:[%s14125_s0 + $0xa00] sm:$0xff] }
 0x10b   :  { %v9978_v36 = vpop.f32.mrb[10].mxu0  ;;  %v9980_v37 = vpop.f32.mrb[10].mxu1 }
 0x10c   :  { %v9982_v38 = vpop.f32.mrb[11].mxu0  ;;  %7828 = vmatmul.mubr.f32.gmra.mrb[116].mxu0 %v147_v31  ;;  %v9984_v39 = vpop.f32.mrb[11].mxu1  ;;  %8154 = vmatmul.mubr.f32.gmra.mrb[116].mxu1 %v6301_v32 }
 0x10d   :  { %7830 = vmatprep.mubr.f32.mxu0 %v148_v34  ;;  %8156 = vmatprep.mubr.f32.mxu1 %v6302_v35 }
 0x10f   :  { %v10002_v46 = vpop.f32.mrb[12].mxu0  ;;  %v10004_v47 = vpop.f32.mrb[12].mxu1 }
 0x110   :  { %v10006_v48 = vpop.f32.mrb[13].mxu0  ;;  %7831 = vmatmul.mubr.f32.gmra.mrb[118].mxu0 %v149_v41  ;;  %v10008_v49 = vpop.f32.mrb[13].mxu1  ;;  %8157 = vmatmul.mubr.f32.gmra.mrb[118].mxu1 %v6303_v42  ;;  %v155_v42 = vld [vmem:[%s14125_s0 + $0x3e8] sm:$0xff] }
 0x111   :  { %7833 = vmatprep.mubr.f32.mxu0 %v150_v44  ;;  %8159 = vmatprep.mubr.f32.mxu1 %v6304_v45  ;;  %v6309_v44 = vld [vmem:[%s14125_s0 + $0xa08] sm:$0xff]  ;;  %v6311_v45 = vld [vmem:[%s14125_s0 + $0xa18] sm:$0xff] }
 0x113   :  { %v10026_v4 = vpop.f32.mrb[14].mxu0  ;;  %v10028_v5 = vpop.f32.mrb[14].mxu1 }
 0x114   :  { %v10030_v11 = vpop.f32.mrb[15].mxu0  ;;  %7834 = vmatmul.mubr.f32.gmra.mrb[120].mxu0 %v151_v56  ;;  %v10032_v12 = vpop.f32.mrb[15].mxu1  ;;  %8160 = vmatmul.mubr.f32.gmra.mrb[120].mxu1 %v6305_v58  ;;  %v156_v56 = vld [vmem:[%s14125_s0 + $0x3f0] sm:$0xff] }
 0x115   :  { %7836 = vmatprep.mubr.f32.mxu0 %v152_v1  ;;  %8162 = vmatprep.mubr.f32.mxu1 %v6306_v2  ;;  %v6310_v58 = vld [vmem:[%s14125_s0 + $0xa10] sm:$0xff] }
 0x117   :  { %v10050_v31 = vpop.f32.mrb[16].mxu0  ;;  %v10052_v32 = vpop.f32.mrb[16].mxu1 }
 0x118   :  { %v10054_v34 = vpop.f32.mrb[17].mxu0  ;;  %7837 = vmatmul.mubr.f32.gmra.mrb[122].mxu0 %v153_v15  ;;  %v10056_v35 = vpop.f32.mrb[17].mxu1  ;;  %8163 = vmatmul.mubr.f32.gmra.mrb[122].mxu1 %v6307_v21 }
 0x119   :  { %7839 = vmatprep.mubr.f32.mxu0 %v154_v24  ;;  %8165 = vmatprep.mubr.f32.mxu1 %v6308_v25  ;;  %v157_v25 = vld [vmem:[%s14125_s0 + $0x3f8] sm:$0xff] }
 0x11b   :  { %v10074_v1 = vpop.f32.mrb[18].mxu0  ;;  %v10076_v2 = vpop.f32.mrb[18].mxu1 }
 0x11c   :  { %v10078_v15 = vpop.f32.mrb[19].mxu0  ;;  %7840 = vmatmul.mubr.f32.gmra.mrb[124].mxu0 %v155_v42  ;;  %v10080_v21 = vpop.f32.mrb[19].mxu1  ;;  %8166 = vmatmul.mubr.f32.gmra.mrb[124].mxu1 %v6309_v44  ;;  %v158_v42 = vld [vmem:[%s14125_s0 + $0x400] sm:$0xff] }
 0x11d   :  { %7842 = vmatprep.mubr.f32.mxu0 %v156_v56  ;;  %8168 = vmatprep.mubr.f32.mxu1 %v6310_v58  ;;  %v6312_v44 = vld [vmem:[%s14125_s0 + $0xa20] sm:$0xff] }
 0x11f   :  { %v10098_v56 = vpop.f32.mrb[20].mxu0  ;;  %v10100_v58 = vpop.f32.mrb[20].mxu1 }
 0x120   :  { %v10102_v24 = vpop.f32.mrb[21].mxu0  ;;  %7843 = vmatmul.mubr.f32.gmra.mrb[126].mxu0 %v157_v25  ;;  %v10104_v22 = vpop.f32.mrb[21].mxu1  ;;  %8169 = vmatmul.mubr.f32.gmra.mrb[126].mxu1 %v6311_v45  ;;  %v160_v45 = vld [vmem:[%s14125_s0 + $0x410] sm:$0xff] }
 0x121   :  { %7845 = vmatprep.mubr.f32.mxu0 %v158_v42  ;;  %8171 = vmatprep.mubr.f32.mxu1 %v6312_v44  ;;  %v6314_v25 = vld [vmem:[%s14125_s0 + $0xa30] sm:$0xff] }
 0x123   :  { %v10122_v42 = vpop.f32.mrb[22].mxu0  ;;  %v10124_v44 = vpop.f32.mrb[22].mxu1 }
 0x124   :  { %v10126_v41 = vpop.f32.mrb[23].mxu0  ;;  %7846 = vmatmul.mubr.f32.gmra.mrb[128].mxu0 %v159_v14  ;;  %v10128_v43 = vpop.f32.mrb[23].mxu1  ;;  %8172 = vmatmul.mubr.f32.gmra.mrb[128].mxu1 %v6313_v59  ;;  %v162_v59 = vld [vmem:[%s14125_s0 + $0x420] sm:$0xff] }
 0x125   :  { %7848 = vmatprep.mubr.f32.mxu0 %v160_v45  ;;  %8174 = vmatprep.mubr.f32.mxu1 %v6314_v25  ;;  %v6316_v14 = vld [vmem:[%s14125_s0 + $0xa40] sm:$0xff] }
 0x127   :  { %v10146_v45 = vpop.f32.mrb[24].mxu0  ;;  %v10148_v25 = vpop.f32.mrb[24].mxu1 }
 0x128   :  { %14471 = vst [vmem:[#allocation2_spill] sm:$0xff] %v10148_v25  ;;  %v10150_v55 = vpop.f32.mrb[25].mxu0  ;;  %7849 = vmatmul.mubr.f32.gmra.mrb[130].mxu0 %v161_v40  ;;  %v10152_v23 = vpop.f32.mrb[25].mxu1  ;;  %8175 = vmatmul.mubr.f32.gmra.mrb[130].mxu1 %v6315_v33  ;;  %v164_v33 = vld [vmem:[%s14125_s0 + $0x430] sm:$0xff] }
 0x129   :  { %14472 = vst [vmem:[#allocation3_spill] sm:$0xff] %v10150_v55  ;;  %14473 = vst [vmem:[#allocation4_spill] sm:$0xff] %v10152_v23  ;;  %7851 = vmatprep.mubr.f32.mxu0 %v162_v59  ;;  %8177 = vmatprep.mubr.f32.mxu1 %v6316_v14  ;;  %v6318_v40 = vld [vmem:[%s14125_s0 + $0xa50] sm:$0xff]  ;;  %v12219_v23 = vld [vmem:[%s14126_s2] ss:$0 sm:$0xff] }
 0x12a   :  { %v6489_v55 = vld [vmem:[%s14125_s0 + $0xfa8] sm:$0xff] }
 0x12b   :  { %v10170_v59 = vpop.f32.mrb[26].mxu0  ;;  %v10172_v14 = vpop.f32.mrb[26].mxu1 }
 0x12c   :  { %14474 = vst [vmem:[#allocation5_spill] sm:$0xff] %v10170_v59  ;;  %14475 = vst [vmem:[#allocation6_spill] sm:$0xff] %v10172_v14  ;;  %v10174_v30 = vpop.f32.mrb[27].mxu0  ;;  %7852 = vmatmul.mubr.f32.gmra.mrb[132].mxu0 %v163_v20  ;;  %v10176_v3 = vpop.f32.mrb[27].mxu1  ;;  %8178 = vmatmul.mubr.f32.gmra.mrb[132].mxu1 %v6317_v13  ;;  %v166_v13 = vld [vmem:[%s14125_s0 + $0x440] sm:$0xff] }
 0x12d   :  { %14476 = vst [vmem:[#allocation7_spill] sm:$0xff] %v10174_v30  ;;  %14477 = vst [vmem:[#allocation8_spill] sm:$0xff] %v10176_v3  ;;  %7854 = vmatprep.mubr.f32.mxu0 %v164_v33  ;;  %8180 = vmatprep.mubr.f32.mxu1 %v6318_v40  ;;  %v6320_v20 = vld [vmem:[%s14125_s0 + $0xa60] sm:$0xff]  ;;  %v167_v3 = vld [vmem:[%s14125_s0 + $0x448] sm:$0xff] }
 0x12e   :  { %v6321_v30 = vld [vmem:[%s14125_s0 + $0xa68] sm:$0xff] }
 0x12f   :  { %v10194_v33 = vpop.f32.mrb[28].mxu0  ;;  %v10196_v40 = vpop.f32.mrb[28].mxu1 }
 0x130   :  { %14478 = vst [vmem:[#allocation9_spill] sm:$0xff] %v10194_v33  ;;  %14479 = vst [vmem:[#allocation10_spill] sm:$0xff] %v10196_v40  ;;  %v10198_v10 = vpop.f32.mrb[29].mxu0  ;;  %7855 = vmatmul.mubr.f32.gmra.mrb[134].mxu0 %v165_v0  ;;  %v10200_v14 = vpop.f32.mrb[29].mxu1  ;;  %8181 = vmatmul.mubr.f32.gmra.mrb[134].mxu1 %v6319_v57  ;;  %v168_v57 = vld [vmem:[%s14125_s0 + $0x450] sm:$0xff] }
 0x131   :  { %14480 = vst [vmem:[#allocation11_spill] sm:$0xff] %v10198_v10  ;;  %14481 = vst [vmem:[#allocation12_spill] sm:$0xff] %v10200_v14  ;;  %7857 = vmatprep.mubr.f32.mxu0 %v166_v13  ;;  %8183 = vmatprep.mubr.f32.mxu1 %v6320_v20  ;;  %v6322_v0 = vld [vmem:[%s14125_s0 + $0xa70] sm:$0xff]  ;;  %v169_v14 = vld [vmem:[%s14125_s0 + $0x458] sm:$0xff] }
 0x132   :  { %v6323_v10 = vld [vmem:[%s14125_s0 + $0xa78] sm:$0xff] }
 0x133   :  { %v10218_v13 = vpop.f32.mrb[30].mxu0  ;;  %v10220_v20 = vpop.f32.mrb[30].mxu1 }
 0x134   :  { %14482 = vst [vmem:[#allocation13_spill] sm:$0xff] %v10218_v13  ;;  %14483 = vst [vmem:[#allocation14_spill] sm:$0xff] %v10220_v20  ;;  %v10222_v54 = vpop.f32.mrb[31].mxu0  ;;  %7858 = vmatmul.mubr.f32.gmra.mrb[136].mxu0 %v167_v3  ;;  %v10224_v40 = vpop.f32.mrb[31].mxu1  ;;  %8184 = vmatmul.mubr.f32.gmra.mrb[136].mxu1 %v6321_v30  ;;  %v170_v3 = vld [vmem:[%s14125_s0 + $0x460] sm:$0xff] }
 0x135   :  { %14484 = vst [vmem:[#allocation15_spill] sm:$0xff] %v10222_v54  ;;  %14485 = vst [vmem:[#allocation16_spill] sm:$0xff] %v10224_v40  ;;  %7860 = vmatprep.mubr.f32.mxu0 %v168_v57  ;;  %8186 = vmatprep.mubr.f32.mxu1 %v6322_v0  ;;  %v6324_v30 = vld [vmem:[%s14125_s0 + $0xa80] sm:$0xff]  ;;  %v171_v40 = vld [vmem:[%s14125_s0 + $0x468] sm:$0xff] }
 0x136   :  { %v6325_v54 = vld [vmem:[%s14125_s0 + $0xa88] sm:$0xff] }
 0x137   :  { %v10242_v57 = vpop.f32.mrb[32].mxu0  ;;  %v10244_v0 = vpop.f32.mrb[32].mxu1 }
 0x138   :  { %14486 = vst [vmem:[#allocation17_spill] sm:$0xff] %v10242_v57  ;;  %14487 = vst [vmem:[#allocation18_spill] sm:$0xff] %v10244_v0  ;;  %v10246_v59 = vpop.f32.mrb[33].mxu0  ;;  %7861 = vmatmul.mubr.f32.gmra.mrb[138].mxu0 %v169_v14  ;;  %v10248_v20 = vpop.f32.mrb[33].mxu1  ;;  %8187 = vmatmul.mubr.f32.gmra.mrb[138].mxu1 %v6323_v10  ;;  %v172_v10 = vld [vmem:[%s14125_s0 + $0x470] sm:$0xff] }
 0x139   :  { %14488 = vst [vmem:[#allocation19_spill] sm:$0xff] %v10246_v59  ;;  %14489 = vst [vmem:[#allocation20_spill] sm:$0xff] %v10248_v20  ;;  %7863 = vmatprep.mubr.f32.mxu0 %v170_v3  ;;  %8189 = vmatprep.mubr.f32.mxu1 %v6324_v30  ;;  %v6326_v14 = vld [vmem:[%s14125_s0 + $0xa90] sm:$0xff]  ;;  %v173_v20 = vld [vmem:[%s14125_s0 + $0x478] sm:$0xff] }
 0x13a   :  { %v6327_v59 = vld [vmem:[%s14125_s0 + $0xa98] sm:$0xff] }
 0x13b   :  { %v10266_v3 = vpop.f32.mrb[34].mxu0  ;;  %v10268_v30 = vpop.f32.mrb[34].mxu1 }
 0x13c   :  { %14490 = vst [vmem:[#allocation21_spill] sm:$0xff] %v10266_v3  ;;  %14491 = vst [vmem:[#allocation22_spill] sm:$0xff] %v10268_v30  ;;  %v10270_v33 = vpop.f32.mrb[35].mxu0  ;;  %7864 = vmatmul.mubr.f32.gmra.mrb[140].mxu0 %v171_v40  ;;  %v10272_v0 = vpop.f32.mrb[35].mxu1  ;;  %8190 = vmatmul.mubr.f32.gmra.mrb[140].mxu1 %v6325_v54  ;;  %v174_v54 = vld [vmem:[%s14125_s0 + $0x480] sm:$0xff] }
 0x13d   :  { %14492 = vst [vmem:[#allocation23_spill] sm:$0xff] %v10270_v33  ;;  %14493 = vst [vmem:[#allocation24_spill] sm:$0xff] %v10272_v0  ;;  %7866 = vmatprep.mubr.f32.mxu0 %v172_v10  ;;  %8192 = vmatprep.mubr.f32.mxu1 %v6326_v14  ;;  %v6328_v40 = vld [vmem:[%s14125_s0 + $0xaa0] sm:$0xff]  ;;  %v175_v0 = vld [vmem:[%s14125_s0 + $0x488] sm:$0xff] }
 0x13e   :  { %v6329_v33 = vld [vmem:[%s14125_s0 + $0xaa8] sm:$0xff] }
 0x13f   :  { %v10290_v10 = vpop.f32.mrb[36].mxu0  ;;  %v10292_v14 = vpop.f32.mrb[36].mxu1 }
 0x140   :  { %14494 = vst [vmem:[#allocation25_spill] sm:$0xff] %v10290_v10  ;;  %14495 = vst [vmem:[#allocation26_spill] sm:$0xff] %v10292_v14  ;;  %v10294_v13 = vpop.f32.mrb[37].mxu0  ;;  %7867 = vmatmul.mubr.f32.gmra.mrb[142].mxu0 %v173_v20  ;;  %v10296_v30 = vpop.f32.mrb[37].mxu1  ;;  %8193 = vmatmul.mubr.f32.gmra.mrb[142].mxu1 %v6327_v59  ;;  %v176_v59 = vld [vmem:[%s14125_s0 + $0x490] sm:$0xff] }
 0x141   :  { %14496 = vst [vmem:[#allocation27_spill] sm:$0xff] %v10294_v13  ;;  %14497 = vst [vmem:[#allocation28_spill] sm:$0xff] %v10296_v30  ;;  %7869 = vmatprep.mubr.f32.mxu0 %v174_v54  ;;  %8195 = vmatprep.mubr.f32.mxu1 %v6328_v40  ;;  %v6330_v20 = vld [vmem:[%s14125_s0 + $0xab0] sm:$0xff]  ;;  %v177_v30 = vld [vmem:[%s14125_s0 + $0x498] sm:$0xff] }
 0x142   :  { %v6331_v13 = vld [vmem:[%s14125_s0 + $0xab8] sm:$0xff] }
 0x143   :  { %v10314_v54 = vpop.f32.mrb[38].mxu0  ;;  %v10316_v40 = vpop.f32.mrb[38].mxu1 }
 0x144   :  { %14498 = vst [vmem:[#allocation29_spill] sm:$0xff] %v10314_v54  ;;  %14499 = vst [vmem:[#allocation30_spill] sm:$0xff] %v10316_v40  ;;  %v10318_v57 = vpop.f32.mrb[39].mxu0  ;;  %7870 = vmatmul.mubr.f32.gmra.mrb[144].mxu0 %v175_v0  ;;  %v10320_v14 = vpop.f32.mrb[39].mxu1  ;;  %8196 = vmatmul.mubr.f32.gmra.mrb[144].mxu1 %v6329_v33  ;;  %v178_v33 = vld [vmem:[%s14125_s0 + $0x4a0] sm:$0xff] }
 0x145   :  { %14500 = vst [vmem:[#allocation31_spill] sm:$0xff] %v10318_v57  ;;  %14501 = vst [vmem:[#allocation32_spill] sm:$0xff] %v10320_v14  ;;  %7872 = vmatprep.mubr.f32.mxu0 %v176_v59  ;;  %8198 = vmatprep.mubr.f32.mxu1 %v6330_v20  ;;  %v6332_v0 = vld [vmem:[%s14125_s0 + $0xac0] sm:$0xff]  ;;  %v179_v14 = vld [vmem:[%s14125_s0 + $0x4a8] sm:$0xff] }
 0x146   :  { %v6333_v57 = vld [vmem:[%s14125_s0 + $0xac8] sm:$0xff] }
 0x147   :  { %v10338_v59 = vpop.f32.mrb[40].mxu0  ;;  %v10340_v20 = vpop.f32.mrb[40].mxu1 }
 0x148   :  { %14502 = vst [vmem:[#allocation33_spill] sm:$0xff] %v10338_v59  ;;  %14503 = vst [vmem:[#allocation34_spill] sm:$0xff] %v10340_v20  ;;  %v10342_v3 = vpop.f32.mrb[41].mxu0  ;;  %7873 = vmatmul.mubr.f32.gmra.mrb[146].mxu0 %v177_v30  ;;  %v10344_v40 = vpop.f32.mrb[41].mxu1  ;;  %8199 = vmatmul.mubr.f32.gmra.mrb[146].mxu1 %v6331_v13  ;;  %v180_v13 = vld [vmem:[%s14125_s0 + $0x4b0] sm:$0xff] }
 0x149   :  { %14504 = vst [vmem:[#allocation35_spill] sm:$0xff] %v10342_v3  ;;  %14505 = vst [vmem:[#allocation36_spill] sm:$0xff] %v10344_v40  ;;  %7875 = vmatprep.mubr.f32.mxu0 %v178_v33  ;;  %8201 = vmatprep.mubr.f32.mxu1 %v6332_v0  ;;  %v6334_v30 = vld [vmem:[%s14125_s0 + $0xad0] sm:$0xff]  ;;  %v181_v40 = vld [vmem:[%s14125_s0 + $0x4b8] sm:$0xff] }
 0x14a   :  { %v6335_v3 = vld [vmem:[%s14125_s0 + $0xad8] sm:$0xff] }
 0x14b   :  { %v10362_v33 = vpop.f32.mrb[42].mxu0  ;;  %v10364_v0 = vpop.f32.mrb[42].mxu1 }
 0x14c   :  { %14506 = vst [vmem:[#allocation37_spill] sm:$0xff] %v10362_v33  ;;  %14507 = vst [vmem:[#allocation38_spill] sm:$0xff] %v10364_v0  ;;  %v10366_v10 = vpop.f32.mrb[43].mxu0  ;;  %7876 = vmatmul.mubr.f32.gmra.mrb[148].mxu0 %v179_v14  ;;  %v10368_v20 = vpop.f32.mrb[43].mxu1  ;;  %8202 = vmatmul.mubr.f32.gmra.mrb[148].mxu1 %v6333_v57  ;;  %v182_v57 = vld [vmem:[%s14125_s0 + $0x4c0] sm:$0xff] }
 0x14d   :  { %14508 = vst [vmem:[#allocation39_spill] sm:$0xff] %v10366_v10  ;;  %14509 = vst [vmem:[#allocation40_spill] sm:$0xff] %v10368_v20  ;;  %7878 = vmatprep.mubr.f32.mxu0 %v180_v13  ;;  %8204 = vmatprep.mubr.f32.mxu1 %v6334_v30  ;;  %v6336_v14 = vld [vmem:[%s14125_s0 + $0xae0] sm:$0xff]  ;;  %v183_v20 = vld [vmem:[%s14125_s0 + $0x4c8] sm:$0xff] }
 0x14e   :  { %v6337_v10 = vld [vmem:[%s14125_s0 + $0xae8] sm:$0xff] }
 0x14f   :  { %v10386_v13 = vpop.f32.mrb[44].mxu0  ;;  %v10388_v30 = vpop.f32.mrb[44].mxu1 }
 0x150   :  { %14510 = vst [vmem:[#allocation41_spill] sm:$0xff] %v10386_v13  ;;  %14511 = vst [vmem:[#allocation42_spill] sm:$0xff] %v10388_v30  ;;  %v10390_v54 = vpop.f32.mrb[45].mxu0  ;;  %7879 = vmatmul.mubr.f32.gmra.mrb[150].mxu0 %v181_v40  ;;  %v10392_v0 = vpop.f32.mrb[45].mxu1  ;;  %8205 = vmatmul.mubr.f32.gmra.mrb[150].mxu1 %v6335_v3  ;;  %v184_v3 = vld [vmem:[%s14125_s0 + $0x4d0] sm:$0xff] }
 0x151   :  { %14512 = vst [vmem:[#allocation43_spill] sm:$0xff] %v10390_v54  ;;  %14513 = vst [vmem:[#allocation44_spill] sm:$0xff] %v10392_v0  ;;  %7881 = vmatprep.mubr.f32.mxu0 %v182_v57  ;;  %8207 = vmatprep.mubr.f32.mxu1 %v6336_v14  ;;  %v6338_v40 = vld [vmem:[%s14125_s0 + $0xaf0] sm:$0xff]  ;;  %v185_v0 = vld [vmem:[%s14125_s0 + $0x4d8] sm:$0xff] }
 0x152   :  { %v6339_v54 = vld [vmem:[%s14125_s0 + $0xaf8] sm:$0xff] }
 0x153   :  { %v10410_v57 = vpop.f32.mrb[46].mxu0  ;;  %v10412_v14 = vpop.f32.mrb[46].mxu1 }
 0x154   :  { %14514 = vst [vmem:[#allocation45_spill] sm:$0xff] %v10410_v57  ;;  %14515 = vst [vmem:[#allocation46_spill] sm:$0xff] %v10412_v14  ;;  %v10414_v59 = vpop.f32.mrb[47].mxu0  ;;  %7882 = vmatmul.mubr.f32.gmra.mrb[152].mxu0 %v183_v20  ;;  %v10416_v30 = vpop.f32.mrb[47].mxu1  ;;  %8208 = vmatmul.mubr.f32.gmra.mrb[152].mxu1 %v6337_v10  ;;  %v186_v10 = vld [vmem:[%s14125_s0 + $0x4e0] sm:$0xff] }
 0x155   :  { %14516 = vst [vmem:[#allocation47_spill] sm:$0xff] %v10414_v59  ;;  %14517 = vst [vmem:[#allocation48_spill] sm:$0xff] %v10416_v30  ;;  %7884 = vmatprep.mubr.f32.mxu0 %v184_v3  ;;  %8210 = vmatprep.mubr.f32.mxu1 %v6338_v40  ;;  %v6340_v20 = vld [vmem:[%s14125_s0 + $0xb00] sm:$0xff]  ;;  %v187_v30 = vld [vmem:[%s14125_s0 + $0x4e8] sm:$0xff] }
 0x156   :  { %v6341_v59 = vld [vmem:[%s14125_s0 + $0xb08] sm:$0xff] }
 0x157   :  { %v10434_v3 = vpop.f32.mrb[48].mxu0  ;;  %v10436_v40 = vpop.f32.mrb[48].mxu1 }
 0x158   :  { %14518 = vst [vmem:[#allocation49_spill] sm:$0xff] %v10434_v3  ;;  %14519 = vst [vmem:[#allocation50_spill] sm:$0xff] %v10436_v40  ;;  %v10438_v33 = vpop.f32.mrb[49].mxu0  ;;  %7885 = vmatmul.mubr.f32.gmra.mrb[154].mxu0 %v185_v0  ;;  %v10440_v14 = vpop.f32.mrb[49].mxu1  ;;  %8211 = vmatmul.mubr.f32.gmra.mrb[154].mxu1 %v6339_v54  ;;  %v188_v54 = vld [vmem:[%s14125_s0 + $0x4f0] sm:$0xff] }
 0x159   :  { %14520 = vst [vmem:[#allocation51_spill] sm:$0xff] %v10438_v33  ;;  %14521 = vst [vmem:[#allocation52_spill] sm:$0xff] %v10440_v14  ;;  %7887 = vmatprep.mubr.f32.mxu0 %v186_v10  ;;  %8213 = vmatprep.mubr.f32.mxu1 %v6340_v20  ;;  %v6342_v0 = vld [vmem:[%s14125_s0 + $0xb10] sm:$0xff]  ;;  %v189_v14 = vld [vmem:[%s14125_s0 + $0x4f8] sm:$0xff] }
 0x15a   :  { %v6343_v33 = vld [vmem:[%s14125_s0 + $0xb18] sm:$0xff] }
 0x15b   :  { %v10458_v10 = vpop.f32.mrb[50].mxu0  ;;  %v10460_v20 = vpop.f32.mrb[50].mxu1 }
 0x15c   :  { %14522 = vst [vmem:[#allocation53_spill] sm:$0xff] %v10458_v10  ;;  %14523 = vst [vmem:[#allocation54_spill] sm:$0xff] %v10460_v20  ;;  %v10462_v13 = vpop.f32.mrb[51].mxu0  ;;  %7888 = vmatmul.mubr.f32.gmra.mrb[156].mxu0 %v187_v30  ;;  %v10464_v40 = vpop.f32.mrb[51].mxu1  ;;  %8214 = vmatmul.mubr.f32.gmra.mrb[156].mxu1 %v6341_v59  ;;  %v190_v59 = vld [vmem:[%s14125_s0 + $0x500] sm:$0xff] }
 0x15d   :  { %14524 = vst [vmem:[#allocation55_spill] sm:$0xff] %v10462_v13  ;;  %14525 = vst [vmem:[#allocation56_spill] sm:$0xff] %v10464_v40  ;;  %7890 = vmatprep.mubr.f32.mxu0 %v188_v54  ;;  %8216 = vmatprep.mubr.f32.mxu1 %v6342_v0  ;;  %v6344_v30 = vld [vmem:[%s14125_s0 + $0xb20] sm:$0xff]  ;;  %v191_v40 = vld [vmem:[%s14125_s0 + $0x508] sm:$0xff] }
 0x15e   :  { %v6345_v13 = vld [vmem:[%s14125_s0 + $0xb28] sm:$0xff] }
 0x15f   :  { %v10482_v54 = vpop.f32.mrb[52].mxu0  ;;  %v10484_v0 = vpop.f32.mrb[52].mxu1 }
 0x160   :  { %14526 = vst [vmem:[#allocation57_spill] sm:$0xff] %v10482_v54  ;;  %14527 = vst [vmem:[#allocation58_spill] sm:$0xff] %v10484_v0  ;;  %v10486_v57 = vpop.f32.mrb[53].mxu0  ;;  %7891 = vmatmul.mubr.f32.gmra.mrb[158].mxu0 %v189_v14  ;;  %v10488_v20 = vpop.f32.mrb[53].mxu1  ;;  %8217 = vmatmul.mubr.f32.gmra.mrb[158].mxu1 %v6343_v33  ;;  %v192_v33 = vld [vmem:[%s14125_s0 + $0x510] sm:$0xff] }
 0x161   :  { %14528 = vst [vmem:[#allocation59_spill] sm:$0xff] %v10486_v57  ;;  %14529 = vst [vmem:[#allocation60_spill] sm:$0xff] %v10488_v20  ;;  %7893 = vmatprep.mubr.f32.mxu0 %v190_v59  ;;  %8219 = vmatprep.mubr.f32.mxu1 %v6344_v30  ;;  %v6346_v14 = vld [vmem:[%s14125_s0 + $0xb30] sm:$0xff]  ;;  %v193_v20 = vld [vmem:[%s14125_s0 + $0x518] sm:$0xff] }
 0x162   :  { %v6347_v57 = vld [vmem:[%s14125_s0 + $0xb38] sm:$0xff] }
 0x163   :  { %v10506_v59 = vpop.f32.mrb[54].mxu0  ;;  %v10508_v30 = vpop.f32.mrb[54].mxu1 }
 0x164   :  { %14530 = vst [vmem:[#allocation61_spill] sm:$0xff] %v10506_v59  ;;  %14531 = vst [vmem:[#allocation62_spill] sm:$0xff] %v10508_v30  ;;  %v10510_v3 = vpop.f32.mrb[55].mxu0  ;;  %7894 = vmatmul.mubr.f32.gmra.mrb[160].mxu0 %v191_v40  ;;  %v10512_v0 = vpop.f32.mrb[55].mxu1  ;;  %8220 = vmatmul.mubr.f32.gmra.mrb[160].mxu1 %v6345_v13  ;;  %v194_v13 = vld [vmem:[%s14125_s0 + $0x520] sm:$0xff] }
 0x165   :  { %14532 = vst [vmem:[#allocation63_spill] sm:$0xff] %v10510_v3  ;;  %14533 = vst [vmem:[#allocation64_spill] sm:$0xff] %v10512_v0  ;;  %7896 = vmatprep.mubr.f32.mxu0 %v192_v33  ;;  %8222 = vmatprep.mubr.f32.mxu1 %v6346_v14  ;;  %v6348_v40 = vld [vmem:[%s14125_s0 + $0xb40] sm:$0xff]  ;;  %v195_v0 = vld [vmem:[%s14125_s0 + $0x528] sm:$0xff] }
 0x166   :  { %v6349_v3 = vld [vmem:[%s14125_s0 + $0xb48] sm:$0xff] }
 0x167   :  { %v10530_v33 = vpop.f32.mrb[56].mxu0  ;;  %v10532_v14 = vpop.f32.mrb[56].mxu1 }
 0x168   :  { %14534 = vst [vmem:[#allocation65_spill] sm:$0xff] %v10530_v33  ;;  %14535 = vst [vmem:[#allocation66_spill] sm:$0xff] %v10532_v14  ;;  %v10534_v10 = vpop.f32.mrb[57].mxu0  ;;  %7897 = vmatmul.mubr.f32.gmra.mrb[162].mxu0 %v193_v20  ;;  %v10536_v30 = vpop.f32.mrb[57].mxu1  ;;  %8223 = vmatmul.mubr.f32.gmra.mrb[162].mxu1 %v6347_v57  ;;  %v196_v57 = vld [vmem:[%s14125_s0 + $0x530] sm:$0xff] }
 0x169   :  { %14536 = vst [vmem:[#allocation67_spill] sm:$0xff] %v10534_v10  ;;  %14537 = vst [vmem:[#allocation68_spill] sm:$0xff] %v10536_v30  ;;  %7899 = vmatprep.mubr.f32.mxu0 %v194_v13  ;;  %8225 = vmatprep.mubr.f32.mxu1 %v6348_v40  ;;  %v6350_v20 = vld [vmem:[%s14125_s0 + $0xb50] sm:$0xff]  ;;  %v197_v30 = vld [vmem:[%s14125_s0 + $0x538] sm:$0xff] }
 0x16a   :  { %v6351_v10 = vld [vmem:[%s14125_s0 + $0xb58] sm:$0xff] }
 0x16b   :  { %v10554_v13 = vpop.f32.mrb[58].mxu0  ;;  %v10556_v40 = vpop.f32.mrb[58].mxu1 }
 0x16c   :  { %14538 = vst [vmem:[#allocation69_spill] sm:$0xff] %v10554_v13  ;;  %14539 = vst [vmem:[#allocation70_spill] sm:$0xff] %v10556_v40  ;;  %v10558_v54 = vpop.f32.mrb[59].mxu0  ;;  %7900 = vmatmul.mubr.f32.gmra.mrb[164].mxu0 %v195_v0  ;;  %v10560_v14 = vpop.f32.mrb[59].mxu1  ;;  %8226 = vmatmul.mubr.f32.gmra.mrb[164].mxu1 %v6349_v3  ;;  %v198_v3 = vld [vmem:[%s14125_s0 + $0x540] sm:$0xff] }
 0x16d   :  { %14540 = vst [vmem:[#allocation71_spill] sm:$0xff] %v10558_v54  ;;  %14541 = vst [vmem:[#allocation72_spill] sm:$0xff] %v10560_v14  ;;  %7902 = vmatprep.mubr.f32.mxu0 %v196_v57  ;;  %8228 = vmatprep.mubr.f32.mxu1 %v6350_v20  ;;  %v6352_v0 = vld [vmem:[%s14125_s0 + $0xb60] sm:$0xff]  ;;  %v199_v14 = vld [vmem:[%s14125_s0 + $0x548] sm:$0xff] }
 0x16e   :  { %v6353_v54 = vld [vmem:[%s14125_s0 + $0xb68] sm:$0xff] }
 0x16f   :  { %v10578_v57 = vpop.f32.mrb[60].mxu0  ;;  %v10580_v20 = vpop.f32.mrb[60].mxu1 }
 0x170   :  { %14542 = vst [vmem:[#allocation73_spill] sm:$0xff] %v10578_v57  ;;  %14543 = vst [vmem:[#allocation74_spill] sm:$0xff] %v10580_v20  ;;  %v10582_v59 = vpop.f32.mrb[61].mxu0  ;;  %7903 = vmatmul.mubr.f32.gmra.mrb[166].mxu0 %v197_v30  ;;  %v10584_v40 = vpop.f32.mrb[61].mxu1  ;;  %8229 = vmatmul.mubr.f32.gmra.mrb[166].mxu1 %v6351_v10  ;;  %v200_v10 = vld [vmem:[%s14125_s0 + $0x550] sm:$0xff] }
 0x171   :  { %14544 = vst [vmem:[#allocation75_spill] sm:$0xff] %v10582_v59  ;;  %14545 = vst [vmem:[#allocation76_spill] sm:$0xff] %v10584_v40  ;;  %7905 = vmatprep.mubr.f32.mxu0 %v198_v3  ;;  %8231 = vmatprep.mubr.f32.mxu1 %v6352_v0  ;;  %v6354_v30 = vld [vmem:[%s14125_s0 + $0xb70] sm:$0xff]  ;;  %v201_v40 = vld [vmem:[%s14125_s0 + $0x558] sm:$0xff] }
 0x172   :  { %v6355_v59 = vld [vmem:[%s14125_s0 + $0xb78] sm:$0xff] }
 0x173   :  { %v10602_v3 = vpop.f32.mrb[62].mxu0  ;;  %v10604_v0 = vpop.f32.mrb[62].mxu1 }
 0x174   :  { %14546 = vst [vmem:[#allocation77_spill] sm:$0xff] %v10602_v3  ;;  %14547 = vst [vmem:[#allocation78_spill] sm:$0xff] %v10604_v0  ;;  %v10606_v33 = vpop.f32.mrb[63].mxu0  ;;  %7906 = vmatmul.mubr.f32.gmra.mrb[168].mxu0 %v199_v14  ;;  %v10608_v20 = vpop.f32.mrb[63].mxu1  ;;  %8232 = vmatmul.mubr.f32.gmra.mrb[168].mxu1 %v6353_v54  ;;  %v202_v54 = vld [vmem:[%s14125_s0 + $0x560] sm:$0xff] }
 0x175   :  { %14548 = vst [vmem:[#allocation79_spill] sm:$0xff] %v10606_v33  ;;  %14549 = vst [vmem:[#allocation80_spill] sm:$0xff] %v10608_v20  ;;  %7908 = vmatprep.mubr.f32.mxu0 %v200_v10  ;;  %8234 = vmatprep.mubr.f32.mxu1 %v6354_v30  ;;  %v6356_v14 = vld [vmem:[%s14125_s0 + $0xb80] sm:$0xff]  ;;  %v203_v20 = vld [vmem:[%s14125_s0 + $0x568] sm:$0xff] }
 0x176   :  { %v6357_v33 = vld [vmem:[%s14125_s0 + $0xb88] sm:$0xff] }
 0x177   :  { %v10626_v10 = vpop.f32.mrb[64].mxu0  ;;  %v10628_v30 = vpop.f32.mrb[64].mxu1 }
 0x178   :  { %14550 = vst [vmem:[#allocation81_spill] sm:$0xff] %v10626_v10  ;;  %14551 = vst [vmem:[#allocation82_spill] sm:$0xff] %v10628_v30  ;;  %v10630_v13 = vpop.f32.mrb[65].mxu0  ;;  %7909 = vmatmul.mubr.f32.gmra.mrb[170].mxu0 %v201_v40  ;;  %v10632_v0 = vpop.f32.mrb[65].mxu1  ;;  %8235 = vmatmul.mubr.f32.gmra.mrb[170].mxu1 %v6355_v59  ;;  %v204_v59 = vld [vmem:[%s14125_s0 + $0x570] sm:$0xff] }
 0x179   :  { %14552 = vst [vmem:[#allocation83_spill] sm:$0xff] %v10630_v13  ;;  %14553 = vst [vmem:[#allocation84_spill] sm:$0xff] %v10632_v0  ;;  %7911 = vmatprep.mubr.f32.mxu0 %v202_v54  ;;  %8237 = vmatprep.mubr.f32.mxu1 %v6356_v14  ;;  %v6358_v40 = vld [vmem:[%s14125_s0 + $0xb90] sm:$0xff]  ;;  %v205_v0 = vld [vmem:[%s14125_s0 + $0x578] sm:$0xff] }
 0x17a   :  { %v6359_v13 = vld [vmem:[%s14125_s0 + $0xb98] sm:$0xff] }
 0x17b   :  { %v10650_v54 = vpop.f32.mrb[66].mxu0  ;;  %v10652_v14 = vpop.f32.mrb[66].mxu1 }
 0x17c   :  { %14554 = vst [vmem:[#allocation85_spill] sm:$0xff] %v10650_v54  ;;  %14555 = vst [vmem:[#allocation86_spill] sm:$0xff] %v10652_v14  ;;  %v10654_v57 = vpop.f32.mrb[67].mxu0  ;;  %7912 = vmatmul.mubr.f32.gmra.mrb[172].mxu0 %v203_v20  ;;  %v10656_v30 = vpop.f32.mrb[67].mxu1  ;;  %8238 = vmatmul.mubr.f32.gmra.mrb[172].mxu1 %v6357_v33  ;;  %v206_v33 = vld [vmem:[%s14125_s0 + $0x580] sm:$0xff] }
 0x17d   :  { %14556 = vst [vmem:[#allocation87_spill] sm:$0xff] %v10654_v57  ;;  %14557 = vst [vmem:[#allocation88_spill] sm:$0xff] %v10656_v30  ;;  %7914 = vmatprep.mubr.f32.mxu0 %v204_v59  ;;  %8240 = vmatprep.mubr.f32.mxu1 %v6358_v40  ;;  %v6360_v20 = vld [vmem:[%s14125_s0 + $0xba0] sm:$0xff]  ;;  %v207_v30 = vld [vmem:[%s14125_s0 + $0x588] sm:$0xff] }
 0x17e   :  { %v6361_v57 = vld [vmem:[%s14125_s0 + $0xba8] sm:$0xff] }
 0x17f   :  { %v10674_v59 = vpop.f32.mrb[68].mxu0  ;;  %v10676_v40 = vpop.f32.mrb[68].mxu1 }
 0x180   :  { %14558 = vst [vmem:[#allocation89_spill] sm:$0xff] %v10674_v59  ;;  %14559 = vst [vmem:[#allocation90_spill] sm:$0xff] %v10676_v40  ;;  %v10678_v3 = vpop.f32.mrb[69].mxu0  ;;  %7915 = vmatmul.mubr.f32.gmra.mrb[174].mxu0 %v205_v0  ;;  %v10680_v14 = vpop.f32.mrb[69].mxu1  ;;  %8241 = vmatmul.mubr.f32.gmra.mrb[174].mxu1 %v6359_v13  ;;  %v208_v13 = vld [vmem:[%s14125_s0 + $0x590] sm:$0xff] }
 0x181   :  { %14560 = vst [vmem:[#allocation91_spill] sm:$0xff] %v10678_v3  ;;  %14561 = vst [vmem:[#allocation92_spill] sm:$0xff] %v10680_v14  ;;  %7917 = vmatprep.mubr.f32.mxu0 %v206_v33  ;;  %8243 = vmatprep.mubr.f32.mxu1 %v6360_v20  ;;  %v6362_v0 = vld [vmem:[%s14125_s0 + $0xbb0] sm:$0xff]  ;;  %v209_v14 = vld [vmem:[%s14125_s0 + $0x598] sm:$0xff] }
 0x182   :  { %v6363_v3 = vld [vmem:[%s14125_s0 + $0xbb8] sm:$0xff] }
 0x183   :  { %v10698_v33 = vpop.f32.mrb[70].mxu0  ;;  %v10700_v20 = vpop.f32.mrb[70].mxu1 }
 0x184   :  { %14562 = vst [vmem:[#allocation93_spill] sm:$0xff] %v10698_v33  ;;  %14563 = vst [vmem:[#allocation94_spill] sm:$0xff] %v10700_v20  ;;  %v10702_v10 = vpop.f32.mrb[71].mxu0  ;;  %7918 = vmatmul.mubr.f32.gmra.mrb[176].mxu0 %v207_v30  ;;  %v10704_v40 = vpop.f32.mrb[71].mxu1  ;;  %8244 = vmatmul.mubr.f32.gmra.mrb[176].mxu1 %v6361_v57  ;;  %v210_v57 = vld [vmem:[%s14125_s0 + $0x5a0] sm:$0xff] }
 0x185   :  { %14564 = vst [vmem:[#allocation95_spill] sm:$0xff] %v10702_v10  ;;  %14565 = vst [vmem:[#allocation96_spill] sm:$0xff] %v10704_v40  ;;  %7920 = vmatprep.mubr.f32.mxu0 %v208_v13  ;;  %8246 = vmatprep.mubr.f32.mxu1 %v6362_v0  ;;  %v6364_v30 = vld [vmem:[%s14125_s0 + $0xbc0] sm:$0xff]  ;;  %v211_v40 = vld [vmem:[%s14125_s0 + $0x5a8] sm:$0xff] }
 0x186   :  { %v6365_v10 = vld [vmem:[%s14125_s0 + $0xbc8] sm:$0xff] }
 0x187   :  { %v10722_v13 = vpop.f32.mrb[72].mxu0  ;;  %v10724_v0 = vpop.f32.mrb[72].mxu1 }
 0x188   :  { %14566 = vst [vmem:[#allocation97_spill] sm:$0xff] %v10722_v13  ;;  %14567 = vst [vmem:[#allocation98_spill] sm:$0xff] %v10724_v0  ;;  %v10726_v54 = vpop.f32.mrb[73].mxu0  ;;  %7921 = vmatmul.mubr.f32.gmra.mrb[178].mxu0 %v209_v14  ;;  %v10728_v20 = vpop.f32.mrb[73].mxu1  ;;  %8247 = vmatmul.mubr.f32.gmra.mrb[178].mxu1 %v6363_v3  ;;  %v212_v3 = vld [vmem:[%s14125_s0 + $0x5b0] sm:$0xff] }
 0x189   :  { %14568 = vst [vmem:[#allocation99_spill] sm:$0xff] %v10726_v54  ;;  %14569 = vst [vmem:[#allocation100_spill] sm:$0xff] %v10728_v20  ;;  %7923 = vmatprep.mubr.f32.mxu0 %v210_v57  ;;  %8249 = vmatprep.mubr.f32.mxu1 %v6364_v30  ;;  %v6366_v14 = vld [vmem:[%s14125_s0 + $0xbd0] sm:$0xff]  ;;  %v213_v20 = vld [vmem:[%s14125_s0 + $0x5b8] sm:$0xff] }
 0x18a   :  { %v6367_v54 = vld [vmem:[%s14125_s0 + $0xbd8] sm:$0xff] }
 0x18b   :  { %v10746_v57 = vpop.f32.mrb[74].mxu0  ;;  %v10748_v30 = vpop.f32.mrb[74].mxu1 }
 0x18c   :  { %14570 = vst [vmem:[#allocation101_spill] sm:$0xff] %v10746_v57  ;;  %14571 = vst [vmem:[#allocation102_spill] sm:$0xff] %v10748_v30  ;;  %v10750_v59 = vpop.f32.mrb[75].mxu0  ;;  %7924 = vmatmul.mubr.f32.gmra.mrb[180].mxu0 %v211_v40  ;;  %v10752_v0 = vpop.f32.mrb[75].mxu1  ;;  %8250 = vmatmul.mubr.f32.gmra.mrb[180].mxu1 %v6365_v10  ;;  %v214_v10 = vld [vmem:[%s14125_s0 + $0x5c0] sm:$0xff] }
 0x18d   :  { %14572 = vst [vmem:[#allocation103_spill] sm:$0xff] %v10750_v59  ;;  %14573 = vst [vmem:[#allocation104_spill] sm:$0xff] %v10752_v0  ;;  %7926 = vmatprep.mubr.f32.mxu0 %v212_v3  ;;  %8252 = vmatprep.mubr.f32.mxu1 %v6366_v14  ;;  %v6368_v40 = vld [vmem:[%s14125_s0 + $0xbe0] sm:$0xff]  ;;  %v215_v0 = vld [vmem:[%s14125_s0 + $0x5c8] sm:$0xff] }
 0x18e   :  { %v6369_v59 = vld [vmem:[%s14125_s0 + $0xbe8] sm:$0xff] }
 0x18f   :  { %v10770_v3 = vpop.f32.mrb[76].mxu0  ;;  %v10772_v14 = vpop.f32.mrb[76].mxu1 }
 0x190   :  { %14574 = vst [vmem:[#allocation105_spill] sm:$0xff] %v10770_v3  ;;  %14575 = vst [vmem:[#allocation106_spill] sm:$0xff] %v10772_v14  ;;  %v10774_v33 = vpop.f32.mrb[77].mxu0  ;;  %7927 = vmatmul.mubr.f32.gmra.mrb[182].mxu0 %v213_v20  ;;  %v10776_v30 = vpop.f32.mrb[77].mxu1  ;;  %8253 = vmatmul.mubr.f32.gmra.mrb[182].mxu1 %v6367_v54  ;;  %v216_v54 = vld [vmem:[%s14125_s0 + $0x5d0] sm:$0xff] }
 0x191   :  { %14576 = vst [vmem:[#allocation107_spill] sm:$0xff] %v10774_v33  ;;  %14577 = vst [vmem:[#allocation108_spill] sm:$0xff] %v10776_v30  ;;  %7929 = vmatprep.mubr.f32.mxu0 %v214_v10  ;;  %8255 = vmatprep.mubr.f32.mxu1 %v6368_v40  ;;  %v6370_v20 = vld [vmem:[%s14125_s0 + $0xbf0] sm:$0xff]  ;;  %v217_v30 = vld [vmem:[%s14125_s0 + $0x5d8] sm:$0xff] }
 0x192   :  { %v6371_v33 = vld [vmem:[%s14125_s0 + $0xbf8] sm:$0xff] }
 0x193   :  { %v10794_v10 = vpop.f32.mrb[78].mxu0  ;;  %v10796_v40 = vpop.f32.mrb[78].mxu1 }
 0x194   :  { %14578 = vst [vmem:[#allocation109_spill] sm:$0xff] %v10794_v10  ;;  %14579 = vst [vmem:[#allocation110_spill] sm:$0xff] %v10796_v40  ;;  %v10798_v13 = vpop.f32.mrb[79].mxu0  ;;  %7930 = vmatmul.mubr.f32.gmra.mrb[184].mxu0 %v215_v0  ;;  %v10800_v14 = vpop.f32.mrb[79].mxu1  ;;  %8256 = vmatmul.mubr.f32.gmra.mrb[184].mxu1 %v6369_v59  ;;  %v218_v59 = vld [vmem:[%s14125_s0 + $0x5e0] sm:$0xff] }
 0x195   :  { %14580 = vst [vmem:[#allocation111_spill] sm:$0xff] %v10798_v13  ;;  %14581 = vst [vmem:[#allocation112_spill] sm:$0xff] %v10800_v14  ;;  %7932 = vmatprep.mubr.f32.mxu0 %v216_v54  ;;  %8258 = vmatprep.mubr.f32.mxu1 %v6370_v20  ;;  %v6372_v0 = vld [vmem:[%s14125_s0 + $0xc00] sm:$0xff]  ;;  %v219_v14 = vld [vmem:[%s14125_s0 + $0x5e8] sm:$0xff] }
 0x196   :  { %v6373_v13 = vld [vmem:[%s14125_s0 + $0xc08] sm:$0xff] }
 0x197   :  { %v10818_v54 = vpop.f32.mrb[80].mxu0  ;;  %v10820_v20 = vpop.f32.mrb[80].mxu1 }
 0x198   :  { %14582 = vst [vmem:[#allocation113_spill] sm:$0xff] %v10818_v54  ;;  %14583 = vst [vmem:[#allocation114_spill] sm:$0xff] %v10820_v20  ;;  %v10822_v57 = vpop.f32.mrb[81].mxu0  ;;  %7933 = vmatmul.mubr.f32.gmra.mrb[186].mxu0 %v217_v30  ;;  %v10824_v40 = vpop.f32.mrb[81].mxu1  ;;  %8259 = vmatmul.mubr.f32.gmra.mrb[186].mxu1 %v6371_v33  ;;  %v220_v33 = vld [vmem:[%s14125_s0 + $0x5f0] sm:$0xff] }
 0x199   :  { %14584 = vst [vmem:[#allocation115_spill] sm:$0xff] %v10822_v57  ;;  %14585 = vst [vmem:[#allocation116_spill] sm:$0xff] %v10824_v40  ;;  %7935 = vmatprep.mubr.f32.mxu0 %v218_v59  ;;  %8261 = vmatprep.mubr.f32.mxu1 %v6372_v0  ;;  %v6374_v30 = vld [vmem:[%s14125_s0 + $0xc10] sm:$0xff]  ;;  %v221_v40 = vld [vmem:[%s14125_s0 + $0x5f8] sm:$0xff] }
 0x19a   :  { %v6375_v57 = vld [vmem:[%s14125_s0 + $0xc18] sm:$0xff] }
 0x19b   :  { %v10842_v59 = vpop.f32.mrb[82].mxu0  ;;  %v10844_v0 = vpop.f32.mrb[82].mxu1 }
 0x19c   :  { %14586 = vst [vmem:[#allocation117_spill] sm:$0xff] %v10842_v59  ;;  %14587 = vst [vmem:[#allocation118_spill] sm:$0xff] %v10844_v0  ;;  %v10846_v3 = vpop.f32.mrb[83].mxu0  ;;  %7936 = vmatmul.mubr.f32.gmra.mrb[188].mxu0 %v219_v14  ;;  %v10848_v20 = vpop.f32.mrb[83].mxu1  ;;  %8262 = vmatmul.mubr.f32.gmra.mrb[188].mxu1 %v6373_v13  ;;  %v222_v13 = vld [vmem:[%s14125_s0 + $0x600] sm:$0xff] }
 0x19d   :  { %14588 = vst [vmem:[#allocation119_spill] sm:$0xff] %v10846_v3  ;;  %14589 = vst [vmem:[#allocation120_spill] sm:$0xff] %v10848_v20  ;;  %7938 = vmatprep.mubr.f32.mxu0 %v220_v33  ;;  %8264 = vmatprep.mubr.f32.mxu1 %v6374_v30  ;;  %v6376_v14 = vld [vmem:[%s14125_s0 + $0xc20] sm:$0xff]  ;;  %v223_v20 = vld [vmem:[%s14125_s0 + $0x608] sm:$0xff] }
 0x19e   :  { %v6377_v3 = vld [vmem:[%s14125_s0 + $0xc28] sm:$0xff] }
 0x19f   :  { %v10866_v33 = vpop.f32.mrb[84].mxu0  ;;  %v10868_v30 = vpop.f32.mrb[84].mxu1 }
 0x1a0   :  { %14590 = vst [vmem:[#allocation121_spill] sm:$0xff] %v10866_v33  ;;  %14591 = vst [vmem:[#allocation122_spill] sm:$0xff] %v10868_v30  ;;  %v10870_v10 = vpop.f32.mrb[85].mxu0  ;;  %7939 = vmatmul.mubr.f32.gmra.mrb[190].mxu0 %v221_v40  ;;  %v10872_v0 = vpop.f32.mrb[85].mxu1  ;;  %8265 = vmatmul.mubr.f32.gmra.mrb[190].mxu1 %v6375_v57  ;;  %v224_v57 = vld [vmem:[%s14125_s0 + $0x610] sm:$0xff] }
 0x1a1   :  { %14592 = vst [vmem:[#allocation123_spill] sm:$0xff] %v10870_v10  ;;  %14593 = vst [vmem:[#allocation124_spill] sm:$0xff] %v10872_v0  ;;  %7941 = vmatprep.mubr.f32.mxu0 %v222_v13  ;;  %8267 = vmatprep.mubr.f32.mxu1 %v6376_v14  ;;  %v6378_v40 = vld [vmem:[%s14125_s0 + $0xc30] sm:$0xff]  ;;  %v225_v0 = vld [vmem:[%s14125_s0 + $0x618] sm:$0xff] }
 0x1a2   :  { %v6379_v10 = vld [vmem:[%s14125_s0 + $0xc38] sm:$0xff] }
 0x1a3   :  { %v10890_v13 = vpop.f32.mrb[86].mxu0  ;;  %v10892_v14 = vpop.f32.mrb[86].mxu1 }
 0x1a4   :  { %14594 = vst [vmem:[#allocation125_spill] sm:$0xff] %v10890_v13  ;;  %14595 = vst [vmem:[#allocation126_spill] sm:$0xff] %v10892_v14  ;;  %v10894_v54 = vpop.f32.mrb[87].mxu0  ;;  %7942 = vmatmul.mubr.f32.gmra.mrb[192].mxu0 %v223_v20  ;;  %v10896_v30 = vpop.f32.mrb[87].mxu1  ;;  %8268 = vmatmul.mubr.f32.gmra.mrb[192].mxu1 %v6377_v3  ;;  %v6380_v3 = vld [vmem:[%s14125_s0 + $0xc40] sm:$0xff] }
 0x1a5   :  { %14596 = vst [vmem:[#allocation127_spill] sm:$0xff] %v10894_v54  ;;  %14597 = vst [vmem:[#allocation128_spill] sm:$0xff] %v10896_v30  ;;  %7944 = vmatprep.mubr.f32.mxu0 %v224_v57  ;;  %8270 = vmatprep.mubr.f32.mxu1 %v6378_v40  ;;  %v6576_v20 = vld [vmem:[%s14125_s0 + $0x1260] sm:$0xff]  ;;  %v6381_v30 = vld [vmem:[%s14125_s0 + $0xc48] sm:$0xff] }
 0x1a6   :  { %v6577_v54 = vld [vmem:[%s14125_s0 + $0x1268] sm:$0xff] }
 0x1a7   :  { %v10914_v57 = vpop.f32.mrb[88].mxu0  ;;  %v10916_v40 = vpop.f32.mrb[88].mxu1 }
 0x1a8   :  { %14598 = vst [vmem:[#allocation129_spill] sm:$0xff] %v10914_v57  ;;  %14599 = vst [vmem:[#allocation130_spill] sm:$0xff] %v10916_v40  ;;  %v10918_v59 = vpop.f32.mrb[89].mxu0  ;;  %7945 = vmatmul.mubr.f32.gmra.mrb[194].mxu0 %v225_v0  ;;  %v10920_v14 = vpop.f32.mrb[89].mxu1  ;;  %8271 = vmatmul.mubr.f32.gmra.mrb[194].mxu1 %v6379_v10  ;;  %v6382_v10 = vld [vmem:[%s14125_s0 + $0xc50] sm:$0xff] }
 0x1a9   :  { %14600 = vst [vmem:[#allocation131_spill] sm:$0xff] %v10918_v59  ;;  %14601 = vst [vmem:[#allocation132_spill] sm:$0xff] %v10920_v14  ;;  %8305 = vmatprep.mubr.f32.mxu0 %v6380_v3  ;;  %8631 = vmatprep.mubr.f32.mxu1 %v6576_v20  ;;  %v6578_v0 = vld [vmem:[%s14125_s0 + $0x1270] sm:$0xff]  ;;  %v6383_v14 = vld [vmem:[%s14125_s0 + $0xc58] sm:$0xff] }
 0x1aa   :  { %v6579_v59 = vld [vmem:[%s14125_s0 + $0x1278] sm:$0xff] }
 0x1ab   :  { %v10938_v3 = vpop.f32.mrb[90].mxu0  ;;  %v10940_v33 = vpop.f32.mrb[90].mxu1 }
 0x1ac   :  { %14602 = vst [vmem:[#allocation133_spill] sm:$0xff] %v10938_v3  ;;  %14603 = vst [vmem:[#allocation134_spill] sm:$0xff] %v10940_v33  ;;  %v10942_v20 = vpop.f32.mrb[91].mxu0  ;;  %v10944_v40 = vpop.f32.mrb[91].mxu1  ;;  %8306 = vmatmul.mubr.f32.vlgmr.msra.gmra.mrb[196].mxu0 %v6381_v30  ;;  %8632 = vmatmul.mubr.f32.vlgmr.msra.gmra.mrb[196].mxu1 %v6577_v54  ;;  %v6384_v54 = vld [vmem:[%s14125_s0 + $0xc60] sm:$0xff] }
 0x1ad   :  { %14604 = vst [vmem:[#allocation135_spill] sm:$0xff] %v10942_v20  ;;  %14605 = vst [vmem:[#allocation136_spill] sm:$0xff] %v10944_v40  ;;  %8308 = vmatprep.mubr.f32.mxu0 %v6382_v10  ;;  %8634 = vmatprep.mubr.f32.mxu1 %v6578_v0  ;;  %v6580_v30 = vld [vmem:[%s14125_s0 + $0x1280] sm:$0xff]  ;;  %v6385_v40 = vld [vmem:[%s14125_s0 + $0xc68] sm:$0xff] }
 0x1ae   :  { %v6581_v20 = vld [vmem:[%s14125_s0 + $0x1288] sm:$0xff] }
 0x1af   :  { %v10962_v10 = vpop.f32.mrb[92].mxu0  ;;  %v10964_v13 = vpop.f32.mrb[92].mxu1 }
 0x1b0   :  { %14606 = vst [vmem:[#allocation137_spill] sm:$0xff] %v10962_v10  ;;  %14607 = vst [vmem:[#allocation138_spill] sm:$0xff] %v10964_v13  ;;  %v10966_v0 = vpop.f32.mrb[93].mxu0  ;;  %v10968_v33 = vpop.f32.mrb[93].mxu1  ;;  %8309 = vmatmul.mubr.f32.gmra.mrb[198].mxu0 %v6383_v14  ;;  %8635 = vmatmul.mubr.f32.gmra.mrb[198].mxu1 %v6579_v59  ;;  %v6386_v59 = vld [vmem:[%s14125_s0 + $0xc70] sm:$0xff] }
 0x1b1   :  { %14608 = vst [vmem:[#allocation139_spill] sm:$0xff] %v10966_v0  ;;  %14609 = vst [vmem:[#allocation140_spill] sm:$0xff] %v10968_v33  ;;  %8311 = vmatprep.mubr.f32.mxu0 %v6384_v54  ;;  %8637 = vmatprep.mubr.f32.mxu1 %v6580_v30  ;;  %v6582_v14 = vld [vmem:[%s14125_s0 + $0x1290] sm:$0xff]  ;;  %v6387_v33 = vld [vmem:[%s14125_s0 + $0xc78] sm:$0xff] }
 0x1b2   :  { %v6583_v0 = vld [vmem:[%s14125_s0 + $0x1298] sm:$0xff] }
 0x1b3   :  { %v10986_v54 = vpop.f32.mrb[94].mxu0  ;;  %v10988_v57 = vpop.f32.mrb[94].mxu1 }
 0x1b4   :  { %14610 = vst [vmem:[#allocation141_spill] sm:$0xff] %v10986_v54  ;;  %14611 = vst [vmem:[#allocation142_spill] sm:$0xff] %v10988_v57  ;;  %v10990_v30 = vpop.f32.mrb[95].mxu0  ;;  %v10992_v13 = vpop.f32.mrb[95].mxu1  ;;  %8312 = vmatmul.mubr.f32.gmra.mrb[200].mxu0 %v6385_v40  ;;  %8638 = vmatmul.mubr.f32.gmra.mrb[200].mxu1 %v6581_v20  ;;  %v6388_v40 = vld [vmem:[%s14125_s0 + $0xc80] sm:$0xff] }
 0x1b5   :  { %14612 = vst [vmem:[#allocation143_spill] sm:$0xff] %v10990_v30  ;;  %14613 = vst [vmem:[#allocation144_spill] sm:$0xff] %v10992_v13  ;;  %8314 = vmatprep.mubr.f32.mxu0 %v6386_v59  ;;  %8640 = vmatprep.mubr.f32.mxu1 %v6582_v14  ;;  %v6584_v20 = vld [vmem:[%s14125_s0 + $0x12a0] sm:$0xff]  ;;  %v6389_v13 = vld [vmem:[%s14125_s0 + $0xc88] sm:$0xff] }
 0x1b6   :  { %v6585_v30 = vld [vmem:[%s14125_s0 + $0x12a8] sm:$0xff] }
 0x1b7   :  { %v11010_v59 = vpop.f32.mrb[96].mxu0  ;;  %v11012_v3 = vpop.f32.mrb[96].mxu1 }
 0x1b8   :  { %14614 = vst [vmem:[#allocation145_spill] sm:$0xff] %v11010_v59  ;;  %14615 = vst [vmem:[#allocation146_spill] sm:$0xff] %v11012_v3  ;;  %v11014_v14 = vpop.f32.mrb[97].mxu0  ;;  %v11016_v57 = vpop.f32.mrb[97].mxu1  ;;  %8315 = vmatmul.mubr.f32.gmra.mrb[202].mxu0 %v6387_v33  ;;  %8641 = vmatmul.mubr.f32.gmra.mrb[202].mxu1 %v6583_v0  ;;  %v6390_v33 = vld [vmem:[%s14125_s0 + $0xc90] sm:$0xff] }
 0x1b9   :  { %14616 = vst [vmem:[#allocation147_spill] sm:$0xff] %v11014_v14  ;;  %14617 = vst [vmem:[#allocation148_spill] sm:$0xff] %v11016_v57  ;;  %8317 = vmatprep.mubr.f32.mxu0 %v6388_v40  ;;  %8643 = vmatprep.mubr.f32.mxu1 %v6584_v20  ;;  %v6586_v0 = vld [vmem:[%s14125_s0 + $0x12b0] sm:$0xff]  ;;  %v6391_v57 = vld [vmem:[%s14125_s0 + $0xc98] sm:$0xff] }
 0x1ba   :  { %v6587_v14 = vld [vmem:[%s14125_s0 + $0x12b8] sm:$0xff] }
 0x1bb   :  { %v11034_v40 = vpop.f32.mrb[98].mxu0  ;;  %v11036_v10 = vpop.f32.mrb[98].mxu1 }
 0x1bc   :  { %14618 = vst [vmem:[#allocation149_spill] sm:$0xff] %v11034_v40  ;;  %14619 = vst [vmem:[#allocation150_spill] sm:$0xff] %v11036_v10  ;;  %v11038_v20 = vpop.f32.mrb[99].mxu0  ;;  %v11040_v3 = vpop.f32.mrb[99].mxu1  ;;  %8318 = vmatmul.mubr.f32.gmra.mrb[204].mxu0 %v6389_v13  ;;  %8644 = vmatmul.mubr.f32.gmra.mrb[204].mxu1 %v6585_v30  ;;  %v6392_v13 = vld [vmem:[%s14125_s0 + $0xca0] sm:$0xff] }
 0x1bd   :  { %14620 = vst [vmem:[#allocation151_spill] sm:$0xff] %v11038_v20  ;;  %14621 = vst [vmem:[#allocation152_spill] sm:$0xff] %v11040_v3  ;;  %8320 = vmatprep.mubr.f32.mxu0 %v6390_v33  ;;  %8646 = vmatprep.mubr.f32.mxu1 %v6586_v0  ;;  %v6588_v30 = vld [vmem:[%s14125_s0 + $0x12c0] sm:$0xff]  ;;  %v6393_v3 = vld [vmem:[%s14125_s0 + $0xca8] sm:$0xff] }
 0x1be   :  { %v6589_v20 = vld [vmem:[%s14125_s0 + $0x12c8] sm:$0xff] }
 0x1bf   :  { %v11058_v33 = vpop.f32.mrb[100].mxu0  ;;  %v11060_v54 = vpop.f32.mrb[100].mxu1 }
 0x1c0   :  { %14622 = vst [vmem:[#allocation153_spill] sm:$0xff] %v11058_v33  ;;  %14623 = vst [vmem:[#allocation154_spill] sm:$0xff] %v11060_v54  ;;  %v11062_v0 = vpop.f32.mrb[101].mxu0  ;;  %v11064_v10 = vpop.f32.mrb[101].mxu1  ;;  %8321 = vmatmul.mubr.f32.gmra.mrb[206].mxu0 %v6391_v57  ;;  %8647 = vmatmul.mubr.f32.gmra.mrb[206].mxu1 %v6587_v14  ;;  %v6394_v57 = vld [vmem:[%s14125_s0 + $0xcb0] sm:$0xff] }
 0x1c1   :  { %14624 = vst [vmem:[#allocation155_spill] sm:$0xff] %v11062_v0  ;;  %14625 = vst [vmem:[#allocation156_spill] sm:$0xff] %v11064_v10  ;;  %8323 = vmatprep.mubr.f32.mxu0 %v6392_v13  ;;  %8649 = vmatprep.mubr.f32.mxu1 %v6588_v30  ;;  %v6590_v14 = vld [vmem:[%s14125_s0 + $0x12d0] sm:$0xff]  ;;  %v6395_v10 = vld [vmem:[%s14125_s0 + $0xcb8] sm:$0xff] }
 0x1c2   :  { %v6591_v0 = vld [vmem:[%s14125_s0 + $0x12d8] sm:$0xff] }
 0x1c3   :  { %v11082_v13 = vpop.f32.mrb[102].mxu0  ;;  %v11084_v59 = vpop.f32.mrb[102].mxu1 }
 0x1c4   :  { %14626 = vst [vmem:[#allocation157_spill] sm:$0xff] %v11082_v13  ;;  %14627 = vst [vmem:[#allocation158_spill] sm:$0xff] %v11084_v59  ;;  %v11086_v30 = vpop.f32.mrb[103].mxu0  ;;  %v11088_v54 = vpop.f32.mrb[103].mxu1  ;;  %8324 = vmatmul.mubr.f32.gmra.mrb[208].mxu0 %v6393_v3  ;;  %8650 = vmatmul.mubr.f32.gmra.mrb[208].mxu1 %v6589_v20  ;;  %v6396_v3 = vld [vmem:[%s14125_s0 + $0xcc0] sm:$0xff] }
 0x1c5   :  { %14628 = vst [vmem:[#allocation159_spill] sm:$0xff] %v11086_v30  ;;  %14629 = vst [vmem:[#allocation160_spill] sm:$0xff] %v11088_v54  ;;  %8326 = vmatprep.mubr.f32.mxu0 %v6394_v57  ;;  %8652 = vmatprep.mubr.f32.mxu1 %v6590_v14  ;;  %v6592_v20 = vld [vmem:[%s14125_s0 + $0x12e0] sm:$0xff]  ;;  %v6397_v54 = vld [vmem:[%s14125_s0 + $0xcc8] sm:$0xff] }
 0x1c6   :  { %v6593_v30 = vld [vmem:[%s14125_s0 + $0x12e8] sm:$0xff] }
 0x1c7   :  { %v11106_v57 = vpop.f32.mrb[104].mxu0  ;;  %v11108_v40 = vpop.f32.mrb[104].mxu1 }
 0x1c8   :  { %14630 = vst [vmem:[#allocation161_spill] sm:$0xff] %v11106_v57  ;;  %14631 = vst [vmem:[#allocation162_spill] sm:$0xff] %v11108_v40  ;;  %v11110_v14 = vpop.f32.mrb[105].mxu0  ;;  %v11112_v59 = vpop.f32.mrb[105].mxu1  ;;  %8327 = vmatmul.mubr.f32.gmra.mrb[210].mxu0 %v6395_v10  ;;  %8653 = vmatmul.mubr.f32.gmra.mrb[210].mxu1 %v6591_v0  ;;  %v6398_v10 = vld [vmem:[%s14125_s0 + $0xcd0] sm:$0xff] }
 0x1c9   :  { %14632 = vst [vmem:[#allocation163_spill] sm:$0xff] %v11110_v14  ;;  %14633 = vst [vmem:[#allocation164_spill] sm:$0xff] %v11112_v59  ;;  %8329 = vmatprep.mubr.f32.mxu0 %v6396_v3  ;;  %8655 = vmatprep.mubr.f32.mxu1 %v6592_v20  ;;  %v6594_v0 = vld [vmem:[%s14125_s0 + $0x12f0] sm:$0xff]  ;;  %v6399_v59 = vld [vmem:[%s14125_s0 + $0xcd8] sm:$0xff] }
 0x1ca   :  { %v6595_v14 = vld [vmem:[%s14125_s0 + $0x12f8] sm:$0xff] }
 0x1cb   :  { %v11130_v3 = vpop.f32.mrb[106].mxu0  ;;  %v11132_v33 = vpop.f32.mrb[106].mxu1 }
 0x1cc   :  { %14634 = vst [vmem:[#allocation165_spill] sm:$0xff] %v11130_v3  ;;  %14635 = vst [vmem:[#allocation166_spill] sm:$0xff] %v11132_v33  ;;  %v11134_v20 = vpop.f32.mrb[107].mxu0  ;;  %v11136_v40 = vpop.f32.mrb[107].mxu1  ;;  %8330 = vmatmul.mubr.f32.gmra.mrb[212].mxu0 %v6397_v54  ;;  %8656 = vmatmul.mubr.f32.gmra.mrb[212].mxu1 %v6593_v30  ;;  %v6400_v54 = vld [vmem:[%s14125_s0 + $0xce0] sm:$0xff] }
 0x1cd   :  { %14636 = vst [vmem:[#allocation167_spill] sm:$0xff] %v11134_v20  ;;  %14637 = vst [vmem:[#allocation168_spill] sm:$0xff] %v11136_v40  ;;  %8332 = vmatprep.mubr.f32.mxu0 %v6398_v10  ;;  %8658 = vmatprep.mubr.f32.mxu1 %v6594_v0  ;;  %v6596_v30 = vld [vmem:[%s14125_s0 + $0x1300] sm:$0xff]  ;;  %v6401_v40 = vld [vmem:[%s14125_s0 + $0xce8] sm:$0xff] }
 0x1ce   :  { %v6597_v20 = vld [vmem:[%s14125_s0 + $0x1308] sm:$0xff] }
 0x1cf   :  { %v11154_v10 = vpop.f32.mrb[108].mxu0  ;;  %v11156_v13 = vpop.f32.mrb[108].mxu1 }
 0x1d0   :  { %14638 = vst [vmem:[#allocation169_spill] sm:$0xff] %v11154_v10  ;;  %14639 = vst [vmem:[#allocation170_spill] sm:$0xff] %v11156_v13  ;;  %v11158_v0 = vpop.f32.mrb[109].mxu0  ;;  %v11160_v33 = vpop.f32.mrb[109].mxu1  ;;  %8333 = vmatmul.mubr.f32.gmra.mrb[214].mxu0 %v6399_v59  ;;  %8659 = vmatmul.mubr.f32.gmra.mrb[214].mxu1 %v6595_v14  ;;  %v6402_v59 = vld [vmem:[%s14125_s0 + $0xcf0] sm:$0xff] }
 0x1d1   :  { %14640 = vst [vmem:[#allocation171_spill] sm:$0xff] %v11158_v0  ;;  %14641 = vst [vmem:[#allocation172_spill] sm:$0xff] %v11160_v33  ;;  %8335 = vmatprep.mubr.f32.mxu0 %v6400_v54  ;;  %8661 = vmatprep.mubr.f32.mxu1 %v6596_v30  ;;  %v6598_v14 = vld [vmem:[%s14125_s0 + $0x1310] sm:$0xff]  ;;  %v6403_v33 = vld [vmem:[%s14125_s0 + $0xcf8] sm:$0xff] }
 0x1d2   :  { %v6599_v0 = vld [vmem:[%s14125_s0 + $0x1318] sm:$0xff] }
 0x1d3   :  { %v11178_v54 = vpop.f32.mrb[110].mxu0  ;;  %v11180_v57 = vpop.f32.mrb[110].mxu1 }
 0x1d4   :  { %14642 = vst [vmem:[#allocation173_spill] sm:$0xff] %v11178_v54  ;;  %14643 = vst [vmem:[#allocation174_spill] sm:$0xff] %v11180_v57  ;;  %v11182_v30 = vpop.f32.mrb[111].mxu0  ;;  %v11184_v13 = vpop.f32.mrb[111].mxu1  ;;  %8336 = vmatmul.mubr.f32.gmra.mrb[216].mxu0 %v6401_v40  ;;  %8662 = vmatmul.mubr.f32.gmra.mrb[216].mxu1 %v6597_v20  ;;  %v6404_v40 = vld [vmem:[%s14125_s0 + $0xd00] sm:$0xff] }
 0x1d5   :  { %14644 = vst [vmem:[#allocation175_spill] sm:$0xff] %v11182_v30  ;;  %14645 = vst [vmem:[#allocation176_spill] sm:$0xff] %v11184_v13  ;;  %8338 = vmatprep.mubr.f32.mxu0 %v6402_v59  ;;  %8664 = vmatprep.mubr.f32.mxu1 %v6598_v14  ;;  %v6600_v20 = vld [vmem:[%s14125_s0 + $0x1320] sm:$0xff]  ;;  %v6405_v13 = vld [vmem:[%s14125_s0 + $0xd08] sm:$0xff] }
 0x1d6   :  { %v6601_v30 = vld [vmem:[%s14125_s0 + $0x1328] sm:$0xff] }
 0x1d7   :  { %v11202_v59 = vpop.f32.mrb[112].mxu0  ;;  %v11204_v3 = vpop.f32.mrb[112].mxu1 }
 0x1d8   :  { %14646 = vst [vmem:[#allocation177_spill] sm:$0xff] %v11202_v59  ;;  %14647 = vst [vmem:[#allocation178_spill] sm:$0xff] %v11204_v3  ;;  %v11206_v14 = vpop.f32.mrb[113].mxu0  ;;  %v11208_v57 = vpop.f32.mrb[113].mxu1  ;;  %8339 = vmatmul.mubr.f32.gmra.mrb[218].mxu0 %v6403_v33  ;;  %8665 = vmatmul.mubr.f32.gmra.mrb[218].mxu1 %v6599_v0  ;;  %v6406_v33 = vld [vmem:[%s14125_s0 + $0xd10] sm:$0xff] }
 0x1d9   :  { %14648 = vst [vmem:[#allocation179_spill] sm:$0xff] %v11206_v14  ;;  %14649 = vst [vmem:[#allocation180_spill] sm:$0xff] %v11208_v57  ;;  %8341 = vmatprep.mubr.f32.mxu0 %v6404_v40  ;;  %8667 = vmatprep.mubr.f32.mxu1 %v6600_v20  ;;  %v6602_v0 = vld [vmem:[%s14125_s0 + $0x1330] sm:$0xff]  ;;  %v6407_v57 = vld [vmem:[%s14125_s0 + $0xd18] sm:$0xff] }
 0x1da   :  { %v6603_v14 = vld [vmem:[%s14125_s0 + $0x1338] sm:$0xff] }
 0x1db   :  { %v11226_v40 = vpop.f32.mrb[114].mxu0  ;;  %v11228_v10 = vpop.f32.mrb[114].mxu1 }
 0x1dc   :  { %14650 = vst [vmem:[#allocation181_spill] sm:$0xff] %v11226_v40  ;;  %14651 = vst [vmem:[#allocation182_spill] sm:$0xff] %v11228_v10  ;;  %v11230_v20 = vpop.f32.mrb[115].mxu0  ;;  %v11232_v3 = vpop.f32.mrb[115].mxu1  ;;  %8342 = vmatmul.mubr.f32.gmra.mrb[220].mxu0 %v6405_v13  ;;  %8668 = vmatmul.mubr.f32.gmra.mrb[220].mxu1 %v6601_v30  ;;  %v6408_v13 = vld [vmem:[%s14125_s0 + $0xd20] sm:$0xff] }
 0x1dd   :  { %14652 = vst [vmem:[#allocation183_spill] sm:$0xff] %v11230_v20  ;;  %14653 = vst [vmem:[#allocation184_spill] sm:$0xff] %v11232_v3  ;;  %8344 = vmatprep.mubr.f32.mxu0 %v6406_v33  ;;  %8670 = vmatprep.mubr.f32.mxu1 %v6602_v0  ;;  %v6604_v30 = vld [vmem:[%s14125_s0 + $0x1340] sm:$0xff]  ;;  %v6409_v3 = vld [vmem:[%s14125_s0 + $0xd28] sm:$0xff] }
 0x1de   :  { %v6605_v20 = vld [vmem:[%s14125_s0 + $0x1348] sm:$0xff] }
 0x1df   :  { %v11250_v33 = vpop.f32.mrb[116].mxu0  ;;  %v11252_v54 = vpop.f32.mrb[116].mxu1 }
 0x1e0   :  { %14654 = vst [vmem:[#allocation185_spill] sm:$0xff] %v11250_v33  ;;  %14655 = vst [vmem:[#allocation186_spill] sm:$0xff] %v11252_v54  ;;  %v11254_v0 = vpop.f32.mrb[117].mxu0  ;;  %v11256_v10 = vpop.f32.mrb[117].mxu1  ;;  %8345 = vmatmul.mubr.f32.gmra.mrb[222].mxu0 %v6407_v57  ;;  %8671 = vmatmul.mubr.f32.gmra.mrb[222].mxu1 %v6603_v14  ;;  %v6410_v57 = vld [vmem:[%s14125_s0 + $0xd30] sm:$0xff] }
 0x1e1   :  { %14656 = vst [vmem:[#allocation187_spill] sm:$0xff] %v11254_v0  ;;  %14657 = vst [vmem:[#allocation188_spill] sm:$0xff] %v11256_v10  ;;  %8347 = vmatprep.mubr.f32.mxu0 %v6408_v13  ;;  %8673 = vmatprep.mubr.f32.mxu1 %v6604_v30  ;;  %v6606_v14 = vld [vmem:[%s14125_s0 + $0x1350] sm:$0xff]  ;;  %v6411_v10 = vld [vmem:[%s14125_s0 + $0xd38] sm:$0xff] }
 0x1e2   :  { %v6607_v0 = vld [vmem:[%s14125_s0 + $0x1358] sm:$0xff] }
 0x1e3   :  { %v11274_v13 = vpop.f32.mrb[118].mxu0  ;;  %v11276_v59 = vpop.f32.mrb[118].mxu1 }
 0x1e4   :  { %14658 = vst [vmem:[#allocation189_spill] sm:$0xff] %v11274_v13  ;;  %14659 = vst [vmem:[#allocation190_spill] sm:$0xff] %v11276_v59  ;;  %v11278_v30 = vpop.f32.mrb[119].mxu0  ;;  %v11280_v54 = vpop.f32.mrb[119].mxu1  ;;  %8348 = vmatmul.mubr.f32.gmra.mrb[224].mxu0 %v6409_v3  ;;  %8674 = vmatmul.mubr.f32.gmra.mrb[224].mxu1 %v6605_v20  ;;  %v6412_v3 = vld [vmem:[%s14125_s0 + $0xd40] sm:$0xff] }
 0x1e5   :  { %14660 = vst [vmem:[#allocation191_spill] sm:$0xff] %v11278_v30  ;;  %14661 = vst [vmem:[#allocation192_spill] sm:$0xff] %v11280_v54  ;;  %8350 = vmatprep.mubr.f32.mxu0 %v6410_v57  ;;  %8676 = vmatprep.mubr.f32.mxu1 %v6606_v14  ;;  %v6608_v20 = vld [vmem:[%s14125_s0 + $0x1360] sm:$0xff]  ;;  %v6413_v54 = vld [vmem:[%s14125_s0 + $0xd48] sm:$0xff] }
 0x1e6   :  { %v6609_v30 = vld [vmem:[%s14125_s0 + $0x1368] sm:$0xff] }
 0x1e7   :  { %v11298_v57 = vpop.f32.mrb[120].mxu0  ;;  %v11300_v40 = vpop.f32.mrb[120].mxu1 }
 0x1e8   :  { %14662 = vst [vmem:[#allocation193_spill] sm:$0xff] %v11298_v57  ;;  %14663 = vst [vmem:[#allocation194_spill] sm:$0xff] %v11300_v40  ;;  %v11302_v14 = vpop.f32.mrb[121].mxu0  ;;  %v11304_v59 = vpop.f32.mrb[121].mxu1  ;;  %8351 = vmatmul.mubr.f32.gmra.mrb[226].mxu0 %v6411_v10  ;;  %8677 = vmatmul.mubr.f32.gmra.mrb[226].mxu1 %v6607_v0  ;;  %v6414_v10 = vld [vmem:[%s14125_s0 + $0xd50] sm:$0xff] }
 0x1e9   :  { %14664 = vst [vmem:[#allocation195_spill] sm:$0xff] %v11302_v14  ;;  %14665 = vst [vmem:[#allocation196_spill] sm:$0xff] %v11304_v59  ;;  %8353 = vmatprep.mubr.f32.mxu0 %v6412_v3  ;;  %8679 = vmatprep.mubr.f32.mxu1 %v6608_v20  ;;  %v6610_v0 = vld [vmem:[%s14125_s0 + $0x1370] sm:$0xff]  ;;  %v6415_v59 = vld [vmem:[%s14125_s0 + $0xd58] sm:$0xff] }
 0x1ea   :  { %v6611_v14 = vld [vmem:[%s14125_s0 + $0x1378] sm:$0xff] }
 0x1eb   :  { %v11322_v3 = vpop.f32.mrb[122].mxu0  ;;  %v11324_v33 = vpop.f32.mrb[122].mxu1 }
 0x1ec   :  { %14666 = vst [vmem:[#allocation197_spill] sm:$0xff] %v11322_v3  ;;  %14667 = vst [vmem:[#allocation198_spill] sm:$0xff] %v11324_v33  ;;  %v11326_v20 = vpop.f32.mrb[123].mxu0  ;;  %v11328_v40 = vpop.f32.mrb[123].mxu1  ;;  %8354 = vmatmul.mubr.f32.gmra.mrb[228].mxu0 %v6413_v54  ;;  %8680 = vmatmul.mubr.f32.gmra.mrb[228].mxu1 %v6609_v30  ;;  %v6416_v54 = vld [vmem:[%s14125_s0 + $0xd60] sm:$0xff] }
 0x1ed   :  { %14668 = vst [vmem:[#allocation199_spill] sm:$0xff] %v11326_v20  ;;  %14669 = vst [vmem:[#allocation200_spill] sm:$0xff] %v11328_v40  ;;  %8356 = vmatprep.mubr.f32.mxu0 %v6414_v10  ;;  %8682 = vmatprep.mubr.f32.mxu1 %v6610_v0  ;;  %v6612_v30 = vld [vmem:[%s14125_s0 + $0x1380] sm:$0xff]  ;;  %v6417_v40 = vld [vmem:[%s14125_s0 + $0xd68] sm:$0xff] }
 0x1ee   :  { %v6613_v20 = vld [vmem:[%s14125_s0 + $0x1388] sm:$0xff] }
 0x1ef   :  { %v11346_v10 = vpop.f32.mrb[124].mxu0  ;;  %v11348_v13 = vpop.f32.mrb[124].mxu1 }
 0x1f0   :  { %14670 = vst [vmem:[#allocation201_spill] sm:$0xff] %v11346_v10  ;;  %14671 = vst [vmem:[#allocation202_spill] sm:$0xff] %v11348_v13  ;;  %v11350_v0 = vpop.f32.mrb[125].mxu0  ;;  %v11352_v33 = vpop.f32.mrb[125].mxu1  ;;  %8357 = vmatmul.mubr.f32.gmra.mrb[230].mxu0 %v6415_v59  ;;  %8683 = vmatmul.mubr.f32.gmra.mrb[230].mxu1 %v6611_v14  ;;  %v6418_v59 = vld [vmem:[%s14125_s0 + $0xd70] sm:$0xff] }
 0x1f1   :  { %14672 = vst [vmem:[#allocation203_spill] sm:$0xff] %v11350_v0  ;;  %14673 = vst [vmem:[#allocation204_spill] sm:$0xff] %v11352_v33  ;;  %8359 = vmatprep.mubr.f32.mxu0 %v6416_v54  ;;  %8685 = vmatprep.mubr.f32.mxu1 %v6612_v30  ;;  %v6614_v14 = vld [vmem:[%s14125_s0 + $0x1390] sm:$0xff]  ;;  %v6419_v33 = vld [vmem:[%s14125_s0 + $0xd78] sm:$0xff] }
 0x1f2   :  { %v6615_v0 = vld [vmem:[%s14125_s0 + $0x1398] sm:$0xff] }
 0x1f3   :  { %v11370_v54 = vpop.f32.mrb[126].mxu0  ;;  %v11372_v57 = vpop.f32.mrb[126].mxu1 }
 0x1f4   :  { %14674 = vst [vmem:[#allocation205_spill] sm:$0xff] %v11370_v54  ;;  %14675 = vst [vmem:[#allocation206_spill] sm:$0xff] %v11372_v57  ;;  %v11374_v30 = vpop.f32.mrb[127].mxu0  ;;  %v11376_v13 = vpop.f32.mrb[127].mxu1  ;;  %8360 = vmatmul.mubr.f32.gmra.mrb[232].mxu0 %v6417_v40  ;;  %8686 = vmatmul.mubr.f32.gmra.mrb[232].mxu1 %v6613_v20  ;;  %v6420_v40 = vld [vmem:[%s14125_s0 + $0xd80] sm:$0xff] }
 0x1f5   :  { %14676 = vst [vmem:[#allocation207_spill] sm:$0xff] %v11374_v30  ;;  %14677 = vst [vmem:[#allocation208_spill] sm:$0xff] %v11376_v13  ;;  %8362 = vmatprep.mubr.f32.mxu0 %v6418_v59  ;;  %8688 = vmatprep.mubr.f32.mxu1 %v6614_v14  ;;  %v6616_v20 = vld [vmem:[%s14125_s0 + $0x13a0] sm:$0xff]  ;;  %v6421_v13 = vld [vmem:[%s14125_s0 + $0xd88] sm:$0xff] }
 0x1f6   :  { %v6617_v30 = vld [vmem:[%s14125_s0 + $0x13a8] sm:$0xff] }
 0x1f7   :  { %v11394_v59 = vpop.f32.mrb[128].mxu0  ;;  %v11396_v3 = vpop.f32.mrb[128].mxu1 }
 0x1f8   :  { %14678 = vst [vmem:[#allocation209_spill] sm:$0xff] %v11394_v59  ;;  %14679 = vst [vmem:[#allocation210_spill] sm:$0xff] %v11396_v3  ;;  %v11398_v14 = vpop.f32.mrb[129].mxu0  ;;  %v11400_v57 = vpop.f32.mrb[129].mxu1  ;;  %8363 = vmatmul.mubr.f32.gmra.mrb[234].mxu0 %v6419_v33  ;;  %8689 = vmatmul.mubr.f32.gmra.mrb[234].mxu1 %v6615_v0  ;;  %v6422_v33 = vld [vmem:[%s14125_s0 + $0xd90] sm:$0xff] }
 0x1f9   :  { %14680 = vst [vmem:[#allocation211_spill] sm:$0xff] %v11398_v14  ;;  %14681 = vst [vmem:[#allocation212_spill] sm:$0xff] %v11400_v57  ;;  %8365 = vmatprep.mubr.f32.mxu0 %v6420_v40  ;;  %8691 = vmatprep.mubr.f32.mxu1 %v6616_v20  ;;  %v6618_v0 = vld [vmem:[%s14125_s0 + $0x13b0] sm:$0xff]  ;;  %v6423_v57 = vld [vmem:[%s14125_s0 + $0xd98] sm:$0xff] }
 0x1fa   :  { %v6619_v14 = vld [vmem:[%s14125_s0 + $0x13b8] sm:$0xff] }
 0x1fb   :  { %v11418_v40 = vpop.f32.mrb[130].mxu0  ;;  %v11420_v10 = vpop.f32.mrb[130].mxu1 }
 0x1fc   :  { %14682 = vst [vmem:[#allocation213_spill] sm:$0xff] %v11418_v40  ;;  %14683 = vst [vmem:[#allocation214_spill] sm:$0xff] %v11420_v10  ;;  %v11422_v20 = vpop.f32.mrb[131].mxu0  ;;  %v11424_v3 = vpop.f32.mrb[131].mxu1  ;;  %8366 = vmatmul.mubr.f32.gmra.mrb[236].mxu0 %v6421_v13  ;;  %8692 = vmatmul.mubr.f32.gmra.mrb[236].mxu1 %v6617_v30  ;;  %v6424_v13 = vld [vmem:[%s14125_s0 + $0xda0] sm:$0xff] }
 0x1fd   :  { %14684 = vst [vmem:[#allocation215_spill] sm:$0xff] %v11422_v20  ;;  %14685 = vst [vmem:[#allocation216_spill] sm:$0xff] %v11424_v3  ;;  %8368 = vmatprep.mubr.f32.mxu0 %v6422_v33  ;;  %8694 = vmatprep.mubr.f32.mxu1 %v6618_v0  ;;  %v6620_v30 = vld [vmem:[%s14125_s0 + $0x13c0] sm:$0xff]  ;;  %v6425_v3 = vld [vmem:[%s14125_s0 + $0xda8] sm:$0xff] }
 0x1fe   :  { %v6621_v20 = vld [vmem:[%s14125_s0 + $0x13c8] sm:$0xff] }
 0x1ff   :  { %v11442_v33 = vpop.f32.mrb[132].mxu0  ;;  %v11444_v54 = vpop.f32.mrb[132].mxu1 }
 0x200   :  { %14686 = vst [vmem:[#allocation217_spill] sm:$0xff] %v11442_v33  ;;  %14687 = vst [vmem:[#allocation218_spill] sm:$0xff] %v11444_v54  ;;  %v11446_v0 = vpop.f32.mrb[133].mxu0  ;;  %v11448_v10 = vpop.f32.mrb[133].mxu1  ;;  %8369 = vmatmul.mubr.f32.gmra.mrb[238].mxu0 %v6423_v57  ;;  %8695 = vmatmul.mubr.f32.gmra.mrb[238].mxu1 %v6619_v14  ;;  %v6426_v57 = vld [vmem:[%s14125_s0 + $0xdb0] sm:$0xff]  ;;  %v6432_v33 = vld [vmem:[%s14125_s0 + $0xde0] sm:$0xff] }
 0x201   :  { %14688 = vst [vmem:[#allocation219_spill] sm:$0xff] %v11446_v0  ;;  %14689 = vst [vmem:[#allocation220_spill] sm:$0xff] %v11448_v10  ;;  %8371 = vmatprep.mubr.f32.mxu0 %v6424_v13  ;;  %8697 = vmatprep.mubr.f32.mxu1 %v6620_v30  ;;  %v6622_v14 = vld [vmem:[%s14125_s0 + $0x13d0] sm:$0xff]  ;;  %v6427_v10 = vld [vmem:[%s14125_s0 + $0xdb8] sm:$0xff] }
 0x202   :  { %v6623_v0 = vld [vmem:[%s14125_s0 + $0x13d8] sm:$0xff] }
 0x203   :  { %v11466_v13 = vpop.f32.mrb[134].mxu0  ;;  %v11468_v59 = vpop.f32.mrb[134].mxu1 }
 0x204   :  { %14690 = vst [vmem:[#allocation221_spill] sm:$0xff] %v11466_v13  ;;  %14691 = vst [vmem:[#allocation222_spill] sm:$0xff] %v11468_v59  ;;  %v11470_v30 = vpop.f32.mrb[135].mxu0  ;;  %v11472_v54 = vpop.f32.mrb[135].mxu1  ;;  %8372 = vmatmul.mubr.f32.gmra.mrb[240].mxu0 %v6425_v3  ;;  %8698 = vmatmul.mubr.f32.gmra.mrb[240].mxu1 %v6621_v20  ;;  %v6428_v3 = vld [vmem:[%s14125_s0 + $0xdc0] sm:$0xff] }
 0x205   :  { %14692 = vst [vmem:[#allocation223_spill] sm:$0xff] %v11470_v30  ;;  %14693 = vst [vmem:[#allocation224_spill] sm:$0xff] %v11472_v54  ;;  %8374 = vmatprep.mubr.f32.mxu0 %v6426_v57  ;;  %8700 = vmatprep.mubr.f32.mxu1 %v6622_v14  ;;  %v6624_v20 = vld [vmem:[%s14125_s0 + $0x13e0] sm:$0xff]  ;;  %v6429_v54 = vld [vmem:[%s14125_s0 + $0xdc8] sm:$0xff] }
 0x206   :  { %v6625_v30 = vld [vmem:[%s14125_s0 + $0x13e8] sm:$0xff]  ;;  %v6430_v14 = vld [vmem:[%s14125_s0 + $0xdd0] sm:$0xff] }
 0x207   :  { %v11490_v57 = vpop.f32.mrb[136].mxu0  ;;  %v11492_v40 = vpop.f32.mrb[136].mxu1 }
 0x208   :  { %14694 = vst [vmem:[#allocation225_spill] sm:$0xff] %v11490_v57  ;;  %14695 = vst [vmem:[#allocation226_spill] sm:$0xff] %v11492_v40  ;;  %v11496_v59 = vpop.f32.mrb[137].mxu0  ;;  %v11498_v13 = vpop.f32.mrb[137].mxu1  ;;  %8375 = vmatmul.mubr.f32.gmra.mrb[242].mxu0 %v6427_v10  ;;  %8701 = vmatmul.mubr.f32.gmra.mrb[242].mxu1 %v6623_v0  ;;  %v6626_v10 = vld [vmem:[%s14125_s0 + $0x13f0] sm:$0xff]  ;;  %v6431_v40 = vld [vmem:[%s14125_s0 + $0xdd8] sm:$0xff] }
 0x209   :  { %14696 = vst [vmem:[#allocation227_spill] sm:$0xff] %v11496_v59  ;;  %14697 = vst [vmem:[#allocation228_spill] sm:$0xff] %v11498_v13  ;;  %8377 = vmatprep.mubr.f32.mxu0 %v6428_v3  ;;  %8703 = vmatprep.mubr.f32.mxu1 %v6624_v20  ;;  %v6627_v57 = vld [vmem:[%s14125_s0 + $0x13f8] sm:$0xff]  ;;  %v6434_v59 = vld [vmem:[%s14125_s0 + $0xdf0] sm:$0xff] }
 0x20b   :  { %v11514_v0 = vpop.f32.mrb[138].mxu0  ;;  %v11516_v3 = vpop.f32.mrb[138].mxu1 }
 0x20c   :  { %14698 = vst [vmem:[#allocation229_spill] sm:$0xff] %v11514_v0  ;;  %14699 = vst [vmem:[#allocation230_spill] sm:$0xff] %v11516_v3  ;;  %v11520_v20 = vpop.f32.mrb[139].mxu0  ;;  %v11522_v13 = vpop.f32.mrb[139].mxu1  ;;  %8378 = vmatmul.mubr.f32.gmra.mrb[244].mxu0 %v6429_v54  ;;  %8704 = vmatmul.mubr.f32.gmra.mrb[244].mxu1 %v6625_v30  ;;  %v6628_v54 = vld [vmem:[%s14125_s0 + $0x1400] sm:$0xff]  ;;  %v6433_v3 = vld [vmem:[%s14125_s0 + $0xde8] sm:$0xff] }
 0x20d   :  { %14700 = vst [vmem:[#allocation231_spill] sm:$0xff] %v11520_v20  ;;  %14701 = vst [vmem:[#allocation232_spill] sm:$0xff] %v11522_v13  ;;  %8380 = vmatprep.mubr.f32.mxu0 %v6430_v14  ;;  %8706 = vmatprep.mubr.f32.mxu1 %v6626_v10  ;;  %v6629_v0 = vld [vmem:[%s14125_s0 + $0x1408] sm:$0xff]  ;;  %v6436_v20 = vld [vmem:[%s14125_s0 + $0xe00] sm:$0xff] }
 0x20f   :  { %v11538_v30 = vpop.f32.mrb[140].mxu0  ;;  %v11540_v14 = vpop.f32.mrb[140].mxu1 }
 0x210   :  { %14702 = vst [vmem:[#allocation233_spill] sm:$0xff] %v11538_v30  ;;  %14703 = vst [vmem:[#allocation234_spill] sm:$0xff] %v11540_v14  ;;  %v11544_v10 = vpop.f32.mrb[141].mxu0  ;;  %v11546_v13 = vpop.f32.mrb[141].mxu1  ;;  %8381 = vmatmul.mubr.f32.gmra.mrb[246].mxu0 %v6431_v40  ;;  %8707 = vmatmul.mubr.f32.gmra.mrb[246].mxu1 %v6627_v57  ;;  %v6630_v40 = vld [vmem:[%s14125_s0 + $0x1410] sm:$0xff]  ;;  %v6435_v14 = vld [vmem:[%s14125_s0 + $0xdf8] sm:$0xff] }
 0x211   :  { %14704 = vst [vmem:[#allocation235_spill] sm:$0xff] %v11544_v10  ;;  %14705 = vst [vmem:[#allocation236_spill] sm:$0xff] %v11546_v13  ;;  %8383 = vmatprep.mubr.f32.mxu0 %v6432_v33  ;;  %8709 = vmatprep.mubr.f32.mxu1 %v6628_v54  ;;  %v6631_v30 = vld [vmem:[%s14125_s0 + $0x1418] sm:$0xff]  ;;  %v6438_v10 = vld [vmem:[%s14125_s0 + $0xe10] sm:$0xff] }
 0x213   :  { %v11562_v57 = vpop.f32.mrb[142].mxu0  ;;  %v11564_v33 = vpop.f32.mrb[142].mxu1 }
 0x214   :  { %14706 = vst [vmem:[#allocation237_spill] sm:$0xff] %v11562_v57  ;;  %14707 = vst [vmem:[#allocation238_spill] sm:$0xff] %v11564_v33  ;;  %v11568_v54 = vpop.f32.mrb[143].mxu0  ;;  %v11570_v13 = vpop.f32.mrb[143].mxu1  ;;  %8384 = vmatmul.mubr.f32.gmra.mrb[248].mxu0 %v6433_v3  ;;  %8710 = vmatmul.mubr.f32.gmra.mrb[248].mxu1 %v6629_v0  ;;  %v6632_v0 = vld [vmem:[%s14125_s0 + $0x1420] sm:$0xff]  ;;  %v6437_v33 = vld [vmem:[%s14125_s0 + $0xe08] sm:$0xff] }
 0x215   :  { %14708 = vst [vmem:[#allocation239_spill] sm:$0xff] %v11568_v54  ;;  %14709 = vst [vmem:[#allocation240_spill] sm:$0xff] %v11570_v13  ;;  %8386 = vmatprep.mubr.f32.mxu0 %v6434_v59  ;;  %8712 = vmatprep.mubr.f32.mxu1 %v6630_v40  ;;  %v6633_v57 = vld [vmem:[%s14125_s0 + $0x1428] sm:$0xff]  ;;  %v6440_v54 = vld [vmem:[%s14125_s0 + $0xe20] sm:$0xff] }
 0x217   :  { %v11586_v3 = vpop.f32.mrb[144].mxu0  ;;  %v11588_v59 = vpop.f32.mrb[144].mxu1 }
 0x218   :  { %14710 = vst [vmem:[#allocation241_spill] sm:$0xff] %v11586_v3  ;;  %14711 = vst [vmem:[#allocation242_spill] sm:$0xff] %v11588_v59  ;;  %v11592_v40 = vpop.f32.mrb[145].mxu0  ;;  %v11594_v13 = vpop.f32.mrb[145].mxu1  ;;  %8387 = vmatmul.mubr.f32.gmra.mrb[250].mxu0 %v6435_v14  ;;  %8713 = vmatmul.mubr.f32.gmra.mrb[250].mxu1 %v6631_v30  ;;  %v6634_v30 = vld [vmem:[%s14125_s0 + $0x1430] sm:$0xff]  ;;  %v6439_v59 = vld [vmem:[%s14125_s0 + $0xe18] sm:$0xff] }
 0x219   :  { %14712 = vst [vmem:[#allocation243_spill] sm:$0xff] %v11592_v40  ;;  %14713 = vst [vmem:[#allocation244_spill] sm:$0xff] %v11594_v13  ;;  %8389 = vmatprep.mubr.f32.mxu0 %v6436_v20  ;;  %8715 = vmatprep.mubr.f32.mxu1 %v6632_v0  ;;  %v6635_v3 = vld [vmem:[%s14125_s0 + $0x1438] sm:$0xff]  ;;  %v6442_v40 = vld [vmem:[%s14125_s0 + $0xe30] sm:$0xff] }
 0x21b   :  { %v11610_v14 = vpop.f32.mrb[146].mxu0  ;;  %v11612_v20 = vpop.f32.mrb[146].mxu1 }
 0x21c   :  { %14714 = vst [vmem:[#allocation245_spill] sm:$0xff] %v11610_v14  ;;  %14715 = vst [vmem:[#allocation246_spill] sm:$0xff] %v11612_v20  ;;  %v11616_v0 = vpop.f32.mrb[147].mxu0  ;;  %v11618_v13 = vpop.f32.mrb[147].mxu1  ;;  %8390 = vmatmul.mubr.f32.gmra.mrb[252].mxu0 %v6437_v33  ;;  %8716 = vmatmul.mubr.f32.gmra.mrb[252].mxu1 %v6633_v57  ;;  %v6636_v57 = vld [vmem:[%s14125_s0 + $0x1440] sm:$0xff]  ;;  %v6441_v20 = vld [vmem:[%s14125_s0 + $0xe28] sm:$0xff] }
 0x21d   :  { %14716 = vst [vmem:[#allocation247_spill] sm:$0xff] %v11616_v0  ;;  %14717 = vst [vmem:[#allocation248_spill] sm:$0xff] %v11618_v13  ;;  %8392 = vmatprep.mubr.f32.mxu0 %v6438_v10  ;;  %8718 = vmatprep.mubr.f32.mxu1 %v6634_v30  ;;  %v6637_v14 = vld [vmem:[%s14125_s0 + $0x1448] sm:$0xff]  ;;  %v6444_v0 = vld [vmem:[%s14125_s0 + $0xe40] sm:$0xff] }
 0x21f   :  { %v11634_v33 = vpop.f32.mrb[148].mxu0  ;;  %v11636_v10 = vpop.f32.mrb[148].mxu1 }
 0x220   :  { %14718 = vst [vmem:[#allocation249_spill] sm:$0xff] %v11634_v33  ;;  %14719 = vst [vmem:[#allocation250_spill] sm:$0xff] %v11636_v10  ;;  %v11640_v30 = vpop.f32.mrb[149].mxu0  ;;  %v11642_v13 = vpop.f32.mrb[149].mxu1  ;;  %8393 = vmatmul.mubr.f32.gmra.mrb[254].mxu0 %v6439_v59  ;;  %8719 = vmatmul.mubr.f32.gmra.mrb[254].mxu1 %v6635_v3  ;;  %v6638_v3 = vld [vmem:[%s14125_s0 + $0x1450] sm:$0xff]  ;;  %v6443_v10 = vld [vmem:[%s14125_s0 + $0xe38] sm:$0xff] }
 0x221   :  { %14720 = vst [vmem:[#allocation251_spill] sm:$0xff] %v11640_v30  ;;  %14721 = vst [vmem:[#allocation252_spill] sm:$0xff] %v11642_v13  ;;  %8395 = vmatprep.mubr.f32.mxu0 %v6440_v54  ;;  %8721 = vmatprep.mubr.f32.mxu1 %v6636_v57  ;;  %v6639_v33 = vld [vmem:[%s14125_s0 + $0x1458] sm:$0xff]  ;;  %v6446_v30 = vld [vmem:[%s14125_s0 + $0xe50] sm:$0xff] }
 0x223   :  { %v11658_v59 = vpop.f32.mrb[150].mxu0  ;;  %v11660_v54 = vpop.f32.mrb[150].mxu1 }
 0x224   :  { %14722 = vst [vmem:[#allocation253_spill] sm:$0xff] %v11658_v59  ;;  %14723 = vst [vmem:[#allocation254_spill] sm:$0xff] %v11660_v54  ;;  %v11664_v57 = vpop.f32.mrb[151].mxu0  ;;  %v11666_v13 = vpop.f32.mrb[151].mxu1  ;;  %8396 = vmatmul.mubr.f32.gmra.mrb[0].mxu0 %v6441_v20  ;;  %8722 = vmatmul.mubr.f32.gmra.mrb[0].mxu1 %v6637_v14  ;;  %v6640_v14 = vld [vmem:[%s14125_s0 + $0x1460] sm:$0xff]  ;;  %v6445_v54 = vld [vmem:[%s14125_s0 + $0xe48] sm:$0xff] }
 0x225   :  { %14724 = vst [vmem:[#allocation255_spill] sm:$0xff] %v11664_v57  ;;  %14725 = vst [vmem:[#allocation256_spill] sm:$0xff] %v11666_v13  ;;  %8398 = vmatprep.mubr.f32.mxu0 %v6442_v40  ;;  %8724 = vmatprep.mubr.f32.mxu1 %v6638_v3  ;;  %v6641_v59 = vld [vmem:[%s14125_s0 + $0x1468] sm:$0xff]  ;;  %v6448_v57 = vld [vmem:[%s14125_s0 + $0xe60] sm:$0xff] }
 0x227   :  { %v11682_v20 = vpop.f32.mrb[152].mxu0  ;;  %v11684_v40 = vpop.f32.mrb[152].mxu1 }
 0x228   :  { %14726 = vst [vmem:[#allocation257_spill] sm:$0xff] %v11682_v20  ;;  %14727 = vst [vmem:[#allocation258_spill] sm:$0xff] %v11684_v40  ;;  %v11688_v3 = vpop.f32.mrb[153].mxu0  ;;  %v11690_v13 = vpop.f32.mrb[153].mxu1  ;;  %8399 = vmatmul.mubr.f32.gmra.mrb[2].mxu0 %v6443_v10  ;;  %8725 = vmatmul.mubr.f32.gmra.mrb[2].mxu1 %v6639_v33  ;;  %v6642_v33 = vld [vmem:[%s14125_s0 + $0x1470] sm:$0xff]  ;;  %v6447_v40 = vld [vmem:[%s14125_s0 + $0xe58] sm:$0xff] }
 0x229   :  { %14728 = vst [vmem:[#allocation259_spill] sm:$0xff] %v11688_v3  ;;  %14729 = vst [vmem:[#allocation260_spill] sm:$0xff] %v11690_v13  ;;  %8401 = vmatprep.mubr.f32.mxu0 %v6444_v0  ;;  %8727 = vmatprep.mubr.f32.mxu1 %v6640_v14  ;;  %v6643_v20 = vld [vmem:[%s14125_s0 + $0x1478] sm:$0xff]  ;;  %v6450_v3 = vld [vmem:[%s14125_s0 + $0xe70] sm:$0xff] }
 0x22b   :  { %v11706_v10 = vpop.f32.mrb[154].mxu0  ;;  %v11708_v0 = vpop.f32.mrb[154].mxu1 }
 0x22c   :  { %14730 = vst [vmem:[#allocation261_spill] sm:$0xff] %v11706_v10  ;;  %14731 = vst [vmem:[#allocation262_spill] sm:$0xff] %v11708_v0  ;;  %v11712_v14 = vpop.f32.mrb[155].mxu0  ;;  %v11714_v13 = vpop.f32.mrb[155].mxu1  ;;  %8402 = vmatmul.mubr.f32.gmra.mrb[4].mxu0 %v6445_v54  ;;  %8728 = vmatmul.mubr.f32.gmra.mrb[4].mxu1 %v6641_v59  ;;  %v6644_v59 = vld [vmem:[%s14125_s0 + $0x1480] sm:$0xff]  ;;  %v6449_v0 = vld [vmem:[%s14125_s0 + $0xe68] sm:$0xff] }
 0x22d   :  { %14732 = vst [vmem:[#allocation263_spill] sm:$0xff] %v11712_v14  ;;  %14733 = vst [vmem:[#allocation264_spill] sm:$0xff] %v11714_v13  ;;  %8404 = vmatprep.mubr.f32.mxu0 %v6446_v30  ;;  %8730 = vmatprep.mubr.f32.mxu1 %v6642_v33  ;;  %v6645_v10 = vld [vmem:[%s14125_s0 + $0x1488] sm:$0xff]  ;;  %v6452_v14 = vld [vmem:[%s14125_s0 + $0xe80] sm:$0xff] }
 0x22f   :  { %v11730_v54 = vpop.f32.mrb[156].mxu0  ;;  %v11732_v30 = vpop.f32.mrb[156].mxu1 }
 0x230   :  { %14734 = vst [vmem:[#allocation265_spill] sm:$0xff] %v11730_v54  ;;  %14735 = vst [vmem:[#allocation266_spill] sm:$0xff] %v11732_v30  ;;  %v11736_v33 = vpop.f32.mrb[157].mxu0  ;;  %v11738_v13 = vpop.f32.mrb[157].mxu1  ;;  %8405 = vmatmul.mubr.f32.gmra.mrb[6].mxu0 %v6447_v40  ;;  %8731 = vmatmul.mubr.f32.gmra.mrb[6].mxu1 %v6643_v20  ;;  %v6646_v20 = vld [vmem:[%s14125_s0 + $0x1490] sm:$0xff]  ;;  %v6451_v30 = vld [vmem:[%s14125_s0 + $0xe78] sm:$0xff] }
 0x231   :  { %14736 = vst [vmem:[#allocation267_spill] sm:$0xff] %v11736_v33  ;;  %14737 = vst [vmem:[#allocation268_spill] sm:$0xff] %v11738_v13  ;;  %8407 = vmatprep.mubr.f32.mxu0 %v6448_v57  ;;  %8733 = vmatprep.mubr.f32.mxu1 %v6644_v59  ;;  %v6647_v54 = vld [vmem:[%s14125_s0 + $0x1498] sm:$0xff]  ;;  %v6454_v33 = vld [vmem:[%s14125_s0 + $0xe90] sm:$0xff] }
 0x233   :  { %v11754_v40 = vpop.f32.mrb[158].mxu0  ;;  %v11756_v57 = vpop.f32.mrb[158].mxu1 }
 0x234   :  { %14738 = vst [vmem:[#allocation269_spill] sm:$0xff] %v11754_v40  ;;  %14739 = vst [vmem:[#allocation270_spill] sm:$0xff] %v11756_v57  ;;  %v11760_v59 = vpop.f32.mrb[159].mxu0  ;;  %v11762_v13 = vpop.f32.mrb[159].mxu1  ;;  %8408 = vmatmul.mubr.f32.gmra.mrb[8].mxu0 %v6449_v0  ;;  %8734 = vmatmul.mubr.f32.gmra.mrb[8].mxu1 %v6645_v10  ;;  %v6648_v10 = vld [vmem:[%s14125_s0 + $0x14a0] sm:$0xff]  ;;  %v6453_v57 = vld [vmem:[%s14125_s0 + $0xe88] sm:$0xff] }
 0x235   :  { %14740 = vst [vmem:[#allocation271_spill] sm:$0xff] %v11760_v59  ;;  %14741 = vst [vmem:[#allocation272_spill] sm:$0xff] %v11762_v13  ;;  %8410 = vmatprep.mubr.f32.mxu0 %v6450_v3  ;;  %8736 = vmatprep.mubr.f32.mxu1 %v6646_v20  ;;  %v6649_v40 = vld [vmem:[%s14125_s0 + $0x14a8] sm:$0xff]  ;;  %v6456_v59 = vld [vmem:[%s14125_s0 + $0xea0] sm:$0xff] }
 0x237   :  { %v11778_v0 = vpop.f32.mrb[160].mxu0  ;;  %v11780_v3 = vpop.f32.mrb[160].mxu1 }
 0x238   :  { %14742 = vst [vmem:[#allocation273_spill] sm:$0xff] %v11778_v0  ;;  %14743 = vst [vmem:[#allocation274_spill] sm:$0xff] %v11780_v3  ;;  %v11784_v20 = vpop.f32.mrb[161].mxu0  ;;  %v11786_v13 = vpop.f32.mrb[161].mxu1  ;;  %8411 = vmatmul.mubr.f32.gmra.mrb[10].mxu0 %v6451_v30  ;;  %8737 = vmatmul.mubr.f32.gmra.mrb[10].mxu1 %v6647_v54  ;;  %v6650_v54 = vld [vmem:[%s14125_s0 + $0x14b0] sm:$0xff]  ;;  %v6455_v3 = vld [vmem:[%s14125_s0 + $0xe98] sm:$0xff] }
 0x239   :  { %14744 = vst [vmem:[#allocation275_spill] sm:$0xff] %v11784_v20  ;;  %14745 = vst [vmem:[#allocation276_spill] sm:$0xff] %v11786_v13  ;;  %8413 = vmatprep.mubr.f32.mxu0 %v6452_v14  ;;  %8739 = vmatprep.mubr.f32.mxu1 %v6648_v10  ;;  %v6651_v0 = vld [vmem:[%s14125_s0 + $0x14b8] sm:$0xff]  ;;  %v6458_v20 = vld [vmem:[%s14125_s0 + $0xeb0] sm:$0xff] }
 0x23b   :  { %v11802_v30 = vpop.f32.mrb[162].mxu0  ;;  %v11804_v14 = vpop.f32.mrb[162].mxu1 }
 0x23c   :  { %14746 = vst [vmem:[#allocation277_spill] sm:$0xff] %v11802_v30  ;;  %14747 = vst [vmem:[#allocation278_spill] sm:$0xff] %v11804_v14  ;;  %v11808_v10 = vpop.f32.mrb[163].mxu0  ;;  %v11810_v13 = vpop.f32.mrb[163].mxu1  ;;  %8414 = vmatmul.mubr.f32.gmra.mrb[12].mxu0 %v6453_v57  ;;  %8740 = vmatmul.mubr.f32.gmra.mrb[12].mxu1 %v6649_v40  ;;  %v6652_v40 = vld [vmem:[%s14125_s0 + $0x14c0] sm:$0xff]  ;;  %v6457_v14 = vld [vmem:[%s14125_s0 + $0xea8] sm:$0xff] }
 0x23d   :  { %14748 = vst [vmem:[#allocation279_spill] sm:$0xff] %v11808_v10  ;;  %14749 = vst [vmem:[#allocation280_spill] sm:$0xff] %v11810_v13  ;;  %8416 = vmatprep.mubr.f32.mxu0 %v6454_v33  ;;  %8742 = vmatprep.mubr.f32.mxu1 %v6650_v54  ;;  %v6653_v30 = vld [vmem:[%s14125_s0 + $0x14c8] sm:$0xff]  ;;  %v6460_v10 = vld [vmem:[%s14125_s0 + $0xec0] sm:$0xff] }
 0x23f   :  { %v11826_v57 = vpop.f32.mrb[164].mxu0  ;;  %v11828_v33 = vpop.f32.mrb[164].mxu1 }
 0x240   :  { %14750 = vst [vmem:[#allocation281_spill] sm:$0xff] %v11826_v57  ;;  %14751 = vst [vmem:[#allocation282_spill] sm:$0xff] %v11828_v33  ;;  %v11832_v54 = vpop.f32.mrb[165].mxu0  ;;  %v11834_v13 = vpop.f32.mrb[165].mxu1  ;;  %8417 = vmatmul.mubr.f32.gmra.mrb[14].mxu0 %v6455_v3  ;;  %8743 = vmatmul.mubr.f32.gmra.mrb[14].mxu1 %v6651_v0  ;;  %v6654_v0 = vld [vmem:[%s14125_s0 + $0x14d0] sm:$0xff]  ;;  %v6459_v33 = vld [vmem:[%s14125_s0 + $0xeb8] sm:$0xff] }
 0x241   :  { %14752 = vst [vmem:[#allocation283_spill] sm:$0xff] %v11832_v54  ;;  %14753 = vst [vmem:[#allocation284_spill] sm:$0xff] %v11834_v13  ;;  %8419 = vmatprep.mubr.f32.mxu0 %v6456_v59  ;;  %8745 = vmatprep.mubr.f32.mxu1 %v6652_v40  ;;  %v6655_v57 = vld [vmem:[%s14125_s0 + $0x14d8] sm:$0xff]  ;;  %v6462_v54 = vld [vmem:[%s14125_s0 + $0xed0] sm:$0xff] }
 0x243   :  { %v11850_v3 = vpop.f32.mrb[166].mxu0  ;;  %v11852_v59 = vpop.f32.mrb[166].mxu1 }
 0x244   :  { %14754 = vst [vmem:[#allocation285_spill] sm:$0xff] %v11850_v3  ;;  %14755 = vst [vmem:[#allocation286_spill] sm:$0xff] %v11852_v59  ;;  %v11856_v40 = vpop.f32.mrb[167].mxu0  ;;  %v11858_v13 = vpop.f32.mrb[167].mxu1  ;;  %8420 = vmatmul.mubr.f32.gmra.mrb[16].mxu0 %v6457_v14  ;;  %8746 = vmatmul.mubr.f32.gmra.mrb[16].mxu1 %v6653_v30  ;;  %v6656_v30 = vld [vmem:[%s14125_s0 + $0x14e0] sm:$0xff]  ;;  %v6461_v59 = vld [vmem:[%s14125_s0 + $0xec8] sm:$0xff] }
 0x245   :  { %14756 = vst [vmem:[#allocation287_spill] sm:$0xff] %v11856_v40  ;;  %14757 = vst [vmem:[#allocation288_spill] sm:$0xff] %v11858_v13  ;;  %8422 = vmatprep.mubr.f32.mxu0 %v6458_v20  ;;  %8748 = vmatprep.mubr.f32.mxu1 %v6654_v0  ;;  %v6657_v3 = vld [vmem:[%s14125_s0 + $0x14e8] sm:$0xff]  ;;  %v6464_v40 = vld [vmem:[%s14125_s0 + $0xee0] sm:$0xff] }
 0x247   :  { %v11874_v14 = vpop.f32.mrb[168].mxu0  ;;  %v11876_v20 = vpop.f32.mrb[168].mxu1 }
 0x248   :  { %14758 = vst [vmem:[#allocation289_spill] sm:$0xff] %v11874_v14  ;;  %14759 = vst [vmem:[#allocation290_spill] sm:$0xff] %v11876_v20  ;;  %v11880_v0 = vpop.f32.mrb[169].mxu0  ;;  %v11882_v13 = vpop.f32.mrb[169].mxu1  ;;  %8423 = vmatmul.mubr.f32.gmra.mrb[18].mxu0 %v6459_v33  ;;  %8749 = vmatmul.mubr.f32.gmra.mrb[18].mxu1 %v6655_v57  ;;  %v6658_v57 = vld [vmem:[%s14125_s0 + $0x14f0] sm:$0xff]  ;;  %v6463_v20 = vld [vmem:[%s14125_s0 + $0xed8] sm:$0xff] }
 0x249   :  { %14760 = vst [vmem:[#allocation291_spill] sm:$0xff] %v11880_v0  ;;  %14761 = vst [vmem:[#allocation292_spill] sm:$0xff] %v11882_v13  ;;  %8425 = vmatprep.mubr.f32.mxu0 %v6460_v10  ;;  %8751 = vmatprep.mubr.f32.mxu1 %v6656_v30  ;;  %v6659_v14 = vld [vmem:[%s14125_s0 + $0x14f8] sm:$0xff]  ;;  %v6466_v0 = vld [vmem:[%s14125_s0 + $0xef0] sm:$0xff] }
 0x24b   :  { %v11898_v33 = vpop.f32.mrb[170].mxu0  ;;  %v11900_v10 = vpop.f32.mrb[170].mxu1 }
 0x24c   :  { %14762 = vst [vmem:[#allocation293_spill] sm:$0xff] %v11898_v33  ;;  %14763 = vst [vmem:[#allocation294_spill] sm:$0xff] %v11900_v10  ;;  %v11904_v30 = vpop.f32.mrb[171].mxu0  ;;  %v11906_v13 = vpop.f32.mrb[171].mxu1  ;;  %8426 = vmatmul.mubr.f32.gmra.mrb[20].mxu0 %v6461_v59  ;;  %8752 = vmatmul.mubr.f32.gmra.mrb[20].mxu1 %v6657_v3  ;;  %v6660_v3 = vld [vmem:[%s14125_s0 + $0x1500] sm:$0xff]  ;;  %v6465_v10 = vld [vmem:[%s14125_s0 + $0xee8] sm:$0xff] }
 0x24d   :  { %14764 = vst [vmem:[#allocation295_spill] sm:$0xff] %v11904_v30  ;;  %14765 = vst [vmem:[#allocation296_spill] sm:$0xff] %v11906_v13  ;;  %8428 = vmatprep.mubr.f32.mxu0 %v6462_v54  ;;  %8754 = vmatprep.mubr.f32.mxu1 %v6658_v57  ;;  %v6661_v33 = vld [vmem:[%s14125_s0 + $0x1508] sm:$0xff]  ;;  %v6468_v30 = vld [vmem:[%s14125_s0 + $0xf00] sm:$0xff] }
 0x24f   :  { %v11922_v59 = vpop.f32.mrb[172].mxu0  ;;  %v11924_v54 = vpop.f32.mrb[172].mxu1 }
 0x250   :  { %14766 = vst [vmem:[#allocation297_spill] sm:$0xff] %v11922_v59  ;;  %14767 = vst [vmem:[#allocation298_spill] sm:$0xff] %v11924_v54  ;;  %v11928_v57 = vpop.f32.mrb[173].mxu0  ;;  %v11930_v13 = vpop.f32.mrb[173].mxu1  ;;  %8429 = vmatmul.mubr.f32.gmra.mrb[22].mxu0 %v6463_v20  ;;  %8755 = vmatmul.mubr.f32.gmra.mrb[22].mxu1 %v6659_v14  ;;  %v6662_v14 = vld [vmem:[%s14125_s0 + $0x1510] sm:$0xff]  ;;  %v6467_v54 = vld [vmem:[%s14125_s0 + $0xef8] sm:$0xff] }
 0x251   :  { %14768 = vst [vmem:[#allocation299_spill] sm:$0xff] %v11928_v57  ;;  %14769 = vst [vmem:[#allocation300_spill] sm:$0xff] %v11930_v13  ;;  %8431 = vmatprep.mubr.f32.mxu0 %v6464_v40  ;;  %8757 = vmatprep.mubr.f32.mxu1 %v6660_v3  ;;  %v6663_v59 = vld [vmem:[%s14125_s0 + $0x1518] sm:$0xff]  ;;  %v6470_v57 = vld [vmem:[%s14125_s0 + $0xf10] sm:$0xff] }
 0x253   :  { %v11946_v20 = vpop.f32.mrb[174].mxu0  ;;  %v11948_v40 = vpop.f32.mrb[174].mxu1 }
 0x254   :  { %14770 = vst [vmem:[#allocation301_spill] sm:$0xff] %v11946_v20  ;;  %14771 = vst [vmem:[#allocation302_spill] sm:$0xff] %v11948_v40  ;;  %v11952_v3 = vpop.f32.mrb[175].mxu0  ;;  %v11954_v13 = vpop.f32.mrb[175].mxu1  ;;  %8432 = vmatmul.mubr.f32.gmra.mrb[24].mxu0 %v6465_v10  ;;  %8758 = vmatmul.mubr.f32.gmra.mrb[24].mxu1 %v6661_v33  ;;  %v6664_v33 = vld [vmem:[%s14125_s0 + $0x1520] sm:$0xff]  ;;  %v6469_v40 = vld [vmem:[%s14125_s0 + $0xf08] sm:$0xff] }
 0x255   :  { %14772 = vst [vmem:[#allocation303_spill] sm:$0xff] %v11952_v3  ;;  %14773 = vst [vmem:[#allocation304_spill] sm:$0xff] %v11954_v13  ;;  %8434 = vmatprep.mubr.f32.mxu0 %v6466_v0  ;;  %8760 = vmatprep.mubr.f32.mxu1 %v6662_v14  ;;  %v6665_v20 = vld [vmem:[%s14125_s0 + $0x1528] sm:$0xff]  ;;  %v6472_v3 = vld [vmem:[%s14125_s0 + $0xf20] sm:$0xff] }
 0x257   :  { %v11970_v10 = vpop.f32.mrb[176].mxu0  ;;  %v11972_v0 = vpop.f32.mrb[176].mxu1 }
 0x258   :  { %14774 = vst [vmem:[#allocation305_spill] sm:$0xff] %v11970_v10  ;;  %14775 = vst [vmem:[#allocation306_spill] sm:$0xff] %v11972_v0  ;;  %v11976_v14 = vpop.f32.mrb[177].mxu0  ;;  %v11978_v13 = vpop.f32.mrb[177].mxu1  ;;  %8435 = vmatmul.mubr.f32.gmra.mrb[26].mxu0 %v6467_v54  ;;  %8761 = vmatmul.mubr.f32.gmra.mrb[26].mxu1 %v6663_v59  ;;  %v6666_v59 = vld [vmem:[%s14125_s0 + $0x1530] sm:$0xff]  ;;  %v6471_v0 = vld [vmem:[%s14125_s0 + $0xf18] sm:$0xff] }
 0x259   :  { %14776 = vst [vmem:[#allocation307_spill] sm:$0xff] %v11976_v14  ;;  %14777 = vst [vmem:[#allocation308_spill] sm:$0xff] %v11978_v13  ;;  %8437 = vmatprep.mubr.f32.mxu0 %v6468_v30  ;;  %8763 = vmatprep.mubr.f32.mxu1 %v6664_v33  ;;  %v6667_v10 = vld [vmem:[%s14125_s0 + $0x1538] sm:$0xff]  ;;  %v6474_v14 = vld [vmem:[%s14125_s0 + $0xf30] sm:$0xff] }
 0x25b   :  { %v11994_v54 = vpop.f32.mrb[178].mxu0  ;;  %v11996_v30 = vpop.f32.mrb[178].mxu1 }
 0x25c   :  { %14778 = vst [vmem:[#allocation309_spill] sm:$0xff] %v11994_v54  ;;  %14779 = vst [vmem:[#allocation310_spill] sm:$0xff] %v11996_v30  ;;  %v12000_v33 = vpop.f32.mrb[179].mxu0  ;;  %v12002_v13 = vpop.f32.mrb[179].mxu1  ;;  %8438 = vmatmul.mubr.f32.gmra.mrb[28].mxu0 %v6469_v40  ;;  %8764 = vmatmul.mubr.f32.gmra.mrb[28].mxu1 %v6665_v20  ;;  %v6668_v20 = vld [vmem:[%s14125_s0 + $0x1540] sm:$0xff]  ;;  %v6473_v30 = vld [vmem:[%s14125_s0 + $0xf28] sm:$0xff] }
 0x25d   :  { %14780 = vst [vmem:[#allocation311_spill] sm:$0xff] %v12000_v33  ;;  %14781 = vst [vmem:[#allocation312_spill] sm:$0xff] %v12002_v13  ;;  %8440 = vmatprep.mubr.f32.mxu0 %v6470_v57  ;;  %8766 = vmatprep.mubr.f32.mxu1 %v6666_v59  ;;  %v6669_v54 = vld [vmem:[%s14125_s0 + $0x1548] sm:$0xff]  ;;  %v6476_v33 = vld [vmem:[%s14125_s0 + $0xf40] sm:$0xff] }
 0x25f   :  { %v12018_v40 = vpop.f32.mrb[180].mxu0  ;;  %v12020_v57 = vpop.f32.mrb[180].mxu1 }
 0x260   :  { %14782 = vst [vmem:[#allocation313_spill] sm:$0xff] %v12018_v40  ;;  %14783 = vst [vmem:[#allocation314_spill] sm:$0xff] %v12020_v57  ;;  %v12024_v59 = vpop.f32.mrb[181].mxu0  ;;  %v12026_v13 = vpop.f32.mrb[181].mxu1  ;;  %8441 = vmatmul.mubr.f32.gmra.mrb[30].mxu0 %v6471_v0  ;;  %8767 = vmatmul.mubr.f32.gmra.mrb[30].mxu1 %v6667_v10  ;;  %v6670_v10 = vld [vmem:[%s14125_s0 + $0x1550] sm:$0xff]  ;;  %v6475_v57 = vld [vmem:[%s14125_s0 + $0xf38] sm:$0xff] }
 0x261   :  { %14784 = vst [vmem:[#allocation315_spill] sm:$0xff] %v12024_v59  ;;  %14785 = vst [vmem:[#allocation316_spill] sm:$0xff] %v12026_v13  ;;  %8443 = vmatprep.mubr.f32.mxu0 %v6472_v3  ;;  %8769 = vmatprep.mubr.f32.mxu1 %v6668_v20  ;;  %v6671_v40 = vld [vmem:[%s14125_s0 + $0x1558] sm:$0xff]  ;;  %v6478_v59 = vld [vmem:[%s14125_s0 + $0xf50] sm:$0xff] }
 0x263   :  { %v12042_v0 = vpop.f32.mrb[182].mxu0  ;;  %v12044_v3 = vpop.f32.mrb[182].mxu1 }
 0x264   :  { %14786 = vst [vmem:[#allocation317_spill] sm:$0xff] %v12042_v0  ;;  %14787 = vst [vmem:[#allocation318_spill] sm:$0xff] %v12044_v3  ;;  %v12048_v20 = vpop.f32.mrb[183].mxu0  ;;  %v12050_v13 = vpop.f32.mrb[183].mxu1  ;;  %8444 = vmatmul.mubr.f32.gmra.mrb[32].mxu0 %v6473_v30  ;;  %8770 = vmatmul.mubr.f32.gmra.mrb[32].mxu1 %v6669_v54  ;;  %v6672_v54 = vld [vmem:[%s14125_s0 + $0x1560] sm:$0xff]  ;;  %v6477_v3 = vld [vmem:[%s14125_s0 + $0xf48] sm:$0xff] }
 0x265   :  { %14788 = vst [vmem:[#allocation319_spill] sm:$0xff] %v12048_v20  ;;  %14789 = vst [vmem:[#allocation320_spill] sm:$0xff] %v12050_v13  ;;  %8446 = vmatprep.mubr.f32.mxu0 %v6474_v14  ;;  %8772 = vmatprep.mubr.f32.mxu1 %v6670_v10  ;;  %v6673_v0 = vld [vmem:[%s14125_s0 + $0x1568] sm:$0xff]  ;;  %v6480_v20 = vld [vmem:[%s14125_s0 + $0xf60] sm:$0xff] }
 0x267   :  { %v12066_v30 = vpop.f32.mrb[184].mxu0  ;;  %v12068_v14 = vpop.f32.mrb[184].mxu1 }
 0x268   :  { %14790 = vst [vmem:[#allocation321_spill] sm:$0xff] %v12066_v30  ;;  %14791 = vst [vmem:[#allocation322_spill] sm:$0xff] %v12068_v14  ;;  %v12072_v10 = vpop.f32.mrb[185].mxu0  ;;  %v12074_v13 = vpop.f32.mrb[185].mxu1  ;;  %8447 = vmatmul.mubr.f32.gmra.mrb[34].mxu0 %v6475_v57  ;;  %8773 = vmatmul.mubr.f32.gmra.mrb[34].mxu1 %v6671_v40  ;;  %v6674_v40 = vld [vmem:[%s14125_s0 + $0x1570] sm:$0xff]  ;;  %v6479_v14 = vld [vmem:[%s14125_s0 + $0xf58] sm:$0xff] }
 0x269   :  { %14792 = vst [vmem:[#allocation323_spill] sm:$0xff] %v12072_v10  ;;  %14793 = vst [vmem:[#allocation324_spill] sm:$0xff] %v12074_v13  ;;  %8449 = vmatprep.mubr.f32.mxu0 %v6476_v33  ;;  %8775 = vmatprep.mubr.f32.mxu1 %v6672_v54  ;;  %v6675_v30 = vld [vmem:[%s14125_s0 + $0x1578] sm:$0xff]  ;;  %v6482_v10 = vld [vmem:[%s14125_s0 + $0xf70] sm:$0xff] }
 0x26b   :  { %v12090_v57 = vpop.f32.mrb[186].mxu0  ;;  %v12092_v33 = vpop.f32.mrb[186].mxu1 }
 0x26c   :  { %14794 = vst [vmem:[#allocation325_spill] sm:$0xff] %v12090_v57  ;;  %14795 = vst [vmem:[#allocation326_spill] sm:$0xff] %v12092_v33  ;;  %v12096_v54 = vpop.f32.mrb[187].mxu0  ;;  %v12098_v13 = vpop.f32.mrb[187].mxu1  ;;  %8450 = vmatmul.mubr.f32.gmra.mrb[36].mxu0 %v6477_v3  ;;  %8776 = vmatmul.mubr.f32.gmra.mrb[36].mxu1 %v6673_v0  ;;  %v6676_v0 = vld [vmem:[%s14125_s0 + $0x1580] sm:$0xff]  ;;  %v6481_v33 = vld [vmem:[%s14125_s0 + $0xf68] sm:$0xff] }
 0x26d   :  { %14796 = vst [vmem:[#allocation327_spill] sm:$0xff] %v12096_v54  ;;  %14797 = vst [vmem:[#allocation328_spill] sm:$0xff] %v12098_v13  ;;  %8452 = vmatprep.mubr.f32.mxu0 %v6478_v59  ;;  %8778 = vmatprep.mubr.f32.mxu1 %v6674_v40  ;;  %v6677_v57 = vld [vmem:[%s14125_s0 + $0x1588] sm:$0xff]  ;;  %v6484_v54 = vld [vmem:[%s14125_s0 + $0xf80] sm:$0xff] }
 0x26f   :  { %v12114_v3 = vpop.f32.mrb[188].mxu0  ;;  %v12116_v59 = vpop.f32.mrb[188].mxu1 }
 0x270   :  { %14798 = vst [vmem:[#allocation329_spill] sm:$0xff] %v12114_v3  ;;  %14799 = vst [vmem:[#allocation330_spill] sm:$0xff] %v12116_v59  ;;  %v12120_v40 = vpop.f32.mrb[189].mxu0  ;;  %v12122_v13 = vpop.f32.mrb[189].mxu1  ;;  %8453 = vmatmul.mubr.f32.gmra.mrb[38].mxu0 %v6479_v14  ;;  %8779 = vmatmul.mubr.f32.gmra.mrb[38].mxu1 %v6675_v30  ;;  %v6678_v30 = vld [vmem:[%s14125_s0 + $0x1590] sm:$0xff]  ;;  %v6483_v59 = vld [vmem:[%s14125_s0 + $0xf78] sm:$0xff] }
 0x271   :  { %14800 = vst [vmem:[#allocation331_spill] sm:$0xff] %v12120_v40  ;;  %14801 = vst [vmem:[#allocation332_spill] sm:$0xff] %v12122_v13  ;;  %8455 = vmatprep.mubr.f32.mxu0 %v6480_v20  ;;  %8781 = vmatprep.mubr.f32.mxu1 %v6676_v0  ;;  %v6679_v3 = vld [vmem:[%s14125_s0 + $0x1598] sm:$0xff]  ;;  %v6486_v40 = vld [vmem:[%s14125_s0 + $0xf90] sm:$0xff] }
 0x273   :  { %v12138_v14 = vpop.f32.mrb[190].mxu0  ;;  %v12140_v20 = vpop.f32.mrb[190].mxu1 }
 0x274   :  { %14802 = vst [vmem:[#allocation333_spill] sm:$0xff] %v12138_v14  ;;  %14803 = vst [vmem:[#allocation334_spill] sm:$0xff] %v12140_v20  ;;  %v12144_v0 = vpop.f32.mrb[191].mxu0  ;;  %v12146_v13 = vpop.f32.mrb[191].mxu1  ;;  %8456 = vmatmul.mubr.f32.gmra.mrb[40].mxu0 %v6481_v33  ;;  %8782 = vmatmul.mubr.f32.gmra.mrb[40].mxu1 %v6677_v57  ;;  %v6680_v57 = vld [vmem:[%s14125_s0 + $0x15a0] sm:$0xff]  ;;  %v6485_v20 = vld [vmem:[%s14125_s0 + $0xf88] sm:$0xff] }
 0x275   :  { %14804 = vst [vmem:[#allocation335_spill] sm:$0xff] %v12144_v0  ;;  %14805 = vst [vmem:[#allocation336_spill] sm:$0xff] %v12146_v13  ;;  %8458 = vmatprep.mubr.f32.mxu0 %v6482_v10  ;;  %8784 = vmatprep.mubr.f32.mxu1 %v6678_v30  ;;  %v6681_v14 = vld [vmem:[%s14125_s0 + $0x15a8] sm:$0xff]  ;;  %v6488_v0 = vld [vmem:[%s14125_s0 + $0xfa0] sm:$0xff] }
 0x277   :  { %v12162_v33 = vpop.f32.mrb[192].mxu0  ;;  %v12164_v10 = vpop.f32.mrb[192].mxu1 }
 0x278   :  { %14806 = vst [vmem:[#allocation337_spill] sm:$0xff] %v12162_v33  ;;  %14807 = vst [vmem:[#allocation338_spill] sm:$0xff] %v12164_v10  ;;  %v12168_v30 = vpop.f32.mrb[193].mxu0  ;;  %v12170_v13 = vpop.f32.mrb[193].mxu1  ;;  %8459 = vmatmul.mubr.f32.gmra.mrb[42].mxu0 %v6483_v59  ;;  %8785 = vmatmul.mubr.f32.gmra.mrb[42].mxu1 %v6679_v3  ;;  %v6682_v3 = vld [vmem:[%s14125_s0 + $0x15b0] sm:$0xff]  ;;  %v6487_v10 = vld [vmem:[%s14125_s0 + $0xf98] sm:$0xff] }
 0x279   :  { %14808 = vst [vmem:[#allocation339_spill] sm:$0xff] %v12168_v30  ;;  %14809 = vst [vmem:[#allocation340_spill] sm:$0xff] %v12170_v13  ;;  %8461 = vmatprep.mubr.f32.mxu0 %v6484_v54  ;;  %8787 = vmatprep.mubr.f32.mxu1 %v6680_v57  ;;  %v6683_v33 = vld [vmem:[%s14125_s0 + $0x15b8] sm:$0xff] }
 0x27b   :  { %v12186_v59 = vpop.f32.mrb[194].mxu0  ;;  %v12188_v54 = vpop.f32.mrb[194].mxu1 }
 0x27c   :  { %14810 = vst [vmem:[#allocation341_spill] sm:$0xff] %v12186_v59  ;;  %14811 = vst [vmem:[#allocation342_spill] sm:$0xff] %v12188_v54  ;;  %v12192_v57 = vpop.f32.mrb[195].mxu0  ;;  %v12194_v13 = vpop.f32.mrb[195].mxu1  ;;  %8462 = vmatmul.mubr.f32.gmra.mrb[44].mxu0 %v6485_v20  ;;  %8788 = vmatmul.mubr.f32.gmra.mrb[44].mxu1 %v6681_v14  ;;  %v6684_v14 = vld [vmem:[%s14125_s0 + $0x15c0] sm:$0xff]  ;;  %v14815_v54 = vmax.f32 %v9862_v52, %v9864_v53  ;;  %v6490_v52 = vld [vmem:[%s14125_s0 + $0xfb0] sm:$0xff] }
 0x27d   :  { %14812 = vst [vmem:[#allocation343_spill] sm:$0xff] %v12192_v57  ;;  %14813 = vst [vmem:[#allocation344_spill] sm:$0xff] %v12194_v13  ;;  %8464 = vmatprep.mubr.f32.mxu0 %v6486_v40  ;;  %8790 = vmatprep.mubr.f32.mxu1 %v6682_v3  ;;  %v14814_v40 = vmax.f32 %v9858_v50, %v9860_v51  ;;  %v6685_v50 = vld [vmem:[%s14125_s0 + $0x15c8] sm:$0xff]  ;;  %v6686_v53 = vld [vmem:[%s14125_s0 + $0x15d0] sm:$0xff] }
 0x27f   :  { %v8307_v20 = vpop.f32.mrb[196].mxu0  ;;  %v8633_v30 = vpop.f32.mrb[196].mxu1 }
 0x280   :  { %v3952_v13 = vmax.f32 %v14814_v40, %v8307_v20  ;;  %v2972_v57 = vpop.f32.mrb[197].mxu0  ;;  %8465 = vmatmul.mubr.f32.gmra.mrb[46].mxu0 %v6487_v10  ;;  %v4410_v3 = vpop.f32.mrb[197].mxu1  ;;  %8791 = vmatmul.mubr.f32.gmra.mrb[46].mxu1 %v6683_v33  ;;  %v14817_v40 = vmax.f32 %v9886_v62, %v9888_v63  ;;  %v6688_v62 = vld [vmem:[%s14125_s0 + $0x15e0] sm:$0xff] }
 0x281   :  { %v3951_v59 = vmax.f32 %v14815_v54, %v2972_v57  ;;  %8467 = vmatprep.mubr.f32.mxu0 %v6488_v0  ;;  %8793 = vmatprep.mubr.f32.mxu1 %v6684_v14  ;;  %v14816_v57 = vmax.f32 %v9882_v60, %v9884_v61  ;;  %v6687_v60 = vld [vmem:[%s14125_s0 + $0x15d8] sm:$0xff] }
 0x282   :  { %v5390_v51 = vmax.f32 %v3952_v13, %v8633_v30 }
 0x283   :  { %v5389_v33 = vmax.f32 %v3951_v59, %v4410_v3  ;;  %v8310_v0 = vpop.f32.mrb[198].mxu0  ;;  %v8636_v10 = vpop.f32.mrb[198].mxu1  ;;  %v6491_v59 = vld [vmem:[%s14125_s0 + $0xfb8] sm:$0xff]  ;;  %v6492_v3 = vld [vmem:[%s14125_s0 + $0xfc0] sm:$0xff] }
 0x284   :  { %v5593_v54 = vadd.f32 %v12219_v23, %v5390_v51  ;;  %v3954_v14 = vmax.f32 %v14816_v57, %v8310_v0  ;;  %v2982_v20 = vpop.f32.mrb[199].mxu0  ;;  %8468 = vmatmul.mubr.f32.gmra.mrb[48].mxu0 %v6489_v55  ;;  %v4420_v13 = vpop.f32.mrb[199].mxu1  ;;  %8794 = vmatmul.mubr.f32.gmra.mrb[48].mxu1 %v6685_v50  ;;  %v14819_v57 = vmax.f32 %v9910_v8, %v9912_v9  ;;  %v6690_v8 = vld [vmem:[%s14125_s0 + $0x15f0] sm:$0xff] }
 0x285   :  { %v5592_v30 = vadd.f32 %v12219_v23, %v5389_v33  ;;  %v3953_v25 = vmax.f32 %v14817_v40, %v2982_v20  ;;  %8470 = vmatprep.mubr.f32.mxu0 %v6490_v52  ;;  %8796 = vmatprep.mubr.f32.mxu1 %v6686_v53  ;;  %v14818_v33 = vmax.f32 %v9906_v6, %v9908_v7  ;;  %v6493_v6 = vld [vmem:[%s14125_s0 + $0xfc8] sm:$0xff] }
 0x286   :  { %v5789_v61 = vmax.f32 %v5593_v54, 0.0  ;;  %v5392_v55 = vmax.f32 %v3954_v14, %v8636_v10  ;;  %v6689_v7 = vld [vmem:[%s14125_s0 + $0x15e8] sm:$0xff] }
 0x287   :  { %v5788_v63 = vmax.f32 %v5592_v30, 0.0  ;;  %v5391_v50 = vmax.f32 %v3953_v25, %v4420_v13  ;;  %v8313_v51 = vpop.f32.mrb[200].mxu0  ;;  %v8639_v52 = vpop.f32.mrb[200].mxu1  ;;  %v6494_v30 = vld [vmem:[%s14125_s0 + $0xfd0] sm:$0xff] }
 0x288   :  { %5985 = vst [vmem:[%s14127_s3 + $0x8] sm:$0xff] %v5789_v61  ;;  %v5595_v53 = vadd.f32 %v12219_v23, %v5392_v55  ;;  %v3956_v0 = vmax.f32 %v14818_v33, %v8313_v51  ;;  %v2992_v10 = vpop.f32.mrb[201].mxu0  ;;  %8471 = vmatmul.mubr.f32.gmra.mrb[50].mxu0 %v6491_v59  ;;  %v4430_v54 = vpop.f32.mrb[201].mxu1  ;;  %8797 = vmatmul.mubr.f32.gmra.mrb[50].mxu1 %v6687_v60 }
 0x289   :  { %5984 = vst [vmem:[%s14127_s3] sm:$0xff] %v5788_v63  ;;  %v5594_v25 = vadd.f32 %v12219_v23, %v5391_v50  ;;  %v3955_v14 = vmax.f32 %v14819_v57, %v2992_v10  ;;  %8473 = vmatprep.mubr.f32.mxu0 %v6492_v3  ;;  %8799 = vmatprep.mubr.f32.mxu1 %v6688_v62 }
 0x28a   :  { %v5791_v20 = vmax.f32 %v5595_v53, 0.0  ;;  %v5394_v13 = vmax.f32 %v3956_v0, %v8639_v52  ;;  %v14820_v55 = vmax.f32 %v9930_v16, %v9932_v17  ;;  %v14821_v51 = vmax.f32 %v9934_v18, %v9936_v19  ;;  %v6495_v16 = vld [vmem:[%s14125_s0 + $0xfd8] sm:$0xff]  ;;  %v6496_v0 = vld [vmem:[%s14125_s0 + $0xfe0] sm:$0xff] }
 0x28b   :  { %v5790_v9 = vmax.f32 %v5594_v25, 0.0  ;;  %v5393_v40 = vmax.f32 %v3955_v14, %v4430_v54  ;;  %v8316_v59 = vpop.f32.mrb[202].mxu0  ;;  %v8642_v60 = vpop.f32.mrb[202].mxu1  ;;  %v6691_v17 = vld [vmem:[%s14125_s0 + $0x15f8] sm:$0xff]  ;;  %v6692_v18 = vld [vmem:[%s14125_s0 + $0x1600] sm:$0xff]  ;;  %v14822_v14 = vmax.f32 %v9954_v26, %v9956_v27  ;;  %v6497_v26 = vld [vmem:[%s14125_s0 + $0xfe8] sm:$0xff] }
 0x28c   :  { %5987 = vst [vmem:[%s14127_s3 + $0x18] sm:$0xff] %v5791_v20  ;;  %v5597_v61 = vadd.f32 %v12219_v23, %v5394_v13  ;;  %v3958_v3 = vmax.f32 %v14820_v55, %v8316_v59  ;;  %v3002_v62 = vpop.f32.mrb[203].mxu0  ;;  %8474 = vmatmul.mubr.f32.gmra.mrb[52].mxu0 %v6493_v6  ;;  %v4440_v63 = vpop.f32.mrb[203].mxu1  ;;  %8800 = vmatmul.mubr.f32.gmra.mrb[52].mxu1 %v6689_v7  ;;  %v6693_v27 = vld [vmem:[%s14125_s0 + $0x1608] sm:$0xff]  ;;  %v6498_v59 = vld [vmem:[%s14125_s0 + $0xff0] sm:$0xff] }
 0x28d   :  { %5986 = vst [vmem:[%s14127_s3 + $0x10] sm:$0xff] %v5790_v9  ;;  %v5596_v50 = vadd.f32 %v12219_v23, %v5393_v40  ;;  %v3957_v52 = vmax.f32 %v14821_v51, %v3002_v62  ;;  %8476 = vmatprep.mubr.f32.mxu0 %v6494_v30  ;;  %8802 = vmatprep.mubr.f32.mxu1 %v6690_v8 }
 0x28e   :  { %v5793_v53 = vmax.f32 %v5597_v61, 0.0  ;;  %v5396_v33 = vmax.f32 %v3958_v3, %v8642_v60  ;;  %v14823_v30 = vmax.f32 %v9958_v28, %v9960_v29  ;;  %v6694_v28 = vld [vmem:[%s14125_s0 + $0x1610] sm:$0xff]  ;;  %v14824_v62 = vmax.f32 %v9978_v36, %v9980_v37  ;;  %v6499_v36 = vld [vmem:[%s14125_s0 + $0xff8] sm:$0xff] }
 0x28f   :  { %v5792_v19 = vmax.f32 %v5596_v50, 0.0  ;;  %v5395_v10 = vmax.f32 %v3957_v52, %v4440_v63  ;;  %v8319_v54 = vpop.f32.mrb[204].mxu0  ;;  %v8645_v25 = vpop.f32.mrb[204].mxu1  ;;  %v6695_v37 = vld [vmem:[%s14125_s0 + $0x1618] sm:$0xff] }
 0x290   :  { %5989 = vst [vmem:[%s14127_s3 + $0x28] sm:$0xff] %v5793_v53  ;;  %v5599_v57 = vadd.f32 %v12219_v23, %v5396_v33  ;;  %v3960_v6 = vmax.f32 %v14822_v14, %v8319_v54  ;;  %v3012_v7 = vpop.f32.mrb[205].mxu0  ;;  %8477 = vmatmul.mubr.f32.gmra.mrb[54].mxu0 %v6495_v16  ;;  %v4450_v20 = vpop.f32.mrb[205].mxu1  ;;  %8803 = vmatmul.mubr.f32.gmra.mrb[54].mxu1 %v6691_v17 }
 0x291   :  { %5988 = vst [vmem:[%s14127_s3 + $0x20] sm:$0xff] %v5792_v19  ;;  %v5598_v13 = vadd.f32 %v12219_v23, %v5395_v10  ;;  %v3959_v8 = vmax.f32 %v14823_v30, %v3012_v7  ;;  %8479 = vmatprep.mubr.f32.mxu0 %v6496_v0  ;;  %8805 = vmatprep.mubr.f32.mxu1 %v6692_v18  ;;  %v6500_v0 = vld [vmem:[%s14125_s0 + $0x1000] sm:$0xff] }
 0x292   :  { %v5795_v9 = vmax.f32 %v5599_v57, 0.0  ;;  %v5398_v40 = vmax.f32 %v3960_v6, %v8645_v25  ;;  %v14825_v16 = vmax.f32 %v9982_v38, %v9984_v39  ;;  %v6696_v38 = vld [vmem:[%s14125_s0 + $0x1620] sm:$0xff]  ;;  %v14826_v25 = vmax.f32 %v10002_v46, %v10004_v47  ;;  %v6501_v46 = vld [vmem:[%s14125_s0 + $0x1008] sm:$0xff] }
 0x293   :  { %v5794_v29 = vmax.f32 %v5598_v13, 0.0  ;;  %v5397_v60 = vmax.f32 %v3959_v8, %v4450_v20  ;;  %v8322_v61 = vpop.f32.mrb[206].mxu0  ;;  %v8648_v55 = vpop.f32.mrb[206].mxu1  ;;  %v14827_v20 = vmax.f32 %v10006_v48, %v10008_v49  ;;  %v6697_v47 = vld [vmem:[%s14125_s0 + $0x1628] sm:$0xff]  ;;  %v6698_v48 = vld [vmem:[%s14125_s0 + $0x1630] sm:$0xff] }
 0x294   :  { %5991 = vst [vmem:[%s14127_s3 + $0x38] sm:$0xff] %v5795_v9  ;;  %v5601_v3 = vadd.f32 %v12219_v23, %v5398_v40  ;;  %v3962_v63 = vmax.f32 %v14824_v62, %v8322_v61  ;;  %v3022_v50 = vpop.f32.mrb[207].mxu0  ;;  %8480 = vmatmul.mubr.f32.gmra.mrb[56].mxu0 %v6497_v26  ;;  %v4460_v51 = vpop.f32.mrb[207].mxu1  ;;  %8806 = vmatmul.mubr.f32.gmra.mrb[56].mxu1 %v6693_v27  ;;  %v6502_v26 = vld [vmem:[%s14125_s0 + $0x1010] sm:$0xff] }
 0x295   :  { %5990 = vst [vmem:[%s14127_s3 + $0x30] sm:$0xff] %v5794_v29  ;;  %v5600_v52 = vadd.f32 %v12219_v23, %v5397_v60  ;;  %v3961_v17 = vmax.f32 %v14825_v16, %v3022_v50  ;;  %8482 = vmatprep.mubr.f32.mxu0 %v6498_v59  ;;  %8808 = vmatprep.mubr.f32.mxu1 %v6694_v28 }
 0x296   :  { %v5797_v53 = vmax.f32 %v5601_v3, 0.0  ;;  %v5400_v33 = vmax.f32 %v3962_v63, %v8648_v55  ;;  %v14828_v28 = vmax.f32 %v10026_v4, %v10028_v5  ;;  %v14829_v3 = vmax.f32 %v10030_v11, %v10032_v12  ;;  %v6503_v4 = vld [vmem:[%s14125_s0 + $0x1018] sm:$0xff]  ;;  %v6700_v11 = vld [vmem:[%s14125_s0 + $0x1640] sm:$0xff] }
 0x297   :  { %v5796_v39 = vmax.f32 %v5600_v52, 0.0  ;;  %v5399_v18 = vmax.f32 %v3961_v17, %v4460_v51  ;;  %v8325_v19 = vpop.f32.mrb[208].mxu0  ;;  %v8651_v10 = vpop.f32.mrb[208].mxu1  ;;  %v6699_v5 = vld [vmem:[%s14125_s0 + $0x1638] sm:$0xff]  ;;  %v6504_v51 = vld [vmem:[%s14125_s0 + $0x1020] sm:$0xff] }
 0x298   :  { %5993 = vst [vmem:[%s14127_s3 + $0x48] sm:$0xff] %v5797_v53  ;;  %v5603_v54 = vadd.f32 %v12219_v23, %v5400_v33  ;;  %v3964_v57 = vmax.f32 %v14826_v25, %v8325_v19  ;;  %v3032_v14 = vpop.f32.mrb[209].mxu0  ;;  %8483 = vmatmul.mubr.f32.gmra.mrb[58].mxu0 %v6499_v36  ;;  %v4470_v6 = vpop.f32.mrb[209].mxu1  ;;  %8809 = vmatmul.mubr.f32.gmra.mrb[58].mxu1 %v6695_v37 }
 0x299   :  { %5992 = vst [vmem:[%s14127_s3 + $0x40] sm:$0xff] %v5796_v39  ;;  %v5602_v7 = vadd.f32 %v12219_v23, %v5399_v18  ;;  %v3963_v13 = vmax.f32 %v14827_v20, %v3032_v14  ;;  %8485 = vmatprep.mubr.f32.mxu0 %v6500_v0  ;;  %8811 = vmatprep.mubr.f32.mxu1 %v6696_v38 }
 0x29a   :  { %v5799_v30 = vmax.f32 %v5603_v54, 0.0  ;;  %v5402_v8 = vmax.f32 %v3964_v57, %v8651_v10  ;;  %v14830_v37 = vmax.f32 %v10050_v31, %v10052_v32  ;;  %v14831_v39 = vmax.f32 %v10054_v34, %v10056_v35  ;;  %v6505_v31 = vld [vmem:[%s14125_s0 + $0x1028] sm:$0xff]  ;;  %v6506_v54 = vld [vmem:[%s14125_s0 + $0x1030] sm:$0xff] }
 0x29b   :  { %v5798_v49 = vmax.f32 %v5602_v7, 0.0  ;;  %v5401_v27 = vmax.f32 %v3963_v13, %v4470_v6  ;;  %v8328_v9 = vpop.f32.mrb[210].mxu0  ;;  %v8654_v40 = vpop.f32.mrb[210].mxu1  ;;  %v6701_v32 = vld [vmem:[%s14125_s0 + $0x1648] sm:$0xff]  ;;  %v6702_v34 = vld [vmem:[%s14125_s0 + $0x1650] sm:$0xff]  ;;  %v14832_v7 = vmax.f32 %v10074_v1, %v10076_v2  ;;  %v6507_v1 = vld [vmem:[%s14125_s0 + $0x1038] sm:$0xff] }
 0x29c   :  { %5995 = vst [vmem:[%s14127_s3 + $0x58] sm:$0xff] %v5799_v30  ;;  %v5605_v59 = vadd.f32 %v12219_v23, %v5402_v8  ;;  %v3966_v29 = vmax.f32 %v14828_v28, %v8328_v9  ;;  %v3042_v60 = vpop.f32.mrb[211].mxu0  ;;  %8486 = vmatmul.mubr.f32.gmra.mrb[60].mxu0 %v6501_v46  ;;  %v4480_v61 = vpop.f32.mrb[211].mxu1  ;;  %8812 = vmatmul.mubr.f32.gmra.mrb[60].mxu1 %v6697_v47  ;;  %v6703_v2 = vld [vmem:[%s14125_s0 + $0x1658] sm:$0xff] }
 0x29d   :  { %5994 = vst [vmem:[%s14127_s3 + $0x50] sm:$0xff] %v5798_v49  ;;  %v5604_v55 = vadd.f32 %v12219_v23, %v5401_v27  ;;  %v3965_v62 = vmax.f32 %v14829_v3, %v3042_v60  ;;  %8488 = vmatprep.mubr.f32.mxu0 %v6502_v26  ;;  %8814 = vmatprep.mubr.f32.mxu1 %v6698_v48  ;;  %v6508_v49 = vld [vmem:[%s14125_s0 + $0x1040] sm:$0xff] }
 0x29e   :  { %v5801_v63 = vmax.f32 %v5605_v59, 0.0  ;;  %v5404_v50 = vmax.f32 %v3966_v29, %v8654_v40  ;;  %v14833_v30 = vmax.f32 %v10078_v15, %v10080_v21  ;;  %v6704_v15 = vld [vmem:[%s14125_s0 + $0x1660] sm:$0xff]  ;;  %v14834_v28 = vmax.f32 %v10098_v56, %v10100_v58  ;;  %v6509_v56 = vld [vmem:[%s14125_s0 + $0x1048] sm:$0xff] }
 0x29f   :  { %v5800_v12 = vmax.f32 %v5604_v55, 0.0  ;;  %v5403_v52 = vmax.f32 %v3965_v62, %v4480_v61  ;;  %v8331_v16 = vpop.f32.mrb[212].mxu0  ;;  %v8657_v17 = vpop.f32.mrb[212].mxu1  ;;  %v14835_v3 = vmax.f32 %v10102_v24, %v10104_v22  ;;  %v6705_v58 = vld [vmem:[%s14125_s0 + $0x1668] sm:$0xff]  ;;  %v6706_v22 = vld [vmem:[%s14125_s0 + $0x1670] sm:$0xff] }
 0x2a0   :  { %5997 = vst [vmem:[%s14127_s3 + $0x68] sm:$0xff] %v5801_v63  ;;  %v5607_v36 = vadd.f32 %v12219_v23, %v5404_v50  ;;  %v3968_v53 = vmax.f32 %v14830_v37, %v8331_v16  ;;  %v3052_v33 = vpop.f32.mrb[213].mxu0  ;;  %8489 = vmatmul.mubr.f32.gmra.mrb[62].mxu0 %v6503_v4  ;;  %v4490_v0 = vpop.f32.mrb[213].mxu1  ;;  %8815 = vmatmul.mubr.f32.gmra.mrb[62].mxu1 %v6699_v5  ;;  %v6510_v63 = vld [vmem:[%s14125_s0 + $0x1050] sm:$0xff] }
 0x2a1   :  { %5996 = vst [vmem:[%s14127_s3 + $0x60] sm:$0xff] %v5800_v12  ;;  %v5606_v38 = vadd.f32 %v12219_v23, %v5403_v52  ;;  %v3967_v18 = vmax.f32 %v14831_v39, %v3052_v33  ;;  %8491 = vmatprep.mubr.f32.mxu0 %v6504_v51  ;;  %8817 = vmatprep.mubr.f32.mxu1 %v6700_v11  ;;  %v6512_v39 = vld [vmem:[%s14125_s0 + $0x1060] sm:$0xff] }
 0x2a2   :  { %v5803_v19 = vmax.f32 %v5607_v36, 0.0  ;;  %v5406_v10 = vmax.f32 %v3968_v53, %v8657_v17  ;;  %v14836_v52 = vmax.f32 %v10122_v42, %v10124_v44  ;;  %v14837_v53 = vmax.f32 %v10126_v41, %v10128_v43  ;;  %v6511_v42 = vld [vmem:[%s14125_s0 + $0x1058] sm:$0xff]  ;;  %v6708_v43 = vld [vmem:[%s14125_s0 + $0x1680] sm:$0xff] }
 0x2a3   :  { %v5802_v35 = vmax.f32 %v5606_v38, 0.0  ;;  %v5405_v25 = vmax.f32 %v3967_v18, %v4490_v0  ;;  %v8334_v57 = vpop.f32.mrb[214].mxu0  ;;  %v8660_v14 = vpop.f32.mrb[214].mxu1  ;;  %v6707_v44 = vld [vmem:[%s14125_s0 + $0x1678] sm:$0xff] }
 0x2a4   :  { %5999 = vst [vmem:[%s14127_s3 + $0x78] sm:$0xff] %v5803_v19  ;;  %v5609_v6 = vadd.f32 %v12219_v23, %v5406_v10  ;;  %v3970_v20 = vmax.f32 %v14832_v7, %v8334_v57  ;;  %v3062_v13 = vpop.f32.mrb[215].mxu0  ;;  %8492 = vmatmul.mubr.f32.gmra.mrb[64].mxu0 %v6505_v31  ;;  %v4500_v46 = vpop.f32.mrb[215].mxu1  ;;  %8818 = vmatmul.mubr.f32.gmra.mrb[64].mxu1 %v6701_v32  ;;  %v14838_v10 = vld [vmem:[#allocation2_spill] sm:$0xff] }
 0x2a5   :  { %5998 = vst [vmem:[%s14127_s3 + $0x70] sm:$0xff] %v5802_v35  ;;  %v5608_v47 = vadd.f32 %v12219_v23, %v5405_v25  ;;  %v3969_v8 = vmax.f32 %v14833_v30, %v3062_v13  ;;  %8494 = vmatprep.mubr.f32.mxu0 %v6506_v54  ;;  %8820 = vmatprep.mubr.f32.mxu1 %v6702_v34  ;;  %v6709_v13 = vld [vmem:[%s14125_s0 + $0x1688] sm:$0xff]  ;;  %v6514_v30 = vld [vmem:[%s14125_s0 + $0x1070] sm:$0xff] }
 0x2a6   :  { %v5805_v26 = vmax.f32 %v5609_v6, 0.0  ;;  %v5408_v48 = vmax.f32 %v3970_v20, %v8660_v14  ;;  %v14839_v54 = vmax.f32 %v10146_v45, %v14838_v10  ;;  %v14840_v14 = vld [vmem:[#allocation3_spill] sm:$0xff]  ;;  %v14841_v6 = vld [vmem:[#allocation4_spill] sm:$0xff] }
 0x2a7   :  { %v5804_v21 = vmax.f32 %v5608_v47, 0.0  ;;  %v5407_v27 = vmax.f32 %v3969_v8, %v4500_v46  ;;  %v8337_v9 = vpop.f32.mrb[216].mxu0  ;;  %v8663_v40 = vpop.f32.mrb[216].mxu1  ;;  %v14842_v7 = vmax.f32 %v14840_v14, %v14841_v6  ;;  %v6513_v45 = vld [vmem:[%s14125_s0 + $0x1068] sm:$0xff]  ;;  %v6710_v8 = vld [vmem:[%s14125_s0 + $0x1690] sm:$0xff] }
 0x2a8   :  { %6001 = vst [vmem:[%s14127_s3 + $0x88] sm:$0xff] %v5805_v26  ;;  %v5611_v59 = vadd.f32 %v12219_v23, %v5408_v48  ;;  %v3972_v29 = vmax.f32 %v14834_v28, %v8337_v9  ;;  %v3072_v60 = vpop.f32.mrb[217].mxu0  ;;  %8495 = vmatmul.mubr.f32.gmra.mrb[66].mxu0 %v6507_v1  ;;  %v4510_v61 = vpop.f32.mrb[217].mxu1  ;;  %8821 = vmatmul.mubr.f32.gmra.mrb[66].mxu1 %v6703_v2 }
 0x2a9   :  { %6000 = vst [vmem:[%s14127_s3 + $0x80] sm:$0xff] %v5804_v21  ;;  %v5610_v55 = vadd.f32 %v12219_v23, %v5407_v27  ;;  %v3971_v62 = vmax.f32 %v14835_v3, %v3072_v60  ;;  %8497 = vmatprep.mubr.f32.mxu0 %v6508_v49  ;;  %8823 = vmatprep.mubr.f32.mxu1 %v6704_v15  ;;  %v14843_v15 = vld [vmem:[#allocation5_spill] sm:$0xff]  ;;  %v14844_v21 = vld [vmem:[#allocation6_spill] sm:$0xff]  ;;  %v14847_v60 = vld [vmem:[#allocation8_spill] sm:$0xff] }
 0x2aa   :  { %v5807_v4 = vmax.f32 %v5611_v59, 0.0  ;;  %v5410_v5 = vmax.f32 %v3972_v29, %v8663_v40  ;;  %v14845_v27 = vmax.f32 %v14843_v15, %v14844_v21  ;;  %v14846_v29 = vld [vmem:[#allocation7_spill] sm:$0xff]  ;;  %v6515_v3 = vld [vmem:[%s14125_s0 + $0x1078] sm:$0xff] }
 0x2ab   :  { %v5806_v24 = vmax.f32 %v5610_v55, 0.0  ;;  %v5409_v50 = vmax.f32 %v3971_v62, %v4510_v61  ;;  %v8340_v51 = vpop.f32.mrb[218].mxu0  ;;  %v8666_v11 = vpop.f32.mrb[218].mxu1  ;;  %v14848_v61 = vmax.f32 %v14846_v29, %v14847_v60  ;;  %v6711_v62 = vld [vmem:[%s14125_s0 + $0x1698] sm:$0xff] }
 0x2ac   :  { %6003 = vst [vmem:[%s14127_s3 + $0x98] sm:$0xff] %v5807_v4  ;;  %v5613_v12 = vadd.f32 %v12219_v23, %v5410_v5  ;;  %v3974_v16 = vmax.f32 %v14836_v52, %v8340_v51  ;;  %v3082_v17 = vpop.f32.mrb[219].mxu0  ;;  %8498 = vmatmul.mubr.f32.gmra.mrb[68].mxu0 %v6509_v56  ;;  %v4520_v36 = vpop.f32.mrb[219].mxu1  ;;  %8824 = vmatmul.mubr.f32.gmra.mrb[68].mxu1 %v6705_v58  ;;  %v6516_v4 = vld [vmem:[%s14125_s0 + $0x1080] sm:$0xff] }
 0x2ad   :  { %6002 = vst [vmem:[%s14127_s3 + $0x90] sm:$0xff] %v5806_v24  ;;  %v5612_v37 = vadd.f32 %v12219_v23, %v5409_v50  ;;  %v3973_v33 = vmax.f32 %v14837_v53, %v3082_v17  ;;  %8500 = vmatprep.mubr.f32.mxu0 %v6510_v63  ;;  %8826 = vmatprep.mubr.f32.mxu1 %v6706_v22  ;;  %v6712_v5 = vld [vmem:[%s14125_s0 + $0x16a0] sm:$0xff]  ;;  %v14852_v53 = vld [vmem:[#allocation11_spill] sm:$0xff] }
 0x2ae   :  { %v5809_v0 = vmax.f32 %v5613_v12, 0.0  ;;  %v5412_v38 = vmax.f32 %v3974_v16, %v8666_v11  ;;  %v14849_v11 = vld [vmem:[#allocation9_spill] sm:$0xff]  ;;  %v14850_v12 = vld [vmem:[#allocation10_spill] sm:$0xff] }
 0x2af   :  { %v5808_v41 = vmax.f32 %v5612_v37, 0.0  ;;  %v5411_v18 = vmax.f32 %v3973_v33, %v4520_v36  ;;  %v8343_v31 = vpop.f32.mrb[220].mxu0  ;;  %v8669_v32 = vpop.f32.mrb[220].mxu1  ;;  %v14851_v52 = vmax.f32 %v14849_v11, %v14850_v12  ;;  %v14853_v33 = vld [vmem:[#allocation12_spill] sm:$0xff] }
 0x2b0   :  { %6005 = vst [vmem:[%s14127_s3 + $0xa8] sm:$0xff] %v5809_v0  ;;  %v5615_v19 = vadd.f32 %v12219_v23, %v5412_v38  ;;  %v3976_v34 = vmax.f32 %v14839_v54, %v8343_v31  ;;  %v3092_v35 = vpop.f32.mrb[221].mxu0  ;;  %8501 = vmatmul.mubr.f32.gmra.mrb[70].mxu0 %v6511_v42  ;;  %v4530_v25 = vpop.f32.mrb[221].mxu1  ;;  %8827 = vmatmul.mubr.f32.gmra.mrb[70].mxu1 %v6707_v44  ;;  %v6517_v0 = vld [vmem:[%s14125_s0 + $0x1088] sm:$0xff] }
 0x2b1   :  { %6004 = vst [vmem:[%s14127_s3 + $0xa0] sm:$0xff] %v5808_v41  ;;  %v5614_v57 = vadd.f32 %v12219_v23, %v5411_v18  ;;  %v3975_v20 = vmax.f32 %v14842_v7, %v3092_v35  ;;  %8503 = vmatprep.mubr.f32.mxu0 %v6512_v39  ;;  %8829 = vmatprep.mubr.f32.mxu1 %v6708_v43  ;;  %v6713_v38 = vld [vmem:[%s14125_s0 + $0x16a8] sm:$0xff]  ;;  %v6518_v41 = vld [vmem:[%s14125_s0 + $0x1090] sm:$0xff]  ;;  %v14856_v35 = vld [vmem:[#allocation14_spill] sm:$0xff] }
 0x2b2   :  { %v5811_v46 = vmax.f32 %v5615_v19, 0.0  ;;  %v5414_v47 = vmax.f32 %v3976_v34, %v8669_v32  ;;  %v14854_v42 = vmax.f32 %v14852_v53, %v14853_v33  ;;  %v6714_v18 = vld [vmem:[%s14125_s0 + $0x16b0] sm:$0xff]  ;;  %v14855_v34 = vld [vmem:[#allocation13_spill] sm:$0xff] }
 0x2b3   :  { %v5810_v1 = vmax.f32 %v5614_v57, 0.0  ;;  %v5413_v2 = vmax.f32 %v3975_v20, %v4530_v25  ;;  %v8346_v26 = vpop.f32.mrb[222].mxu0  ;;  %v8672_v48 = vpop.f32.mrb[222].mxu1  ;;  %v14857_v25 = vmax.f32 %v14855_v34, %v14856_v35  ;;  %v14858_v20 = vld [vmem:[#allocation15_spill] sm:$0xff] }
 0x2b4   :  { %6007 = vst [vmem:[%s14127_s3 + $0xb8] sm:$0xff] %v5811_v46  ;;  %v5617_v49 = vadd.f32 %v12219_v23, %v5414_v47  ;;  %v3978_v9 = vmax.f32 %v14845_v27, %v8346_v26  ;;  %v3102_v40 = vpop.f32.mrb[223].mxu0  ;;  %8504 = vmatmul.mubr.f32.gmra.mrb[72].mxu0 %v6513_v45  ;;  %v4540_v59 = vpop.f32.mrb[223].mxu1  ;;  %8830 = vmatmul.mubr.f32.gmra.mrb[72].mxu1 %v6709_v13  ;;  %v14859_v45 = vld [vmem:[#allocation16_spill] sm:$0xff]  ;;  %v6519_v47 = vld [vmem:[%s14125_s0 + $0x1098] sm:$0xff]  ;;  %v6716_v26 = vld [vmem:[%s14125_s0 + $0x16c0] sm:$0xff] }
 0x2b5   :  { %6006 = vst [vmem:[%s14127_s3 + $0xb0] sm:$0xff] %v5810_v1  ;;  %v5616_v28 = vadd.f32 %v12219_v23, %v5413_v2  ;;  %v3977_v55 = vmax.f32 %v14848_v61, %v3102_v40  ;;  %8506 = vmatprep.mubr.f32.mxu0 %v6514_v30  ;;  %8832 = vmatprep.mubr.f32.mxu1 %v6710_v8  ;;  %v6715_v30 = vld [vmem:[%s14125_s0 + $0x16b8] sm:$0xff]  ;;  %v6520_v2 = vld [vmem:[%s14125_s0 + $0x10a0] sm:$0xff] }
 0x2b6   :  { %v5813_v56 = vmax.f32 %v5617_v49, 0.0  ;;  %v5416_v58 = vmax.f32 %v3978_v9, %v8672_v48  ;;  %v14860_v13 = vmax.f32 %v14858_v20, %v14859_v45  ;;  %v14861_v9 = vld [vmem:[#allocation17_spill] sm:$0xff]  ;;  %v14862_v40 = vld [vmem:[#allocation18_spill] sm:$0xff] }
 0x2b7   :  { %v5812_v63 = vmax.f32 %v5616_v28, 0.0  ;;  %v5415_v22 = vmax.f32 %v3977_v55, %v4540_v59  ;;  %v8349_v24 = vpop.f32.mrb[224].mxu0  ;;  %v8675_v50 = vpop.f32.mrb[224].mxu1  ;;  %v14863_v59 = vmax.f32 %v14861_v9, %v14862_v40  ;;  %v14864_v55 = vld [vmem:[#allocation19_spill] sm:$0xff] }
 0x2b8   :  { %6009 = vst [vmem:[%s14127_s3 + $0xc8] sm:$0xff] %v5813_v56  ;;  %v5619_v51 = vadd.f32 %v12219_v23, %v5416_v58  ;;  %v3980_v16 = vmax.f32 %v14851_v52, %v8349_v24  ;;  %v3112_v17 = vpop.f32.mrb[225].mxu0  ;;  %8507 = vmatmul.mubr.f32.gmra.mrb[74].mxu0 %v6515_v3  ;;  %v4550_v36 = vpop.f32.mrb[225].mxu1  ;;  %8833 = vmatmul.mubr.f32.gmra.mrb[74].mxu1 %v6711_v62  ;;  %v14865_v3 = vld [vmem:[#allocation20_spill] sm:$0xff]  ;;  %v6521_v58 = vld [vmem:[%s14125_s0 + $0x10a8] sm:$0xff] }
 0x2b9   :  { %6008 = vst [vmem:[%s14127_s3 + $0xc0] sm:$0xff] %v5812_v63  ;;  %v5618_v37 = vadd.f32 %v12219_v23, %v5415_v22  ;;  %v3979_v44 = vmax.f32 %v14854_v42, %v3112_v17  ;;  %8509 = vmatprep.mubr.f32.mxu0 %v6516_v4  ;;  %8835 = vmatprep.mubr.f32.mxu1 %v6712_v5  ;;  %v6717_v4 = vld [vmem:[%s14125_s0 + $0x16c8] sm:$0xff]  ;;  %v6522_v22 = vld [vmem:[%s14125_s0 + $0x10b0] sm:$0xff]  ;;  %v14868_v17 = vld [vmem:[#allocation22_spill] sm:$0xff] }
 0x2ba   :  { %v5815_v39 = vmax.f32 %v5619_v51, 0.0  ;;  %v5418_v43 = vmax.f32 %v3980_v16, %v8675_v50  ;;  %v14866_v62 = vmax.f32 %v14864_v55, %v14865_v3  ;;  %v6718_v24 = vld [vmem:[%s14125_s0 + $0x16d0] sm:$0xff]  ;;  %v14867_v16 = vld [vmem:[#allocation21_spill] sm:$0xff] }
 0x2bb   :  { %v5814_v31 = vmax.f32 %v5618_v37, 0.0  ;;  %v5417_v32 = vmax.f32 %v3979_v44, %v4550_v36  ;;  %v8352_v19 = vpop.f32.mrb[226].mxu0  ;;  %v8678_v10 = vpop.f32.mrb[226].mxu1  ;;  %v14869_v36 = vmax.f32 %v14867_v16, %v14868_v17  ;;  %v14870_v44 = vld [vmem:[#allocation23_spill] sm:$0xff] }
 0x2bc   :  { %6011 = vst [vmem:[%s14127_s3 + $0xd8] sm:$0xff] %v5815_v39  ;;  %v5621_v54 = vadd.f32 %v12219_v23, %v5418_v43  ;;  %v3982_v57 = vmax.f32 %v14857_v25, %v8352_v19  ;;  %v3122_v14 = vpop.f32.mrb[227].mxu0  ;;  %8510 = vmatmul.mubr.f32.gmra.mrb[76].mxu0 %v6517_v0  ;;  %v4560_v6 = vpop.f32.mrb[227].mxu1  ;;  %8836 = vmatmul.mubr.f32.gmra.mrb[76].mxu1 %v6713_v38  ;;  %v14871_v0 = vld [vmem:[#allocation24_spill] sm:$0xff]  ;;  %v6523_v43 = vld [vmem:[%s14125_s0 + $0x10b8] sm:$0xff]  ;;  %v6720_v19 = vld [vmem:[%s14125_s0 + $0x16e0] sm:$0xff] }
 0x2bd   :  { %6010 = vst [vmem:[%s14127_s3 + $0xd0] sm:$0xff] %v5814_v31  ;;  %v5620_v7 = vadd.f32 %v12219_v23, %v5417_v32  ;;  %v3981_v46 = vmax.f32 %v14860_v13, %v3122_v14  ;;  %8512 = vmatprep.mubr.f32.mxu0 %v6518_v41  ;;  %8838 = vmatprep.mubr.f32.mxu1 %v6714_v18  ;;  %v6719_v41 = vld [vmem:[%s14125_s0 + $0x16d8] sm:$0xff]  ;;  %v6524_v32 = vld [vmem:[%s14125_s0 + $0x10c0] sm:$0xff] }
 0x2be   :  { %v5817_v8 = vmax.f32 %v5621_v54, 0.0  ;;  %v5420_v1 = vmax.f32 %v3982_v57, %v8678_v10  ;;  %v14872_v38 = vmax.f32 %v14870_v44, %v14871_v0  ;;  %v14873_v57 = vld [vmem:[#allocation25_spill] sm:$0xff]  ;;  %v14874_v14 = vld [vmem:[#allocation26_spill] sm:$0xff] }
 0x2bf   :  { %v5816_v48 = vmax.f32 %v5620_v7, 0.0  ;;  %v5419_v49 = vmax.f32 %v3981_v46, %v4560_v6  ;;  %v8355_v15 = vpop.f32.mrb[228].mxu0  ;;  %v8681_v21 = vpop.f32.mrb[228].mxu1  ;;  %v14875_v6 = vmax.f32 %v14873_v57, %v14874_v14  ;;  %v14876_v46 = vld [vmem:[#allocation27_spill] sm:$0xff] }
 0x2c0   :  { %6013 = vst [vmem:[%s14127_s3 + $0xe8] sm:$0xff] %v5817_v8  ;;  %v5623_v27 = vadd.f32 %v12219_v23, %v5420_v1  ;;  %v3984_v28 = vmax.f32 %v14863_v59, %v8355_v15  ;;  %v3132_v29 = vpop.f32.mrb[229].mxu0  ;;  %8513 = vmatmul.mubr.f32.gmra.mrb[78].mxu0 %v6519_v47  ;;  %v4570_v60 = vpop.f32.mrb[229].mxu1  ;;  %8839 = vmatmul.mubr.f32.gmra.mrb[78].mxu1 %v6715_v30  ;;  %v14877_v47 = vld [vmem:[#allocation28_spill] sm:$0xff]  ;;  %v6525_v1 = vld [vmem:[%s14125_s0 + $0x10c8] sm:$0xff] }
 0x2c1   :  { %6012 = vst [vmem:[%s14127_s3 + $0xe0] sm:$0xff] %v5816_v48  ;;  %v5622_v61 = vadd.f32 %v12219_v23, %v5419_v49  ;;  %v3983_v56 = vmax.f32 %v14866_v62, %v3132_v29  ;;  %8515 = vmatprep.mubr.f32.mxu0 %v6520_v2  ;;  %8841 = vmatprep.mubr.f32.mxu1 %v6716_v26  ;;  %v6721_v2 = vld [vmem:[%s14125_s0 + $0x16e8] sm:$0xff]  ;;  %v6526_v49 = vld [vmem:[%s14125_s0 + $0x10d0] sm:$0xff]  ;;  %v14880_v29 = vld [vmem:[#allocation30_spill] sm:$0xff] }
 0x2c2   :  { %v5819_v5 = vmax.f32 %v5623_v27, 0.0  ;;  %v5422_v63 = vmax.f32 %v3984_v28, %v8681_v21  ;;  %v14878_v30 = vmax.f32 %v14876_v46, %v14877_v47  ;;  %v6722_v15 = vld [vmem:[%s14125_s0 + $0x16f0] sm:$0xff]  ;;  %v14879_v28 = vld [vmem:[#allocation29_spill] sm:$0xff] }
 0x2c3   :  { %v5818_v50 = vmax.f32 %v5622_v61, 0.0  ;;  %v5421_v51 = vmax.f32 %v3983_v56, %v4570_v60  ;;  %v8358_v11 = vpop.f32.mrb[230].mxu0  ;;  %v8684_v12 = vpop.f32.mrb[230].mxu1  ;;  %v14881_v60 = vmax.f32 %v14879_v28, %v14880_v29  ;;  %v14882_v56 = vld [vmem:[#allocation31_spill] sm:$0xff] }
 0x2c4   :  { %6015 = vst [vmem:[%s14127_s3 + $0xf8] sm:$0xff] %v5819_v5  ;;  %v5625_v52 = vadd.f32 %v12219_v23, %v5422_v63  ;;  %v3986_v37 = vmax.f32 %v14869_v36, %v8358_v11  ;;  %v3142_v53 = vpop.f32.mrb[231].mxu0  ;;  %8516 = vmatmul.mubr.f32.gmra.mrb[80].mxu0 %v6521_v58  ;;  %v4580_v33 = vpop.f32.mrb[231].mxu1  ;;  %8842 = vmatmul.mubr.f32.gmra.mrb[80].mxu1 %v6717_v4  ;;  %v14883_v58 = vld [vmem:[#allocation32_spill] sm:$0xff]  ;;  %v6527_v63 = vld [vmem:[%s14125_s0 + $0x10d8] sm:$0xff]  ;;  %v6724_v11 = vld [vmem:[%s14125_s0 + $0x1700] sm:$0xff] }
 0x2c5   :  { %6014 = vst [vmem:[%s14127_s3 + $0xf0] sm:$0xff] %v5818_v50  ;;  %v5624_v42 = vadd.f32 %v12219_v23, %v5421_v51  ;;  %v3985_v39 = vmax.f32 %v14872_v38, %v3142_v53  ;;  %8518 = vmatprep.mubr.f32.mxu0 %v6522_v22  ;;  %8844 = vmatprep.mubr.f32.mxu1 %v6718_v24  ;;  %v6723_v22 = vld [vmem:[%s14125_s0 + $0x16f8] sm:$0xff]  ;;  %v6528_v51 = vld [vmem:[%s14125_s0 + $0x10e0] sm:$0xff] }
 0x2c6   :  { %v5821_v18 = vmax.f32 %v5625_v52, 0.0  ;;  %v5424_v31 = vmax.f32 %v3986_v37, %v8684_v12  ;;  %v14884_v4 = vmax.f32 %v14882_v56, %v14883_v58  ;;  %v14885_v37 = vld [vmem:[#allocation33_spill] sm:$0xff]  ;;  %v14886_v53 = vld [vmem:[#allocation34_spill] sm:$0xff] }
 0x2c7   :  { %v5820_v10 = vmax.f32 %v5624_v42, 0.0  ;;  %v5423_v54 = vmax.f32 %v3985_v39, %v4580_v33  ;;  %v8361_v34 = vpop.f32.mrb[232].mxu0  ;;  %v8687_v35 = vpop.f32.mrb[232].mxu1  ;;  %v14887_v33 = vmax.f32 %v14885_v37, %v14886_v53  ;;  %v14888_v39 = vld [vmem:[#allocation35_spill] sm:$0xff] }
 0x2c8   :  { %6017 = vst [vmem:[%s14127_s3 + $0x108] sm:$0xff] %v5821_v18  ;;  %v5627_v25 = vadd.f32 %v12219_v23, %v5424_v31  ;;  %v3988_v7 = vmax.f32 %v14875_v6, %v8361_v34  ;;  %v3152_v20 = vpop.f32.mrb[233].mxu0  ;;  %8519 = vmatmul.mubr.f32.gmra.mrb[82].mxu0 %v6523_v43  ;;  %v4590_v45 = vpop.f32.mrb[233].mxu1  ;;  %8845 = vmatmul.mubr.f32.gmra.mrb[82].mxu1 %v6719_v41  ;;  %v14889_v43 = vld [vmem:[#allocation36_spill] sm:$0xff]  ;;  %v6529_v31 = vld [vmem:[%s14125_s0 + $0x10e8] sm:$0xff] }
 0x2c9   :  { %6016 = vst [vmem:[%s14127_s3 + $0x100] sm:$0xff] %v5820_v10  ;;  %v5626_v13 = vadd.f32 %v12219_v23, %v5423_v54  ;;  %v3987_v8 = vmax.f32 %v14878_v30, %v3152_v20  ;;  %8521 = vmatprep.mubr.f32.mxu0 %v6524_v32  ;;  %8847 = vmatprep.mubr.f32.mxu1 %v6720_v19  ;;  %v6725_v32 = vld [vmem:[%s14125_s0 + $0x1708] sm:$0xff]  ;;  %v6530_v54 = vld [vmem:[%s14125_s0 + $0x10f0] sm:$0xff]  ;;  %v14892_v20 = vld [vmem:[#allocation38_spill] sm:$0xff] }
 0x2ca   :  { %v5823_v26 = vmax.f32 %v5627_v25, 0.0  ;;  %v5426_v48 = vmax.f32 %v3988_v7, %v8687_v35  ;;  %v14890_v41 = vmax.f32 %v14888_v39, %v14889_v43  ;;  %v6726_v34 = vld [vmem:[%s14125_s0 + $0x1710] sm:$0xff]  ;;  %v14891_v7 = vld [vmem:[#allocation37_spill] sm:$0xff] }
 0x2cb   :  { %v5822_v21 = vmax.f32 %v5626_v13, 0.0  ;;  %v5425_v27 = vmax.f32 %v3987_v8, %v4590_v45  ;;  %v8364_v9 = vpop.f32.mrb[234].mxu0  ;;  %v8690_v40 = vpop.f32.mrb[234].mxu1  ;;  %v14893_v45 = vmax.f32 %v14891_v7, %v14892_v20  ;;  %v14894_v8 = vld [vmem:[#allocation39_spill] sm:$0xff]  ;;  %v12831_v20 = vld [vmem:[%s14126_s2] ss:$0 sm:$0xff] }
 0x2cc   :  { %6019 = vst [vmem:[%s14127_s3 + $0x118] sm:$0xff] %v5823_v26  ;;  %v5629_v59 = vadd.f32 %v12219_v23, %v5426_v48  ;;  %v3990_v61 = vmax.f32 %v14881_v60, %v8364_v9  ;;  %v3162_v55 = vpop.f32.mrb[235].mxu0  ;;  %8522 = vmatmul.mubr.f32.gmra.mrb[84].mxu0 %v6525_v1  ;;  %v4600_v3 = vpop.f32.mrb[235].mxu1  ;;  %8848 = vmatmul.mubr.f32.gmra.mrb[84].mxu1 %v6721_v2  ;;  %v14895_v1 = vld [vmem:[#allocation40_spill] sm:$0xff]  ;;  %v6531_v48 = vld [vmem:[%s14125_s0 + $0x10f8] sm:$0xff]  ;;  %v6728_v9 = vld [vmem:[%s14125_s0 + $0x1720] sm:$0xff] }
 0x2cd   :  { %6018 = vst [vmem:[%s14127_s3 + $0x110] sm:$0xff] %v5822_v21  ;;  %v5628_v62 = vadd.f32 %v12219_v23, %v5425_v27  ;;  %v3989_v5 = vmax.f32 %v14884_v4, %v3162_v55  ;;  %8524 = vmatprep.mubr.f32.mxu0 %v6526_v49  ;;  %8850 = vmatprep.mubr.f32.mxu1 %v6722_v15  ;;  %v6727_v49 = vld [vmem:[%s14125_s0 + $0x1718] sm:$0xff]  ;;  %v6532_v27 = vld [vmem:[%s14125_s0 + $0x1100] sm:$0xff] }
 0x2ce   :  { %v5825_v24 = vmax.f32 %v5629_v59, 0.0  ;;  %v5428_v50 = vmax.f32 %v3990_v61, %v8690_v40  ;;  %v14896_v2 = vmax.f32 %v14894_v8, %v14895_v1  ;;  %v14897_v61 = vld [vmem:[#allocation41_spill] sm:$0xff]  ;;  %v14898_v55 = vld [vmem:[#allocation42_spill] sm:$0xff] }
 0x2cf   :  { %v5824_v12 = vmax.f32 %v5628_v62, 0.0  ;;  %v5427_v52 = vmax.f32 %v3989_v5, %v4600_v3  ;;  %v8367_v16 = vpop.f32.mrb[236].mxu0  ;;  %v8693_v17 = vpop.f32.mrb[236].mxu1  ;;  %v14899_v3 = vmax.f32 %v14897_v61, %v14898_v55  ;;  %v14900_v5 = vld [vmem:[#allocation43_spill] sm:$0xff] }
 0x2d0   :  { %6021 = vst [vmem:[%s14127_s3 + $0x128] sm:$0xff] %v5825_v24  ;;  %v5631_v36 = vadd.f32 %v12219_v23, %v5428_v50  ;;  %v3992_v42 = vmax.f32 %v14887_v33, %v8367_v16  ;;  %v3172_v44 = vpop.f32.mrb[237].mxu0  ;;  %8525 = vmatmul.mubr.f32.gmra.mrb[86].mxu0 %v6527_v63  ;;  %v4610_v0 = vpop.f32.mrb[237].mxu1  ;;  %8851 = vmatmul.mubr.f32.gmra.mrb[86].mxu1 %v6723_v22  ;;  %v14901_v63 = vld [vmem:[#allocation44_spill] sm:$0xff]  ;;  %v6533_v50 = vld [vmem:[%s14125_s0 + $0x1108] sm:$0xff] }
 0x2d1   :  { %6020 = vst [vmem:[%s14127_s3 + $0x120] sm:$0xff] %v5824_v12  ;;  %v5630_v38 = vadd.f32 %v12219_v23, %v5427_v52  ;;  %v3991_v18 = vmax.f32 %v14890_v41, %v3172_v44  ;;  %8527 = vmatprep.mubr.f32.mxu0 %v6528_v51  ;;  %8853 = vmatprep.mubr.f32.mxu1 %v6724_v11  ;;  %v6729_v51 = vld [vmem:[%s14125_s0 + $0x1728] sm:$0xff]  ;;  %v6534_v52 = vld [vmem:[%s14125_s0 + $0x1110] sm:$0xff]  ;;  %v14904_v44 = vld [vmem:[#allocation46_spill] sm:$0xff] }
 0x2d2   :  { %v5827_v19 = vmax.f32 %v5631_v36, 0.0  ;;  %v5430_v10 = vmax.f32 %v3992_v42, %v8693_v17  ;;  %v14902_v22 = vmax.f32 %v14900_v5, %v14901_v63  ;;  %v6730_v16 = vld [vmem:[%s14125_s0 + $0x1730] sm:$0xff]  ;;  %v14903_v42 = vld [vmem:[#allocation45_spill] sm:$0xff] }
 0x2d3   :  { %v5826_v35 = vmax.f32 %v5630_v38, 0.0  ;;  %v5429_v25 = vmax.f32 %v3991_v18, %v4610_v0  ;;  %v8370_v57 = vpop.f32.mrb[238].mxu0  ;;  %v8696_v14 = vpop.f32.mrb[238].mxu1  ;;  %v14905_v0 = vmax.f32 %v14903_v42, %v14904_v44  ;;  %v14906_v18 = vld [vmem:[#allocation47_spill] sm:$0xff] }
 0x2d4   :  { %6023 = vst [vmem:[%s14127_s3 + $0x138] sm:$0xff] %v5827_v19  ;;  %v5633_v6 = vadd.f32 %v12219_v23, %v5430_v10  ;;  %v3994_v13 = vmax.f32 %v14893_v45, %v8370_v57  ;;  %v3182_v46 = vpop.f32.mrb[239].mxu0  ;;  %8528 = vmatmul.mubr.f32.gmra.mrb[88].mxu0 %v6529_v31  ;;  %v4620_v47 = vpop.f32.mrb[239].mxu1  ;;  %8854 = vmatmul.mubr.f32.gmra.mrb[88].mxu1 %v6725_v32  ;;  %v14907_v31 = vld [vmem:[#allocation48_spill] sm:$0xff]  ;;  %v6535_v10 = vld [vmem:[%s14125_s0 + $0x1118] sm:$0xff] }
 0x2d5   :  { %6022 = vst [vmem:[%s14127_s3 + $0x130] sm:$0xff] %v5826_v35  ;;  %v5632_v30 = vadd.f32 %v12219_v23, %v5429_v25  ;;  %v3993_v26 = vmax.f32 %v14896_v2, %v3182_v46  ;;  %8530 = vmatprep.mubr.f32.mxu0 %v6530_v54  ;;  %8856 = vmatprep.mubr.f32.mxu1 %v6726_v34  ;;  %v6731_v54 = vld [vmem:[%s14125_s0 + $0x1738] sm:$0xff]  ;;  %v6732_v25 = vld [vmem:[%s14125_s0 + $0x1740] sm:$0xff] }
 0x2d6   :  { %v5829_v15 = vmax.f32 %v5633_v6, 0.0  ;;  %v5432_v21 = vmax.f32 %v3994_v13, %v8696_v14  ;;  %v14908_v32 = vmax.f32 %v14906_v18, %v14907_v31  ;;  %v14909_v13 = vld [vmem:[#allocation49_spill] sm:$0xff]  ;;  %v14910_v46 = vld [vmem:[#allocation50_spill] sm:$0xff] }
 0x2d7   :  { %v5828_v40 = vmax.f32 %v5632_v30, 0.0  ;;  %v5431_v59 = vmax.f32 %v3993_v26, %v4620_v47  ;;  %v8373_v28 = vpop.f32.mrb[240].mxu0  ;;  %v8699_v29 = vpop.f32.mrb[240].mxu1  ;;  %v14911_v47 = vmax.f32 %v14909_v13, %v14910_v46  ;;  %v14912_v26 = vld [vmem:[#allocation51_spill] sm:$0xff] }
 0x2d8   :  { %6025 = vst [vmem:[%s14127_s3 + $0x148] sm:$0xff] %v5829_v15  ;;  %v5635_v60 = vadd.f32 %v12219_v23, %v5432_v21  ;;  %v3996_v62 = vmax.f32 %v14899_v3, %v8373_v28  ;;  %v3192_v56 = vpop.f32.mrb[241].mxu0  ;;  %8531 = vmatmul.mubr.f32.gmra.mrb[90].mxu0 %v6531_v48  ;;  %v4630_v58 = vpop.f32.mrb[241].mxu1  ;;  %8857 = vmatmul.mubr.f32.gmra.mrb[90].mxu1 %v6727_v49  ;;  %v14913_v48 = vld [vmem:[#allocation52_spill] sm:$0xff]  ;;  %v6537_v21 = vld [vmem:[%s14125_s0 + $0x1128] sm:$0xff] }
 0x2d9   :  { %6024 = vst [vmem:[%s14127_s3 + $0x140] sm:$0xff] %v5828_v40  ;;  %v5634_v4 = vadd.f32 %v12219_v23, %v5431_v59  ;;  %v3995_v24 = vmax.f32 %v14902_v22, %v3192_v56  ;;  %8533 = vmatprep.mubr.f32.mxu0 %v6532_v27  ;;  %8859 = vmatprep.mubr.f32.mxu1 %v6728_v9  ;;  %v6733_v27 = vld [vmem:[%s14125_s0 + $0x1748] sm:$0xff]  ;;  %v6538_v59 = vld [vmem:[%s14125_s0 + $0x1130] sm:$0xff]  ;;  %v14916_v56 = vld [vmem:[#allocation54_spill] sm:$0xff] }
 0x2da   :  { %v5831_v11 = vmax.f32 %v5635_v60, 0.0  ;;  %v5434_v12 = vmax.f32 %v3996_v62, %v8699_v29  ;;  %v14914_v49 = vmax.f32 %v14912_v26, %v14913_v48  ;;  %v6734_v28 = vld [vmem:[%s14125_s0 + $0x1750] sm:$0xff]  ;;  %v14915_v62 = vld [vmem:[#allocation53_spill] sm:$0xff] }
 0x2db   :  { %v5830_v17 = vmax.f32 %v5634_v4, 0.0  ;;  %v5433_v36 = vmax.f32 %v3995_v24, %v4630_v58  ;;  %v8376_v37 = vpop.f32.mrb[242].mxu0  ;;  %v8702_v53 = vpop.f32.mrb[242].mxu1  ;;  %v14917_v58 = vmax.f32 %v14915_v62, %v14916_v56  ;;  %v14918_v24 = vld [vmem:[#allocation55_spill] sm:$0xff] }
 0x2dc   :  { %6027 = vst [vmem:[%s14127_s3 + $0x158] sm:$0xff] %v5831_v11  ;;  %v5637_v33 = vadd.f32 %v12219_v23, %v5434_v12  ;;  %v3998_v38 = vmax.f32 %v14905_v0, %v8376_v37  ;;  %v3202_v39 = vpop.f32.mrb[243].mxu0  ;;  %8534 = vmatmul.mubr.f32.gmra.mrb[92].mxu0 %v6533_v50  ;;  %v4640_v43 = vpop.f32.mrb[243].mxu1  ;;  %8860 = vmatmul.mubr.f32.gmra.mrb[92].mxu1 %v6729_v51  ;;  %v14919_v50 = vld [vmem:[#allocation56_spill] sm:$0xff]  ;;  %v6539_v12 = vld [vmem:[%s14125_s0 + $0x1138] sm:$0xff]  ;;  %v6736_v37 = vld [vmem:[%s14125_s0 + $0x1760] sm:$0xff] }
 0x2dd   :  { %6026 = vst [vmem:[%s14127_s3 + $0x150] sm:$0xff] %v5830_v17  ;;  %v5636_v41 = vadd.f32 %v12219_v23, %v5433_v36  ;;  %v3997_v19 = vmax.f32 %v14908_v32, %v3202_v39  ;;  %8536 = vmatprep.mubr.f32.mxu0 %v6534_v52  ;;  %8862 = vmatprep.mubr.f32.mxu1 %v6730_v16  ;;  %v6536_v23 = vld [vmem:[%s14125_s0 + $0x1120] sm:$0xff]  ;;  %v6735_v52 = vld [vmem:[%s14125_s0 + $0x1758] sm:$0xff] }
 0x2de   :  { %v5833_v34 = vmax.f32 %v5637_v33, 0.0  ;;  %v5436_v35 = vmax.f32 %v3998_v38, %v8702_v53  ;;  %v14920_v51 = vmax.f32 %v14918_v24, %v14919_v50  ;;  %v6540_v36 = vld [vmem:[%s14125_s0 + $0x1140] sm:$0xff]  ;;  %v14921_v38 = vld [vmem:[#allocation57_spill] sm:$0xff] }
 0x2df   :  { %v5832_v57 = vmax.f32 %v5636_v41, 0.0  ;;  %v5435_v14 = vmax.f32 %v3997_v19, %v4640_v43  ;;  %v8379_v6 = vpop.f32.mrb[244].mxu0  ;;  %v8705_v7 = vpop.f32.mrb[244].mxu1  ;;  %v14922_v39 = vld [vmem:[#allocation58_spill] sm:$0xff]  ;;  %v14924_v19 = vld [vmem:[#allocation59_spill] sm:$0xff] }
 0x2e0   :  { %6029 = vst [vmem:[%s14127_s3 + $0x168] sm:$0xff] %v5833_v34  ;;  %v5639_v45 = vadd.f32 %v12831_v20, %v5436_v35  ;;  %v4000_v30 = vmax.f32 %v14911_v47, %v8379_v6  ;;  %v3212_v8 = vpop.f32.mrb[245].mxu0  ;;  %8537 = vmatmul.mubr.f32.gmra.mrb[94].mxu0 %v6535_v10  ;;  %v4650_v1 = vpop.f32.mrb[245].mxu1  ;;  %8863 = vmatmul.mubr.f32.gmra.mrb[94].mxu1 %v6731_v54  ;;  %v14925_v10 = vld [vmem:[#allocation60_spill] sm:$0xff]  ;;  %v6541_v35 = vld [vmem:[%s14125_s0 + $0x1148] sm:$0xff] }
 0x2e1   :  { %6028 = vst [vmem:[%s14127_s3 + $0x160] sm:$0xff] %v5832_v57  ;;  %v5638_v2 = vadd.f32 %v12831_v20, %v5435_v14  ;;  %v3999_v15 = vmax.f32 %v14914_v49, %v3212_v8  ;;  %8539 = vmatprep.mubr.f32.mxu0 %v6536_v23  ;;  %8865 = vmatprep.mubr.f32.mxu1 %v6732_v25  ;;  %v6737_v23 = vld [vmem:[%s14125_s0 + $0x1768] sm:$0xff]  ;;  %v6542_v14 = vld [vmem:[%s14125_s0 + $0x1150] sm:$0xff]  ;;  %v14928_v8 = vld [vmem:[#allocation62_spill] sm:$0xff] }
 0x2e2   :  { %v5835_v9 = vmax.f32 %v5639_v45, 0.0  ;;  %v5438_v40 = vmax.f32 %v4000_v30, %v8705_v7  ;;  %v14923_v43 = vmax.f32 %v14921_v38, %v14922_v39  ;;  %v14926_v54 = vmax.f32 %v14924_v19, %v14925_v10  ;;  %v6738_v6 = vld [vmem:[%s14125_s0 + $0x1770] sm:$0xff]  ;;  %v14927_v30 = vld [vmem:[#allocation61_spill] sm:$0xff] }
 0x2e3   :  { %v5834_v29 = vmax.f32 %v5638_v2, 0.0  ;;  %v5437_v60 = vmax.f32 %v3999_v15, %v4650_v1  ;;  %v8382_v61 = vpop.f32.mrb[246].mxu0  ;;  %v8708_v55 = vpop.f32.mrb[246].mxu1  ;;  %v14929_v1 = vmax.f32 %v14927_v30, %v14928_v8  ;;  %v14930_v15 = vld [vmem:[#allocation63_spill] sm:$0xff] }
 0x2e4   :  { %6031 = vst [vmem:[%s14127_s3 + $0x178] sm:$0xff] %v5835_v9  ;;  %v5641_v3 = vadd.f32 %v12831_v20, %v5438_v40  ;;  %v4002_v4 = vmax.f32 %v14917_v58, %v8382_v61  ;;  %v3222_v5 = vpop.f32.mrb[247].mxu0  ;;  %8540 = vmatmul.mubr.f32.gmra.mrb[96].mxu0 %v6537_v21  ;;  %v4660_v63 = vpop.f32.mrb[247].mxu1  ;;  %8866 = vmatmul.mubr.f32.gmra.mrb[96].mxu1 %v6733_v27  ;;  %v14931_v21 = vld [vmem:[#allocation64_spill] sm:$0xff]  ;;  %v6543_v40 = vld [vmem:[%s14125_s0 + $0x1158] sm:$0xff]  ;;  %v6740_v61 = vld [vmem:[%s14125_s0 + $0x1780] sm:$0xff] }
 0x2e5   :  { %6030 = vst [vmem:[%s14127_s3 + $0x170] sm:$0xff] %v5834_v29  ;;  %v5640_v22 = vadd.f32 %v12831_v20, %v5437_v60  ;;  %v4001_v11 = vmax.f32 %v14920_v51, %v3222_v5  ;;  %8542 = vmatprep.mubr.f32.mxu0 %v6538_v59  ;;  %8868 = vmatprep.mubr.f32.mxu1 %v6734_v28  ;;  %v6739_v59 = vld [vmem:[%s14125_s0 + $0x1778] sm:$0xff]  ;;  %v6544_v60 = vld [vmem:[%s14125_s0 + $0x1160] sm:$0xff] }
 0x2e6   :  { %v5837_v16 = vmax.f32 %v5641_v3, 0.0  ;;  %v5440_v17 = vmax.f32 %v4002_v4, %v8708_v55  ;;  %v14932_v27 = vmax.f32 %v14930_v15, %v14931_v21  ;;  %v14933_v4 = vld [vmem:[#allocation65_spill] sm:$0xff]  ;;  %v14934_v5 = vld [vmem:[#allocation66_spill] sm:$0xff] }
 0x2e7   :  { %v5836_v53 = vmax.f32 %v5640_v22, 0.0  ;;  %v5439_v33 = vmax.f32 %v4001_v11, %v4660_v63  ;;  %v8385_v42 = vpop.f32.mrb[248].mxu0  ;;  %v8711_v44 = vpop.f32.mrb[248].mxu1  ;;  %v14935_v63 = vmax.f32 %v14933_v4, %v14934_v5  ;;  %v14936_v11 = vld [vmem:[#allocation67_spill] sm:$0xff] }
 0x2e8   :  { %6033 = vst [vmem:[%s14127_s3 + $0x188] sm:$0xff] %v5837_v16  ;;  %v5643_v0 = vadd.f32 %v12831_v20, %v5440_v17  ;;  %v4004_v41 = vmax.f32 %v14923_v43, %v8385_v42  ;;  %v3232_v18 = vpop.f32.mrb[249].mxu0  ;;  %8543 = vmatmul.mubr.f32.gmra.mrb[98].mxu0 %v6539_v12  ;;  %v4670_v31 = vpop.f32.mrb[249].mxu1  ;;  %8869 = vmatmul.mubr.f32.gmra.mrb[98].mxu1 %v6735_v52  ;;  %v14937_v12 = vld [vmem:[#allocation68_spill] sm:$0xff]  ;;  %v6545_v17 = vld [vmem:[%s14125_s0 + $0x1168] sm:$0xff] }
 0x2e9   :  { %6032 = vst [vmem:[%s14127_s3 + $0x180] sm:$0xff] %v5836_v53  ;;  %v5642_v32 = vadd.f32 %v12831_v20, %v5439_v33  ;;  %v4003_v34 = vmax.f32 %v14926_v54, %v3232_v18  ;;  %8545 = vmatprep.mubr.f32.mxu0 %v6540_v36  ;;  %8871 = vmatprep.mubr.f32.mxu1 %v6736_v37  ;;  %v6741_v36 = vld [vmem:[%s14125_s0 + $0x1788] sm:$0xff]  ;;  %v6546_v33 = vld [vmem:[%s14125_s0 + $0x1170] sm:$0xff]  ;;  %v14940_v18 = vld [vmem:[#allocation70_spill] sm:$0xff] }
 0x2ea   :  { %v5839_v25 = vmax.f32 %v5643_v0, 0.0  ;;  %v5442_v57 = vmax.f32 %v4004_v41, %v8711_v44  ;;  %v14938_v52 = vmax.f32 %v14936_v11, %v14937_v12  ;;  %v6742_v42 = vld [vmem:[%s14125_s0 + $0x1790] sm:$0xff]  ;;  %v14939_v41 = vld [vmem:[#allocation69_spill] sm:$0xff] }
 0x2eb   :  { %v5838_v7 = vmax.f32 %v5642_v32, 0.0  ;;  %v5441_v45 = vmax.f32 %v4003_v34, %v4670_v31  ;;  %v8388_v13 = vpop.f32.mrb[250].mxu0  ;;  %v8714_v46 = vpop.f32.mrb[250].mxu1  ;;  %v14941_v31 = vmax.f32 %v14939_v41, %v14940_v18  ;;  %v14942_v34 = vld [vmem:[#allocation71_spill] sm:$0xff] }
 0x2ec   :  { %6035 = vst [vmem:[%s14127_s3 + $0x198] sm:$0xff] %v5839_v25  ;;  %v5645_v47 = vadd.f32 %v12831_v20, %v5442_v57  ;;  %v4006_v2 = vmax.f32 %v14929_v1, %v8388_v13  ;;  %v3242_v26 = vpop.f32.mrb[251].mxu0  ;;  %8546 = vmatmul.mubr.f32.gmra.mrb[100].mxu0 %v6541_v35  ;;  %v4680_v48 = vpop.f32.mrb[251].mxu1  ;;  %8872 = vmatmul.mubr.f32.gmra.mrb[100].mxu1 %v6737_v23  ;;  %v14943_v35 = vld [vmem:[#allocation72_spill] sm:$0xff]  ;;  %v6547_v57 = vld [vmem:[%s14125_s0 + $0x1178] sm:$0xff]  ;;  %v6744_v13 = vld [vmem:[%s14125_s0 + $0x17a0] sm:$0xff] }
 0x2ed   :  { %6034 = vst [vmem:[%s14127_s3 + $0x190] sm:$0xff] %v5838_v7  ;;  %v5644_v49 = vadd.f32 %v12831_v20, %v5441_v45  ;;  %v4005_v9 = vmax.f32 %v14932_v27, %v3242_v26  ;;  %8548 = vmatprep.mubr.f32.mxu0 %v6542_v14  ;;  %8874 = vmatprep.mubr.f32.mxu1 %v6738_v6  ;;  %v6743_v14 = vld [vmem:[%s14125_s0 + $0x1798] sm:$0xff]  ;;  %v6548_v45 = vld [vmem:[%s14125_s0 + $0x1180] sm:$0xff] }
 0x2ee   :  { %v5841_v28 = vmax.f32 %v5645_v47, 0.0  ;;  %v5444_v29 = vmax.f32 %v4006_v2, %v8714_v46  ;;  %v14944_v23 = vmax.f32 %v14942_v34, %v14943_v35  ;;  %v14945_v2 = vld [vmem:[#allocation73_spill] sm:$0xff]  ;;  %v14946_v26 = vld [vmem:[#allocation74_spill] sm:$0xff] }
 0x2ef   :  { %v5840_v55 = vmax.f32 %v5644_v49, 0.0  ;;  %v5443_v3 = vmax.f32 %v4005_v9, %v4680_v48  ;;  %v8391_v62 = vpop.f32.mrb[252].mxu0  ;;  %v8717_v56 = vpop.f32.mrb[252].mxu1  ;;  %v14947_v48 = vmax.f32 %v14945_v2, %v14946_v26  ;;  %v14948_v9 = vld [vmem:[#allocation75_spill] sm:$0xff] }
 0x2f0   :  { %6037 = vst [vmem:[%s14127_s3 + $0x1a8] sm:$0xff] %v5841_v28  ;;  %v5647_v58 = vadd.f32 %v12831_v20, %v5444_v29  ;;  %v4008_v22 = vmax.f32 %v14935_v63, %v8391_v62  ;;  %v3252_v24 = vpop.f32.mrb[253].mxu0  ;;  %8549 = vmatmul.mubr.f32.gmra.mrb[102].mxu0 %v6543_v40  ;;  %v4690_v50 = vpop.f32.mrb[253].mxu1  ;;  %8875 = vmatmul.mubr.f32.gmra.mrb[102].mxu1 %v6739_v59  ;;  %v14949_v40 = vld [vmem:[#allocation76_spill] sm:$0xff]  ;;  %v6549_v29 = vld [vmem:[%s14125_s0 + $0x1188] sm:$0xff] }
 0x2f1   :  { %6036 = vst [vmem:[%s14127_s3 + $0x1a0] sm:$0xff] %v5840_v55  ;;  %v5646_v51 = vadd.f32 %v12831_v20, %v5443_v3  ;;  %v4007_v16 = vmax.f32 %v14938_v52, %v3252_v24  ;;  %8551 = vmatprep.mubr.f32.mxu0 %v6544_v60  ;;  %8877 = vmatprep.mubr.f32.mxu1 %v6740_v61  ;;  %v6745_v60 = vld [vmem:[%s14125_s0 + $0x17a8] sm:$0xff]  ;;  %v6550_v3 = vld [vmem:[%s14125_s0 + $0x1190] sm:$0xff]  ;;  %v14952_v24 = vld [vmem:[#allocation78_spill] sm:$0xff] }
 0x2f2   :  { %v5843_v37 = vmax.f32 %v5647_v58, 0.0  ;;  %v5446_v53 = vmax.f32 %v4008_v22, %v8717_v56  ;;  %v14950_v59 = vmax.f32 %v14948_v9, %v14949_v40  ;;  %v6746_v62 = vld [vmem:[%s14125_s0 + $0x17b0] sm:$0xff]  ;;  %v14951_v22 = vld [vmem:[#allocation77_spill] sm:$0xff] }
 0x2f3   :  { %v5842_v44 = vmax.f32 %v5646_v51, 0.0  ;;  %v5445_v0 = vmax.f32 %v4007_v16, %v4690_v50  ;;  %v8394_v38 = vpop.f32.mrb[254].mxu0  ;;  %v8720_v39 = vpop.f32.mrb[254].mxu1  ;;  %v14953_v50 = vmax.f32 %v14951_v22, %v14952_v24  ;;  %v14954_v16 = vld [vmem:[#allocation79_spill] sm:$0xff] }
 0x2f4   :  { %6039 = vst [vmem:[%s14127_s3 + $0x1b8] sm:$0xff] %v5843_v37  ;;  %v5649_v43 = vadd.f32 %v12831_v20, %v5446_v53  ;;  %v4010_v32 = vmax.f32 %v14941_v31, %v8394_v38  ;;  %v3262_v19 = vpop.f32.mrb[255].mxu0  ;;  %8552 = vmatmul.mubr.f32.gmra.mrb[104].mxu0 %v6545_v17  ;;  %v4700_v10 = vpop.f32.mrb[255].mxu1  ;;  %8878 = vmatmul.mubr.f32.gmra.mrb[104].mxu1 %v6741_v36  ;;  %v14955_v17 = vld [vmem:[#allocation80_spill] sm:$0xff]  ;;  %v6551_v53 = vld [vmem:[%s14125_s0 + $0x1198] sm:$0xff]  ;;  %v6748_v38 = vld [vmem:[%s14125_s0 + $0x17c0] sm:$0xff] }
 0x2f5   :  { %6038 = vst [vmem:[%s14127_s3 + $0x1b0] sm:$0xff] %v5842_v44  ;;  %v5648_v54 = vadd.f32 %v12831_v20, %v5445_v0  ;;  %v4009_v25 = vmax.f32 %v14944_v23, %v3262_v19  ;;  %8554 = vmatprep.mubr.f32.mxu0 %v6546_v33  ;;  %8880 = vmatprep.mubr.f32.mxu1 %v6742_v42  ;;  %v6747_v33 = vld [vmem:[%s14125_s0 + $0x17b8] sm:$0xff]  ;;  %v6552_v0 = vld [vmem:[%s14125_s0 + $0x11a0] sm:$0xff] }
 0x2f6   :  { %v5845_v6 = vmax.f32 %v5649_v43, 0.0  ;;  %v5448_v7 = vmax.f32 %v4010_v32, %v8720_v39  ;;  %v14956_v36 = vmax.f32 %v14954_v16, %v14955_v17  ;;  %v14957_v32 = vld [vmem:[#allocation81_spill] sm:$0xff]  ;;  %v14958_v19 = vld [vmem:[#allocation82_spill] sm:$0xff] }
 0x2f7   :  { %v5844_v46 = vmax.f32 %v5648_v54, 0.0  ;;  %v5447_v47 = vmax.f32 %v4009_v25, %v4700_v10  ;;  %v8397_v30 = vpop.f32.mrb[0].mxu0  ;;  %v8723_v8 = vpop.f32.mrb[0].mxu1  ;;  %v14959_v10 = vmax.f32 %v14957_v32, %v14958_v19  ;;  %v14960_v25 = vld [vmem:[#allocation83_spill] sm:$0xff] }
 0x2f8   :  { %6041 = vst [vmem:[%s14127_s3 + $0x1c8] sm:$0xff] %v5845_v6  ;;  %v5651_v1 = vadd.f32 %v12831_v20, %v5448_v7  ;;  %v4012_v49 = vmax.f32 %v14947_v48, %v8397_v30  ;;  %v3272_v15 = vpop.f32.mrb[1].mxu0  ;;  %8555 = vmatmul.mubr.f32.gmra.mrb[106].mxu0 %v6547_v57  ;;  %v4710_v21 = vpop.f32.mrb[1].mxu1  ;;  %8881 = vmatmul.mubr.f32.gmra.mrb[106].mxu1 %v6743_v14  ;;  %v14961_v57 = vld [vmem:[#allocation84_spill] sm:$0xff]  ;;  %v6553_v7 = vld [vmem:[%s14125_s0 + $0x11a8] sm:$0xff] }
 0x2f9   :  { %6040 = vst [vmem:[%s14127_s3 + $0x1c0] sm:$0xff] %v5844_v46  ;;  %v5650_v27 = vadd.f32 %v12831_v20, %v5447_v47  ;;  %v4011_v28 = vmax.f32 %v14950_v59, %v3272_v15  ;;  %8557 = vmatprep.mubr.f32.mxu0 %v6548_v45  ;;  %8883 = vmatprep.mubr.f32.mxu1 %v6744_v13  ;;  %v6749_v45 = vld [vmem:[%s14125_s0 + $0x17c8] sm:$0xff]  ;;  %v6554_v47 = vld [vmem:[%s14125_s0 + $0x11b0] sm:$0xff]  ;;  %v14964_v15 = vld [vmem:[#allocation86_spill] sm:$0xff] }
 0x2fa   :  { %v5847_v61 = vmax.f32 %v5651_v1, 0.0  ;;  %v5450_v55 = vmax.f32 %v4012_v49, %v8723_v8  ;;  %v14962_v14 = vmax.f32 %v14960_v25, %v14961_v57  ;;  %v6750_v30 = vld [vmem:[%s14125_s0 + $0x17d0] sm:$0xff]  ;;  %v14963_v49 = vld [vmem:[#allocation85_spill] sm:$0xff] }
 0x2fb   :  { %v5846_v56 = vmax.f32 %v5650_v27, 0.0  ;;  %v5449_v58 = vmax.f32 %v4011_v28, %v4710_v21  ;;  %v8400_v4 = vpop.f32.mrb[2].mxu0  ;;  %v8726_v5 = vpop.f32.mrb[2].mxu1  ;;  %v14965_v21 = vmax.f32 %v14963_v49, %v14964_v15  ;;  %v14966_v28 = vld [vmem:[#allocation87_spill] sm:$0xff] }
 0x2fc   :  { %6043 = vst [vmem:[%s14127_s3 + $0x1d8] sm:$0xff] %v5847_v61  ;;  %v5653_v63 = vadd.f32 %v12831_v20, %v5450_v55  ;;  %v4014_v51 = vmax.f32 %v14953_v50, %v8400_v4  ;;  %v3282_v11 = vpop.f32.mrb[3].mxu0  ;;  %8558 = vmatmul.mubr.f32.gmra.mrb[108].mxu0 %v6549_v29  ;;  %v4720_v12 = vpop.f32.mrb[3].mxu1  ;;  %8884 = vmatmul.mubr.f32.gmra.mrb[108].mxu1 %v6745_v60  ;;  %v14967_v29 = vld [vmem:[#allocation88_spill] sm:$0xff]  ;;  %v6555_v55 = vld [vmem:[%s14125_s0 + $0x11b8] sm:$0xff]  ;;  %v6752_v4 = vld [vmem:[%s14125_s0 + $0x17e0] sm:$0xff] }
 0x2fd   :  { %6042 = vst [vmem:[%s14127_s3 + $0x1d0] sm:$0xff] %v5846_v56  ;;  %v5652_v52 = vadd.f32 %v12831_v20, %v5449_v58  ;;  %v4013_v37 = vmax.f32 %v14956_v36, %v3282_v11  ;;  %8560 = vmatprep.mubr.f32.mxu0 %v6550_v3  ;;  %8886 = vmatprep.mubr.f32.mxu1 %v6746_v62  ;;  %v6751_v3 = vld [vmem:[%s14125_s0 + $0x17d8] sm:$0xff]  ;;  %v6556_v58 = vld [vmem:[%s14125_s0 + $0x11c0] sm:$0xff] }
 0x2fe   :  { %v5849_v42 = vmax.f32 %v5653_v63, 0.0  ;;  %v5452_v44 = vmax.f32 %v4014_v51, %v8726_v5  ;;  %v14968_v60 = vmax.f32 %v14966_v28, %v14967_v29  ;;  %v14969_v51 = vld [vmem:[#allocation89_spill] sm:$0xff]  ;;  %v14970_v11 = vld [vmem:[#allocation90_spill] sm:$0xff] }
 0x2ff   :  { %v5848_v39 = vmax.f32 %v5652_v52, 0.0  ;;  %v5451_v43 = vmax.f32 %v4013_v37, %v4720_v12  ;;  %v8403_v41 = vpop.f32.mrb[4].mxu0  ;;  %v8729_v18 = vpop.f32.mrb[4].mxu1  ;;  %v14971_v12 = vmax.f32 %v14969_v51, %v14970_v11  ;;  %v14972_v37 = vld [vmem:[#allocation91_spill] sm:$0xff] }
 0x300   :  { %6045 = vst [vmem:[%s14127_s3 + $0x1e8] sm:$0xff] %v5849_v42  ;;  %v5655_v31 = vadd.f32 %v12831_v20, %v5452_v44  ;;  %v4016_v54 = vmax.f32 %v14959_v10, %v8403_v41  ;;  %v3292_v34 = vpop.f32.mrb[5].mxu0  ;;  %8561 = vmatmul.mubr.f32.gmra.mrb[110].mxu0 %v6551_v53  ;;  %v4730_v35 = vpop.f32.mrb[5].mxu1  ;;  %8887 = vmatmul.mubr.f32.gmra.mrb[110].mxu1 %v6747_v33  ;;  %v14973_v53 = vld [vmem:[#allocation92_spill] sm:$0xff]  ;;  %v6557_v44 = vld [vmem:[%s14125_s0 + $0x11c8] sm:$0xff] }
 0x301   :  { %6044 = vst [vmem:[%s14127_s3 + $0x1e0] sm:$0xff] %v5848_v39  ;;  %v5654_v23 = vadd.f32 %v12831_v20, %v5451_v43  ;;  %v4015_v6 = vmax.f32 %v14962_v14, %v3292_v34  ;;  %8563 = vmatprep.mubr.f32.mxu0 %v6552_v0  ;;  %8889 = vmatprep.mubr.f32.mxu1 %v6748_v38  ;;  %v6753_v0 = vld [vmem:[%s14125_s0 + $0x17e8] sm:$0xff]  ;;  %v6558_v43 = vld [vmem:[%s14125_s0 + $0x11d0] sm:$0xff]  ;;  %v14976_v34 = vld [vmem:[#allocation94_spill] sm:$0xff] }
 0x302   :  { %v5851_v13 = vmax.f32 %v5655_v31, 0.0  ;;  %v5454_v46 = vmax.f32 %v4016_v54, %v8729_v18  ;;  %v14974_v33 = vmax.f32 %v14972_v37, %v14973_v53  ;;  %v6754_v41 = vld [vmem:[%s14125_s0 + $0x17f0] sm:$0xff]  ;;  %v14975_v54 = vld [vmem:[#allocation93_spill] sm:$0xff] }
 0x303   :  { %v5850_v8 = vmax.f32 %v5654_v23, 0.0  ;;  %v5453_v1 = vmax.f32 %v4015_v6, %v4730_v35  ;;  %v8406_v2 = vpop.f32.mrb[6].mxu0  ;;  %v8732_v26 = vpop.f32.mrb[6].mxu1  ;;  %v14977_v35 = vmax.f32 %v14975_v54, %v14976_v34  ;;  %v14978_v6 = vld [vmem:[#allocation95_spill] sm:$0xff] }
 0x304   :  { %6047 = vst [vmem:[%s14127_s3 + $0x1f8] sm:$0xff] %v5851_v13  ;;  %v5657_v48 = vadd.f32 %v12831_v20, %v5454_v46  ;;  %v4018_v27 = vmax.f32 %v14965_v21, %v8406_v2  ;;  %v3302_v9 = vpop.f32.mrb[7].mxu0  ;;  %8564 = vmatmul.mubr.f32.gmra.mrb[112].mxu0 %v6553_v7  ;;  %v4740_v40 = vpop.f32.mrb[7].mxu1  ;;  %8890 = vmatmul.mubr.f32.gmra.mrb[112].mxu1 %v6749_v45  ;;  %v14979_v7 = vld [vmem:[#allocation96_spill] sm:$0xff]  ;;  %v6559_v46 = vld [vmem:[%s14125_s0 + $0x11d8] sm:$0xff]  ;;  %v6756_v2 = vld [vmem:[%s14125_s0 + $0x1800] sm:$0xff] }
 0x305   :  { %6046 = vst [vmem:[%s14127_s3 + $0x1f0] sm:$0xff] %v5850_v8  ;;  %v5656_v59 = vadd.f32 %v12831_v20, %v5453_v1  ;;  %v4017_v61 = vmax.f32 %v14968_v60, %v3302_v9  ;;  %8566 = vmatprep.mubr.f32.mxu0 %v6554_v47  ;;  %8892 = vmatprep.mubr.f32.mxu1 %v6750_v30  ;;  %v6755_v47 = vld [vmem:[%s14125_s0 + $0x17f8] sm:$0xff]  ;;  %v6560_v1 = vld [vmem:[%s14125_s0 + $0x11e0] sm:$0xff] }
 0x306   :  { %v5853_v62 = vmax.f32 %v5657_v48, 0.0  ;;  %v5456_v56 = vmax.f32 %v4018_v27, %v8732_v26  ;;  %v14980_v45 = vmax.f32 %v14978_v6, %v14979_v7  ;;  %v14981_v27 = vld [vmem:[#allocation97_spill] sm:$0xff]  ;;  %v14982_v9 = vld [vmem:[#allocation98_spill] sm:$0xff] }
 0x307   :  { %v5852_v5 = vmax.f32 %v5656_v59, 0.0  ;;  %v5455_v63 = vmax.f32 %v4017_v61, %v4740_v40  ;;  %v8409_v22 = vpop.f32.mrb[8].mxu0  ;;  %v8735_v24 = vpop.f32.mrb[8].mxu1  ;;  %v14983_v40 = vmax.f32 %v14981_v27, %v14982_v9  ;;  %v14984_v61 = vld [vmem:[#allocation99_spill] sm:$0xff] }
 0x308   :  { %6049 = vst [vmem:[%s14127_s3 + $0x208] sm:$0xff] %v5853_v62  ;;  %v5659_v50 = vadd.f32 %v12831_v20, %v5456_v56  ;;  %v4020_v52 = vmax.f32 %v14971_v12, %v8409_v22  ;;  %v3312_v16 = vpop.f32.mrb[9].mxu0  ;;  %8567 = vmatmul.mubr.f32.gmra.mrb[114].mxu0 %v6555_v55  ;;  %v4750_v17 = vpop.f32.mrb[9].mxu1  ;;  %8893 = vmatmul.mubr.f32.gmra.mrb[114].mxu1 %v6751_v3  ;;  %v14985_v55 = vld [vmem:[#allocation100_spill] sm:$0xff]  ;;  %v6561_v56 = vld [vmem:[%s14125_s0 + $0x11e8] sm:$0xff] }
 0x309   :  { %6048 = vst [vmem:[%s14127_s3 + $0x200] sm:$0xff] %v5852_v5  ;;  %v5658_v36 = vadd.f32 %v12831_v20, %v5455_v63  ;;  %v4019_v42 = vmax.f32 %v14974_v33, %v3312_v16  ;;  %8569 = vmatprep.mubr.f32.mxu0 %v6556_v58  ;;  %8895 = vmatprep.mubr.f32.mxu1 %v6752_v4  ;;  %v6757_v58 = vld [vmem:[%s14125_s0 + $0x1808] sm:$0xff]  ;;  %v6562_v63 = vld [vmem:[%s14125_s0 + $0x11f0] sm:$0xff]  ;;  %v14988_v16 = vld [vmem:[#allocation102_spill] sm:$0xff] }
 0x30a   :  { %v5855_v38 = vmax.f32 %v5659_v50, 0.0  ;;  %v5458_v39 = vmax.f32 %v4020_v52, %v8735_v24  ;;  %v14986_v3 = vmax.f32 %v14984_v61, %v14985_v55  ;;  %v6758_v22 = vld [vmem:[%s14125_s0 + $0x1810] sm:$0xff]  ;;  %v14987_v52 = vld [vmem:[#allocation101_spill] sm:$0xff] }
 0x30b   :  { %v5854_v18 = vmax.f32 %v5658_v36, 0.0  ;;  %v5457_v31 = vmax.f32 %v4019_v42, %v4750_v17  ;;  %v8412_v32 = vpop.f32.mrb[10].mxu0  ;;  %v8738_v19 = vpop.f32.mrb[10].mxu1  ;;  %v14989_v17 = vmax.f32 %v14987_v52, %v14988_v16  ;;  %v14990_v42 = vld [vmem:[#allocation103_spill] sm:$0xff] }
 0x30c   :  { %6051 = vst [vmem:[%s14127_s3 + $0x218] sm:$0xff] %v5855_v38  ;;  %v5661_v10 = vadd.f32 %v12831_v20, %v5458_v39  ;;  %v4022_v23 = vmax.f32 %v14977_v35, %v8412_v32  ;;  %v3322_v25 = vpop.f32.mrb[11].mxu0  ;;  %8570 = vmatmul.mubr.f32.gmra.mrb[116].mxu0 %v6557_v44  ;;  %v4760_v57 = vpop.f32.mrb[11].mxu1  ;;  %8896 = vmatmul.mubr.f32.gmra.mrb[116].mxu1 %v6753_v0  ;;  %v14991_v44 = vld [vmem:[#allocation104_spill] sm:$0xff]  ;;  %v6563_v39 = vld [vmem:[%s14125_s0 + $0x11f8] sm:$0xff]  ;;  %v6760_v32 = vld [vmem:[%s14125_s0 + $0x1820] sm:$0xff] }
 0x30d   :  { %6050 = vst [vmem:[%s14127_s3 + $0x210] sm:$0xff] %v5854_v18  ;;  %v5660_v14 = vadd.f32 %v12831_v20, %v5457_v31  ;;  %v4021_v13 = vmax.f32 %v14980_v45, %v3322_v25  ;;  %8572 = vmatprep.mubr.f32.mxu0 %v6558_v43  ;;  %8898 = vmatprep.mubr.f32.mxu1 %v6754_v41  ;;  %v6759_v43 = vld [vmem:[%s14125_s0 + $0x1818] sm:$0xff]  ;;  %v6564_v31 = vld [vmem:[%s14125_s0 + $0x1200] sm:$0xff] }
 0x30e   :  { %v5857_v30 = vmax.f32 %v5661_v10, 0.0  ;;  %v5460_v8 = vmax.f32 %v4022_v23, %v8738_v19  ;;  %v14992_v0 = vmax.f32 %v14990_v42, %v14991_v44  ;;  %v14993_v23 = vld [vmem:[#allocation105_spill] sm:$0xff]  ;;  %v14994_v25 = vld [vmem:[#allocation106_spill] sm:$0xff] }
 0x30f   :  { %v5856_v26 = vmax.f32 %v5660_v14, 0.0  ;;  %v5459_v48 = vmax.f32 %v4021_v13, %v4760_v57  ;;  %v8415_v49 = vpop.f32.mrb[12].mxu0  ;;  %v8741_v15 = vpop.f32.mrb[12].mxu1  ;;  %v14995_v57 = vmax.f32 %v14993_v23, %v14994_v25  ;;  %v14996_v13 = vld [vmem:[#allocation107_spill] sm:$0xff] }
 0x310   :  { %6053 = vst [vmem:[%s14127_s3 + $0x228] sm:$0xff] %v5857_v30  ;;  %v5663_v21 = vadd.f32 %v12831_v20, %v5460_v8  ;;  %v4024_v59 = vmax.f32 %v14983_v40, %v8415_v49  ;;  %v3332_v28 = vpop.f32.mrb[13].mxu0  ;;  %8573 = vmatmul.mubr.f32.gmra.mrb[118].mxu0 %v6559_v46  ;;  %v4770_v29 = vpop.f32.mrb[13].mxu1  ;;  %8899 = vmatmul.mubr.f32.gmra.mrb[118].mxu1 %v6755_v47  ;;  %v14997_v46 = vld [vmem:[#allocation108_spill] sm:$0xff]  ;;  %v6565_v8 = vld [vmem:[%s14125_s0 + $0x1208] sm:$0xff] }
 0x311   :  { %6052 = vst [vmem:[%s14127_s3 + $0x220] sm:$0xff] %v5856_v26  ;;  %v5662_v60 = vadd.f32 %v12831_v20, %v5459_v48  ;;  %v4023_v62 = vmax.f32 %v14986_v3, %v3332_v28  ;;  %8575 = vmatprep.mubr.f32.mxu0 %v6560_v1  ;;  %8901 = vmatprep.mubr.f32.mxu1 %v6756_v2  ;;  %v6761_v1 = vld [vmem:[%s14125_s0 + $0x1828] sm:$0xff]  ;;  %v6566_v48 = vld [vmem:[%s14125_s0 + $0x1210] sm:$0xff]  ;;  %v15000_v28 = vld [vmem:[#allocation110_spill] sm:$0xff] }
 0x312   :  { %v5859_v4 = vmax.f32 %v5663_v21, 0.0  ;;  %v5462_v5 = vmax.f32 %v4024_v59, %v8741_v15  ;;  %v14998_v47 = vmax.f32 %v14996_v13, %v14997_v46  ;;  %v6762_v49 = vld [vmem:[%s14125_s0 + $0x1830] sm:$0xff]  ;;  %v14999_v59 = vld [vmem:[#allocation109_spill] sm:$0xff] }
 0x313   :  { %v5858_v24 = vmax.f32 %v5662_v60, 0.0  ;;  %v5461_v50 = vmax.f32 %v4023_v62, %v4770_v29  ;;  %v8418_v51 = vpop.f32.mrb[14].mxu0  ;;  %v8744_v11 = vpop.f32.mrb[14].mxu1  ;;  %v15001_v29 = vmax.f32 %v14999_v59, %v15000_v28  ;;  %v15002_v62 = vld [vmem:[#allocation111_spill] sm:$0xff] }
 0x314   :  { %6055 = vst [vmem:[%s14127_s3 + $0x238] sm:$0xff] %v5859_v4  ;;  %v5665_v12 = vadd.f32 %v12831_v20, %v5462_v5  ;;  %v4026_v36 = vmax.f32 %v14989_v17, %v8418_v51  ;;  %v3342_v37 = vpop.f32.mrb[15].mxu0  ;;  %8576 = vmatmul.mubr.f32.gmra.mrb[120].mxu0 %v6561_v56  ;;  %v4780_v53 = vpop.f32.mrb[15].mxu1  ;;  %8902 = vmatmul.mubr.f32.gmra.mrb[120].mxu1 %v6757_v58  ;;  %v15003_v56 = vld [vmem:[#allocation112_spill] sm:$0xff]  ;;  %v6567_v5 = vld [vmem:[%s14125_s0 + $0x1218] sm:$0xff]  ;;  %v6764_v51 = vld [vmem:[%s14125_s0 + $0x1840] sm:$0xff] }
 0x315   :  { %6054 = vst [vmem:[%s14127_s3 + $0x230] sm:$0xff] %v5858_v24  ;;  %v5664_v33 = vadd.f32 %v12831_v20, %v5461_v50  ;;  %v4025_v38 = vmax.f32 %v14992_v0, %v3342_v37  ;;  %8578 = vmatprep.mubr.f32.mxu0 %v6562_v63  ;;  %8904 = vmatprep.mubr.f32.mxu1 %v6758_v22  ;;  %v6763_v63 = vld [vmem:[%s14125_s0 + $0x1838] sm:$0xff]  ;;  %v6568_v50 = vld [vmem:[%s14125_s0 + $0x1220] sm:$0xff] }
 0x316   :  { %v5861_v41 = vmax.f32 %v5665_v12, 0.0  ;;  %v5464_v18 = vmax.f32 %v4026_v36, %v8744_v11  ;;  %v15004_v58 = vmax.f32 %v15002_v62, %v15003_v56  ;;  %v15005_v36 = vld [vmem:[#allocation113_spill] sm:$0xff]  ;;  %v15006_v37 = vld [vmem:[#allocation114_spill] sm:$0xff] }
 0x317   :  { %v5860_v19 = vmax.f32 %v5664_v33, 0.0  ;;  %v5463_v10 = vmax.f32 %v4025_v38, %v4780_v53  ;;  %v8421_v54 = vpop.f32.mrb[16].mxu0  ;;  %v8747_v34 = vpop.f32.mrb[16].mxu1  ;;  %v15007_v53 = vmax.f32 %v15005_v36, %v15006_v37  ;;  %v15008_v38 = vld [vmem:[#allocation115_spill] sm:$0xff] }
 0x318   :  { %6057 = vst [vmem:[%s14127_s3 + $0x248] sm:$0xff] %v5861_v41  ;;  %v5667_v35 = vadd.f32 %v12831_v20, %v5464_v18  ;;  %v4028_v14 = vmax.f32 %v14995_v57, %v8421_v54  ;;  %v3352_v6 = vpop.f32.mrb[17].mxu0  ;;  %8579 = vmatmul.mubr.f32.gmra.mrb[122].mxu0 %v6563_v39  ;;  %v4790_v7 = vpop.f32.mrb[17].mxu1  ;;  %8905 = vmatmul.mubr.f32.gmra.mrb[122].mxu1 %v6759_v43  ;;  %v15009_v39 = vld [vmem:[#allocation116_spill] sm:$0xff]  ;;  %v6569_v18 = vld [vmem:[%s14125_s0 + $0x1228] sm:$0xff] }
 0x319   :  { %6056 = vst [vmem:[%s14127_s3 + $0x240] sm:$0xff] %v5860_v19  ;;  %v5666_v45 = vadd.f32 %v12831_v20, %v5463_v10  ;;  %v4027_v30 = vmax.f32 %v14998_v47, %v3352_v6  ;;  %8581 = vmatprep.mubr.f32.mxu0 %v6564_v31  ;;  %8907 = vmatprep.mubr.f32.mxu1 %v6760_v32  ;;  %v6765_v31 = vld [vmem:[%s14125_s0 + $0x1848] sm:$0xff]  ;;  %v6570_v10 = vld [vmem:[%s14125_s0 + $0x1230] sm:$0xff]  ;;  %v15012_v6 = vld [vmem:[#allocation118_spill] sm:$0xff] }
 0x31a   :  { %v5863_v2 = vmax.f32 %v5667_v35, 0.0  ;;  %v5466_v26 = vmax.f32 %v4028_v14, %v8747_v34  ;;  %v15010_v43 = vmax.f32 %v15008_v38, %v15009_v39  ;;  %v6766_v54 = vld [vmem:[%s14125_s0 + $0x1850] sm:$0xff]  ;;  %v15011_v14 = vld [vmem:[#allocation117_spill] sm:$0xff] }
 0x31b   :  { %v5862_v15 = vmax.f32 %v5666_v45, 0.0  ;;  %v5465_v21 = vmax.f32 %v4027_v30, %v4790_v7  ;;  %v8424_v27 = vpop.f32.mrb[18].mxu0  ;;  %v8750_v9 = vpop.f32.mrb[18].mxu1  ;;  %v15013_v7 = vmax.f32 %v15011_v14, %v15012_v6  ;;  %v15014_v30 = vld [vmem:[#allocation119_spill] sm:$0xff]  ;;  %v15029_v6 = vld [vmem:[#allocation129_spill] sm:$0xff] }
 0x31c   :  { %6059 = vst [vmem:[%s14127_s3 + $0x258] sm:$0xff] %v5863_v2  ;;  %v5669_v40 = vadd.f32 %v12831_v20, %v5466_v26  ;;  %v4030_v60 = vmax.f32 %v15001_v29, %v8424_v27  ;;  %v3362_v61 = vpop.f32.mrb[19].mxu0  ;;  %8582 = vmatmul.mubr.f32.gmra.mrb[124].mxu0 %v6565_v8  ;;  %v4800_v55 = vpop.f32.mrb[19].mxu1  ;;  %8908 = vmatmul.mubr.f32.gmra.mrb[124].mxu1 %v6761_v1  ;;  %v15015_v8 = vld [vmem:[#allocation120_spill] sm:$0xff]  ;;  %v6571_v26 = vld [vmem:[%s14125_s0 + $0x1238] sm:$0xff]  ;;  %v6768_v27 = vld [vmem:[%s14125_s0 + $0x1860] sm:$0xff] }
 0x31d   :  { %6058 = vst [vmem:[%s14127_s3 + $0x250] sm:$0xff] %v5862_v15  ;;  %v5668_v3 = vadd.f32 %v12831_v20, %v5465_v21  ;;  %v4029_v4 = vmax.f32 %v15004_v58, %v3362_v61  ;;  %8584 = vmatprep.mubr.f32.mxu0 %v6566_v48  ;;  %8910 = vmatprep.mubr.f32.mxu1 %v6762_v49  ;;  %v6767_v48 = vld [vmem:[%s14125_s0 + $0x1858] sm:$0xff]  ;;  %v6572_v21 = vld [vmem:[%s14125_s0 + $0x1240] sm:$0xff] }
 0x31e   :  { %v5865_v22 = vmax.f32 %v5669_v40, 0.0  ;;  %v5468_v24 = vmax.f32 %v4030_v60, %v8750_v9  ;;  %v15016_v1 = vmax.f32 %v15014_v30, %v15015_v8  ;;  %v15017_v60 = vld [vmem:[#allocation121_spill] sm:$0xff]  ;;  %v15018_v61 = vld [vmem:[#allocation122_spill] sm:$0xff]  ;;  %v15032_v8 = vld [vmem:[#allocation131_spill] sm:$0xff] }
 0x31f   :  { %v5864_v11 = vmax.f32 %v5668_v3, 0.0  ;;  %v5467_v12 = vmax.f32 %v4029_v4, %v4800_v55  ;;  %v8427_v52 = vpop.f32.mrb[20].mxu0  ;;  %v8753_v16 = vpop.f32.mrb[20].mxu1  ;;  %v15019_v55 = vmax.f32 %v15017_v60, %v15018_v61  ;;  %v15020_v4 = vld [vmem:[#allocation123_spill] sm:$0xff] }
 0x320   :  { %6061 = vst [vmem:[%s14127_s3 + $0x268] sm:$0xff] %v5865_v22  ;;  %v5671_v17 = vadd.f32 %v12831_v20, %v5468_v24  ;;  %v4032_v33 = vmax.f32 %v15007_v53, %v8427_v52  ;;  %v3372_v42 = vpop.f32.mrb[21].mxu0  ;;  %8585 = vmatmul.mubr.f32.gmra.mrb[126].mxu0 %v6567_v5  ;;  %v4810_v44 = vpop.f32.mrb[21].mxu1  ;;  %8911 = vmatmul.mubr.f32.gmra.mrb[126].mxu1 %v6763_v63  ;;  %v15021_v5 = vld [vmem:[#allocation124_spill] sm:$0xff]  ;;  %v6573_v24 = vld [vmem:[%s14125_s0 + $0x1248] sm:$0xff] }
 0x321   :  { %6060 = vst [vmem:[%s14127_s3 + $0x260] sm:$0xff] %v5864_v11  ;;  %v5670_v0 = vadd.f32 %v12831_v20, %v5467_v12  ;;  %v4031_v41 = vmax.f32 %v15010_v43, %v3372_v42  ;;  %8587 = vmatprep.mubr.f32.mxu0 %v6568_v50  ;;  %8913 = vmatprep.mubr.f32.mxu1 %v6764_v51  ;;  %v6769_v50 = vld [vmem:[%s14125_s0 + $0x1868] sm:$0xff]  ;;  %v6574_v12 = vld [vmem:[%s14125_s0 + $0x1250] sm:$0xff]  ;;  %v15024_v42 = vld [vmem:[#allocation126_spill] sm:$0xff] }
 0x322   :  { %v5867_v32 = vmax.f32 %v5671_v17, 0.0  ;;  %v5470_v19 = vmax.f32 %v4032_v33, %v8753_v16  ;;  %v15022_v63 = vmax.f32 %v15020_v4, %v15021_v5  ;;  %v6770_v52 = vld [vmem:[%s14125_s0 + $0x1870] sm:$0xff]  ;;  %v15023_v33 = vld [vmem:[#allocation125_spill] sm:$0xff] }
 0x323   :  { %v5866_v34 = vmax.f32 %v5670_v0, 0.0  ;;  %v5469_v35 = vmax.f32 %v4031_v41, %v4810_v44  ;;  %v8430_v23 = vpop.f32.mrb[22].mxu0  ;;  %v8756_v25 = vpop.f32.mrb[22].mxu1  ;;  %v15025_v44 = vmax.f32 %v15023_v33, %v15024_v42  ;;  %v15026_v41 = vld [vmem:[#allocation127_spill] sm:$0xff]  ;;  %v15045_v42 = vld [vmem:[#allocation140_spill] sm:$0xff] }
 0x324   :  { %6063 = vst [vmem:[%s14127_s3 + $0x278] sm:$0xff] %v5867_v32  ;;  %v5673_v57 = vadd.f32 %v12831_v20, %v5470_v19  ;;  %v4034_v45 = vmax.f32 %v15013_v7, %v8430_v23  ;;  %v3382_v13 = vpop.f32.mrb[23].mxu0  ;;  %8588 = vmatmul.mubr.f32.gmra.mrb[128].mxu0 %v6569_v18  ;;  %v4820_v46 = vpop.f32.mrb[23].mxu1  ;;  %8914 = vmatmul.mubr.f32.gmra.mrb[128].mxu1 %v6765_v31  ;;  %v15027_v18 = vld [vmem:[#allocation128_spill] sm:$0xff]  ;;  %v6575_v19 = vld [vmem:[%s14125_s0 + $0x1258] sm:$0xff]  ;;  %v15030_v7 = vld [vmem:[#allocation130_spill] sm:$0xff] }
 0x325   :  { %6062 = vst [vmem:[%s14127_s3 + $0x270] sm:$0xff] %v5866_v34  ;;  %v5672_v47 = vadd.f32 %v12831_v20, %v5469_v35  ;;  %v4033_v2 = vmax.f32 %v15016_v1, %v3382_v13  ;;  %8590 = vmatprep.mubr.f32.mxu0 %v6570_v10  ;;  %8916 = vmatprep.mubr.f32.mxu1 %v6766_v54  ;;  %v6771_v10 = vld [vmem:[%s14125_s0 + $0x1878] sm:$0xff]  ;;  %v15033_v1 = vld [vmem:[#allocation132_spill] sm:$0xff]  ;;  %v15044_v33 = vld [vmem:[#allocation139_spill] sm:$0xff] }
 0x326   :  { %v5869_v49 = vmax.f32 %v5673_v57, 0.0  ;;  %v5472_v15 = vmax.f32 %v4034_v45, %v8756_v25  ;;  %v15028_v31 = vmax.f32 %v15026_v41, %v15027_v18  ;;  %v15031_v45 = vmax.f32 %v15029_v6, %v15030_v7 }
 0x327   :  { %v5868_v9 = vmax.f32 %v5672_v47, 0.0  ;;  %v5471_v40 = vmax.f32 %v4033_v2, %v4820_v46  ;;  %v8433_v59 = vpop.f32.mrb[24].mxu0  ;;  %v8759_v28 = vpop.f32.mrb[24].mxu1  ;;  %v15034_v2 = vmax.f32 %v15032_v8, %v15033_v1 }
 0x328   :  { %6065 = vst [vmem:[%s14127_s3 + $0x288] sm:$0xff] %v5869_v49  ;;  %v5675_v29 = vadd.f32 %v12831_v20, %v5472_v15  ;;  %v4036_v3 = vmax.f32 %v15019_v55, %v8433_v59  ;;  %v3392_v62 = vpop.f32.mrb[25].mxu0  ;;  %8591 = vmatmul.mubr.f32.gmra.mrb[130].mxu0 %v6571_v26  ;;  %v4830_v56 = vpop.f32.mrb[25].mxu1  ;;  %8917 = vmatmul.mubr.f32.gmra.mrb[130].mxu1 %v6767_v48  ;;  %v15035_v59 = vld [vmem:[#allocation133_spill] sm:$0xff] }
 0x329   :  { %6064 = vst [vmem:[%s14127_s3 + $0x280] sm:$0xff] %v5868_v9  ;;  %v5674_v58 = vadd.f32 %v12831_v20, %v5471_v40  ;;  %v4035_v22 = vmax.f32 %v15022_v63, %v3392_v62  ;;  %8593 = vmatprep.mubr.f32.mxu0 %v6572_v21  ;;  %8919 = vmatprep.mubr.f32.mxu1 %v6768_v27  ;;  %v15038_v62 = vld [vmem:[#allocation135_spill] sm:$0xff] }
 0x32a   :  { %v5871_v51 = vmax.f32 %v5675_v29, 0.0  ;;  %v5474_v11 = vmax.f32 %v4036_v3, %v8759_v28  ;;  %v15036_v28 = vld [vmem:[#allocation134_spill] sm:$0xff] }
 0x32b   :  { %v5870_v16 = vmax.f32 %v5674_v58, 0.0  ;;  %v5473_v17 = vmax.f32 %v4035_v22, %v4830_v56  ;;  %v8436_v36 = vpop.f32.mrb[26].mxu0  ;;  %v8762_v37 = vpop.f32.mrb[26].mxu1  ;;  %v15037_v29 = vmax.f32 %v15035_v59, %v15036_v28  ;;  %v15039_v56 = vld [vmem:[#allocation136_spill] sm:$0xff] }
 0x32c   :  { %6067 = vst [vmem:[%s14127_s3 + $0x298] sm:$0xff] %v5871_v51  ;;  %v5677_v53 = vadd.f32 %v12831_v20, %v5474_v11  ;;  %v4038_v0 = vmax.f32 %v15025_v44, %v8436_v36  ;;  %v3402_v38 = vpop.f32.mrb[27].mxu0  ;;  %8594 = vmatmul.mubr.f32.gmra.mrb[132].mxu0 %v6573_v24  ;;  %v4840_v39 = vpop.f32.mrb[27].mxu1  ;;  %8920 = vmatmul.mubr.f32.gmra.mrb[132].mxu1 %v6769_v50 }
 0x32d   :  { %6066 = vst [vmem:[%s14127_s3 + $0x290] sm:$0xff] %v5870_v16  ;;  %v5676_v43 = vadd.f32 %v12831_v20, %v5473_v17  ;;  %v4037_v32 = vmax.f32 %v15028_v31, %v3402_v38  ;;  %8596 = vmatprep.mubr.f32.mxu0 %v6574_v12  ;;  %8922 = vmatprep.mubr.f32.mxu1 %v6770_v52  ;;  %v15041_v12 = vld [vmem:[#allocation137_spill] sm:$0xff]  ;;  %v15042_v52 = vld [vmem:[#allocation138_spill] sm:$0xff] }
 0x32e   :  { %v5873_v54 = vmax.f32 %v5677_v53, 0.0  ;;  %v5476_v34 = vmax.f32 %v4038_v0, %v8762_v37  ;;  %v15040_v58 = vmax.f32 %v15038_v62, %v15039_v56  ;;  %v15043_v16 = vmax.f32 %v15041_v12, %v15042_v52  ;;  %v15063_v12 = vld [vmem:[#allocation152_spill] sm:$0xff] }
 0x32f   :  { %v5872_v35 = vmax.f32 %v5676_v43, 0.0  ;;  %v5475_v23 = vmax.f32 %v4037_v32, %v4840_v39  ;;  %v8439_v25 = vpop.f32.mrb[28].mxu0  ;;  %v8765_v57 = vpop.f32.mrb[28].mxu1  ;;  %v15046_v44 = vmax.f32 %v15044_v33, %v15045_v42 }
 0x330   :  { %6069 = vst [vmem:[%s14127_s3 + $0x2a8] sm:$0xff] %v5873_v54  ;;  %v5679_v14 = vadd.f32 %v12831_v20, %v5476_v34  ;;  %v4040_v13 = vmax.f32 %v15031_v45, %v8439_v25  ;;  %v3412_v46 = vpop.f32.mrb[29].mxu0  ;;  %8597 = vmatmul.mubr.f32.gmra.mrb[134].mxu0 %v6575_v19  ;;  %v4850_v47 = vpop.f32.mrb[29].mxu1  ;;  %8923 = vmatmul.mubr.f32.gmra.mrb[134].mxu1 %v6771_v10  ;;  %v15047_v19 = vld [vmem:[#allocation141_spill] sm:$0xff]  ;;  %v15048_v10 = vld [vmem:[#allocation142_spill] sm:$0xff] }
 0x331   :  { %6068 = vst [vmem:[%s14127_s3 + $0x2a0] sm:$0xff] %v5872_v35  ;;  %v5678_v30 = vadd.f32 %v12831_v20, %v5475_v23  ;;  %v4039_v26 = vmax.f32 %v15034_v2, %v3412_v46  ;;  %v15049_v54 = vmax.f32 %v15047_v19, %v15048_v10  ;;  %v15053_v2 = vld [vmem:[#allocation145_spill] sm:$0xff] }
 0x332   :  { %v5875_v48 = vmax.f32 %v5679_v14, 0.0  ;;  %v5478_v49 = vmax.f32 %v4040_v13, %v8765_v57  ;;  %v15050_v57 = vld [vmem:[#allocation143_spill] sm:$0xff]  ;;  %v15051_v14 = vld [vmem:[#allocation144_spill] sm:$0xff] }
 0x333   :  { %v5874_v15 = vmax.f32 %v5678_v30, 0.0  ;;  %v5477_v21 = vmax.f32 %v4039_v26, %v4850_v47  ;;  %v8442_v27 = vpop.f32.mrb[30].mxu0  ;;  %v8768_v9 = vpop.f32.mrb[30].mxu1  ;;  %v15052_v6 = vmax.f32 %v15050_v57, %v15051_v14  ;;  %v15054_v26 = vld [vmem:[#allocation146_spill] sm:$0xff] }
 0x334   :  { %6071 = vst [vmem:[%s14127_s3 + $0x2b8] sm:$0xff] %v5875_v48  ;;  %v5681_v40 = vadd.f32 %v12831_v20, %v5478_v49  ;;  %v4042_v60 = vmax.f32 %v15037_v29, %v8442_v27  ;;  %v3422_v61 = vpop.f32.mrb[31].mxu0  ;;  %v4860_v55 = vpop.f32.mrb[31].mxu1  ;;  %v15055_v48 = vmax.f32 %v15053_v2, %v15054_v26 }
 0x335   :  { %6070 = vst [vmem:[%s14127_s3 + $0x2b0] sm:$0xff] %v5874_v15  ;;  %v5680_v3 = vadd.f32 %v12831_v20, %v5477_v21  ;;  %v4041_v4 = vmax.f32 %v15040_v58, %v3422_v61  ;;  %v15059_v58 = vld [vmem:[#allocation149_spill] sm:$0xff] }
 0x336   :  { %v5877_v5 = vmax.f32 %v5681_v40, 0.0  ;;  %v5480_v63 = vmax.f32 %v4042_v60, %v8768_v9  ;;  %v15056_v9 = vld [vmem:[#allocation147_spill] sm:$0xff]  ;;  %v15057_v40 = vld [vmem:[#allocation148_spill] sm:$0xff] }
 0x337   :  { %v5876_v22 = vmax.f32 %v5680_v3, 0.0  ;;  %v5479_v24 = vmax.f32 %v4041_v4, %v4860_v55  ;;  %v8445_v50 = vpop.f32.mrb[32].mxu0  ;;  %v8771_v51 = vpop.f32.mrb[32].mxu1  ;;  %v15058_v59 = vmax.f32 %v15056_v9, %v15057_v40  ;;  %v15060_v4 = vld [vmem:[#allocation150_spill] sm:$0xff] }
 0x338   :  { %6073 = vst [vmem:[%s14127_s3 + $0x2c8] sm:$0xff] %v5877_v5  ;;  %v5683_v11 = vadd.f32 %v12831_v20, %v5480_v63  ;;  %v4044_v17 = vmax.f32 %v15043_v16, %v8445_v50  ;;  %v3432_v36 = vpop.f32.mrb[33].mxu0  ;;  %v4870_v37 = vpop.f32.mrb[33].mxu1  ;;  %v15061_v5 = vmax.f32 %v15059_v58, %v15060_v4  ;;  %v13427_v50 = vld [vmem:[%s14126_s2] ss:$0 sm:$0xff] }
 0x339   :  { %6072 = vst [vmem:[%s14127_s3 + $0x2c0] sm:$0xff] %v5876_v22  ;;  %v5682_v53 = vadd.f32 %v12831_v20, %v5479_v24  ;;  %v4043_v0 = vmax.f32 %v15046_v44, %v3432_v36  ;;  %v15065_v44 = vld [vmem:[#allocation153_spill] sm:$0xff] }
 0x33a   :  { %v5879_v38 = vmax.f32 %v5683_v11, 0.0  ;;  %v5482_v39 = vmax.f32 %v4044_v17, %v8771_v51  ;;  %v15062_v11 = vld [vmem:[#allocation151_spill] sm:$0xff] }
 0x33b   :  { %v5878_v43 = vmax.f32 %v5682_v53, 0.0  ;;  %v5481_v41 = vmax.f32 %v4043_v0, %v4870_v37  ;;  %v8448_v18 = vpop.f32.mrb[34].mxu0  ;;  %v8774_v31 = vpop.f32.mrb[34].mxu1  ;;  %v15066_v0 = vld [vmem:[#allocation154_spill] sm:$0xff] }
 0x33c   :  { %6075 = vst [vmem:[%s14127_s3 + $0x2d8] sm:$0xff] %v5879_v38  ;;  %v5685_v32 = vadd.f32 %v12831_v20, %v5482_v39  ;;  %v4046_v34 = vmax.f32 %v15049_v54, %v8448_v18  ;;  %v3442_v35 = vpop.f32.mrb[35].mxu0  ;;  %v4880_v23 = vpop.f32.mrb[35].mxu1  ;;  %v15067_v38 = vmax.f32 %v15065_v44, %v15066_v0 }
 0x33d   :  { %6074 = vst [vmem:[%s14127_s3 + $0x2d0] sm:$0xff] %v5878_v43  ;;  %v5684_v25 = vadd.f32 %v12831_v20, %v5481_v41  ;;  %v4045_v7 = vmax.f32 %v15052_v6, %v3442_v35  ;;  %v15071_v6 = vld [vmem:[#allocation157_spill] sm:$0xff] }
 0x33e   :  { %v5881_v45 = vmax.f32 %v5685_v32, 0.0  ;;  %v5484_v13 = vmax.f32 %v4046_v34, %v8774_v31  ;;  %v15068_v31 = vld [vmem:[#allocation155_spill] sm:$0xff]  ;;  %v15069_v32 = vld [vmem:[#allocation156_spill] sm:$0xff] }
 0x33f   :  { %v5880_v46 = vmax.f32 %v5684_v25, 0.0  ;;  %v5483_v47 = vmax.f32 %v4045_v7, %v4880_v23  ;;  %v8451_v30 = vpop.f32.mrb[36].mxu0  ;;  %v8777_v8 = vpop.f32.mrb[36].mxu1  ;;  %v15070_v19 = vmax.f32 %v15068_v31, %v15069_v32  ;;  %v15072_v7 = vld [vmem:[#allocation158_spill] sm:$0xff] }
 0x340   :  { %6077 = vst [vmem:[%s14127_s3 + $0x2e8] sm:$0xff] %v5881_v45  ;;  %v5687_v1 = vadd.f32 %v12831_v20, %v5484_v13  ;;  %v4048_v49 = vmax.f32 %v15055_v48, %v8451_v30  ;;  %v3452_v15 = vpop.f32.mrb[37].mxu0  ;;  %v4890_v21 = vpop.f32.mrb[37].mxu1  ;;  %v15073_v45 = vmax.f32 %v15071_v6, %v15072_v7 }
 0x341   :  { %6076 = vst [vmem:[%s14127_s3 + $0x2e0] sm:$0xff] %v5880_v46  ;;  %v5686_v27 = vadd.f32 %v12831_v20, %v5483_v47  ;;  %v4047_v28 = vmax.f32 %v15058_v59, %v3452_v15  ;;  %v15077_v59 = vld [vmem:[#allocation161_spill] sm:$0xff] }
 0x342   :  { %v5883_v29 = vmax.f32 %v5687_v1, 0.0  ;;  %v5486_v60 = vmax.f32 %v4048_v49, %v8777_v8  ;;  %v15074_v8 = vld [vmem:[#allocation159_spill] sm:$0xff]  ;;  %v15075_v1 = vld [vmem:[#allocation160_spill] sm:$0xff] }
 0x343   :  { %v5882_v61 = vmax.f32 %v5686_v27, 0.0  ;;  %v5485_v55 = vmax.f32 %v4047_v28, %v4890_v21  ;;  %v8454_v3 = vpop.f32.mrb[38].mxu0  ;;  %v8780_v62 = vpop.f32.mrb[38].mxu1  ;;  %v15076_v2 = vmax.f32 %v15074_v8, %v15075_v1  ;;  %v15078_v28 = vld [vmem:[#allocation162_spill] sm:$0xff] }
 0x344   :  { %6079 = vst [vmem:[%s14127_s3 + $0x2f8] sm:$0xff] %v5883_v29  ;;  %v5689_v56 = vadd.f32 %v12831_v20, %v5486_v60  ;;  %v4050_v63 = vmax.f32 %v15061_v5, %v8454_v3  ;;  %v3462_v22 = vpop.f32.mrb[39].mxu0  ;;  %v4900_v24 = vpop.f32.mrb[39].mxu1  ;;  %v15064_v20 = vmax.f32 %v15062_v11, %v15063_v12  ;;  %v15079_v29 = vmax.f32 %v15077_v59, %v15078_v28 }
 0x345   :  { %6078 = vst [vmem:[%s14127_s3 + $0x2f0] sm:$0xff] %v5882_v61  ;;  %v5688_v51 = vadd.f32 %v13427_v50, %v5485_v55 }
 0x346   :  { %v4049_v52 = vmax.f32 %v15064_v20, %v3462_v22  ;;  %v5885_v16 = vmax.f32 %v5689_v56, 0.0  ;;  %v5488_v17 = vmax.f32 %v4050_v63, %v8780_v62  ;;  %v15080_v62 = vld [vmem:[#allocation163_spill] sm:$0xff]  ;;  %v15081_v56 = vld [vmem:[#allocation164_spill] sm:$0xff]  ;;  %v15083_v20 = vld [vmem:[#allocation165_spill] sm:$0xff] }
 0x347   :  { %v5884_v36 = vmax.f32 %v5688_v51, 0.0  ;;  %v8457_v53 = vpop.f32.mrb[40].mxu0  ;;  %v8783_v33 = vpop.f32.mrb[40].mxu1  ;;  %v15082_v58 = vmax.f32 %v15080_v62, %v15081_v56 }
 0x348   :  { %v5487_v37 = vmax.f32 %v4049_v52, %v4900_v24  ;;  %6081 = vst [vmem:[%s14127_s3 + $0x308] sm:$0xff] %v5885_v16  ;;  %v5691_v42 = vadd.f32 %v13427_v50, %v5488_v17  ;;  %v4052_v39 = vmax.f32 %v15067_v38, %v8457_v53  ;;  %v3472_v43 = vpop.f32.mrb[41].mxu0  ;;  %v4910_v41 = vpop.f32.mrb[41].mxu1  ;;  %v15084_v52 = vld [vmem:[#allocation166_spill] sm:$0xff] }
 0x349   :  { %6080 = vst [vmem:[%s14127_s3 + $0x300] sm:$0xff] %v5884_v36  ;;  %v4051_v10 = vmax.f32 %v15070_v19, %v3472_v43  ;;  %v15085_v16 = vmax.f32 %v15083_v20, %v15084_v52  ;;  %v15089_v19 = vld [vmem:[#allocation169_spill] sm:$0xff] }
 0x34a   :  { %v5690_v18 = vadd.f32 %v13427_v50, %v5487_v37  ;;  %v5887_v54 = vmax.f32 %v5691_v42, 0.0  ;;  %v5490_v34 = vmax.f32 %v4052_v39, %v8783_v33  ;;  %v15086_v33 = vld [vmem:[#allocation167_spill] sm:$0xff]  ;;  %v15087_v42 = vld [vmem:[#allocation168_spill] sm:$0xff] }
 0x34b   :  { %v5489_v23 = vmax.f32 %v4051_v10, %v4910_v41  ;;  %v8460_v25 = vpop.f32.mrb[42].mxu0  ;;  %v8786_v57 = vpop.f32.mrb[42].mxu1  ;;  %v15088_v44 = vmax.f32 %v15086_v33, %v15087_v42  ;;  %v15090_v10 = vld [vmem:[#allocation170_spill] sm:$0xff] }
 0x34c   :  { %v5886_v35 = vmax.f32 %v5690_v18, 0.0  ;;  %6083 = vst [vmem:[%s14127_s3 + $0x318] sm:$0xff] %v5887_v54  ;;  %v5693_v14 = vadd.f32 %v13427_v50, %v5490_v34  ;;  %v4054_v13 = vmax.f32 %v15073_v45, %v8460_v25  ;;  %v3482_v46 = vpop.f32.mrb[43].mxu0  ;;  %v4920_v47 = vpop.f32.mrb[43].mxu1  ;;  %v15091_v54 = vmax.f32 %v15089_v19, %v15090_v10 }
 0x34d   :  { %v5692_v30 = vadd.f32 %v13427_v50, %v5489_v23  ;;  %v4053_v26 = vmax.f32 %v15076_v2, %v3482_v46  ;;  %v15095_v2 = vld [vmem:[#allocation173_spill] sm:$0xff] }
 0x34e   :  { %6082 = vst [vmem:[%s14127_s3 + $0x310] sm:$0xff] %v5886_v35  ;;  %v5889_v48 = vmax.f32 %v5693_v14, 0.0  ;;  %v5492_v49 = vmax.f32 %v4054_v13, %v8786_v57  ;;  %v15092_v57 = vld [vmem:[#allocation171_spill] sm:$0xff]  ;;  %v15093_v14 = vld [vmem:[#allocation172_spill] sm:$0xff] }
 0x34f   :  { %v5888_v15 = vmax.f32 %v5692_v30, 0.0  ;;  %v5491_v21 = vmax.f32 %v4053_v26, %v4920_v47  ;;  %v8463_v27 = vpop.f32.mrb[44].mxu0  ;;  %v8789_v9 = vpop.f32.mrb[44].mxu1  ;;  %v15094_v6 = vmax.f32 %v15092_v57, %v15093_v14  ;;  %v15096_v26 = vld [vmem:[#allocation174_spill] sm:$0xff] }
 0x350   :  { %6085 = vst [vmem:[%s14127_s3 + $0x328] sm:$0xff] %v5889_v48  ;;  %v5695_v40 = vadd.f32 %v13427_v50, %v5492_v49  ;;  %v4056_v60 = vmax.f32 %v15079_v29, %v8463_v27  ;;  %v3492_v61 = vpop.f32.mrb[45].mxu0  ;;  %v4930_v55 = vpop.f32.mrb[45].mxu1  ;;  %v15097_v48 = vmax.f32 %v15095_v2, %v15096_v26 }
 0x351   :  { %6084 = vst [vmem:[%s14127_s3 + $0x320] sm:$0xff] %v5888_v15  ;;  %v5694_v3 = vadd.f32 %v13427_v50, %v5491_v21  ;;  %v4055_v4 = vmax.f32 %v15082_v58, %v3492_v61  ;;  %v15101_v58 = vld [vmem:[#allocation177_spill] sm:$0xff] }
 0x352   :  { %v5891_v5 = vmax.f32 %v5695_v40, 0.0  ;;  %v5494_v63 = vmax.f32 %v4056_v60, %v8789_v9  ;;  %v15098_v9 = vld [vmem:[#allocation175_spill] sm:$0xff]  ;;  %v15099_v40 = vld [vmem:[#allocation176_spill] sm:$0xff] }
 0x353   :  { %v5890_v22 = vmax.f32 %v5694_v3, 0.0  ;;  %v5493_v24 = vmax.f32 %v4055_v4, %v4930_v55  ;;  %v8466_v51 = vpop.f32.mrb[46].mxu0  ;;  %v8792_v11 = vpop.f32.mrb[46].mxu1  ;;  %v15100_v59 = vmax.f32 %v15098_v9, %v15099_v40  ;;  %v15102_v4 = vld [vmem:[#allocation178_spill] sm:$0xff] }
 0x354   :  { %6087 = vst [vmem:[%s14127_s3 + $0x338] sm:$0xff] %v5891_v5  ;;  %v5697_v12 = vadd.f32 %v13427_v50, %v5494_v63  ;;  %v4058_v17 = vmax.f32 %v15085_v16, %v8466_v51  ;;  %v3502_v36 = vpop.f32.mrb[47].mxu0  ;;  %v4940_v37 = vpop.f32.mrb[47].mxu1  ;;  %v15103_v5 = vmax.f32 %v15101_v58, %v15102_v4 }
 0x355   :  { %6086 = vst [vmem:[%s14127_s3 + $0x330] sm:$0xff] %v5890_v22  ;;  %v5696_v53 = vadd.f32 %v13427_v50, %v5493_v24  ;;  %v4057_v0 = vmax.f32 %v15088_v44, %v3502_v36  ;;  %v15107_v44 = vld [vmem:[#allocation181_spill] sm:$0xff] }
 0x356   :  { %v5893_v38 = vmax.f32 %v5697_v12, 0.0  ;;  %v5496_v39 = vmax.f32 %v4058_v17, %v8792_v11  ;;  %v15104_v11 = vld [vmem:[#allocation179_spill] sm:$0xff]  ;;  %v15105_v12 = vld [vmem:[#allocation180_spill] sm:$0xff] }
 0x357   :  { %v5892_v43 = vmax.f32 %v5696_v53, 0.0  ;;  %v5495_v41 = vmax.f32 %v4057_v0, %v4940_v37  ;;  %v8469_v18 = vpop.f32.mrb[48].mxu0  ;;  %v8795_v31 = vpop.f32.mrb[48].mxu1  ;;  %v15106_v20 = vmax.f32 %v15104_v11, %v15105_v12  ;;  %v15108_v0 = vld [vmem:[#allocation182_spill] sm:$0xff] }
 0x358   :  { %6089 = vst [vmem:[%s14127_s3 + $0x348] sm:$0xff] %v5893_v38  ;;  %v5699_v32 = vadd.f32 %v13427_v50, %v5496_v39  ;;  %v4060_v34 = vmax.f32 %v15091_v54, %v8469_v18  ;;  %v3512_v35 = vpop.f32.mrb[49].mxu0  ;;  %v4950_v23 = vpop.f32.mrb[49].mxu1  ;;  %v15109_v38 = vmax.f32 %v15107_v44, %v15108_v0 }
 0x359   :  { %6088 = vst [vmem:[%s14127_s3 + $0x340] sm:$0xff] %v5892_v43  ;;  %v5698_v25 = vadd.f32 %v13427_v50, %v5495_v41  ;;  %v4059_v7 = vmax.f32 %v15094_v6, %v3512_v35  ;;  %v15113_v6 = vld [vmem:[#allocation185_spill] sm:$0xff] }
 0x35a   :  { %v5895_v45 = vmax.f32 %v5699_v32, 0.0  ;;  %v5498_v13 = vmax.f32 %v4060_v34, %v8795_v31  ;;  %v15110_v31 = vld [vmem:[#allocation183_spill] sm:$0xff]  ;;  %v15111_v32 = vld [vmem:[#allocation184_spill] sm:$0xff] }
 0x35b   :  { %v5894_v46 = vmax.f32 %v5698_v25, 0.0  ;;  %v5497_v47 = vmax.f32 %v4059_v7, %v4950_v23  ;;  %v8472_v30 = vpop.f32.mrb[50].mxu0  ;;  %v8798_v8 = vpop.f32.mrb[50].mxu1  ;;  %v15112_v19 = vmax.f32 %v15110_v31, %v15111_v32  ;;  %v15114_v7 = vld [vmem:[#allocation186_spill] sm:$0xff] }
 0x35c   :  { %6091 = vst [vmem:[%s14127_s3 + $0x358] sm:$0xff] %v5895_v45  ;;  %v5701_v1 = vadd.f32 %v13427_v50, %v5498_v13  ;;  %v4062_v49 = vmax.f32 %v15097_v48, %v8472_v30  ;;  %v3522_v15 = vpop.f32.mrb[51].mxu0  ;;  %v4960_v21 = vpop.f32.mrb[51].mxu1  ;;  %v15115_v45 = vmax.f32 %v15113_v6, %v15114_v7 }
 0x35d   :  { %6090 = vst [vmem:[%s14127_s3 + $0x350] sm:$0xff] %v5894_v46  ;;  %v5700_v27 = vadd.f32 %v13427_v50, %v5497_v47  ;;  %v4061_v28 = vmax.f32 %v15100_v59, %v3522_v15  ;;  %v15119_v59 = vld [vmem:[#allocation189_spill] sm:$0xff] }
 0x35e   :  { %v5897_v29 = vmax.f32 %v5701_v1, 0.0  ;;  %v5500_v60 = vmax.f32 %v4062_v49, %v8798_v8  ;;  %v15116_v8 = vld [vmem:[#allocation187_spill] sm:$0xff]  ;;  %v15117_v1 = vld [vmem:[#allocation188_spill] sm:$0xff] }
 0x35f   :  { %v5896_v61 = vmax.f32 %v5700_v27, 0.0  ;;  %v5499_v55 = vmax.f32 %v4061_v28, %v4960_v21  ;;  %v8475_v3 = vpop.f32.mrb[52].mxu0  ;;  %v8801_v62 = vpop.f32.mrb[52].mxu1  ;;  %v15118_v2 = vmax.f32 %v15116_v8, %v15117_v1  ;;  %v15120_v28 = vld [vmem:[#allocation190_spill] sm:$0xff] }
 0x360   :  { %6093 = vst [vmem:[%s14127_s3 + $0x368] sm:$0xff] %v5897_v29  ;;  %v5703_v56 = vadd.f32 %v13427_v50, %v5500_v60  ;;  %v4064_v63 = vmax.f32 %v15103_v5, %v8475_v3  ;;  %v3532_v22 = vpop.f32.mrb[53].mxu0  ;;  %v4970_v24 = vpop.f32.mrb[53].mxu1  ;;  %v15121_v29 = vmax.f32 %v15119_v59, %v15120_v28 }
 0x361   :  { %6092 = vst [vmem:[%s14127_s3 + $0x360] sm:$0xff] %v5896_v61  ;;  %v5702_v51 = vadd.f32 %v13427_v50, %v5499_v55  ;;  %v4063_v52 = vmax.f32 %v15106_v20, %v3532_v22  ;;  %v15125_v20 = vld [vmem:[#allocation193_spill] sm:$0xff] }
 0x362   :  { %v5899_v16 = vmax.f32 %v5703_v56, 0.0  ;;  %v5502_v17 = vmax.f32 %v4064_v63, %v8801_v62  ;;  %v15122_v62 = vld [vmem:[#allocation191_spill] sm:$0xff]  ;;  %v15123_v56 = vld [vmem:[#allocation192_spill] sm:$0xff] }
 0x363   :  { %v5898_v36 = vmax.f32 %v5702_v51, 0.0  ;;  %v5501_v37 = vmax.f32 %v4063_v52, %v4970_v24  ;;  %v8478_v53 = vpop.f32.mrb[54].mxu0  ;;  %v8804_v33 = vpop.f32.mrb[54].mxu1  ;;  %v15124_v58 = vmax.f32 %v15122_v62, %v15123_v56  ;;  %v15126_v52 = vld [vmem:[#allocation194_spill] sm:$0xff] }
 0x364   :  { %6095 = vst [vmem:[%s14127_s3 + $0x378] sm:$0xff] %v5899_v16  ;;  %v5705_v42 = vadd.f32 %v13427_v50, %v5502_v17  ;;  %v4066_v39 = vmax.f32 %v15109_v38, %v8478_v53  ;;  %v3542_v43 = vpop.f32.mrb[55].mxu0  ;;  %v4980_v41 = vpop.f32.mrb[55].mxu1  ;;  %v15127_v16 = vmax.f32 %v15125_v20, %v15126_v52 }
 0x365   :  { %6094 = vst [vmem:[%s14127_s3 + $0x370] sm:$0xff] %v5898_v36  ;;  %v5704_v18 = vadd.f32 %v13427_v50, %v5501_v37  ;;  %v4065_v10 = vmax.f32 %v15112_v19, %v3542_v43  ;;  %v15131_v19 = vld [vmem:[#allocation197_spill] sm:$0xff] }
 0x366   :  { %v5901_v54 = vmax.f32 %v5705_v42, 0.0  ;;  %v5504_v34 = vmax.f32 %v4066_v39, %v8804_v33  ;;  %v15128_v33 = vld [vmem:[#allocation195_spill] sm:$0xff]  ;;  %v15129_v42 = vld [vmem:[#allocation196_spill] sm:$0xff] }
 0x367   :  { %v5900_v35 = vmax.f32 %v5704_v18, 0.0  ;;  %v5503_v23 = vmax.f32 %v4065_v10, %v4980_v41  ;;  %v8481_v25 = vpop.f32.mrb[56].mxu0  ;;  %v8807_v57 = vpop.f32.mrb[56].mxu1  ;;  %v15130_v44 = vmax.f32 %v15128_v33, %v15129_v42  ;;  %v15132_v10 = vld [vmem:[#allocation198_spill] sm:$0xff] }
 0x368   :  { %6097 = vst [vmem:[%s14127_s3 + $0x388] sm:$0xff] %v5901_v54  ;;  %v5707_v14 = vadd.f32 %v13427_v50, %v5504_v34  ;;  %v4068_v13 = vmax.f32 %v15115_v45, %v8481_v25  ;;  %v3552_v46 = vpop.f32.mrb[57].mxu0  ;;  %v4990_v47 = vpop.f32.mrb[57].mxu1  ;;  %v15133_v54 = vmax.f32 %v15131_v19, %v15132_v10 }
 0x369   :  { %6096 = vst [vmem:[%s14127_s3 + $0x380] sm:$0xff] %v5900_v35  ;;  %v5706_v30 = vadd.f32 %v13427_v50, %v5503_v23  ;;  %v4067_v26 = vmax.f32 %v15118_v2, %v3552_v46  ;;  %v15137_v2 = vld [vmem:[#allocation201_spill] sm:$0xff] }
 0x36a   :  { %v5903_v48 = vmax.f32 %v5707_v14, 0.0  ;;  %v5506_v49 = vmax.f32 %v4068_v13, %v8807_v57  ;;  %v15134_v57 = vld [vmem:[#allocation199_spill] sm:$0xff]  ;;  %v15135_v14 = vld [vmem:[#allocation200_spill] sm:$0xff] }
 0x36b   :  { %v5902_v15 = vmax.f32 %v5706_v30, 0.0  ;;  %v5505_v21 = vmax.f32 %v4067_v26, %v4990_v47  ;;  %v8484_v27 = vpop.f32.mrb[58].mxu0  ;;  %v8810_v9 = vpop.f32.mrb[58].mxu1  ;;  %v15136_v6 = vmax.f32 %v15134_v57, %v15135_v14  ;;  %v15138_v26 = vld [vmem:[#allocation202_spill] sm:$0xff] }
 0x36c   :  { %6099 = vst [vmem:[%s14127_s3 + $0x398] sm:$0xff] %v5903_v48  ;;  %v5709_v40 = vadd.f32 %v13427_v50, %v5506_v49  ;;  %v4070_v60 = vmax.f32 %v15121_v29, %v8484_v27  ;;  %v3562_v61 = vpop.f32.mrb[59].mxu0  ;;  %v5000_v55 = vpop.f32.mrb[59].mxu1  ;;  %v15139_v48 = vmax.f32 %v15137_v2, %v15138_v26 }
 0x36d   :  { %6098 = vst [vmem:[%s14127_s3 + $0x390] sm:$0xff] %v5902_v15  ;;  %v5708_v3 = vadd.f32 %v13427_v50, %v5505_v21  ;;  %v4069_v4 = vmax.f32 %v15124_v58, %v3562_v61  ;;  %v15143_v58 = vld [vmem:[#allocation205_spill] sm:$0xff] }
 0x36e   :  { %v5905_v5 = vmax.f32 %v5709_v40, 0.0  ;;  %v5508_v63 = vmax.f32 %v4070_v60, %v8810_v9  ;;  %v15140_v9 = vld [vmem:[#allocation203_spill] sm:$0xff]  ;;  %v15141_v40 = vld [vmem:[#allocation204_spill] sm:$0xff] }
 0x36f   :  { %v5904_v22 = vmax.f32 %v5708_v3, 0.0  ;;  %v5507_v24 = vmax.f32 %v4069_v4, %v5000_v55  ;;  %v8487_v51 = vpop.f32.mrb[60].mxu0  ;;  %v8813_v11 = vpop.f32.mrb[60].mxu1  ;;  %v15142_v59 = vmax.f32 %v15140_v9, %v15141_v40  ;;  %v15144_v4 = vld [vmem:[#allocation206_spill] sm:$0xff] }
 0x370   :  { %6101 = vst [vmem:[%s14127_s3 + $0x3a8] sm:$0xff] %v5905_v5  ;;  %v5711_v12 = vadd.f32 %v13427_v50, %v5508_v63  ;;  %v4072_v17 = vmax.f32 %v15127_v16, %v8487_v51  ;;  %v3572_v36 = vpop.f32.mrb[61].mxu0  ;;  %v5010_v37 = vpop.f32.mrb[61].mxu1  ;;  %v15145_v5 = vmax.f32 %v15143_v58, %v15144_v4 }
 0x371   :  { %6100 = vst [vmem:[%s14127_s3 + $0x3a0] sm:$0xff] %v5904_v22  ;;  %v5710_v53 = vadd.f32 %v13427_v50, %v5507_v24  ;;  %v4071_v0 = vmax.f32 %v15130_v44, %v3572_v36  ;;  %v15149_v44 = vld [vmem:[#allocation209_spill] sm:$0xff] }
 0x372   :  { %v5907_v38 = vmax.f32 %v5711_v12, 0.0  ;;  %v5510_v39 = vmax.f32 %v4072_v17, %v8813_v11  ;;  %v15146_v11 = vld [vmem:[#allocation207_spill] sm:$0xff]  ;;  %v15147_v12 = vld [vmem:[#allocation208_spill] sm:$0xff] }
 0x373   :  { %v5906_v43 = vmax.f32 %v5710_v53, 0.0  ;;  %v5509_v41 = vmax.f32 %v4071_v0, %v5010_v37  ;;  %v8490_v18 = vpop.f32.mrb[62].mxu0  ;;  %v8816_v31 = vpop.f32.mrb[62].mxu1  ;;  %v15148_v20 = vmax.f32 %v15146_v11, %v15147_v12  ;;  %v15150_v0 = vld [vmem:[#allocation210_spill] sm:$0xff] }
 0x374   :  { %6103 = vst [vmem:[%s14127_s3 + $0x3b8] sm:$0xff] %v5907_v38  ;;  %v5713_v32 = vadd.f32 %v13427_v50, %v5510_v39  ;;  %v4074_v34 = vmax.f32 %v15133_v54, %v8490_v18  ;;  %v3582_v35 = vpop.f32.mrb[63].mxu0  ;;  %v5020_v23 = vpop.f32.mrb[63].mxu1  ;;  %v15151_v38 = vmax.f32 %v15149_v44, %v15150_v0 }
 0x375   :  { %6102 = vst [vmem:[%s14127_s3 + $0x3b0] sm:$0xff] %v5906_v43  ;;  %v5712_v25 = vadd.f32 %v13427_v50, %v5509_v41  ;;  %v4073_v7 = vmax.f32 %v15136_v6, %v3582_v35  ;;  %v15155_v6 = vld [vmem:[#allocation213_spill] sm:$0xff] }
 0x376   :  { %v5909_v45 = vmax.f32 %v5713_v32, 0.0  ;;  %v5512_v13 = vmax.f32 %v4074_v34, %v8816_v31  ;;  %v15152_v31 = vld [vmem:[#allocation211_spill] sm:$0xff]  ;;  %v15153_v32 = vld [vmem:[#allocation212_spill] sm:$0xff] }
 0x377   :  { %v5908_v46 = vmax.f32 %v5712_v25, 0.0  ;;  %v5511_v47 = vmax.f32 %v4073_v7, %v5020_v23  ;;  %v8493_v30 = vpop.f32.mrb[64].mxu0  ;;  %v8819_v8 = vpop.f32.mrb[64].mxu1  ;;  %v15154_v19 = vmax.f32 %v15152_v31, %v15153_v32  ;;  %v15156_v7 = vld [vmem:[#allocation214_spill] sm:$0xff] }
 0x378   :  { %6105 = vst [vmem:[%s14127_s3 + $0x3c8] sm:$0xff] %v5909_v45  ;;  %v5715_v1 = vadd.f32 %v13427_v50, %v5512_v13  ;;  %v4076_v49 = vmax.f32 %v15139_v48, %v8493_v30  ;;  %v3592_v15 = vpop.f32.mrb[65].mxu0  ;;  %v5030_v21 = vpop.f32.mrb[65].mxu1  ;;  %v15157_v45 = vmax.f32 %v15155_v6, %v15156_v7 }
 0x379   :  { %6104 = vst [vmem:[%s14127_s3 + $0x3c0] sm:$0xff] %v5908_v46  ;;  %v5714_v27 = vadd.f32 %v13427_v50, %v5511_v47  ;;  %v4075_v28 = vmax.f32 %v15142_v59, %v3592_v15  ;;  %v15161_v59 = vld [vmem:[#allocation217_spill] sm:$0xff] }
 0x37a   :  { %v5911_v29 = vmax.f32 %v5715_v1, 0.0  ;;  %v5514_v60 = vmax.f32 %v4076_v49, %v8819_v8  ;;  %v15158_v8 = vld [vmem:[#allocation215_spill] sm:$0xff]  ;;  %v15159_v1 = vld [vmem:[#allocation216_spill] sm:$0xff] }
 0x37b   :  { %v5910_v61 = vmax.f32 %v5714_v27, 0.0  ;;  %v5513_v55 = vmax.f32 %v4075_v28, %v5030_v21  ;;  %v8496_v3 = vpop.f32.mrb[66].mxu0  ;;  %v8822_v62 = vpop.f32.mrb[66].mxu1  ;;  %v15160_v2 = vmax.f32 %v15158_v8, %v15159_v1  ;;  %v15162_v28 = vld [vmem:[#allocation218_spill] sm:$0xff] }
 0x37c   :  { %6107 = vst [vmem:[%s14127_s3 + $0x3d8] sm:$0xff] %v5911_v29  ;;  %v5717_v56 = vadd.f32 %v13427_v50, %v5514_v60  ;;  %v4078_v63 = vmax.f32 %v15145_v5, %v8496_v3  ;;  %v3602_v22 = vpop.f32.mrb[67].mxu0  ;;  %v5040_v24 = vpop.f32.mrb[67].mxu1  ;;  %v15163_v29 = vmax.f32 %v15161_v59, %v15162_v28 }
 0x37d   :  { %6106 = vst [vmem:[%s14127_s3 + $0x3d0] sm:$0xff] %v5910_v61  ;;  %v5716_v51 = vadd.f32 %v13427_v50, %v5513_v55  ;;  %v4077_v52 = vmax.f32 %v15148_v20, %v3602_v22  ;;  %v15167_v20 = vld [vmem:[#allocation221_spill] sm:$0xff] }
 0x37e   :  { %v5913_v16 = vmax.f32 %v5717_v56, 0.0  ;;  %v5516_v17 = vmax.f32 %v4078_v63, %v8822_v62  ;;  %v15164_v62 = vld [vmem:[#allocation219_spill] sm:$0xff]  ;;  %v15165_v56 = vld [vmem:[#allocation220_spill] sm:$0xff] }
 0x37f   :  { %v5912_v36 = vmax.f32 %v5716_v51, 0.0  ;;  %v5515_v37 = vmax.f32 %v4077_v52, %v5040_v24  ;;  %v8499_v53 = vpop.f32.mrb[68].mxu0  ;;  %v8825_v33 = vpop.f32.mrb[68].mxu1  ;;  %v15166_v58 = vmax.f32 %v15164_v62, %v15165_v56  ;;  %v15168_v52 = vld [vmem:[#allocation222_spill] sm:$0xff] }
 0x380   :  { %6109 = vst [vmem:[%s14127_s3 + $0x3e8] sm:$0xff] %v5913_v16  ;;  %v5719_v42 = vadd.f32 %v13427_v50, %v5516_v17  ;;  %v4080_v39 = vmax.f32 %v15151_v38, %v8499_v53  ;;  %v3612_v43 = vpop.f32.mrb[69].mxu0  ;;  %v5050_v41 = vpop.f32.mrb[69].mxu1  ;;  %v15169_v16 = vmax.f32 %v15167_v20, %v15168_v52 }
 0x381   :  { %6108 = vst [vmem:[%s14127_s3 + $0x3e0] sm:$0xff] %v5912_v36  ;;  %v5718_v18 = vadd.f32 %v13427_v50, %v5515_v37  ;;  %v4079_v10 = vmax.f32 %v15154_v19, %v3612_v43  ;;  %v15173_v19 = vld [vmem:[#allocation225_spill] sm:$0xff] }
 0x382   :  { %v5915_v54 = vmax.f32 %v5719_v42, 0.0  ;;  %v5518_v34 = vmax.f32 %v4080_v39, %v8825_v33  ;;  %v15170_v33 = vld [vmem:[#allocation223_spill] sm:$0xff]  ;;  %v15171_v42 = vld [vmem:[#allocation224_spill] sm:$0xff] }
 0x383   :  { %v5914_v35 = vmax.f32 %v5718_v18, 0.0  ;;  %v5517_v23 = vmax.f32 %v4079_v10, %v5050_v41  ;;  %v8502_v25 = vpop.f32.mrb[70].mxu0  ;;  %v8828_v57 = vpop.f32.mrb[70].mxu1  ;;  %v15172_v44 = vmax.f32 %v15170_v33, %v15171_v42  ;;  %v15174_v10 = vld [vmem:[#allocation226_spill] sm:$0xff] }
 0x384   :  { %6111 = vst [vmem:[%s14127_s3 + $0x3f8] sm:$0xff] %v5915_v54  ;;  %v5721_v14 = vadd.f32 %v13427_v50, %v5518_v34  ;;  %v4082_v13 = vmax.f32 %v15157_v45, %v8502_v25  ;;  %v3622_v46 = vpop.f32.mrb[71].mxu0  ;;  %v5060_v47 = vpop.f32.mrb[71].mxu1  ;;  %v15175_v54 = vmax.f32 %v15173_v19, %v15174_v10 }
 0x385   :  { %6110 = vst [vmem:[%s14127_s3 + $0x3f0] sm:$0xff] %v5914_v35  ;;  %v5720_v30 = vadd.f32 %v13427_v50, %v5517_v23  ;;  %v4081_v26 = vmax.f32 %v15160_v2, %v3622_v46  ;;  %v15179_v2 = vld [vmem:[#allocation229_spill] sm:$0xff] }
 0x386   :  { %v5917_v48 = vmax.f32 %v5721_v14, 0.0  ;;  %v5520_v49 = vmax.f32 %v4082_v13, %v8828_v57  ;;  %v15176_v57 = vld [vmem:[#allocation227_spill] sm:$0xff]  ;;  %v15177_v14 = vld [vmem:[#allocation228_spill] sm:$0xff] }
 0x387   :  { %v5916_v15 = vmax.f32 %v5720_v30, 0.0  ;;  %v5519_v21 = vmax.f32 %v4081_v26, %v5060_v47  ;;  %v8505_v27 = vpop.f32.mrb[72].mxu0  ;;  %v8831_v9 = vpop.f32.mrb[72].mxu1  ;;  %v15178_v6 = vmax.f32 %v15176_v57, %v15177_v14  ;;  %v15180_v26 = vld [vmem:[#allocation230_spill] sm:$0xff] }
 0x388   :  { %6113 = vst [vmem:[%s14127_s3 + $0x408] sm:$0xff] %v5917_v48  ;;  %v5723_v40 = vadd.f32 %v13427_v50, %v5520_v49  ;;  %v4084_v60 = vmax.f32 %v15163_v29, %v8505_v27  ;;  %v3632_v61 = vpop.f32.mrb[73].mxu0  ;;  %v5070_v55 = vpop.f32.mrb[73].mxu1  ;;  %v15181_v48 = vmax.f32 %v15179_v2, %v15180_v26 }
 0x389   :  { %6112 = vst [vmem:[%s14127_s3 + $0x400] sm:$0xff] %v5916_v15  ;;  %v5722_v3 = vadd.f32 %v13427_v50, %v5519_v21  ;;  %v4083_v4 = vmax.f32 %v15166_v58, %v3632_v61  ;;  %v15185_v58 = vld [vmem:[#allocation233_spill] sm:$0xff] }
 0x38a   :  { %v5919_v5 = vmax.f32 %v5723_v40, 0.0  ;;  %v5522_v63 = vmax.f32 %v4084_v60, %v8831_v9  ;;  %v15182_v9 = vld [vmem:[#allocation231_spill] sm:$0xff]  ;;  %v15183_v40 = vld [vmem:[#allocation232_spill] sm:$0xff] }
 0x38b   :  { %v5918_v22 = vmax.f32 %v5722_v3, 0.0  ;;  %v5521_v24 = vmax.f32 %v4083_v4, %v5070_v55  ;;  %v8508_v51 = vpop.f32.mrb[74].mxu0  ;;  %v8834_v11 = vpop.f32.mrb[74].mxu1  ;;  %v15184_v59 = vmax.f32 %v15182_v9, %v15183_v40  ;;  %v15186_v4 = vld [vmem:[#allocation234_spill] sm:$0xff] }
 0x38c   :  { %6115 = vst [vmem:[%s14127_s3 + $0x418] sm:$0xff] %v5919_v5  ;;  %v5725_v12 = vadd.f32 %v13427_v50, %v5522_v63  ;;  %v4086_v17 = vmax.f32 %v15169_v16, %v8508_v51  ;;  %v3642_v36 = vpop.f32.mrb[75].mxu0  ;;  %v5080_v37 = vpop.f32.mrb[75].mxu1  ;;  %v15187_v5 = vmax.f32 %v15185_v58, %v15186_v4 }
 0x38d   :  { %6114 = vst [vmem:[%s14127_s3 + $0x410] sm:$0xff] %v5918_v22  ;;  %v5724_v53 = vadd.f32 %v13427_v50, %v5521_v24  ;;  %v4085_v0 = vmax.f32 %v15172_v44, %v3642_v36  ;;  %v15191_v44 = vld [vmem:[#allocation237_spill] sm:$0xff] }
 0x38e   :  { %v5921_v38 = vmax.f32 %v5725_v12, 0.0  ;;  %v5524_v39 = vmax.f32 %v4086_v17, %v8834_v11  ;;  %v15188_v11 = vld [vmem:[#allocation235_spill] sm:$0xff]  ;;  %v15189_v12 = vld [vmem:[#allocation236_spill] sm:$0xff] }
 0x38f   :  { %v5920_v43 = vmax.f32 %v5724_v53, 0.0  ;;  %v5523_v41 = vmax.f32 %v4085_v0, %v5080_v37  ;;  %v8511_v18 = vpop.f32.mrb[76].mxu0  ;;  %v8837_v31 = vpop.f32.mrb[76].mxu1  ;;  %v15190_v20 = vmax.f32 %v15188_v11, %v15189_v12  ;;  %v15192_v0 = vld [vmem:[#allocation238_spill] sm:$0xff] }
 0x390   :  { %6117 = vst [vmem:[%s14127_s3 + $0x428] sm:$0xff] %v5921_v38  ;;  %v5727_v32 = vadd.f32 %v13427_v50, %v5524_v39  ;;  %v4088_v34 = vmax.f32 %v15175_v54, %v8511_v18  ;;  %v3652_v35 = vpop.f32.mrb[77].mxu0  ;;  %v5090_v23 = vpop.f32.mrb[77].mxu1  ;;  %v15193_v38 = vmax.f32 %v15191_v44, %v15192_v0 }
 0x391   :  { %6116 = vst [vmem:[%s14127_s3 + $0x420] sm:$0xff] %v5920_v43  ;;  %v5726_v25 = vadd.f32 %v13427_v50, %v5523_v41  ;;  %v4087_v7 = vmax.f32 %v15178_v6, %v3652_v35  ;;  %v15197_v6 = vld [vmem:[#allocation241_spill] sm:$0xff] }
 0x392   :  { %v5923_v45 = vmax.f32 %v5727_v32, 0.0  ;;  %v5526_v13 = vmax.f32 %v4088_v34, %v8837_v31  ;;  %v15194_v31 = vld [vmem:[#allocation239_spill] sm:$0xff]  ;;  %v15195_v32 = vld [vmem:[#allocation240_spill] sm:$0xff] }
 0x393   :  { %v5922_v46 = vmax.f32 %v5726_v25, 0.0  ;;  %v5525_v47 = vmax.f32 %v4087_v7, %v5090_v23  ;;  %v8514_v30 = vpop.f32.mrb[78].mxu0  ;;  %v8840_v8 = vpop.f32.mrb[78].mxu1  ;;  %v15196_v19 = vmax.f32 %v15194_v31, %v15195_v32  ;;  %v15198_v7 = vld [vmem:[#allocation242_spill] sm:$0xff] }
 0x394   :  { %6119 = vst [vmem:[%s14127_s3 + $0x438] sm:$0xff] %v5923_v45  ;;  %v5729_v1 = vadd.f32 %v13427_v50, %v5526_v13  ;;  %v4090_v49 = vmax.f32 %v15181_v48, %v8514_v30  ;;  %v3662_v15 = vpop.f32.mrb[79].mxu0  ;;  %v5100_v21 = vpop.f32.mrb[79].mxu1  ;;  %v15199_v45 = vmax.f32 %v15197_v6, %v15198_v7 }
 0x395   :  { %6118 = vst [vmem:[%s14127_s3 + $0x430] sm:$0xff] %v5922_v46  ;;  %v5728_v27 = vadd.f32 %v13427_v50, %v5525_v47  ;;  %v4089_v28 = vmax.f32 %v15184_v59, %v3662_v15  ;;  %v15203_v59 = vld [vmem:[#allocation245_spill] sm:$0xff] }
 0x396   :  { %v5925_v29 = vmax.f32 %v5729_v1, 0.0  ;;  %v5528_v60 = vmax.f32 %v4090_v49, %v8840_v8  ;;  %v15200_v8 = vld [vmem:[#allocation243_spill] sm:$0xff]  ;;  %v15201_v1 = vld [vmem:[#allocation244_spill] sm:$0xff] }
 0x397   :  { %v5924_v61 = vmax.f32 %v5728_v27, 0.0  ;;  %v5527_v55 = vmax.f32 %v4089_v28, %v5100_v21  ;;  %v8517_v3 = vpop.f32.mrb[80].mxu0  ;;  %v8843_v62 = vpop.f32.mrb[80].mxu1  ;;  %v15202_v2 = vmax.f32 %v15200_v8, %v15201_v1  ;;  %v15204_v28 = vld [vmem:[#allocation246_spill] sm:$0xff] }
 0x398   :  { %6121 = vst [vmem:[%s14127_s3 + $0x448] sm:$0xff] %v5925_v29  ;;  %v5731_v56 = vadd.f32 %v13427_v50, %v5528_v60  ;;  %v4092_v63 = vmax.f32 %v15187_v5, %v8517_v3  ;;  %v3672_v22 = vpop.f32.mrb[81].mxu0  ;;  %v5110_v24 = vpop.f32.mrb[81].mxu1  ;;  %v15205_v29 = vmax.f32 %v15203_v59, %v15204_v28 }
 0x399   :  { %6120 = vst [vmem:[%s14127_s3 + $0x440] sm:$0xff] %v5924_v61  ;;  %v5730_v51 = vadd.f32 %v13427_v50, %v5527_v55  ;;  %v4091_v52 = vmax.f32 %v15190_v20, %v3672_v22  ;;  %v15209_v20 = vld [vmem:[#allocation249_spill] sm:$0xff] }
 0x39a   :  { %v5927_v16 = vmax.f32 %v5731_v56, 0.0  ;;  %v5530_v17 = vmax.f32 %v4092_v63, %v8843_v62  ;;  %v15206_v62 = vld [vmem:[#allocation247_spill] sm:$0xff]  ;;  %v15207_v56 = vld [vmem:[#allocation248_spill] sm:$0xff] }
 0x39b   :  { %v5926_v36 = vmax.f32 %v5730_v51, 0.0  ;;  %v5529_v37 = vmax.f32 %v4091_v52, %v5110_v24  ;;  %v8520_v53 = vpop.f32.mrb[82].mxu0  ;;  %v8846_v33 = vpop.f32.mrb[82].mxu1  ;;  %v15208_v58 = vmax.f32 %v15206_v62, %v15207_v56  ;;  %v15210_v52 = vld [vmem:[#allocation250_spill] sm:$0xff] }
 0x39c   :  { %6123 = vst [vmem:[%s14127_s3 + $0x458] sm:$0xff] %v5927_v16  ;;  %v5733_v42 = vadd.f32 %v13427_v50, %v5530_v17  ;;  %v4094_v39 = vmax.f32 %v15193_v38, %v8520_v53  ;;  %v3682_v43 = vpop.f32.mrb[83].mxu0  ;;  %v5120_v41 = vpop.f32.mrb[83].mxu1  ;;  %v15211_v16 = vmax.f32 %v15209_v20, %v15210_v52 }
 0x39d   :  { %6122 = vst [vmem:[%s14127_s3 + $0x450] sm:$0xff] %v5926_v36  ;;  %v5732_v18 = vadd.f32 %v13427_v50, %v5529_v37  ;;  %v4093_v10 = vmax.f32 %v15196_v19, %v3682_v43  ;;  %v15215_v19 = vld [vmem:[#allocation253_spill] sm:$0xff] }
 0x39e   :  { %v5929_v54 = vmax.f32 %v5733_v42, 0.0  ;;  %v5532_v34 = vmax.f32 %v4094_v39, %v8846_v33  ;;  %v15212_v33 = vld [vmem:[#allocation251_spill] sm:$0xff]  ;;  %v15213_v42 = vld [vmem:[#allocation252_spill] sm:$0xff] }
 0x39f   :  { %v5928_v35 = vmax.f32 %v5732_v18, 0.0  ;;  %v5531_v23 = vmax.f32 %v4093_v10, %v5120_v41  ;;  %v8523_v25 = vpop.f32.mrb[84].mxu0  ;;  %v8849_v57 = vpop.f32.mrb[84].mxu1  ;;  %v15214_v44 = vmax.f32 %v15212_v33, %v15213_v42  ;;  %v15216_v10 = vld [vmem:[#allocation254_spill] sm:$0xff] }
 0x3a0   :  { %6125 = vst [vmem:[%s14127_s3 + $0x468] sm:$0xff] %v5929_v54  ;;  %v5735_v14 = vadd.f32 %v13427_v50, %v5532_v34  ;;  %v4096_v13 = vmax.f32 %v15199_v45, %v8523_v25  ;;  %v3692_v46 = vpop.f32.mrb[85].mxu0  ;;  %v5130_v47 = vpop.f32.mrb[85].mxu1  ;;  %v15217_v54 = vmax.f32 %v15215_v19, %v15216_v10 }
 0x3a1   :  { %6124 = vst [vmem:[%s14127_s3 + $0x460] sm:$0xff] %v5928_v35  ;;  %v5734_v30 = vadd.f32 %v13427_v50, %v5531_v23  ;;  %v4095_v26 = vmax.f32 %v15202_v2, %v3692_v46  ;;  %v15221_v2 = vld [vmem:[#allocation257_spill] sm:$0xff] }
 0x3a2   :  { %v5931_v48 = vmax.f32 %v5735_v14, 0.0  ;;  %v5534_v49 = vmax.f32 %v4096_v13, %v8849_v57  ;;  %v15218_v57 = vld [vmem:[#allocation255_spill] sm:$0xff]  ;;  %v15219_v14 = vld [vmem:[#allocation256_spill] sm:$0xff] }
 0x3a3   :  { %v5930_v15 = vmax.f32 %v5734_v30, 0.0  ;;  %v5533_v21 = vmax.f32 %v4095_v26, %v5130_v47  ;;  %v8526_v27 = vpop.f32.mrb[86].mxu0  ;;  %v8852_v9 = vpop.f32.mrb[86].mxu1  ;;  %v15220_v6 = vmax.f32 %v15218_v57, %v15219_v14  ;;  %v15222_v26 = vld [vmem:[#allocation258_spill] sm:$0xff] }
 0x3a4   :  { %6127 = vst [vmem:[%s14127_s3 + $0x478] sm:$0xff] %v5931_v48  ;;  %v5737_v40 = vadd.f32 %v13427_v50, %v5534_v49  ;;  %v4098_v60 = vmax.f32 %v15205_v29, %v8526_v27  ;;  %v3702_v61 = vpop.f32.mrb[87].mxu0  ;;  %v5140_v55 = vpop.f32.mrb[87].mxu1  ;;  %v15223_v48 = vmax.f32 %v15221_v2, %v15222_v26 }
 0x3a5   :  { %6126 = vst [vmem:[%s14127_s3 + $0x470] sm:$0xff] %v5930_v15  ;;  %v5736_v3 = vadd.f32 %v13427_v50, %v5533_v21  ;;  %v4097_v4 = vmax.f32 %v15208_v58, %v3702_v61  ;;  %v15227_v58 = vld [vmem:[#allocation261_spill] sm:$0xff] }
 0x3a6   :  { %v5933_v5 = vmax.f32 %v5737_v40, 0.0  ;;  %v5536_v63 = vmax.f32 %v4098_v60, %v8852_v9  ;;  %v15224_v9 = vld [vmem:[#allocation259_spill] sm:$0xff]  ;;  %v15225_v40 = vld [vmem:[#allocation260_spill] sm:$0xff] }
 0x3a7   :  { %v5932_v22 = vmax.f32 %v5736_v3, 0.0  ;;  %v5535_v24 = vmax.f32 %v4097_v4, %v5140_v55  ;;  %v8529_v51 = vpop.f32.mrb[88].mxu0  ;;  %v8855_v11 = vpop.f32.mrb[88].mxu1  ;;  %v15226_v59 = vmax.f32 %v15224_v9, %v15225_v40  ;;  %v15228_v4 = vld [vmem:[#allocation262_spill] sm:$0xff] }
 0x3a8   :  { %6129 = vst [vmem:[%s14127_s3 + $0x488] sm:$0xff] %v5933_v5  ;;  %v5739_v12 = vadd.f32 %v13427_v50, %v5536_v63  ;;  %v4100_v17 = vmax.f32 %v15211_v16, %v8529_v51  ;;  %v3712_v36 = vpop.f32.mrb[89].mxu0  ;;  %v5150_v37 = vpop.f32.mrb[89].mxu1  ;;  %v15229_v5 = vmax.f32 %v15227_v58, %v15228_v4 }
 0x3a9   :  { %6128 = vst [vmem:[%s14127_s3 + $0x480] sm:$0xff] %v5932_v22  ;;  %v5738_v53 = vadd.f32 %v13427_v50, %v5535_v24  ;;  %v4099_v0 = vmax.f32 %v15214_v44, %v3712_v36  ;;  %v15233_v44 = vld [vmem:[#allocation265_spill] sm:$0xff] }
 0x3aa   :  { %v5935_v38 = vmax.f32 %v5739_v12, 0.0  ;;  %v5538_v39 = vmax.f32 %v4100_v17, %v8855_v11  ;;  %v15230_v11 = vld [vmem:[#allocation263_spill] sm:$0xff]  ;;  %v15231_v12 = vld [vmem:[#allocation264_spill] sm:$0xff] }
 0x3ab   :  { %v5934_v43 = vmax.f32 %v5738_v53, 0.0  ;;  %v5537_v41 = vmax.f32 %v4099_v0, %v5150_v37  ;;  %v8532_v18 = vpop.f32.mrb[90].mxu0  ;;  %v8858_v31 = vpop.f32.mrb[90].mxu1  ;;  %v15232_v20 = vmax.f32 %v15230_v11, %v15231_v12  ;;  %v15234_v0 = vld [vmem:[#allocation266_spill] sm:$0xff] }
 0x3ac   :  { %6131 = vst [vmem:[%s14127_s3 + $0x498] sm:$0xff] %v5935_v38  ;;  %v5741_v32 = vadd.f32 %v13427_v50, %v5538_v39  ;;  %v4102_v34 = vmax.f32 %v15217_v54, %v8532_v18  ;;  %v3722_v35 = vpop.f32.mrb[91].mxu0  ;;  %v5160_v23 = vpop.f32.mrb[91].mxu1  ;;  %v15235_v38 = vmax.f32 %v15233_v44, %v15234_v0 }
 0x3ad   :  { %6130 = vst [vmem:[%s14127_s3 + $0x490] sm:$0xff] %v5934_v43  ;;  %v5740_v25 = vadd.f32 %v13427_v50, %v5537_v41  ;;  %v4101_v7 = vmax.f32 %v15220_v6, %v3722_v35  ;;  %v15239_v6 = vld [vmem:[#allocation269_spill] sm:$0xff] }
 0x3ae   :  { %v5937_v45 = vmax.f32 %v5741_v32, 0.0  ;;  %v5540_v13 = vmax.f32 %v4102_v34, %v8858_v31  ;;  %v15236_v31 = vld [vmem:[#allocation267_spill] sm:$0xff]  ;;  %v15237_v32 = vld [vmem:[#allocation268_spill] sm:$0xff] }
 0x3af   :  { %v5936_v46 = vmax.f32 %v5740_v25, 0.0  ;;  %v5539_v47 = vmax.f32 %v4101_v7, %v5160_v23  ;;  %v8535_v30 = vpop.f32.mrb[92].mxu0  ;;  %v8861_v8 = vpop.f32.mrb[92].mxu1  ;;  %v15238_v19 = vmax.f32 %v15236_v31, %v15237_v32  ;;  %v15240_v7 = vld [vmem:[#allocation270_spill] sm:$0xff] }
 0x3b0   :  { %6133 = vst [vmem:[%s14127_s3 + $0x4a8] sm:$0xff] %v5937_v45  ;;  %v5743_v1 = vadd.f32 %v13427_v50, %v5540_v13  ;;  %v4104_v49 = vmax.f32 %v15223_v48, %v8535_v30  ;;  %v3732_v15 = vpop.f32.mrb[93].mxu0  ;;  %v5170_v21 = vpop.f32.mrb[93].mxu1  ;;  %v15241_v45 = vmax.f32 %v15239_v6, %v15240_v7 }
 0x3b1   :  { %6132 = vst [vmem:[%s14127_s3 + $0x4a0] sm:$0xff] %v5936_v46  ;;  %v5742_v27 = vadd.f32 %v13427_v50, %v5539_v47  ;;  %v4103_v28 = vmax.f32 %v15226_v59, %v3732_v15  ;;  %v15245_v59 = vld [vmem:[#allocation273_spill] sm:$0xff] }
 0x3b2   :  { %v5939_v29 = vmax.f32 %v5743_v1, 0.0  ;;  %v5542_v60 = vmax.f32 %v4104_v49, %v8861_v8  ;;  %v15242_v8 = vld [vmem:[#allocation271_spill] sm:$0xff]  ;;  %v15243_v1 = vld [vmem:[#allocation272_spill] sm:$0xff] }
 0x3b3   :  { %v5938_v61 = vmax.f32 %v5742_v27, 0.0  ;;  %v5541_v55 = vmax.f32 %v4103_v28, %v5170_v21  ;;  %v8538_v3 = vpop.f32.mrb[94].mxu0  ;;  %v8864_v62 = vpop.f32.mrb[94].mxu1  ;;  %v15244_v2 = vmax.f32 %v15242_v8, %v15243_v1  ;;  %v15246_v28 = vld [vmem:[#allocation274_spill] sm:$0xff] }
 0x3b4   :  { %6135 = vst [vmem:[%s14127_s3 + $0x4b8] sm:$0xff] %v5939_v29  ;;  %v5745_v56 = vadd.f32 %v13427_v50, %v5542_v60  ;;  %v4106_v63 = vmax.f32 %v15229_v5, %v8538_v3  ;;  %v3742_v22 = vpop.f32.mrb[95].mxu0  ;;  %v5180_v24 = vpop.f32.mrb[95].mxu1  ;;  %v15247_v29 = vmax.f32 %v15245_v59, %v15246_v28 }
 0x3b5   :  { %6134 = vst [vmem:[%s14127_s3 + $0x4b0] sm:$0xff] %v5938_v61  ;;  %v5744_v51 = vadd.f32 %v13427_v50, %v5541_v55  ;;  %v4105_v52 = vmax.f32 %v15232_v20, %v3742_v22  ;;  %v15251_v20 = vld [vmem:[#allocation277_spill] sm:$0xff] }
 0x3b6   :  { %v5941_v16 = vmax.f32 %v5745_v56, 0.0  ;;  %v5544_v17 = vmax.f32 %v4106_v63, %v8864_v62  ;;  %v15248_v62 = vld [vmem:[#allocation275_spill] sm:$0xff]  ;;  %v15249_v56 = vld [vmem:[#allocation276_spill] sm:$0xff] }
 0x3b7   :  { %v5940_v36 = vmax.f32 %v5744_v51, 0.0  ;;  %v5543_v37 = vmax.f32 %v4105_v52, %v5180_v24  ;;  %v8541_v53 = vpop.f32.mrb[96].mxu0  ;;  %v8867_v33 = vpop.f32.mrb[96].mxu1  ;;  %v15250_v58 = vmax.f32 %v15248_v62, %v15249_v56  ;;  %v15252_v52 = vld [vmem:[#allocation278_spill] sm:$0xff] }
 0x3b8   :  { %6137 = vst [vmem:[%s14127_s3 + $0x4c8] sm:$0xff] %v5941_v16  ;;  %v5747_v42 = vadd.f32 %v13427_v50, %v5544_v17  ;;  %v4108_v39 = vmax.f32 %v15235_v38, %v8541_v53  ;;  %v3752_v43 = vpop.f32.mrb[97].mxu0  ;;  %v5190_v41 = vpop.f32.mrb[97].mxu1  ;;  %v15253_v16 = vmax.f32 %v15251_v20, %v15252_v52 }
 0x3b9   :  { %6136 = vst [vmem:[%s14127_s3 + $0x4c0] sm:$0xff] %v5940_v36  ;;  %v5746_v18 = vadd.f32 %v13427_v50, %v5543_v37  ;;  %v4107_v10 = vmax.f32 %v15238_v19, %v3752_v43  ;;  %v15257_v19 = vld [vmem:[#allocation281_spill] sm:$0xff] }
 0x3ba   :  { %v5943_v54 = vmax.f32 %v5747_v42, 0.0  ;;  %v5546_v34 = vmax.f32 %v4108_v39, %v8867_v33  ;;  %v15254_v33 = vld [vmem:[#allocation279_spill] sm:$0xff]  ;;  %v15255_v42 = vld [vmem:[#allocation280_spill] sm:$0xff] }
 0x3bb   :  { %v5942_v35 = vmax.f32 %v5746_v18, 0.0  ;;  %v5545_v23 = vmax.f32 %v4107_v10, %v5190_v41  ;;  %v8544_v25 = vpop.f32.mrb[98].mxu0  ;;  %v8870_v57 = vpop.f32.mrb[98].mxu1  ;;  %v15256_v44 = vmax.f32 %v15254_v33, %v15255_v42  ;;  %v15258_v10 = vld [vmem:[#allocation282_spill] sm:$0xff] }
 0x3bc   :  { %6139 = vst [vmem:[%s14127_s3 + $0x4d8] sm:$0xff] %v5943_v54  ;;  %v5749_v14 = vadd.f32 %v13427_v50, %v5546_v34  ;;  %v4110_v13 = vmax.f32 %v15241_v45, %v8544_v25  ;;  %v3762_v46 = vpop.f32.mrb[99].mxu0  ;;  %v5200_v47 = vpop.f32.mrb[99].mxu1  ;;  %v15259_v54 = vmax.f32 %v15257_v19, %v15258_v10 }
 0x3bd   :  { %6138 = vst [vmem:[%s14127_s3 + $0x4d0] sm:$0xff] %v5942_v35  ;;  %v5748_v30 = vadd.f32 %v13427_v50, %v5545_v23  ;;  %v4109_v26 = vmax.f32 %v15244_v2, %v3762_v46  ;;  %v15263_v2 = vld [vmem:[#allocation285_spill] sm:$0xff] }
 0x3be   :  { %v5945_v48 = vmax.f32 %v5749_v14, 0.0  ;;  %v5548_v49 = vmax.f32 %v4110_v13, %v8870_v57  ;;  %v15260_v57 = vld [vmem:[#allocation283_spill] sm:$0xff]  ;;  %v15261_v14 = vld [vmem:[#allocation284_spill] sm:$0xff] }
 0x3bf   :  { %v5944_v15 = vmax.f32 %v5748_v30, 0.0  ;;  %v5547_v21 = vmax.f32 %v4109_v26, %v5200_v47  ;;  %v8547_v27 = vpop.f32.mrb[100].mxu0  ;;  %v8873_v9 = vpop.f32.mrb[100].mxu1  ;;  %v15262_v6 = vmax.f32 %v15260_v57, %v15261_v14  ;;  %v15264_v26 = vld [vmem:[#allocation286_spill] sm:$0xff] }
 0x3c0   :  { %6141 = vst [vmem:[%s14127_s3 + $0x4e8] sm:$0xff] %v5945_v48  ;;  %v5751_v40 = vadd.f32 %v13427_v50, %v5548_v49  ;;  %v4112_v60 = vmax.f32 %v15247_v29, %v8547_v27  ;;  %v3772_v61 = vpop.f32.mrb[101].mxu0  ;;  %v5210_v55 = vpop.f32.mrb[101].mxu1  ;;  %v15265_v48 = vmax.f32 %v15263_v2, %v15264_v26  ;;  %v13943_v14 = vld [vmem:[%s14126_s2] ss:$0 sm:$0xff] }
 0x3c1   :  { %6140 = vst [vmem:[%s14127_s3 + $0x4e0] sm:$0xff] %v5944_v15  ;;  %v5750_v3 = vadd.f32 %v13427_v50, %v5547_v21  ;;  %v4111_v4 = vmax.f32 %v15250_v58, %v3772_v61  ;;  %v15269_v58 = vld [vmem:[#allocation289_spill] sm:$0xff] }
 0x3c2   :  { %v5947_v5 = vmax.f32 %v5751_v40, 0.0  ;;  %v5550_v63 = vmax.f32 %v4112_v60, %v8873_v9  ;;  %v15266_v9 = vld [vmem:[#allocation287_spill] sm:$0xff]  ;;  %v15267_v40 = vld [vmem:[#allocation288_spill] sm:$0xff] }
 0x3c3   :  { %v5946_v22 = vmax.f32 %v5750_v3, 0.0  ;;  %v5549_v24 = vmax.f32 %v4111_v4, %v5210_v55  ;;  %v8550_v51 = vpop.f32.mrb[102].mxu0  ;;  %v8876_v11 = vpop.f32.mrb[102].mxu1  ;;  %v15268_v59 = vmax.f32 %v15266_v9, %v15267_v40  ;;  %v15270_v4 = vld [vmem:[#allocation290_spill] sm:$0xff] }
 0x3c4   :  { %6143 = vst [vmem:[%s14127_s3 + $0x4f8] sm:$0xff] %v5947_v5  ;;  %v5753_v12 = vadd.f32 %v13427_v50, %v5550_v63  ;;  %v4114_v17 = vmax.f32 %v15253_v16, %v8550_v51  ;;  %v3782_v36 = vpop.f32.mrb[103].mxu0  ;;  %v5220_v37 = vpop.f32.mrb[103].mxu1  ;;  %v15271_v5 = vmax.f32 %v15269_v58, %v15270_v4 }
 0x3c5   :  { %6142 = vst [vmem:[%s14127_s3 + $0x4f0] sm:$0xff] %v5946_v22  ;;  %v5752_v53 = vadd.f32 %v13427_v50, %v5549_v24  ;;  %v4113_v0 = vmax.f32 %v15256_v44, %v3782_v36  ;;  %v15275_v44 = vld [vmem:[#allocation293_spill] sm:$0xff] }
 0x3c6   :  { %v5949_v38 = vmax.f32 %v5753_v12, 0.0  ;;  %v5552_v39 = vmax.f32 %v4114_v17, %v8876_v11  ;;  %v15272_v11 = vld [vmem:[#allocation291_spill] sm:$0xff]  ;;  %v15273_v12 = vld [vmem:[#allocation292_spill] sm:$0xff] }
 0x3c7   :  { %v5948_v43 = vmax.f32 %v5752_v53, 0.0  ;;  %v5551_v41 = vmax.f32 %v4113_v0, %v5220_v37  ;;  %v8553_v18 = vpop.f32.mrb[104].mxu0  ;;  %v8879_v31 = vpop.f32.mrb[104].mxu1  ;;  %v15274_v20 = vmax.f32 %v15272_v11, %v15273_v12  ;;  %v15276_v0 = vld [vmem:[#allocation294_spill] sm:$0xff] }
 0x3c8   :  { %6145 = vst [vmem:[%s14127_s3 + $0x508] sm:$0xff] %v5949_v38  ;;  %v5755_v32 = vadd.f32 %v13427_v50, %v5552_v39  ;;  %v4116_v34 = vmax.f32 %v15259_v54, %v8553_v18  ;;  %v3792_v35 = vpop.f32.mrb[105].mxu0  ;;  %v5230_v23 = vpop.f32.mrb[105].mxu1  ;;  %v15277_v38 = vmax.f32 %v15275_v44, %v15276_v0 }
 0x3c9   :  { %6144 = vst [vmem:[%s14127_s3 + $0x500] sm:$0xff] %v5948_v43  ;;  %v5754_v25 = vadd.f32 %v13427_v50, %v5551_v41  ;;  %v4115_v7 = vmax.f32 %v15262_v6, %v3792_v35  ;;  %v15281_v6 = vld [vmem:[#allocation297_spill] sm:$0xff] }
 0x3ca   :  { %v5951_v45 = vmax.f32 %v5755_v32, 0.0  ;;  %v5554_v13 = vmax.f32 %v4116_v34, %v8879_v31  ;;  %v15278_v31 = vld [vmem:[#allocation295_spill] sm:$0xff]  ;;  %v15279_v32 = vld [vmem:[#allocation296_spill] sm:$0xff] }
 0x3cb   :  { %v5950_v46 = vmax.f32 %v5754_v25, 0.0  ;;  %v5553_v47 = vmax.f32 %v4115_v7, %v5230_v23  ;;  %v8556_v30 = vpop.f32.mrb[106].mxu0  ;;  %v8882_v8 = vpop.f32.mrb[106].mxu1  ;;  %v15280_v19 = vmax.f32 %v15278_v31, %v15279_v32  ;;  %v15282_v7 = vld [vmem:[#allocation298_spill] sm:$0xff] }
 0x3cc   :  { %6147 = vst [vmem:[%s14127_s3 + $0x518] sm:$0xff] %v5951_v45  ;;  %v5757_v1 = vadd.f32 %v13427_v50, %v5554_v13  ;;  %v4118_v49 = vmax.f32 %v15265_v48, %v8556_v30  ;;  %v3802_v15 = vpop.f32.mrb[107].mxu0  ;;  %v5240_v21 = vpop.f32.mrb[107].mxu1  ;;  %v15283_v45 = vmax.f32 %v15281_v6, %v15282_v7 }
 0x3cd   :  { %6146 = vst [vmem:[%s14127_s3 + $0x510] sm:$0xff] %v5950_v46  ;;  %v5756_v27 = vadd.f32 %v13427_v50, %v5553_v47  ;;  %v4117_v28 = vmax.f32 %v15268_v59, %v3802_v15  ;;  %v15287_v59 = vld [vmem:[#allocation301_spill] sm:$0xff] }
 0x3ce   :  { %v5953_v29 = vmax.f32 %v5757_v1, 0.0  ;;  %v5556_v60 = vmax.f32 %v4118_v49, %v8882_v8  ;;  %v15284_v8 = vld [vmem:[#allocation299_spill] sm:$0xff]  ;;  %v15285_v1 = vld [vmem:[#allocation300_spill] sm:$0xff] }
 0x3cf   :  { %v5952_v61 = vmax.f32 %v5756_v27, 0.0  ;;  %v5555_v55 = vmax.f32 %v4117_v28, %v5240_v21  ;;  %v8559_v3 = vpop.f32.mrb[108].mxu0  ;;  %v8885_v62 = vpop.f32.mrb[108].mxu1  ;;  %v15286_v2 = vmax.f32 %v15284_v8, %v15285_v1  ;;  %v15288_v28 = vld [vmem:[#allocation302_spill] sm:$0xff] }
 0x3d0   :  { %6149 = vst [vmem:[%s14127_s3 + $0x528] sm:$0xff] %v5953_v29  ;;  %v5759_v56 = vadd.f32 %v13427_v50, %v5556_v60  ;;  %v4120_v63 = vmax.f32 %v15271_v5, %v8559_v3  ;;  %v3812_v22 = vpop.f32.mrb[109].mxu0  ;;  %v5250_v24 = vpop.f32.mrb[109].mxu1  ;;  %v15289_v29 = vmax.f32 %v15287_v59, %v15288_v28 }
 0x3d1   :  { %6148 = vst [vmem:[%s14127_s3 + $0x520] sm:$0xff] %v5952_v61  ;;  %v5758_v51 = vadd.f32 %v13427_v50, %v5555_v55  ;;  %v4119_v52 = vmax.f32 %v15274_v20, %v3812_v22  ;;  %v15293_v20 = vld [vmem:[#allocation305_spill] sm:$0xff] }
 0x3d2   :  { %v5955_v16 = vmax.f32 %v5759_v56, 0.0  ;;  %v5558_v17 = vmax.f32 %v4120_v63, %v8885_v62  ;;  %v15290_v62 = vld [vmem:[#allocation303_spill] sm:$0xff]  ;;  %v15291_v56 = vld [vmem:[#allocation304_spill] sm:$0xff] }
 0x3d3   :  { %v5954_v36 = vmax.f32 %v5758_v51, 0.0  ;;  %v5557_v37 = vmax.f32 %v4119_v52, %v5250_v24  ;;  %v8562_v53 = vpop.f32.mrb[110].mxu0  ;;  %v8888_v33 = vpop.f32.mrb[110].mxu1  ;;  %v15292_v58 = vmax.f32 %v15290_v62, %v15291_v56  ;;  %v15294_v52 = vld [vmem:[#allocation306_spill] sm:$0xff] }
 0x3d4   :  { %6151 = vst [vmem:[%s14127_s3 + $0x538] sm:$0xff] %v5955_v16  ;;  %v5761_v42 = vadd.f32 %v13427_v50, %v5558_v17  ;;  %v4122_v39 = vmax.f32 %v15277_v38, %v8562_v53  ;;  %v3822_v43 = vpop.f32.mrb[111].mxu0  ;;  %v5260_v41 = vpop.f32.mrb[111].mxu1  ;;  %v15295_v16 = vmax.f32 %v15293_v20, %v15294_v52 }
 0x3d5   :  { %6150 = vst [vmem:[%s14127_s3 + $0x530] sm:$0xff] %v5954_v36  ;;  %v5760_v18 = vadd.f32 %v13427_v50, %v5557_v37  ;;  %v4121_v10 = vmax.f32 %v15280_v19, %v3822_v43  ;;  %v15299_v19 = vld [vmem:[#allocation309_spill] sm:$0xff] }
 0x3d6   :  { %v5957_v54 = vmax.f32 %v5761_v42, 0.0  ;;  %v5560_v34 = vmax.f32 %v4122_v39, %v8888_v33  ;;  %v15296_v33 = vld [vmem:[#allocation307_spill] sm:$0xff]  ;;  %v15297_v42 = vld [vmem:[#allocation308_spill] sm:$0xff] }
 0x3d7   :  { %v5956_v35 = vmax.f32 %v5760_v18, 0.0  ;;  %v5559_v23 = vmax.f32 %v4121_v10, %v5260_v41  ;;  %v8565_v25 = vpop.f32.mrb[112].mxu0  ;;  %v8891_v57 = vpop.f32.mrb[112].mxu1  ;;  %v15298_v44 = vmax.f32 %v15296_v33, %v15297_v42  ;;  %v15300_v10 = vld [vmem:[#allocation310_spill] sm:$0xff] }
 0x3d8   :  { %6153 = vst [vmem:[%s14127_s3 + $0x548] sm:$0xff] %v5957_v54  ;;  %v5763_v50 = vadd.f32 %v13943_v14, %v5560_v34  ;;  %v4124_v13 = vmax.f32 %v15283_v45, %v8565_v25  ;;  %v3832_v46 = vpop.f32.mrb[113].mxu0  ;;  %v5270_v47 = vpop.f32.mrb[113].mxu1  ;;  %v15301_v54 = vmax.f32 %v15299_v19, %v15300_v10 }
 0x3d9   :  { %6152 = vst [vmem:[%s14127_s3 + $0x540] sm:$0xff] %v5956_v35  ;;  %v5762_v30 = vadd.f32 %v13943_v14, %v5559_v23  ;;  %v4123_v26 = vmax.f32 %v15286_v2, %v3832_v46  ;;  %v15305_v2 = vld [vmem:[#allocation313_spill] sm:$0xff] }
 0x3da   :  { %v5959_v48 = vmax.f32 %v5763_v50, 0.0  ;;  %v5562_v49 = vmax.f32 %v4124_v13, %v8891_v57  ;;  %v15302_v57 = vld [vmem:[#allocation311_spill] sm:$0xff]  ;;  %v15303_v50 = vld [vmem:[#allocation312_spill] sm:$0xff] }
 0x3db   :  { %v5958_v15 = vmax.f32 %v5762_v30, 0.0  ;;  %v5561_v21 = vmax.f32 %v4123_v26, %v5270_v47  ;;  %v8568_v27 = vpop.f32.mrb[114].mxu0  ;;  %v8894_v9 = vpop.f32.mrb[114].mxu1  ;;  %v15304_v6 = vmax.f32 %v15302_v57, %v15303_v50  ;;  %v15306_v26 = vld [vmem:[#allocation314_spill] sm:$0xff] }
 0x3dc   :  { %6155 = vst [vmem:[%s14127_s3 + $0x558] sm:$0xff] %v5959_v48  ;;  %v5765_v40 = vadd.f32 %v13943_v14, %v5562_v49  ;;  %v4126_v60 = vmax.f32 %v15289_v29, %v8568_v27  ;;  %v3842_v61 = vpop.f32.mrb[115].mxu0  ;;  %v5280_v55 = vpop.f32.mrb[115].mxu1  ;;  %v15307_v48 = vmax.f32 %v15305_v2, %v15306_v26 }
 0x3dd   :  { %6154 = vst [vmem:[%s14127_s3 + $0x550] sm:$0xff] %v5958_v15  ;;  %v5764_v3 = vadd.f32 %v13943_v14, %v5561_v21  ;;  %v4125_v4 = vmax.f32 %v15292_v58, %v3842_v61  ;;  %v15311_v58 = vld [vmem:[#allocation317_spill] sm:$0xff] }
 0x3de   :  { %v5961_v5 = vmax.f32 %v5765_v40, 0.0  ;;  %v5564_v63 = vmax.f32 %v4126_v60, %v8894_v9  ;;  %v15308_v9 = vld [vmem:[#allocation315_spill] sm:$0xff]  ;;  %v15309_v40 = vld [vmem:[#allocation316_spill] sm:$0xff] }
 0x3df   :  { %v5960_v22 = vmax.f32 %v5764_v3, 0.0  ;;  %v5563_v24 = vmax.f32 %v4125_v4, %v5280_v55  ;;  %v8571_v51 = vpop.f32.mrb[116].mxu0  ;;  %v8897_v11 = vpop.f32.mrb[116].mxu1  ;;  %v15310_v59 = vmax.f32 %v15308_v9, %v15309_v40  ;;  %v15312_v4 = vld [vmem:[#allocation318_spill] sm:$0xff] }
 0x3e0   :  { %6157 = vst [vmem:[%s14127_s3 + $0x568] sm:$0xff] %v5961_v5  ;;  %v5767_v12 = vadd.f32 %v13943_v14, %v5564_v63  ;;  %v4128_v17 = vmax.f32 %v15295_v16, %v8571_v51  ;;  %v3852_v36 = vpop.f32.mrb[117].mxu0  ;;  %v5290_v37 = vpop.f32.mrb[117].mxu1  ;;  %v15313_v5 = vmax.f32 %v15311_v58, %v15312_v4 }
 0x3e1   :  { %6156 = vst [vmem:[%s14127_s3 + $0x560] sm:$0xff] %v5960_v22  ;;  %v5766_v53 = vadd.f32 %v13943_v14, %v5563_v24  ;;  %v4127_v0 = vmax.f32 %v15298_v44, %v3852_v36  ;;  %v15317_v44 = vld [vmem:[#allocation321_spill] sm:$0xff] }
 0x3e2   :  { %v5963_v38 = vmax.f32 %v5767_v12, 0.0  ;;  %v5566_v39 = vmax.f32 %v4128_v17, %v8897_v11  ;;  %v15314_v11 = vld [vmem:[#allocation319_spill] sm:$0xff]  ;;  %v15315_v12 = vld [vmem:[#allocation320_spill] sm:$0xff] }
 0x3e3   :  { %v5962_v43 = vmax.f32 %v5766_v53, 0.0  ;;  %v5565_v41 = vmax.f32 %v4127_v0, %v5290_v37  ;;  %v8574_v18 = vpop.f32.mrb[118].mxu0  ;;  %v8900_v31 = vpop.f32.mrb[118].mxu1  ;;  %v15316_v20 = vmax.f32 %v15314_v11, %v15315_v12  ;;  %v15318_v0 = vld [vmem:[#allocation322_spill] sm:$0xff] }
 0x3e4   :  { %6159 = vst [vmem:[%s14127_s3 + $0x578] sm:$0xff] %v5963_v38  ;;  %v5769_v32 = vadd.f32 %v13943_v14, %v5566_v39  ;;  %v4130_v34 = vmax.f32 %v15301_v54, %v8574_v18  ;;  %v3862_v35 = vpop.f32.mrb[119].mxu0  ;;  %v5300_v23 = vpop.f32.mrb[119].mxu1  ;;  %v15319_v38 = vmax.f32 %v15317_v44, %v15318_v0 }
 0x3e5   :  { %6158 = vst [vmem:[%s14127_s3 + $0x570] sm:$0xff] %v5962_v43  ;;  %v5768_v25 = vadd.f32 %v13943_v14, %v5565_v41  ;;  %v4129_v7 = vmax.f32 %v15304_v6, %v3862_v35  ;;  %v15323_v6 = vld [vmem:[#allocation325_spill] sm:$0xff] }
 0x3e6   :  { %v5965_v45 = vmax.f32 %v5769_v32, 0.0  ;;  %v5568_v13 = vmax.f32 %v4130_v34, %v8900_v31  ;;  %v15320_v31 = vld [vmem:[#allocation323_spill] sm:$0xff]  ;;  %v15321_v32 = vld [vmem:[#allocation324_spill] sm:$0xff] }
 0x3e7   :  { %v5964_v46 = vmax.f32 %v5768_v25, 0.0  ;;  %v5567_v47 = vmax.f32 %v4129_v7, %v5300_v23  ;;  %v8577_v30 = vpop.f32.mrb[120].mxu0  ;;  %v8903_v8 = vpop.f32.mrb[120].mxu1  ;;  %v15322_v19 = vmax.f32 %v15320_v31, %v15321_v32  ;;  %v15324_v7 = vld [vmem:[#allocation326_spill] sm:$0xff] }
 0x3e8   :  { %6161 = vst [vmem:[%s14127_s3 + $0x588] sm:$0xff] %v5965_v45  ;;  %v5771_v1 = vadd.f32 %v13943_v14, %v5568_v13  ;;  %v4132_v49 = vmax.f32 %v15307_v48, %v8577_v30  ;;  %v3872_v15 = vpop.f32.mrb[121].mxu0  ;;  %v5310_v21 = vpop.f32.mrb[121].mxu1  ;;  %v15325_v45 = vmax.f32 %v15323_v6, %v15324_v7 }
 0x3e9   :  { %6160 = vst [vmem:[%s14127_s3 + $0x580] sm:$0xff] %v5964_v46  ;;  %v5770_v27 = vadd.f32 %v13943_v14, %v5567_v47  ;;  %v4131_v28 = vmax.f32 %v15310_v59, %v3872_v15  ;;  %v15329_v59 = vld [vmem:[#allocation329_spill] sm:$0xff] }
 0x3ea   :  { %v5967_v29 = vmax.f32 %v5771_v1, 0.0  ;;  %v5570_v60 = vmax.f32 %v4132_v49, %v8903_v8  ;;  %v15326_v8 = vld [vmem:[#allocation327_spill] sm:$0xff]  ;;  %v15327_v1 = vld [vmem:[#allocation328_spill] sm:$0xff] }
 0x3eb   :  { %v5966_v61 = vmax.f32 %v5770_v27, 0.0  ;;  %v5569_v55 = vmax.f32 %v4131_v28, %v5310_v21  ;;  %v8580_v3 = vpop.f32.mrb[122].mxu0  ;;  %v8906_v62 = vpop.f32.mrb[122].mxu1  ;;  %v15328_v2 = vmax.f32 %v15326_v8, %v15327_v1  ;;  %v15330_v28 = vld [vmem:[#allocation330_spill] sm:$0xff] }
 0x3ec   :  { %6163 = vst [vmem:[%s14127_s3 + $0x598] sm:$0xff] %v5967_v29  ;;  %v5773_v56 = vadd.f32 %v13943_v14, %v5570_v60  ;;  %v4134_v63 = vmax.f32 %v15313_v5, %v8580_v3  ;;  %v3882_v22 = vpop.f32.mrb[123].mxu0  ;;  %v5320_v24 = vpop.f32.mrb[123].mxu1  ;;  %v15331_v29 = vmax.f32 %v15329_v59, %v15330_v28 }
 0x3ed   :  { %6162 = vst [vmem:[%s14127_s3 + $0x590] sm:$0xff] %v5966_v61  ;;  %v5772_v51 = vadd.f32 %v13943_v14, %v5569_v55  ;;  %v4133_v52 = vmax.f32 %v15316_v20, %v3882_v22  ;;  %v15335_v20 = vld [vmem:[#allocation333_spill] sm:$0xff] }
 0x3ee   :  { %v5969_v16 = vmax.f32 %v5773_v56, 0.0  ;;  %v5572_v17 = vmax.f32 %v4134_v63, %v8906_v62  ;;  %v15332_v62 = vld [vmem:[#allocation331_spill] sm:$0xff]  ;;  %v15333_v56 = vld [vmem:[#allocation332_spill] sm:$0xff] }
 0x3ef   :  { %v5968_v36 = vmax.f32 %v5772_v51, 0.0  ;;  %v5571_v37 = vmax.f32 %v4133_v52, %v5320_v24  ;;  %v8583_v53 = vpop.f32.mrb[124].mxu0  ;;  %v8909_v33 = vpop.f32.mrb[124].mxu1  ;;  %v15334_v58 = vmax.f32 %v15332_v62, %v15333_v56  ;;  %v15336_v52 = vld [vmem:[#allocation334_spill] sm:$0xff] }
 0x3f0   :  { %6165 = vst [vmem:[%s14127_s3 + $0x5a8] sm:$0xff] %v5969_v16  ;;  %v5775_v42 = vadd.f32 %v13943_v14, %v5572_v17  ;;  %v4136_v39 = vmax.f32 %v15319_v38, %v8583_v53  ;;  %v3892_v43 = vpop.f32.mrb[125].mxu0  ;;  %v5330_v41 = vpop.f32.mrb[125].mxu1  ;;  %v15337_v16 = vmax.f32 %v15335_v20, %v15336_v52 }
 0x3f1   :  { %6164 = vst [vmem:[%s14127_s3 + $0x5a0] sm:$0xff] %v5968_v36  ;;  %v5774_v18 = vadd.f32 %v13943_v14, %v5571_v37  ;;  %v4135_v10 = vmax.f32 %v15322_v19, %v3892_v43  ;;  %v15341_v19 = vld [vmem:[#allocation337_spill] sm:$0xff] }
 0x3f2   :  { %v5971_v54 = vmax.f32 %v5775_v42, 0.0  ;;  %v5574_v34 = vmax.f32 %v4136_v39, %v8909_v33  ;;  %v15338_v33 = vld [vmem:[#allocation335_spill] sm:$0xff]  ;;  %v15339_v42 = vld [vmem:[#allocation336_spill] sm:$0xff] }
 0x3f3   :  { %v5970_v35 = vmax.f32 %v5774_v18, 0.0  ;;  %v5573_v23 = vmax.f32 %v4135_v10, %v5330_v41  ;;  %v8586_v25 = vpop.f32.mrb[126].mxu0  ;;  %v8912_v57 = vpop.f32.mrb[126].mxu1  ;;  %v15340_v44 = vmax.f32 %v15338_v33, %v15339_v42  ;;  %v15342_v10 = vld [vmem:[#allocation338_spill] sm:$0xff] }
 0x3f4   :  { %6167 = vst [vmem:[%s14127_s3 + $0x5b8] sm:$0xff] %v5971_v54  ;;  %v5777_v50 = vadd.f32 %v13943_v14, %v5574_v34  ;;  %v4138_v13 = vmax.f32 %v15325_v45, %v8586_v25  ;;  %v3902_v46 = vpop.f32.mrb[127].mxu0  ;;  %v5340_v47 = vpop.f32.mrb[127].mxu1  ;;  %v15343_v54 = vmax.f32 %v15341_v19, %v15342_v10 }
 0x3f5   :  { %6166 = vst [vmem:[%s14127_s3 + $0x5b0] sm:$0xff] %v5970_v35  ;;  %v5776_v30 = vadd.f32 %v13943_v14, %v5573_v23  ;;  %v4137_v26 = vmax.f32 %v15328_v2, %v3902_v46  ;;  %v15347_v2 = vld [vmem:[#allocation341_spill] sm:$0xff] }
 0x3f6   :  { %v5973_v48 = vmax.f32 %v5777_v50, 0.0  ;;  %v5576_v49 = vmax.f32 %v4138_v13, %v8912_v57  ;;  %v15344_v57 = vld [vmem:[#allocation339_spill] sm:$0xff]  ;;  %v15345_v50 = vld [vmem:[#allocation340_spill] sm:$0xff] }
 0x3f7   :  { %v5972_v15 = vmax.f32 %v5776_v30, 0.0  ;;  %v5575_v21 = vmax.f32 %v4137_v26, %v5340_v47  ;;  %v8589_v27 = vpop.f32.mrb[128].mxu0  ;;  %v8915_v9 = vpop.f32.mrb[128].mxu1  ;;  %v15346_v6 = vmax.f32 %v15344_v57, %v15345_v50  ;;  %v15348_v26 = vld [vmem:[#allocation342_spill] sm:$0xff] }
 0x3f8   :  { %6169 = vst [vmem:[%s14127_s3 + $0x5c8] sm:$0xff] %v5973_v48  ;;  %v5779_v40 = vadd.f32 %v13943_v14, %v5576_v49  ;;  %v4140_v60 = vmax.f32 %v15331_v29, %v8589_v27  ;;  %v3912_v61 = vpop.f32.mrb[129].mxu0  ;;  %v5350_v55 = vpop.f32.mrb[129].mxu1  ;;  %v15349_v48 = vmax.f32 %v15347_v2, %v15348_v26 }
 0x3f9   :  { %6168 = vst [vmem:[%s14127_s3 + $0x5c0] sm:$0xff] %v5972_v15  ;;  %v5778_v3 = vadd.f32 %v13943_v14, %v5575_v21  ;;  %v4139_v4 = vmax.f32 %v15334_v58, %v3912_v61 }
 0x3fa   :  { %v5975_v5 = vmax.f32 %v5779_v40, 0.0  ;;  %v5578_v63 = vmax.f32 %v4140_v60, %v8915_v9  ;;  %v15350_v9 = vld [vmem:[#allocation343_spill] sm:$0xff]  ;;  %v15351_v40 = vld [vmem:[#allocation344_spill] sm:$0xff] }
 0x3fb   :  { %v5974_v22 = vmax.f32 %v5778_v3, 0.0  ;;  %v5577_v24 = vmax.f32 %v4139_v4, %v5350_v55  ;;  %v8592_v51 = vpop.f32.mrb[130].mxu0  ;;  %v8918_v11 = vpop.f32.mrb[130].mxu1  ;;  %v15352_v59 = vmax.f32 %v15350_v9, %v15351_v40 }
 0x3fc   :  { %6171 = vst [vmem:[%s14127_s3 + $0x5d8] sm:$0xff] %v5975_v5  ;;  %v5781_v12 = vadd.f32 %v13943_v14, %v5578_v63  ;;  %v4142_v17 = vmax.f32 %v15337_v16, %v8592_v51  ;;  %v3922_v36 = vpop.f32.mrb[131].mxu0  ;;  %v5360_v37 = vpop.f32.mrb[131].mxu1 }
 0x3fd   :  { %6170 = vst [vmem:[%s14127_s3 + $0x5d0] sm:$0xff] %v5974_v22  ;;  %v5780_v53 = vadd.f32 %v13943_v14, %v5577_v24  ;;  %v4141_v0 = vmax.f32 %v15340_v44, %v3922_v36 }
 0x3fe   :  { %v5977_v38 = vmax.f32 %v5781_v12, 0.0  ;;  %v5580_v39 = vmax.f32 %v4142_v17, %v8918_v11 }
 0x3ff   :  { %v5976_v43 = vmax.f32 %v5780_v53, 0.0  ;;  %v5579_v41 = vmax.f32 %v4141_v0, %v5360_v37  ;;  %v8595_v18 = vpop.f32.mrb[132].mxu0  ;;  %v8921_v31 = vpop.f32.mrb[132].mxu1 }
 0x400   :  { %6173 = vst [vmem:[%s14127_s3 + $0x5e8] sm:$0xff] %v5977_v38  ;;  %v5783_v32 = vadd.f32 %v13943_v14, %v5580_v39  ;;  %v4144_v34 = vmax.f32 %v15343_v54, %v8595_v18  ;;  %v3932_v35 = vpop.f32.mrb[133].mxu0  ;;  %v5370_v23 = vpop.f32.mrb[133].mxu1 }
 0x401   :  { %6172 = vst [vmem:[%s14127_s3 + $0x5e0] sm:$0xff] %v5976_v43  ;;  %v5782_v25 = vadd.f32 %v13943_v14, %v5579_v41  ;;  %v4143_v7 = vmax.f32 %v15346_v6, %v3932_v35 }
 0x402   :  { %v5979_v45 = vmax.f32 %v5783_v32, 0.0  ;;  %v5582_v13 = vmax.f32 %v4144_v34, %v8921_v31 }
 0x403   :  { %v5978_v46 = vmax.f32 %v5782_v25, 0.0  ;;  %v5581_v47 = vmax.f32 %v4143_v7, %v5370_v23  ;;  %v8598_v30 = vpop.f32.mrb[134].mxu0  ;;  %v8924_v8 = vpop.f32.mrb[134].mxu1 }
 0x404   :  { %6175 = vst [vmem:[%s14127_s3 + $0x5f8] sm:$0xff] %v5979_v45  ;;  %v5785_v1 = vadd.f32 %v13943_v14, %v5582_v13  ;;  %v4146_v49 = vmax.f32 %v15349_v48, %v8598_v30  ;;  %v3942_v15 = vpop.f32.mrb[135].mxu0  ;;  %v5380_v21 = vpop.f32.mrb[135].mxu1 }
 0x405   :  { %6174 = vst [vmem:[%s14127_s3 + $0x5f0] sm:$0xff] %v5978_v46  ;;  %v5784_v27 = vadd.f32 %v13943_v14, %v5581_v47  ;;  %v4145_v28 = vmax.f32 %v15352_v59, %v3942_v15 }
 0x406   :  { %v5981_v29 = vmax.f32 %v5785_v1, 0.0  ;;  %v5584_v60 = vmax.f32 %v4146_v49, %v8924_v8 }
 0x407   :  { %v5980_v61 = vmax.f32 %v5784_v27, 0.0  ;;  %v5583_v55 = vmax.f32 %v4145_v28, %v5380_v21 }
 0x408   :  { %6177 = vst [vmem:[%s14127_s3 + $0x608] sm:$0xff] %v5981_v29  ;;  %v5787_v3 = vadd.f32 %v13943_v14, %v5584_v60 }
 0x409   :  { %6176 = vst [vmem:[%s14127_s3 + $0x600] sm:$0xff] %v5980_v61  ;;  %v5786_v62 = vadd.f32 %v13943_v14, %v5583_v55 }
 0x40a   :  { %v5983_v56 = vmax.f32 %v5787_v3, 0.0 }
 0x40b   :  { %v5982_v58 = vmax.f32 %v5786_v62, 0.0 }
 0x40c   :  { %6179 = vst [vmem:[%s14127_s3 + $0x618] sm:$0xff] %v5983_v56 }
 0x40d   :  { %6178 = vst [vmem:[%s14127_s3 + $0x610] sm:$0xff] %v5982_v58 }

// kernel: _forward_logits.3
= control target key start
LH: loop header
LB: loop body
LE: loop exit
PB: predicated region body
PF: predicated region fallthrough
CT: control target
= control target key end

     0   :  { %v10136_v0 = vmov 0.0|0.0   ;;  %vm6140_vm0 = vmmov 0   ;;  %s10126_s1 = inlined_call_operand.vmem [shape: f32[256,128], index: 1, kind: input, shape index: {}]   ;;  %s10127_s0 = inlined_call_operand.vmem [shape: f32[4,200,256], index: 0, kind: input, shape index: {}]   ;;  %s10128_s3 = inlined_call_operand.vmem [shape: f32[25,128,256], index: 3, kind: input, shape index: {}]   ;;  %s10129_s2 = inlined_call_operand.vmem [shape: f32[1,128], index: 2, kind: input, shape index: {}]   ;;  %s10130_s5 = inlined_call_operand.vmem [shape: f32[256,128], index: 5, kind: input, shape index: {}]   ;;  %s10131_s4 = inlined_call_operand.vmem [shape: f32[1,256], index: 4, kind: input, shape index: {}]   ;;  %s10132_s7 = inlined_call_operand.vmem [shape: f32[128,128], index: 7, kind: input, shape index: {}]   ;;  %s10133_s6 = inlined_call_operand.vmem [shape: f32[1,128], index: 6, kind: input, shape index: {}]   ;;  %s10134_s8 = inlined_call_operand.vmem [shape: f32[1,128], index: 8, kind: input, shape index: {}]   ;;  %s10135_s9 = inlined_call_operand.vmem [shape: f32[8,128], index: 9, kind: output, shape index: {}]  }
   0x1   :  { %5036 = vmatprep.subr.bf16.mxu1 %v10136_v0  ;;  %v32_v1 = vld [vmem:[%s10126_s1] sm:$0xff]  ;;  %v33_v2 = vld [vmem:[%s10126_s1 + $0x8] sm:$0xff]  ;;  %v34_v3 = vld [vmem:[%s10126_s1 + $0x10] sm:$0xff] }
   0x2   :  { %v6201_v4 = vpack.c.bf16 %v33_v2, %v32_v1  ;;  %v35_v5 = vld [vmem:[%s10126_s1 + $0x18] sm:$0xff]  ;;  %v36_v7 = vld [vmem:[%s10126_s1 + $0x20] sm:$0xff]  ;;  %v37_v8 = vld [vmem:[%s10126_s1 + $0x28] sm:$0xff] }
   0x3   :  { %v6207_v6 = vpack.c.bf16 %v35_v5, %v34_v3  ;;  %v6217_v9 = vpack.c.bf16 %v37_v8, %v36_v7  ;;  %v38_v10 = vld [vmem:[%s10126_s1 + $0x30] sm:$0xff]  ;;  %v39_v11 = vld [vmem:[%s10126_s1 + $0x38] sm:$0xff]  ;;  %v65_v12 = vld [vmem:[%s10127_s0 + $0x8] sm:$0xff] }
   0x4   :  { %5038 = vmatpush1.bf16.msra.mxu1 %v6201_v4  ;;  %v6230_v13 = vpack.c.bf16 %v39_v11, %v38_v10  ;;  %178 = vmatprep.mubr.f32.mxu1 %v65_v12  ;;  %v40_v14 = vld [vmem:[%s10126_s1 + $0x40] sm:$0xff]  ;;  %v41_v15 = vld [vmem:[%s10126_s1 + $0x48] sm:$0xff]  ;;  %v42_v17 = vld [vmem:[%s10126_s1 + $0x50] sm:$0xff] }
   0x5   :  { %5039 = vmatprep.subr.bf16.mxu1 %v10136_v0  ;;  %v6240_v16 = vpack.c.bf16 %v41_v15, %v40_v14  ;;  %v43_v18 = vld [vmem:[%s10126_s1 + $0x58] sm:$0xff]  ;;  %v44_v20 = vld [vmem:[%s10126_s1 + $0x60] sm:$0xff]  ;;  %v45_v21 = vld [vmem:[%s10126_s1 + $0x68] sm:$0xff] }
   0x6   :  { %v6250_v19 = vpack.c.bf16 %v43_v18, %v42_v17  ;;  %v6260_v22 = vpack.c.bf16 %v45_v21, %v44_v20  ;;  %v46_v23 = vld [vmem:[%s10126_s1 + $0x70] sm:$0xff]  ;;  %v47_v24 = vld [vmem:[%s10126_s1 + $0x78] sm:$0xff]  ;;  %v48_v26 = vld [vmem:[%s10126_s1 + $0x80] sm:$0xff] }
   0x7   :  { %v6270_v25 = vpack.c.bf16 %v47_v24, %v46_v23  ;;  %v49_v27 = vld [vmem:[%s10126_s1 + $0x88] sm:$0xff]  ;;  %v50_v29 = vld [vmem:[%s10126_s1 + $0x90] sm:$0xff]  ;;  %v51_v30 = vld [vmem:[%s10126_s1 + $0x98] sm:$0xff] }
   0x8   :  { %5041 = vmatpush1.bf16.msra.mxu1 %v6207_v6  ;;  %v6280_v28 = vpack.c.bf16 %v49_v27, %v48_v26  ;;  %v6290_v31 = vpack.c.bf16 %v51_v30, %v50_v29  ;;  %v52_v32 = vld [vmem:[%s10126_s1 + $0xa0] sm:$0xff]  ;;  %v53_v33 = vld [vmem:[%s10126_s1 + $0xa8] sm:$0xff]  ;;  %v54_v35 = vld [vmem:[%s10126_s1 + $0xb0] sm:$0xff] }
   0x9   :  { %5042 = vmatprep.subr.bf16.mxu1 %v10136_v0  ;;  %v6300_v34 = vpack.c.bf16 %v53_v33, %v52_v32  ;;  %v55_v36 = vld [vmem:[%s10126_s1 + $0xb8] sm:$0xff]  ;;  %v56_v38 = vld [vmem:[%s10126_s1 + $0xc0] sm:$0xff]  ;;  %v57_v39 = vld [vmem:[%s10126_s1 + $0xc8] sm:$0xff] }
   0xa   :  { %v6310_v37 = vpack.c.bf16 %v55_v36, %v54_v35  ;;  %v6320_v40 = vpack.c.bf16 %v57_v39, %v56_v38  ;;  %v58_v41 = vld [vmem:[%s10126_s1 + $0xd0] sm:$0xff]  ;;  %v59_v42 = vld [vmem:[%s10126_s1 + $0xd8] sm:$0xff]  ;;  %v60_v44 = vld [vmem:[%s10126_s1 + $0xe0] sm:$0xff] }
   0xb   :  { %v6330_v43 = vpack.c.bf16 %v59_v42, %v58_v41  ;;  %v61_v45 = vld [vmem:[%s10126_s1 + $0xe8] sm:$0xff]  ;;  %v62_v47 = vld [vmem:[%s10126_s1 + $0xf0] sm:$0xff]  ;;  %v63_v48 = vld [vmem:[%s10126_s1 + $0xf8] sm:$0xff] }
   0xc   :  { %5044 = vmatpush1.bf16.msra.mxu1 %v6217_v9  ;;  %v6340_v46 = vpack.c.bf16 %v61_v45, %v60_v44  ;;  %v6350_v49 = vpack.c.bf16 %v63_v48, %v62_v47  ;;  %v64_v50 = vld [vmem:[%s10127_s0] sm:$0xff]  ;;  %v67_v51 = vld [vmem:[%s10127_s0 + $0x18] sm:$0xff]  ;;  %v66_v52 = vld [vmem:[%s10127_s0 + $0x10] sm:$0xff] }
   0xd   :  { %5045 = vmatprep.subr.bf16.mxu1 %v10136_v0  ;;  %v69_v53 = vld [vmem:[%s10127_s0 + $0x28] sm:$0xff]  ;;  %v68_v54 = vld [vmem:[%s10127_s0 + $0x20] sm:$0xff]  ;;  %v71_v55 = vld [vmem:[%s10127_s0 + $0x38] sm:$0xff] }
   0xe   :  { %v70_v56 = vld [vmem:[%s10127_s0 + $0x30] sm:$0xff]  ;;  %v73_v57 = vld [vmem:[%s10127_s0 + $0x48] sm:$0xff]  ;;  %v72_v58 = vld [vmem:[%s10127_s0 + $0x40] sm:$0xff] }
   0xf   :  { %v75_v59 = vld [vmem:[%s10127_s0 + $0x58] sm:$0xff]  ;;  %v74_v60 = vld [vmem:[%s10127_s0 + $0x50] sm:$0xff]  ;;  %v77_v61 = vld [vmem:[%s10127_s0 + $0x68] sm:$0xff] }
  0x10   :  { %5047 = vmatpush1.bf16.msra.mxu1 %v6230_v13  ;;  %v76_v62 = vld [vmem:[%s10127_s0 + $0x60] sm:$0xff]  ;;  %v79_v63 = vld [vmem:[%s10127_s0 + $0x78] sm:$0xff]  ;;  %v78_v1 = vld [vmem:[%s10127_s0 + $0x70] sm:$0xff] }
  0x11   :  { %5048 = vmatprep.subr.bf16.mxu1 %v10136_v0  ;;  %v81_v2 = vld [vmem:[%s10127_s0 + $0x88] sm:$0xff]  ;;  %v80_v3 = vld [vmem:[%s10127_s0 + $0x80] sm:$0xff]  ;;  %v83_v5 = vld [vmem:[%s10127_s0 + $0x98] sm:$0xff] }
  0x12   :  { %v82_v7 = vld [vmem:[%s10127_s0 + $0x90] sm:$0xff]  ;;  %v85_v8 = vld [vmem:[%s10127_s0 + $0xa8] sm:$0xff]  ;;  %v84_v10 = vld [vmem:[%s10127_s0 + $0xa0] sm:$0xff] }
  0x13   :  { %v87_v11 = vld [vmem:[%s10127_s0 + $0xb8] sm:$0xff]  ;;  %v86_v12 = vld [vmem:[%s10127_s0 + $0xb0] sm:$0xff]  ;;  %v89_v14 = vld [vmem:[%s10127_s0 + $0xc8] sm:$0xff] }
  0x14   :  { %5050 = vmatpush1.bf16.msra.mxu1 %v6240_v16  ;;  %v88_v15 = vld [vmem:[%s10127_s0 + $0xc0] sm:$0xff]  ;;  %v91_v17 = vld [vmem:[%s10127_s0 + $0xd8] sm:$0xff]  ;;  %v90_v18 = vld [vmem:[%s10127_s0 + $0xd0] sm:$0xff] }
  0x15   :  { %5051 = vmatprep.subr.bf16.mxu1 %v10136_v0  ;;  %v93_v20 = vld [vmem:[%s10127_s0 + $0xe8] sm:$0xff]  ;;  %v92_v21 = vld [vmem:[%s10127_s0 + $0xe0] sm:$0xff]  ;;  %v95_v23 = vld [vmem:[%s10127_s0 + $0xf8] sm:$0xff] }
  0x16   :  { %v94_v24 = vld [vmem:[%s10127_s0 + $0xf0] sm:$0xff]  ;;  %v97_v26 = vld [vmem:[%s10127_s0 + $0x108] sm:$0xff]  ;;  %v96_v27 = vld [vmem:[%s10127_s0 + $0x100] sm:$0xff] }
  0x17   :  { %v99_v29 = vld [vmem:[%s10127_s0 + $0x118] sm:$0xff]  ;;  %v98_v30 = vld [vmem:[%s10127_s0 + $0x110] sm:$0xff]  ;;  %v101_v32 = vld [vmem:[%s10127_s0 + $0x128] sm:$0xff] }
  0x18   :  { %5053 = vmatpush1.bf16.msra.mxu1 %v6250_v19  ;;  %v100_v33 = vld [vmem:[%s10127_s0 + $0x120] sm:$0xff]  ;;  %v103_v35 = vld [vmem:[%s10127_s0 + $0x138] sm:$0xff]  ;;  %v102_v36 = vld [vmem:[%s10127_s0 + $0x130] sm:$0xff] }
  0x19   :  { %5054 = vmatprep.subr.bf16.mxu1 %v10136_v0  ;;  %v105_v38 = vld [vmem:[%s10127_s0 + $0x148] sm:$0xff]  ;;  %v104_v39 = vld [vmem:[%s10127_s0 + $0x140] sm:$0xff]  ;;  %v107_v41 = vld [vmem:[%s10127_s0 + $0x158] sm:$0xff] }
  0x1a   :  { %v106_v42 = vld [vmem:[%s10127_s0 + $0x150] sm:$0xff]  ;;  %v109_v44 = vld [vmem:[%s10127_s0 + $0x168] sm:$0xff]  ;;  %v108_v45 = vld [vmem:[%s10127_s0 + $0x160] sm:$0xff] }
  0x1b   :  { %v111_v47 = vld [vmem:[%s10127_s0 + $0x178] sm:$0xff]  ;;  %v110_v48 = vld [vmem:[%s10127_s0 + $0x170] sm:$0xff] }
  0x1c   :  { %5056 = vmatpush1.bf16.msra.mxu1 %v6260_v22 }
  0x1d   :  { %5057 = vmatprep.subr.bf16.mxu1 %v10136_v0 }
  0x20   :  { %5059 = vmatpush1.bf16.msra.mxu1 %v6270_v25 }
  0x21   :  { %5060 = vmatprep.subr.bf16.mxu1 %v10136_v0 }
  0x24   :  { %5062 = vmatpush1.bf16.msra.mxu1 %v6280_v28 }
  0x25   :  { %5063 = vmatprep.subr.bf16.mxu1 %v10136_v0 }
  0x28   :  { %5065 = vmatpush1.bf16.msra.mxu1 %v6290_v31 }
  0x29   :  { %5066 = vmatprep.subr.bf16.mxu1 %v10136_v0 }
  0x2c   :  { %5068 = vmatpush1.bf16.msra.mxu1 %v6300_v34 }
  0x2d   :  { %5069 = vmatprep.subr.bf16.mxu1 %v10136_v0 }
  0x30   :  { %5071 = vmatpush1.bf16.msra.mxu1 %v6310_v37 }
  0x31   :  { %5072 = vmatprep.subr.bf16.mxu1 %v10136_v0 }
  0x34   :  { %5074 = vmatpush1.bf16.msra.mxu1 %v6320_v40 }
  0x35   :  { %5075 = vmatprep.subr.bf16.mxu1 %v10136_v0 }
  0x38   :  { %5077 = vmatpush1.bf16.msra.mxu1 %v6330_v43 }
  0x39   :  { %5078 = vmatprep.subr.bf16.mxu1 %v10136_v0 }
  0x3c   :  { %5080 = vmatpush1.bf16.msra.mxu1 %v6340_v46 }
  0x3d   :  { %5081 = vmatprep.subr.bf16.mxu1 %v10136_v0 }
  0x40   :  { %5083 = vmatpush1.bf16.msra.mxu1 %v6350_v49 }
  0x41   :  { %5084 = vmatprep.subr.bf16.mxu1 %v10136_v0 }
  0x43   :  { %179 = vmatmul.mubr.f32.vlgmr.msra.gmra.mrb[0].mxu1 %v64_v50  ;;  %v113_v50 = vld [vmem:[%s10127_s0 + $0x188] sm:$0xff] }
  0x44   :  { %5086 = vmatpush1.bf16.msra.mxu1 %v6201_v4  ;;  %183 = vmatprep.mubr.f32.mxu1 %v67_v51  ;;  %v112_v51 = vld [vmem:[%s10127_s0 + $0x180] sm:$0xff] }
  0x45   :  { %5087 = vmatprep.subr.bf16.mxu1 %v10136_v0 }
  0x47   :  { %184 = vmatmul.mubr.f32.gmra.mrb[2].mxu1 %v66_v52  ;;  %v4029_v52 = vld [vmem:[%s10127_s0 + $0x198] sm:$0xff] }
  0x48   :  { %188 = vmatprep.mubr.f32.mxu1 %v69_v53  ;;  %5089 = vmatpush1.bf16.msra.mxu1 %v6207_v6  ;;  %v4028_v53 = vld [vmem:[%s10127_s0 + $0x190] sm:$0xff] }
  0x49   :  { %5090 = vmatprep.subr.bf16.mxu1 %v10136_v0 }
  0x4b   :  { %189 = vmatmul.mubr.f32.gmra.mrb[4].mxu1 %v68_v54  ;;  %v4031_v54 = vld [vmem:[%s10127_s0 + $0x1a8] sm:$0xff] }
  0x4c   :  { %193 = vmatprep.mubr.f32.mxu1 %v71_v55  ;;  %5092 = vmatpush1.bf16.msra.mxu1 %v6217_v9  ;;  %v4030_v55 = vld [vmem:[%s10127_s0 + $0x1a0] sm:$0xff] }
  0x4d   :  { %5093 = vmatprep.subr.bf16.mxu1 %v10136_v0 }
  0x4f   :  { %194 = vmatmul.mubr.f32.gmra.mrb[6].mxu1 %v70_v56  ;;  %v4033_v56 = vld [vmem:[%s10127_s0 + $0x1b8] sm:$0xff] }
  0x50   :  { %198 = vmatprep.mubr.f32.mxu1 %v73_v57  ;;  %5095 = vmatpush1.bf16.msra.mxu1 %v6230_v13  ;;  %v4032_v57 = vld [vmem:[%s10127_s0 + $0x1b0] sm:$0xff] }
  0x51   :  { %5096 = vmatprep.subr.bf16.mxu1 %v10136_v0 }
  0x53   :  { %199 = vmatmul.mubr.f32.gmra.mrb[8].mxu1 %v72_v58  ;;  %v4035_v58 = vld [vmem:[%s10127_s0 + $0x1c8] sm:$0xff] }
  0x54   :  { %203 = vmatprep.mubr.f32.mxu1 %v75_v59  ;;  %5098 = vmatpush1.bf16.msra.mxu1 %v6240_v16  ;;  %v4034_v59 = vld [vmem:[%s10127_s0 + $0x1c0] sm:$0xff] }
  0x55   :  { %5099 = vmatprep.subr.bf16.mxu1 %v10136_v0 }
  0x57   :  { %204 = vmatmul.mubr.f32.gmra.mrb[10].mxu1 %v74_v60  ;;  %v4037_v60 = vld [vmem:[%s10127_s0 + $0x1d8] sm:$0xff] }
  0x58   :  { %208 = vmatprep.mubr.f32.mxu1 %v77_v61  ;;  %5101 = vmatpush1.bf16.msra.mxu1 %v6250_v19  ;;  %v4036_v61 = vld [vmem:[%s10127_s0 + $0x1d0] sm:$0xff] }
  0x59   :  { %5102 = vmatprep.subr.bf16.mxu1 %v10136_v0 }
  0x5b   :  { %209 = vmatmul.mubr.f32.gmra.mrb[12].mxu1 %v76_v62  ;;  %v4039_v62 = vld [vmem:[%s10127_s0 + $0x1e8] sm:$0xff] }
  0x5c   :  { %213 = vmatprep.mubr.f32.mxu1 %v79_v63  ;;  %5104 = vmatpush1.bf16.msra.mxu1 %v6260_v22  ;;  %v4038_v63 = vld [vmem:[%s10127_s0 + $0x1e0] sm:$0xff] }
  0x5d   :  { %5105 = vmatprep.subr.bf16.mxu1 %v10136_v0 }
  0x5f   :  { %214 = vmatmul.mubr.f32.gmra.mrb[14].mxu1 %v78_v1  ;;  %v4041_v1 = vld [vmem:[%s10127_s0 + $0x1f8] sm:$0xff] }
  0x60   :  { %218 = vmatprep.mubr.f32.mxu1 %v81_v2  ;;  %5107 = vmatpush1.bf16.msra.mxu1 %v6270_v25  ;;  %v4040_v2 = vld [vmem:[%s10127_s0 + $0x1f0] sm:$0xff] }
  0x61   :  { %5108 = vmatprep.subr.bf16.mxu1 %v10136_v0 }
  0x63   :  { %219 = vmatmul.mubr.f32.gmra.mrb[16].mxu1 %v80_v3  ;;  %v4043_v3 = vld [vmem:[%s10127_s0 + $0x208] sm:$0xff] }
  0x64   :  { %223 = vmatprep.mubr.f32.mxu1 %v83_v5  ;;  %5110 = vmatpush1.bf16.msra.mxu1 %v6280_v28  ;;  %v4042_v5 = vld [vmem:[%s10127_s0 + $0x200] sm:$0xff] }
  0x65   :  { %5111 = vmatprep.subr.bf16.mxu1 %v10136_v0 }
  0x67   :  { %224 = vmatmul.mubr.f32.gmra.mrb[18].mxu1 %v82_v7  ;;  %v4045_v7 = vld [vmem:[%s10127_s0 + $0x218] sm:$0xff] }
  0x68   :  { %228 = vmatprep.mubr.f32.mxu1 %v85_v8  ;;  %5113 = vmatpush1.bf16.msra.mxu1 %v6290_v31  ;;  %v4044_v8 = vld [vmem:[%s10127_s0 + $0x210] sm:$0xff] }
  0x69   :  { %5114 = vmatprep.subr.bf16.mxu1 %v10136_v0 }
  0x6b   :  { %229 = vmatmul.mubr.f32.gmra.mrb[20].mxu1 %v84_v10  ;;  %v4047_v10 = vld [vmem:[%s10127_s0 + $0x228] sm:$0xff] }
  0x6c   :  { %233 = vmatprep.mubr.f32.mxu1 %v87_v11  ;;  %5116 = vmatpush1.bf16.msra.mxu1 %v6300_v34  ;;  %v4046_v11 = vld [vmem:[%s10127_s0 + $0x220] sm:$0xff] }
  0x6d   :  { %5117 = vmatprep.subr.bf16.mxu1 %v10136_v0 }
  0x6f   :  { %234 = vmatmul.mubr.f32.gmra.mrb[22].mxu1 %v86_v12  ;;  %v4049_v12 = vld [vmem:[%s10127_s0 + $0x238] sm:$0xff] }
  0x70   :  { %238 = vmatprep.mubr.f32.mxu1 %v89_v14  ;;  %5119 = vmatpush1.bf16.msra.mxu1 %v6310_v37  ;;  %v4048_v14 = vld [vmem:[%s10127_s0 + $0x230] sm:$0xff] }
  0x71   :  { %5120 = vmatprep.subr.bf16.mxu1 %v10136_v0 }
  0x73   :  { %239 = vmatmul.mubr.f32.gmra.mrb[24].mxu1 %v88_v15  ;;  %v4051_v15 = vld [vmem:[%s10127_s0 + $0x248] sm:$0xff] }
  0x74   :  { %243 = vmatprep.mubr.f32.mxu1 %v91_v17  ;;  %5122 = vmatpush1.bf16.msra.mxu1 %v6320_v40  ;;  %v4050_v17 = vld [vmem:[%s10127_s0 + $0x240] sm:$0xff] }
  0x75   :  { %5123 = vmatprep.subr.bf16.mxu1 %v10136_v0 }
  0x77   :  { %244 = vmatmul.mubr.f32.gmra.mrb[26].mxu1 %v90_v18  ;;  %v4053_v18 = vld [vmem:[%s10127_s0 + $0x258] sm:$0xff] }
  0x78   :  { %248 = vmatprep.mubr.f32.mxu1 %v93_v20  ;;  %5125 = vmatpush1.bf16.msra.mxu1 %v6330_v43  ;;  %v4052_v20 = vld [vmem:[%s10127_s0 + $0x250] sm:$0xff] }
  0x79   :  { %5126 = vmatprep.subr.bf16.mxu1 %v10136_v0 }
  0x7b   :  { %249 = vmatmul.mubr.f32.gmra.mrb[28].mxu1 %v92_v21  ;;  %v4055_v21 = vld [vmem:[%s10127_s0 + $0x268] sm:$0xff] }
  0x7c   :  { %253 = vmatprep.mubr.f32.mxu1 %v95_v23  ;;  %5128 = vmatpush1.bf16.msra.mxu1 %v6340_v46  ;;  %v4054_v23 = vld [vmem:[%s10127_s0 + $0x260] sm:$0xff] }
  0x7d   :  { %5129 = vmatprep.subr.bf16.mxu1 %v10136_v0 }
  0x7f   :  { %254 = vmatmul.mubr.f32.gmra.mrb[30].mxu1 %v94_v24  ;;  %v4057_v24 = vld [vmem:[%s10127_s0 + $0x278] sm:$0xff] }
  0x80   :  { %258 = vmatprep.mubr.f32.mxu1 %v97_v26  ;;  %5131 = vmatpush1.bf16.msra.mxu1 %v6350_v49  ;;  %v4056_v26 = vld [vmem:[%s10127_s0 + $0x270] sm:$0xff] }
  0x81   :  { %5132 = vmatprep.subr.bf16.mxu1 %v10136_v0 }
  0x83   :  { %259 = vmatmul.mubr.f32.gmra.mrb[32].mxu1 %v96_v27  ;;  %v4059_v27 = vld [vmem:[%s10127_s0 + $0x288] sm:$0xff] }
  0x84   :  { %263 = vmatprep.mubr.f32.mxu1 %v99_v29  ;;  %v4058_v29 = vld [vmem:[%s10127_s0 + $0x280] sm:$0xff] }
  0x87   :  { %264 = vmatmul.mubr.f32.gmra.mrb[34].mxu1 %v98_v30  ;;  %v4061_v30 = vld [vmem:[%s10127_s0 + $0x298] sm:$0xff] }
  0x88   :  { %268 = vmatprep.mubr.f32.mxu1 %v101_v32  ;;  %v4060_v32 = vld [vmem:[%s10127_s0 + $0x290] sm:$0xff] }
  0x8b   :  { %269 = vmatmul.mubr.f32.gmra.mrb[36].mxu1 %v100_v33  ;;  %v4063_v33 = vld [vmem:[%s10127_s0 + $0x2a8] sm:$0xff] }
  0x8c   :  { %273 = vmatprep.mubr.f32.mxu1 %v103_v35  ;;  %v4062_v35 = vld [vmem:[%s10127_s0 + $0x2a0] sm:$0xff] }
  0x8f   :  { %274 = vmatmul.mubr.f32.gmra.mrb[38].mxu1 %v102_v36  ;;  %v4065_v36 = vld [vmem:[%s10127_s0 + $0x2b8] sm:$0xff] }
  0x90   :  { %278 = vmatprep.mubr.f32.mxu1 %v105_v38  ;;  %v4064_v38 = vld [vmem:[%s10127_s0 + $0x2b0] sm:$0xff] }
  0x93   :  { %279 = vmatmul.mubr.f32.gmra.mrb[40].mxu1 %v104_v39  ;;  %v4067_v39 = vld [vmem:[%s10127_s0 + $0x2c8] sm:$0xff] }
  0x94   :  { %283 = vmatprep.mubr.f32.mxu1 %v107_v41  ;;  %v4066_v41 = vld [vmem:[%s10127_s0 + $0x2c0] sm:$0xff] }
  0x97   :  { %284 = vmatmul.mubr.f32.gmra.mrb[42].mxu1 %v106_v42  ;;  %v4069_v42 = vld [vmem:[%s10127_s0 + $0x2d8] sm:$0xff] }
  0x98   :  { %288 = vmatprep.mubr.f32.mxu1 %v109_v44  ;;  %v4068_v44 = vld [vmem:[%s10127_s0 + $0x2d0] sm:$0xff] }
  0x9b   :  { %289 = vmatmul.mubr.f32.gmra.mrb[44].mxu1 %v108_v45  ;;  %v4071_v45 = vld [vmem:[%s10127_s0 + $0x2e8] sm:$0xff] }
  0x9c   :  { %293 = vmatprep.mubr.f32.mxu1 %v111_v47  ;;  %v4070_v47 = vld [vmem:[%s10127_s0 + $0x2e0] sm:$0xff] }
  0x9f   :  { %294 = vmatmul.mubr.f32.gmra.mrb[46].mxu1 %v110_v48  ;;  %v4073_v48 = vld [vmem:[%s10127_s0 + $0x2f8] sm:$0xff] }
  0xa0   :  { %298 = vmatprep.mubr.f32.mxu1 %v113_v50  ;;  %v4072_v50 = vld [vmem:[%s10127_s0 + $0x2f0] sm:$0xff] }
  0xa3   :  { %299 = vmatmul.mubr.f32.gmra.mrb[48].mxu1 %v112_v51  ;;  %v4075_v51 = vld [vmem:[%s10127_s0 + $0x308] sm:$0xff] }
  0xa4   :  { %419 = vmatprep.mubr.f32.mxu1 %v4029_v52  ;;  %v4074_v52 = vld [vmem:[%s10127_s0 + $0x300] sm:$0xff] }
  0xa7   :  { %420 = vmatmul.mubr.f32.vlgmr.msra.gmra.mrb[50].mxu1 %v4028_v53  ;;  %v4077_v53 = vld [vmem:[%s10127_s0 + $0x318] sm:$0xff] }
  0xa8   :  { %5134 = vmatpush1.bf16.msra.mxu1 %v6201_v4  ;;  %424 = vmatprep.mubr.f32.mxu1 %v4031_v54  ;;  %v4076_v54 = vld [vmem:[%s10127_s0 + $0x310] sm:$0xff] }
  0xa9   :  { %5135 = vmatprep.subr.bf16.mxu1 %v10136_v0 }
  0xab   :  { %425 = vmatmul.mubr.f32.gmra.mrb[52].mxu1 %v4030_v55  ;;  %v4079_v55 = vld [vmem:[%s10127_s0 + $0x328] sm:$0xff] }
  0xac   :  { %429 = vmatprep.mubr.f32.mxu1 %v4033_v56  ;;  %5137 = vmatpush1.bf16.msra.mxu1 %v6207_v6  ;;  %v4078_v56 = vld [vmem:[%s10127_s0 + $0x320] sm:$0xff] }
  0xad   :  { %5138 = vmatprep.subr.bf16.mxu1 %v10136_v0 }
  0xaf   :  { %430 = vmatmul.mubr.f32.gmra.mrb[54].mxu1 %v4032_v57  ;;  %v4081_v57 = vld [vmem:[%s10127_s0 + $0x338] sm:$0xff] }
  0xb0   :  { %434 = vmatprep.mubr.f32.mxu1 %v4035_v58  ;;  %5140 = vmatpush1.bf16.msra.mxu1 %v6217_v9  ;;  %v4080_v58 = vld [vmem:[%s10127_s0 + $0x330] sm:$0xff] }
  0xb1   :  { %5141 = vmatprep.subr.bf16.mxu1 %v10136_v0 }
  0xb3   :  { %435 = vmatmul.mubr.f32.gmra.mrb[56].mxu1 %v4034_v59  ;;  %v4083_v59 = vld [vmem:[%s10127_s0 + $0x348] sm:$0xff] }
  0xb4   :  { %439 = vmatprep.mubr.f32.mxu1 %v4037_v60  ;;  %5143 = vmatpush1.bf16.msra.mxu1 %v6230_v13  ;;  %v4082_v60 = vld [vmem:[%s10127_s0 + $0x340] sm:$0xff] }
  0xb5   :  { %5144 = vmatprep.subr.bf16.mxu1 %v10136_v0 }
  0xb7   :  { %440 = vmatmul.mubr.f32.gmra.mrb[58].mxu1 %v4036_v61  ;;  %v4084_v61 = vld [vmem:[%s10127_s0 + $0x350] sm:$0xff] }
  0xb8   :  { %444 = vmatprep.mubr.f32.mxu1 %v4039_v62  ;;  %5146 = vmatpush1.bf16.msra.mxu1 %v6240_v16  ;;  %v4087_v62 = vld [vmem:[%s10127_s0 + $0x368] sm:$0xff] }
  0xb9   :  { %5147 = vmatprep.subr.bf16.mxu1 %v10136_v0 }
  0xbb   :  { %445 = vmatmul.mubr.f32.gmra.mrb[60].mxu1 %v4038_v63 }
  0xbc   :  { %449 = vmatprep.mubr.f32.mxu1 %v4041_v1  ;;  %5149 = vmatpush1.bf16.msra.mxu1 %v6250_v19  ;;  %v4086_v1 = vld [vmem:[%s10127_s0 + $0x360] sm:$0xff] }
  0xbd   :  { %5150 = vmatprep.subr.bf16.mxu1 %v10136_v0 }
  0xbf   :  { %450 = vmatmul.mubr.f32.gmra.mrb[62].mxu1 %v4040_v2 }
  0xc0   :  { %454 = vmatprep.mubr.f32.mxu1 %v4043_v3  ;;  %5152 = vmatpush1.bf16.msra.mxu1 %v6260_v22 }
  0xc1   :  { %5153 = vmatprep.subr.bf16.mxu1 %v10136_v0 }
  0xc3   :  { %455 = vmatmul.mubr.f32.gmra.mrb[64].mxu1 %v4042_v5  ;;  %v4088_v5 = vld [vmem:[%s10127_s0 + $0x370] sm:$0xff] }
  0xc4   :  { %459 = vmatprep.mubr.f32.mxu1 %v4045_v7  ;;  %5155 = vmatpush1.bf16.msra.mxu1 %v6270_v25 }
  0xc5   :  { %5156 = vmatprep.subr.bf16.mxu1 %v10136_v0 }
  0xc7   :  { %460 = vmatmul.mubr.f32.gmra.mrb[66].mxu1 %v4044_v8 }
  0xc8   :  { %464 = vmatprep.mubr.f32.mxu1 %v4047_v10  ;;  %5158 = vmatpush1.bf16.msra.mxu1 %v6280_v28  ;;  %v4090_v10 = vld [vmem:[%s10127_s0 + $0x380] sm:$0xff] }
  0xc9   :  { %5159 = vmatprep.subr.bf16.mxu1 %v10136_v0 }
  0xcb   :  { %465 = vmatmul.mubr.f32.gmra.mrb[68].mxu1 %v4046_v11 }
  0xcc   :  { %469 = vmatprep.mubr.f32.mxu1 %v4049_v12  ;;  %5161 = vmatpush1.bf16.msra.mxu1 %v6290_v31 }
  0xcd   :  { %5162 = vmatprep.subr.bf16.mxu1 %v10136_v0 }
  0xcf   :  { %470 = vmatmul.mubr.f32.gmra.mrb[70].mxu1 %v4048_v14  ;;  %v4092_v14 = vld [vmem:[%s10127_s0 + $0x390] sm:$0xff] }
  0xd0   :  { %474 = vmatprep.mubr.f32.mxu1 %v4051_v15  ;;  %5164 = vmatpush1.bf16.msra.mxu1 %v6300_v34 }
  0xd1   :  { %5165 = vmatprep.subr.bf16.mxu1 %v10136_v0 }
  0xd3   :  { %475 = vmatmul.mubr.f32.gmra.mrb[72].mxu1 %v4050_v17 }
  0xd4   :  { %479 = vmatprep.mubr.f32.mxu1 %v4053_v18  ;;  %5167 = vmatpush1.bf16.msra.mxu1 %v6310_v37  ;;  %v4094_v18 = vld [vmem:[%s10127_s0 + $0x3a0] sm:$0xff] }
  0xd5   :  { %5168 = vmatprep.subr.bf16.mxu1 %v10136_v0 }
  0xd7   :  { %480 = vmatmul.mubr.f32.gmra.mrb[74].mxu1 %v4052_v20 }
  0xd8   :  { %484 = vmatprep.mubr.f32.mxu1 %v4055_v21  ;;  %5170 = vmatpush1.bf16.msra.mxu1 %v6320_v40 }
  0xd9   :  { %5171 = vmatprep.subr.bf16.mxu1 %v10136_v0 }
  0xdb   :  { %485 = vmatmul.mubr.f32.gmra.mrb[76].mxu1 %v4054_v23  ;;  %v4096_v23 = vld [vmem:[%s10127_s0 + $0x3b0] sm:$0xff] }
  0xdc   :  { %489 = vmatprep.mubr.f32.mxu1 %v4057_v24  ;;  %5173 = vmatpush1.bf16.msra.mxu1 %v6330_v43 }
  0xdd   :  { %5174 = vmatprep.subr.bf16.mxu1 %v10136_v0 }
  0xdf   :  { %490 = vmatmul.mubr.f32.gmra.mrb[78].mxu1 %v4056_v26 }
  0xe0   :  { %494 = vmatprep.mubr.f32.mxu1 %v4059_v27  ;;  %5176 = vmatpush1.bf16.msra.mxu1 %v6340_v46  ;;  %v4098_v27 = vld [vmem:[%s10127_s0 + $0x3c0] sm:$0xff] }
  0xe1   :  { %5177 = vmatprep.subr.bf16.mxu1 %v10136_v0 }
  0xe3   :  { %495 = vmatmul.mubr.f32.gmra.mrb[80].mxu1 %v4058_v29 }
  0xe4   :  { %499 = vmatprep.mubr.f32.mxu1 %v4061_v30  ;;  %5179 = vmatpush1.bf16.msra.mxu1 %v6350_v49 }
  0xe5   :  { %5180 = vmatprep.subr.bf16.mxu1 %v10136_v0 }
  0xe7   :  { %500 = vmatmul.mubr.f32.gmra.mrb[82].mxu1 %v4060_v32  ;;  %v4100_v32 = vld [vmem:[%s10127_s0 + $0x3d0] sm:$0xff] }
  0xe8   :  { %504 = vmatprep.mubr.f32.mxu1 %v4063_v33 }
  0xeb   :  { %505 = vmatmul.mubr.f32.gmra.mrb[84].mxu1 %v4062_v35 }
  0xec   :  { %509 = vmatprep.mubr.f32.mxu1 %v4065_v36  ;;  %v4102_v36 = vld [vmem:[%s10127_s0 + $0x3e0] sm:$0xff] }
  0xef   :  { %510 = vmatmul.mubr.f32.gmra.mrb[86].mxu1 %v4064_v38 }
  0xf0   :  { %514 = vmatprep.mubr.f32.mxu1 %v4067_v39 }
  0xf3   :  { %515 = vmatmul.mubr.f32.gmra.mrb[88].mxu1 %v4066_v41  ;;  %v4104_v41 = vld [vmem:[%s10127_s0 + $0x3f0] sm:$0xff] }
  0xf4   :  { %519 = vmatprep.mubr.f32.mxu1 %v4069_v42 }
  0xf7   :  { %520 = vmatmul.mubr.f32.gmra.mrb[90].mxu1 %v4068_v44 }
  0xf8   :  { %524 = vmatprep.mubr.f32.mxu1 %v4071_v45  ;;  %v4106_v45 = vld [vmem:[%s10127_s0 + $0x400] sm:$0xff] }
  0xfb   :  { %525 = vmatmul.mubr.f32.gmra.mrb[92].mxu1 %v4070_v47 }
  0xfc   :  { %529 = vmatprep.mubr.f32.mxu1 %v4073_v48 }
  0xff   :  { %530 = vmatmul.mubr.f32.gmra.mrb[94].mxu1 %v4072_v50  ;;  %v4108_v50 = vld [vmem:[%s10127_s0 + $0x410] sm:$0xff] }
 0x100   :  { %534 = vmatprep.mubr.f32.mxu1 %v4075_v51 }
 0x103   :  { %535 = vmatmul.mubr.f32.gmra.mrb[96].mxu1 %v4074_v52 }
 0x104   :  { %539 = vmatprep.mubr.f32.mxu1 %v4077_v53  ;;  %v4110_v53 = vld [vmem:[%s10127_s0 + $0x420] sm:$0xff] }
 0x107   :  { %540 = vmatmul.mubr.f32.gmra.mrb[98].mxu1 %v4076_v54 }
 0x108   :  { %685 = vmatprep.mubr.f32.mxu1 %v4079_v55 }
 0x10b   :  { %686 = vmatmul.mubr.f32.vlgmr.msra.gmra.mrb[100].mxu1 %v4078_v56  ;;  %v4112_v56 = vld [vmem:[%s10127_s0 + $0x430] sm:$0xff] }
 0x10c   :  { %5182 = vmatpush1.bf16.msra.mxu1 %v6201_v4  ;;  %690 = vmatprep.mubr.f32.mxu1 %v4081_v57  ;;  %v4085_v4 = vld [vmem:[%s10127_s0 + $0x358] sm:$0xff]  ;;  %v4115_v57 = vld [vmem:[%s10127_s0 + $0x448] sm:$0xff] }
 0x10d   :  { %5183 = vmatprep.subr.bf16.mxu1 %v10136_v0 }
 0x10f   :  { %691 = vmatmul.mubr.f32.gmra.mrb[102].mxu1 %v4080_v58 }
 0x110   :  { %695 = vmatprep.mubr.f32.mxu1 %v4083_v59  ;;  %5185 = vmatpush1.bf16.msra.mxu1 %v6207_v6  ;;  %v4114_v59 = vld [vmem:[%s10127_s0 + $0x440] sm:$0xff] }
 0x111   :  { %5186 = vmatprep.subr.bf16.mxu1 %v10136_v0 }
 0x113   :  { %696 = vmatmul.mubr.f32.gmra.mrb[104].mxu1 %v4082_v60  ;;  %v4117_v60 = vld [vmem:[%s10127_s0 + $0x458] sm:$0xff] }
 0x114   :  { %700 = vmatprep.mubr.f32.mxu1 %v4085_v4  ;;  %5188 = vmatpush1.bf16.msra.mxu1 %v6217_v9  ;;  %v4089_v9 = vld [vmem:[%s10127_s0 + $0x378] sm:$0xff] }
 0x115   :  { %5189 = vmatprep.subr.bf16.mxu1 %v10136_v0 }
 0x116   :  { %v6749_v6 = vpop.f32.mrb[0].mxu1 }
 0x117   :  { %v182_v63 = vpop.f32.mrb[1].mxu1  ;;  %701 = vmatmul.mubr.f32.gmra.mrb[106].mxu1 %v4084_v61 }
 0x118   :  { %705 = vmatprep.mubr.f32.mxu1 %v4087_v62  ;;  %5191 = vmatpush1.bf16.msra.mxu1 %v6230_v13  ;;  %v4091_v13 = vld [vmem:[%s10127_s0 + $0x388] sm:$0xff]  ;;  %v4116_v62 = vld [vmem:[%s10127_s0 + $0x450] sm:$0xff] }
 0x119   :  { %5192 = vmatprep.subr.bf16.mxu1 %v10136_v0  ;;  %v4119_v63 = vld [vmem:[%s10127_s0 + $0x468] sm:$0xff] }
 0x11a   :  { %v6759_v2 = vpop.f32.mrb[2].mxu1 }
 0x11b   :  { %v187_v3 = vpop.f32.mrb[3].mxu1  ;;  %706 = vmatmul.mubr.f32.gmra.mrb[108].mxu1 %v4086_v1 }
 0x11c   :  { %710 = vmatprep.mubr.f32.mxu1 %v4089_v9  ;;  %5194 = vmatpush1.bf16.msra.mxu1 %v6240_v16  ;;  %v4093_v16 = vld [vmem:[%s10127_s0 + $0x398] sm:$0xff]  ;;  %v4118_v3 = vld [vmem:[%s10127_s0 + $0x460] sm:$0xff] }
 0x11d   :  { %5195 = vmatprep.subr.bf16.mxu1 %v10136_v0 }
 0x11e   :  { %v6769_v7 = vpop.f32.mrb[4].mxu1 }
 0x11f   :  { %v192_v8 = vpop.f32.mrb[5].mxu1  ;;  %711 = vmatmul.mubr.f32.gmra.mrb[110].mxu1 %v4088_v5  ;;  %v4121_v5 = vld [vmem:[%s10127_s0 + $0x478] sm:$0xff] }
 0x120   :  { %715 = vmatprep.mubr.f32.mxu1 %v4091_v13  ;;  %5197 = vmatpush1.bf16.msra.mxu1 %v6250_v19  ;;  %v4095_v19 = vld [vmem:[%s10127_s0 + $0x3a8] sm:$0xff] }
 0x121   :  { %5198 = vmatprep.subr.bf16.mxu1 %v10136_v0 }
 0x122   :  { %v6779_v11 = vpop.f32.mrb[6].mxu1 }
 0x123   :  { %v197_v12 = vpop.f32.mrb[7].mxu1  ;;  %716 = vmatmul.mubr.f32.gmra.mrb[112].mxu1 %v4090_v10  ;;  %v4120_v10 = vld [vmem:[%s10127_s0 + $0x470] sm:$0xff] }
 0x124   :  { %720 = vmatprep.mubr.f32.mxu1 %v4093_v16  ;;  %5200 = vmatpush1.bf16.msra.mxu1 %v6260_v22  ;;  %v4097_v22 = vld [vmem:[%s10127_s0 + $0x3b8] sm:$0xff]  ;;  %v4123_v16 = vld [vmem:[%s10127_s0 + $0x488] sm:$0xff] }
 0x125   :  { %5201 = vmatprep.subr.bf16.mxu1 %v10136_v0 }
 0x126   :  { %v6789_v15 = vpop.f32.mrb[8].mxu1 }
 0x127   :  { %v202_v17 = vpop.f32.mrb[9].mxu1  ;;  %721 = vmatmul.mubr.f32.gmra.mrb[114].mxu1 %v4092_v14 }
 0x128   :  { %725 = vmatprep.mubr.f32.mxu1 %v4095_v19  ;;  %5203 = vmatpush1.bf16.msra.mxu1 %v6270_v25  ;;  %v4099_v25 = vld [vmem:[%s10127_s0 + $0x3c8] sm:$0xff]  ;;  %v4122_v19 = vld [vmem:[%s10127_s0 + $0x480] sm:$0xff]  ;;  %v4125_v17 = vld [vmem:[%s10127_s0 + $0x498] sm:$0xff] }
 0x129   :  { %5204 = vmatprep.subr.bf16.mxu1 %v10136_v0 }
 0x12a   :  { %v6799_v20 = vpop.f32.mrb[10].mxu1 }
 0x12b   :  { %v207_v21 = vpop.f32.mrb[11].mxu1  ;;  %726 = vmatmul.mubr.f32.gmra.mrb[116].mxu1 %v4094_v18 }
 0x12c   :  { %730 = vmatprep.mubr.f32.mxu1 %v4097_v22  ;;  %5206 = vmatpush1.bf16.msra.mxu1 %v6280_v28  ;;  %v4101_v28 = vld [vmem:[%s10127_s0 + $0x3d8] sm:$0xff]  ;;  %v4124_v21 = vld [vmem:[%s10127_s0 + $0x490] sm:$0xff] }
 0x12d   :  { %5207 = vmatprep.subr.bf16.mxu1 %v10136_v0 }
 0x12e   :  { %v6809_v24 = vpop.f32.mrb[12].mxu1 }
 0x12f   :  { %v212_v26 = vpop.f32.mrb[13].mxu1  ;;  %731 = vmatmul.mubr.f32.gmra.mrb[118].mxu1 %v4096_v23  ;;  %v4127_v23 = vld [vmem:[%s10127_s0 + $0x4a8] sm:$0xff] }
 0x130   :  { %735 = vmatprep.mubr.f32.mxu1 %v4099_v25  ;;  %5209 = vmatpush1.bf16.msra.mxu1 %v6290_v31  ;;  %v4103_v31 = vld [vmem:[%s10127_s0 + $0x3e8] sm:$0xff] }
 0x131   :  { %5210 = vmatprep.subr.bf16.mxu1 %v10136_v0 }
 0x132   :  { %v6819_v29 = vpop.f32.mrb[14].mxu1 }
 0x133   :  { %v217_v30 = vpop.f32.mrb[15].mxu1  ;;  %736 = vmatmul.mubr.f32.gmra.mrb[120].mxu1 %v4098_v27  ;;  %v4126_v27 = vld [vmem:[%s10127_s0 + $0x4a0] sm:$0xff] }
 0x134   :  { %740 = vmatprep.mubr.f32.mxu1 %v4101_v28  ;;  %5212 = vmatpush1.bf16.msra.mxu1 %v6300_v34  ;;  %v4105_v34 = vld [vmem:[%s10127_s0 + $0x3f8] sm:$0xff] }
 0x135   :  { %5213 = vmatprep.subr.bf16.mxu1 %v10136_v0  ;;  %v4129_v28 = vld [vmem:[%s10127_s0 + $0x4b8] sm:$0xff] }
 0x136   :  { %v6829_v33 = vpop.f32.mrb[16].mxu1 }
 0x137   :  { %v222_v35 = vpop.f32.mrb[17].mxu1  ;;  %741 = vmatmul.mubr.f32.gmra.mrb[122].mxu1 %v4100_v32 }
 0x138   :  { %745 = vmatprep.mubr.f32.mxu1 %v4103_v31  ;;  %5215 = vmatpush1.bf16.msra.mxu1 %v6310_v37  ;;  %v4107_v37 = vld [vmem:[%s10127_s0 + $0x408] sm:$0xff]  ;;  %v4128_v31 = vld [vmem:[%s10127_s0 + $0x4b0] sm:$0xff] }
 0x139   :  { %5216 = vmatprep.subr.bf16.mxu1 %v10136_v0  ;;  %v4131_v35 = vld [vmem:[%s10127_s0 + $0x4c8] sm:$0xff] }
 0x13a   :  { %v6839_v38 = vpop.f32.mrb[18].mxu1 }
 0x13b   :  { %v227_v39 = vpop.f32.mrb[19].mxu1  ;;  %746 = vmatmul.mubr.f32.gmra.mrb[124].mxu1 %v4102_v36 }
 0x13c   :  { %750 = vmatprep.mubr.f32.mxu1 %v4105_v34  ;;  %5218 = vmatpush1.bf16.msra.mxu1 %v6320_v40  ;;  %v4109_v40 = vld [vmem:[%s10127_s0 + $0x418] sm:$0xff]  ;;  %v4130_v39 = vld [vmem:[%s10127_s0 + $0x4c0] sm:$0xff] }
 0x13d   :  { %5219 = vmatprep.subr.bf16.mxu1 %v10136_v0 }
 0x13e   :  { %v6849_v42 = vpop.f32.mrb[20].mxu1 }
 0x13f   :  { %v232_v44 = vpop.f32.mrb[21].mxu1  ;;  %751 = vmatmul.mubr.f32.gmra.mrb[126].mxu1 %v4104_v41  ;;  %v4133_v41 = vld [vmem:[%s10127_s0 + $0x4d8] sm:$0xff] }
 0x140   :  { %755 = vmatprep.mubr.f32.mxu1 %v4107_v37  ;;  %5221 = vmatpush1.bf16.msra.mxu1 %v6330_v43  ;;  %v4111_v43 = vld [vmem:[%s10127_s0 + $0x428] sm:$0xff] }
 0x141   :  { %5222 = vmatprep.subr.bf16.mxu1 %v10136_v0 }
 0x142   :  { %v6859_v47 = vpop.f32.mrb[22].mxu1 }
 0x143   :  { %v237_v48 = vpop.f32.mrb[23].mxu1  ;;  %756 = vmatmul.mubr.f32.gmra.mrb[128].mxu1 %v4106_v45  ;;  %v4132_v45 = vld [vmem:[%s10127_s0 + $0x4d0] sm:$0xff] }
 0x144   :  { %760 = vmatprep.mubr.f32.mxu1 %v4109_v40  ;;  %5224 = vmatpush1.bf16.msra.mxu1 %v6340_v46  ;;  %v4113_v46 = vld [vmem:[%s10127_s0 + $0x438] sm:$0xff]  ;;  %v4135_v40 = vld [vmem:[%s10127_s0 + $0x4e8] sm:$0xff] }
 0x145   :  { %5225 = vmatprep.subr.bf16.mxu1 %v10136_v0 }
 0x146   :  { %v6869_v51 = vpop.f32.mrb[24].mxu1 }
 0x147   :  { %v242_v52 = vpop.f32.mrb[25].mxu1  ;;  %761 = vmatmul.mubr.f32.gmra.mrb[130].mxu1 %v4108_v50 }
 0x148   :  { %765 = vmatprep.mubr.f32.mxu1 %v4111_v43  ;;  %5227 = vmatpush1.bf16.msra.mxu1 %v6350_v49  ;;  %v4134_v43 = vld [vmem:[%s10127_s0 + $0x4e0] sm:$0xff]  ;;  %v4137_v52 = vld [vmem:[%s10127_s0 + $0x4f8] sm:$0xff] }
 0x14a   :  { %v6878_v54 = vpop.f32.mrb[26].mxu1 }
 0x14b   :  { %v247_v55 = vpop.f32.mrb[27].mxu1  ;;  %766 = vmatmul.mubr.f32.gmra.mrb[132].mxu1 %v4110_v53 }
 0x14c   :  { %770 = vmatprep.mubr.f32.mxu1 %v4113_v46 }
 0x14e   :  { %v6886_v58 = vpop.f32.mrb[28].mxu1 }
 0x14f   :  { %v252_v49 = vpop.f32.mrb[29].mxu1  ;;  %771 = vmatmul.mubr.f32.gmra.mrb[134].mxu1 %v4112_v56  ;;  %v4136_v56 = vld [vmem:[%s10127_s0 + $0x4f0] sm:$0xff] }
 0x150   :  { %775 = vmatprep.mubr.f32.mxu1 %v4115_v57  ;;  %v4139_v57 = vld [vmem:[%s10127_s0 + $0x508] sm:$0xff] }
 0x152   :  { %v6894_v4 = vpop.f32.mrb[30].mxu1 }
 0x153   :  { %v257_v61 = vpop.f32.mrb[31].mxu1  ;;  %776 = vmatmul.mubr.f32.gmra.mrb[136].mxu1 %v4114_v59 }
 0x154   :  { %780 = vmatprep.mubr.f32.mxu1 %v4117_v60  ;;  %v4138_v61 = vld [vmem:[%s10127_s0 + $0x500] sm:$0xff] }
 0x156   :  { %v6902_v1 = vpop.f32.mrb[32].mxu1 }
 0x157   :  { %v262_v9 = vpop.f32.mrb[33].mxu1  ;;  %781 = vmatmul.mubr.f32.gmra.mrb[138].mxu1 %v4116_v62  ;;  %v4141_v62 = vld [vmem:[%s10127_s0 + $0x518] sm:$0xff] }
 0x158   :  { %785 = vmatprep.mubr.f32.mxu1 %v4119_v63 }
 0x15a   :  { %v6910_v13 = vpop.f32.mrb[34].mxu1 }
 0x15b   :  { %v267_v8 = vpop.f32.mrb[35].mxu1  ;;  %786 = vmatmul.mubr.f32.gmra.mrb[140].mxu1 %v4118_v3 }
 0x15c   :  { %790 = vmatprep.mubr.f32.mxu1 %v4121_v5  ;;  %v4140_v5 = vld [vmem:[%s10127_s0 + $0x510] sm:$0xff]  ;;  %v4143_v8 = vld [vmem:[%s10127_s0 + $0x528] sm:$0xff] }
 0x15e   :  { %v6918_v12 = vpop.f32.mrb[36].mxu1 }
 0x15f   :  { %v272_v14 = vpop.f32.mrb[37].mxu1  ;;  %791 = vmatmul.mubr.f32.gmra.mrb[142].mxu1 %v4120_v10 }
 0x160   :  { %795 = vmatprep.mubr.f32.mxu1 %v4123_v16 }
 0x162   :  { %v6926_v18 = vpop.f32.mrb[38].mxu1 }
 0x163   :  { %v277_v22 = vpop.f32.mrb[39].mxu1  ;;  %796 = vmatmul.mubr.f32.gmra.mrb[144].mxu1 %v4122_v19  ;;  %v4142_v19 = vld [vmem:[%s10127_s0 + $0x520] sm:$0xff] }
 0x164   :  { %800 = vmatprep.mubr.f32.mxu1 %v4125_v17  ;;  %v4145_v17 = vld [vmem:[%s10127_s0 + $0x538] sm:$0xff] }
 0x166   :  { %v6934_v25 = vpop.f32.mrb[40].mxu1 }
 0x167   :  { %v282_v26 = vpop.f32.mrb[41].mxu1  ;;  %801 = vmatmul.mubr.f32.gmra.mrb[146].mxu1 %v4124_v21 }
 0x168   :  { %805 = vmatprep.mubr.f32.mxu1 %v4127_v23  ;;  %v4144_v26 = vld [vmem:[%s10127_s0 + $0x530] sm:$0xff] }
 0x16a   :  { %v6942_v30 = vpop.f32.mrb[42].mxu1 }
 0x16b   :  { %v287_v32 = vpop.f32.mrb[43].mxu1  ;;  %806 = vmatmul.mubr.f32.gmra.mrb[148].mxu1 %v4126_v27  ;;  %v4147_v27 = vld [vmem:[%s10127_s0 + $0x548] sm:$0xff] }
 0x16c   :  { %951 = vmatprep.mubr.f32.mxu1 %v4129_v28  ;;  %v4174_v32 = vld [vmem:[%s10127_s0 + $0x620] sm:$0xff] }
 0x16e   :  { %v6950_v36 = vpop.f32.mrb[44].mxu1 }
 0x16f   :  { %v292_v34 = vpop.f32.mrb[45].mxu1  ;;  %952 = vmatmul.mubr.f32.vlgmr.msra.gmra.mrb[150].mxu1 %v4128_v31 }
 0x170   :  { %956 = vmatprep.mubr.f32.mxu1 %v4131_v35  ;;  %v4146_v35 = vld [vmem:[%s10127_s0 + $0x540] sm:$0xff]  ;;  %v4149_v34 = vld [vmem:[%s10127_s0 + $0x558] sm:$0xff] }
 0x172   :  { %v6958_v37 = vpop.f32.mrb[46].mxu1 }
 0x173   :  { %v297_v44 = vpop.f32.mrb[47].mxu1  ;;  %957 = vmatmul.mubr.f32.gmra.mrb[152].mxu1 %v4130_v39 }
 0x174   :  { %961 = vmatprep.mubr.f32.mxu1 %v4133_v41  ;;  %v4172_v41 = vld [vmem:[%s10127_s0 + $0x610] sm:$0xff] }
 0x176   :  { %v6966_v48 = vpop.f32.mrb[48].mxu1 }
 0x177   :  { %v302_v50 = vpop.f32.mrb[49].mxu1  ;;  %962 = vmatmul.mubr.f32.gmra.mrb[154].mxu1 %v4132_v45  ;;  %v4148_v45 = vld [vmem:[%s10127_s0 + $0x550] sm:$0xff] }
 0x178   :  { %966 = vmatprep.mubr.f32.mxu1 %v4135_v40  ;;  %v4151_v40 = vld [vmem:[%s10127_s0 + $0x568] sm:$0xff] }
 0x17a   :  { %v6974_v53 = vpop.f32.mrb[50].mxu1 }
 0x17b   :  { %v545_v46 = vmax.f32 %v6749_v6, %v6974_v53  ;;  %v423_v55 = vpop.f32.mrb[51].mxu1  ;;  %967 = vmatmul.mubr.f32.gmra.mrb[156].mxu1 %v4134_v43  ;;  %v4170_v43 = vld [vmem:[%s10127_s0 + $0x600] sm:$0xff] }
 0x17c   :  { %971 = vmatprep.mubr.f32.mxu1 %v4137_v52  ;;  %v4150_v55 = vld [vmem:[%s10127_s0 + $0x560] sm:$0xff] }
 0x17e   :  { %v6984_v49 = vpop.f32.mrb[52].mxu1 }
 0x17f   :  { %v546_v59 = vmax.f32 %v6759_v2, %v6984_v49  ;;  %v428_v60 = vpop.f32.mrb[53].mxu1  ;;  %972 = vmatmul.mubr.f32.gmra.mrb[158].mxu1 %v4136_v56  ;;  %v4153_v56 = vld [vmem:[%s10127_s0 + $0x578] sm:$0xff] }
 0x180   :  { %976 = vmatprep.mubr.f32.mxu1 %v4139_v57  ;;  %v4168_v60 = vld [vmem:[%s10127_s0 + $0x5f0] sm:$0xff] }
 0x182   :  { %v6994_v63 = vpop.f32.mrb[54].mxu1 }
 0x183   :  { %v547_v9 = vmax.f32 %v6769_v7, %v6994_v63  ;;  %v433_v3 = vpop.f32.mrb[55].mxu1  ;;  %977 = vmatmul.mubr.f32.gmra.mrb[160].mxu1 %v4138_v61 }
 0x184   :  { %981 = vmatprep.mubr.f32.mxu1 %v4141_v62  ;;  %v4152_v62 = vld [vmem:[%s10127_s0 + $0x570] sm:$0xff]  ;;  %v4155_v3 = vld [vmem:[%s10127_s0 + $0x588] sm:$0xff] }
 0x186   :  { %v7004_v10 = vpop.f32.mrb[56].mxu1 }
 0x187   :  { %v548_v16 = vmax.f32 %v6779_v11, %v7004_v10  ;;  %v438_v14 = vpop.f32.mrb[57].mxu1  ;;  %982 = vmatmul.mubr.f32.gmra.mrb[162].mxu1 %v4140_v5 }
 0x188   :  { %986 = vmatprep.mubr.f32.mxu1 %v4143_v8 }
 0x18a   :  { %v7014_v22 = vpop.f32.mrb[58].mxu1 }
 0x18b   :  { %v443_v23 = vpop.f32.mrb[59].mxu1  ;;  %987 = vmatmul.mubr.f32.gmra.mrb[164].mxu1 %v4142_v19  ;;  %v4154_v19 = vld [vmem:[%s10127_s0 + $0x580] sm:$0xff]  ;;  %v10140_v2 = vmax.f32 %v6789_v15, %v7014_v22 }
 0x18c   :  { %991 = vmatprep.mubr.f32.mxu1 %v4145_v17  ;;  %v4157_v17 = vld [vmem:[%s10127_s0 + $0x598] sm:$0xff] }
 0x18e   :  { %v7024_v28 = vpop.f32.mrb[60].mxu1 }
 0x18f   :  { %v448_v31 = vpop.f32.mrb[61].mxu1  ;;  %992 = vmatmul.mubr.f32.gmra.mrb[166].mxu1 %v4144_v26  ;;  %v10141_v7 = vmax.f32 %v6799_v20, %v7024_v28 }
 0x190   :  { %996 = vmatprep.mubr.f32.mxu1 %v4147_v27  ;;  %v4156_v31 = vld [vmem:[%s10127_s0 + $0x590] sm:$0xff] }
 0x192   :  { %v7034_v39 = vpop.f32.mrb[62].mxu1 }
 0x193   :  { %v453_v44 = vpop.f32.mrb[63].mxu1  ;;  %997 = vmatmul.mubr.f32.gmra.mrb[168].mxu1 %v4146_v35  ;;  %v4159_v35 = vld [vmem:[%s10127_s0 + $0x5a8] sm:$0xff]  ;;  %v10142_v11 = vmax.f32 %v6809_v24, %v7034_v39 }
 0x194   :  { %1001 = vmatprep.mubr.f32.mxu1 %v4149_v34 }
 0x196   :  { %v7044_v50 = vpop.f32.mrb[64].mxu1 }
 0x197   :  { %v458_v52 = vpop.f32.mrb[65].mxu1  ;;  %1002 = vmatmul.mubr.f32.gmra.mrb[170].mxu1 %v4148_v45  ;;  %v10143_v15 = vmax.f32 %v6819_v29, %v7044_v50 }
 0x198   :  { %1006 = vmatprep.mubr.f32.mxu1 %v4151_v40  ;;  %v4158_v40 = vld [vmem:[%s10127_s0 + $0x5a0] sm:$0xff]  ;;  %v4161_v52 = vld [vmem:[%s10127_s0 + $0x5b8] sm:$0xff] }
 0x19a   :  { %v7054_v57 = vpop.f32.mrb[66].mxu1 }
 0x19b   :  { %v463_v61 = vpop.f32.mrb[67].mxu1  ;;  %1007 = vmatmul.mubr.f32.gmra.mrb[172].mxu1 %v4150_v55  ;;  %v4180_v55 = vld [vmem:[%s10128_s3 + $0x108] sm:$0xff]  ;;  %v10144_v20 = vmax.f32 %v6829_v33, %v7054_v57 }
 0x19c   :  { %1011 = vmatprep.mubr.f32.mxu1 %v4153_v56  ;;  %v4182_v56 = vld [vmem:[%s10128_s3 + $0x118] sm:$0xff] }
 0x19e   :  { %v7064_v5 = vpop.f32.mrb[68].mxu1 }
 0x19f   :  { %v468_v14 = vpop.f32.mrb[69].mxu1  ;;  %1012 = vmatmul.mubr.f32.gmra.mrb[174].mxu1 %v4152_v62  ;;  %v5228_v62 = vpack.c.bf16 %v4182_v56, %v4180_v55  ;;  %v4183_v56 = vld [vmem:[%s10128_s3 + $0x120] sm:$0xff]  ;;  %v10145_v24 = vmax.f32 %v6839_v38, %v7064_v5 }
 0x1a0   :  { %1016 = vmatprep.mubr.f32.mxu1 %v4155_v3  ;;  %v4179_v3 = vld [vmem:[%s10128_s3 + $0x100] sm:$0xff]  ;;  %v4181_v14 = vld [vmem:[%s10128_s3 + $0x110] sm:$0xff] }
 0x1a1   :  { %5229 = vmatprep.subr.bf16.mxu1 %v5228_v62  ;;  %v4185_v62 = vld [vmem:[%s10128_s3 + $0x130] sm:$0xff] }
 0x1a2   :  { %v7074_v23 = vpop.f32.mrb[70].mxu1 }
 0x1a3   :  { %v473_v27 = vpop.f32.mrb[71].mxu1  ;;  %1017 = vmatmul.mubr.f32.gmra.mrb[176].mxu1 %v4154_v19  ;;  %v4166_v19 = vld [vmem:[%s10127_s0 + $0x5e0] sm:$0xff]  ;;  %v10146_v29 = vmax.f32 %v6849_v42, %v7074_v23 }
 0x1a4   :  { %1021 = vmatprep.mubr.f32.mxu1 %v4157_v17  ;;  %v5230_v27 = vpack.c.bf16 %v4181_v14, %v4179_v3  ;;  %v4164_v3 = vld [vmem:[%s10127_s0 + $0x5d0] sm:$0xff] }
 0x1a6   :  { %v7084_v34 = vpop.f32.mrb[72].mxu1  ;;  %5231 = vmatpush1.bf16.msra.mxu1 %v5230_v27  ;;  %v4162_v27 = vld [vmem:[%s10127_s0 + $0x5c0] sm:$0xff] }
 0x1a7   :  { %v478_v45 = vpop.f32.mrb[73].mxu1  ;;  %1022 = vmatmul.mubr.f32.gmra.mrb[178].mxu1 %v4156_v31  ;;  %v4160_v31 = vld [vmem:[%s10127_s0 + $0x5b0] sm:$0xff]  ;;  %v10147_v33 = vmax.f32 %v6859_v47, %v7084_v34 }
 0x1a8   :  { %1026 = vmatprep.mubr.f32.mxu1 %v4159_v35  ;;  %v4163_v35 = vld [vmem:[%s10127_s0 + $0x5c8] sm:$0xff] }
 0x1a9   :  { %v4184_v45 = vld [vmem:[%s10128_s3 + $0x128] sm:$0xff] }
 0x1aa   :  { %v7100_v61 = vpop.f32.mrb[74].mxu1 }
 0x1ab   :  { %v483_v17 = vpop.f32.mrb[75].mxu1  ;;  %1027 = vmatmul.mubr.f32.gmra.mrb[180].mxu1 %v4158_v40  ;;  %v4186_v40 = vld [vmem:[%s10128_s3 + $0x138] sm:$0xff]  ;;  %v10148_v38 = vmax.f32 %v6869_v51, %v7100_v61 }
 0x1ac   :  { %1031 = vmatprep.mubr.f32.mxu1 %v4161_v52  ;;  %v5232_v52 = vpack.c.bf16 %v4186_v40, %v4184_v45  ;;  %v5234_v17 = vpack.c.bf16 %v4185_v62, %v4183_v56  ;;  %v4165_v45 = vld [vmem:[%s10127_s0 + $0x5d8] sm:$0xff]  ;;  %v4188_v40 = vld [vmem:[%s10128_s3 + $0x148] sm:$0xff]  ;;  %v4189_v62 = vld [vmem:[%s10128_s3 + $0x150] sm:$0xff] }
 0x1ae   :  { %v7122_v55 = vpop.f32.mrb[76].mxu1  ;;  %5233 = vmatprep.subr.bf16.mxu1 %v5232_v52  ;;  %v4187_v52 = vld [vmem:[%s10128_s3 + $0x140] sm:$0xff] }
 0x1af   :  { %v488_v14 = vpop.f32.mrb[77].mxu1  ;;  %1032 = vmatmul.mubr.f32.gmra.mrb[182].mxu1 %v4160_v31  ;;  %v4190_v31 = vld [vmem:[%s10128_s3 + $0x158] sm:$0xff]  ;;  %v5238_v0 = vpack.c.bf16 %v4189_v62, %v4187_v52  ;;  %v4193_v62 = vld [vmem:[%s10128_s3 + $0x170] sm:$0xff]  ;;  %v10149_v42 = vmax.f32 %v6878_v54, %v7122_v55 }
 0x1b0   :  { %1036 = vmatprep.mubr.f32.mxu1 %v4163_v35  ;;  %5235 = vmatpush1.bf16.msra.mxu1 %v5234_v17  ;;  %v5236_v35 = vpack.c.bf16 %v4190_v31, %v4188_v40  ;;  %v4167_v40 = vld [vmem:[%s10127_s0 + $0x5e8] sm:$0xff] }
 0x1b1   :  { %v4192_v31 = vld [vmem:[%s10128_s3 + $0x168] sm:$0xff] }
 0x1b2   :  { %v7144_v56 = vpop.f32.mrb[78].mxu1  ;;  %5237 = vmatprep.subr.bf16.mxu1 %v5236_v35  ;;  %v4191_v35 = vld [vmem:[%s10128_s3 + $0x160] sm:$0xff] }
 0x1b3   :  { %v493_v17 = vpop.f32.mrb[79].mxu1  ;;  %1037 = vmatmul.mubr.f32.gmra.mrb[184].mxu1 %v4162_v27  ;;  %v4194_v27 = vld [vmem:[%s10128_s3 + $0x178] sm:$0xff]  ;;  %v5242_v14 = vpack.c.bf16 %v4193_v62, %v4191_v35  ;;  %v10150_v47 = vmax.f32 %v6886_v58, %v7144_v56 }
 0x1b4   :  { %1041 = vmatprep.mubr.f32.mxu1 %v4165_v45  ;;  %5239 = vmatpush1.bf16.msra.mxu1 %v5238_v0  ;;  %v5240_v45 = vpack.c.bf16 %v4194_v27, %v4192_v31  ;;  %v4169_v31 = vld [vmem:[%s10127_s0 + $0x5f8] sm:$0xff]  ;;  %v4196_v27 = vld [vmem:[%s10128_s3 + $0x188] sm:$0xff] }
 0x1b6   :  { %v7166_v52 = vpop.f32.mrb[80].mxu1  ;;  %5241 = vmatprep.subr.bf16.mxu1 %v5240_v45  ;;  %v4310_v45 = vld [vmem:[%s10128_s3 + $0x518] sm:$0xff] }
 0x1b7   :  { %v498_v17 = vpop.f32.mrb[81].mxu1  ;;  %1042 = vmatmul.mubr.f32.gmra.mrb[186].mxu1 %v4164_v3  ;;  %v4198_v3 = vld [vmem:[%s10128_s3 + $0x198] sm:$0xff]  ;;  %v10151_v51 = vmax.f32 %v6894_v4, %v7166_v52 }
 0x1b8   :  { %1046 = vmatprep.mubr.f32.mxu1 %v4167_v40  ;;  %5243 = vmatpush1.bf16.msra.mxu1 %v5242_v14  ;;  %v4308_v40 = vld [vmem:[%s10128_s3 + $0x508] sm:$0xff]  ;;  %v5244_v62 = vpack.c.bf16 %v4198_v3, %v4196_v27  ;;  %v4195_v14 = vld [vmem:[%s10128_s3 + $0x180] sm:$0xff]  ;;  %v4197_v17 = vld [vmem:[%s10128_s3 + $0x190] sm:$0xff] }
 0x1b9   :  { %v5388_v26 = vpack.c.bf16 %v4310_v45, %v4308_v40  ;;  %v5246_v8 = vpack.c.bf16 %v4197_v17, %v4195_v14  ;;  %v4307_v27 = vld [vmem:[%s10128_s3 + $0x500] sm:$0xff]  ;;  %v4309_v3 = vld [vmem:[%s10128_s3 + $0x510] sm:$0xff]  ;;  %v4200_v40 = vld [vmem:[%s10128_s3 + $0x1a8] sm:$0xff] }
 0x1ba   :  { %v7191_v35 = vpop.f32.mrb[82].mxu1  ;;  %5245 = vmatprep.subr.bf16.mxu1 %v5244_v62  ;;  %v4312_v45 = vld [vmem:[%s10128_s3 + $0x528] sm:$0xff]  ;;  %v4201_v62 = vld [vmem:[%s10128_s3 + $0x1b0] sm:$0xff] }
 0x1bb   :  { %v503_v44 = vpop.f32.mrb[83].mxu1  ;;  %1047 = vmatmul.mubr.f32.gmra.mrb[188].mxu1 %v4166_v19  ;;  %v5390_v19 = vpack.c.bf16 %v4309_v3, %v4307_v27  ;;  %5389 = vmatprep.subr.bf16.mxu0 %v5388_v26  ;;  %v4199_v26 = vld [vmem:[%s10128_s3 + $0x1a0] sm:$0xff]  ;;  %v10152_v54 = vmax.f32 %v6902_v1, %v7191_v35 }
 0x1bc   :  { %1051 = vmatprep.mubr.f32.mxu1 %v4169_v31  ;;  %v4171_v44 = vld [vmem:[%s10127_s0 + $0x608] sm:$0xff]  ;;  %5247 = vmatpush1.bf16.msra.mxu1 %v5246_v8  ;;  %v4202_v31 = vld [vmem:[%s10128_s3 + $0x1b8] sm:$0xff] }
 0x1bd   :  { %5391 = vmatpush1.bf16.msra.mxu0 %v5390_v19  ;;  %v5248_v17 = vpack.c.bf16 %v4202_v31, %v4200_v40  ;;  %v4314_v8 = vld [vmem:[%s10128_s3 + $0x538] sm:$0xff]  ;;  %v5250_v19 = vpack.c.bf16 %v4201_v62, %v4199_v26  ;;  %v4311_v40 = vld [vmem:[%s10128_s3 + $0x520] sm:$0xff]  ;;  %v4313_v31 = vld [vmem:[%s10128_s3 + $0x530] sm:$0xff] }
 0x1be   :  { %v7225_v14 = vpop.f32.mrb[84].mxu1  ;;  %v5392_v0 = vpack.c.bf16 %v4314_v8, %v4312_v45  ;;  %v4204_v45 = vld [vmem:[%s10128_s3 + $0x1c8] sm:$0xff] }
 0x1bf   :  { %v508_v3 = vpop.f32.mrb[85].mxu1  ;;  %1052 = vmatmul.mubr.f32.gmra.mrb[190].mxu1 %v4168_v60  ;;  %5249 = vmatprep.subr.bf16.mxu1 %v5248_v17  ;;  %v5394_v60 = vpack.c.bf16 %v4313_v31, %v4311_v40  ;;  %v4316_v8 = vld [vmem:[%s10128_s3 + $0x548] sm:$0xff]  ;;  %v4203_v17 = vld [vmem:[%s10128_s3 + $0x1c0] sm:$0xff]  ;;  %v10153_v58 = vmax.f32 %v6910_v13, %v7225_v14 }
 0x1c0   :  { %1056 = vmatprep.mubr.f32.mxu1 %v4171_v44  ;;  %v4173_v3 = vld [vmem:[%s10127_s0 + $0x618] sm:$0xff]  ;;  %5393 = vmatprep.subr.bf16.mxu0 %v5392_v0 }
 0x1c1   :  { %5251 = vmatpush1.bf16.msra.mxu1 %v5250_v19  ;;  %v4206_v44 = vld [vmem:[%s10128_s3 + $0x1d8] sm:$0xff]  ;;  %5395 = vmatpush1.bf16.msra.mxu0 %v5394_v60  ;;  %v4205_v19 = vld [vmem:[%s10128_s3 + $0x1d0] sm:$0xff] }
 0x1c2   :  { %v7259_v26 = vpop.f32.mrb[86].mxu1  ;;  %v5252_v62 = vpack.c.bf16 %v4206_v44, %v4204_v45  ;;  %v4318_v0 = vld [vmem:[%s10128_s3 + $0x558] sm:$0xff]  ;;  %v5254_v60 = vpack.c.bf16 %v4205_v19, %v4203_v17  ;;  %v4315_v45 = vld [vmem:[%s10128_s3 + $0x540] sm:$0xff]  ;;  %v4317_v44 = vld [vmem:[%s10128_s3 + $0x550] sm:$0xff] }
 0x1c3   :  { %v513_v31 = vpop.f32.mrb[87].mxu1  ;;  %1057 = vmatmul.mubr.f32.gmra.mrb[192].mxu1 %v4170_v43  ;;  %v5396_v27 = vpack.c.bf16 %v4318_v0, %v4316_v8  ;;  %v5398_v43 = vpack.c.bf16 %v4317_v44, %v4315_v45  ;;  %v4208_v8 = vld [vmem:[%s10128_s3 + $0x1e8] sm:$0xff]  ;;  %v4325_v45 = vld [vmem:[%s10128_s3 + $0x590] sm:$0xff]  ;;  %v10154_v4 = vmax.f32 %v6918_v12, %v7259_v26 }
 0x1c4   :  { %1061 = vmatprep.mubr.f32.mxu1 %v4173_v3  ;;  %v4175_v31 = vld [vmem:[%s10127_s0 + $0x628] sm:$0xff]  ;;  %5253 = vmatprep.subr.bf16.mxu1 %v5252_v62  ;;  %v4210_v3 = vld [vmem:[%s10128_s3 + $0x1f8] sm:$0xff]  ;;  %v4207_v62 = vld [vmem:[%s10128_s3 + $0x1e0] sm:$0xff] }
 0x1c5   :  { %5397 = vmatprep.subr.bf16.mxu0 %v5396_v27  ;;  %5255 = vmatpush1.bf16.msra.mxu1 %v5254_v60  ;;  %v4320_v0 = vld [vmem:[%s10128_s3 + $0x568] sm:$0xff]  ;;  %v5256_v19 = vpack.c.bf16 %v4210_v3, %v4208_v8  ;;  %v4322_v27 = vld [vmem:[%s10128_s3 + $0x578] sm:$0xff]  ;;  %v4209_v60 = vld [vmem:[%s10128_s3 + $0x1f0] sm:$0xff] }
 0x1c6   :  { %v7293_v17 = vpop.f32.mrb[88].mxu1  ;;  %5399 = vmatpush1.bf16.msra.mxu0 %v5398_v43  ;;  %v5400_v40 = vpack.c.bf16 %v4322_v27, %v4320_v0  ;;  %v5258_v43 = vpack.c.bf16 %v4209_v60, %v4207_v62  ;;  %v4319_v8 = vld [vmem:[%s10128_s3 + $0x560] sm:$0xff]  ;;  %v4321_v3 = vld [vmem:[%s10128_s3 + $0x570] sm:$0xff]  ;;  %v1160_v0 = vld [vmem:[%s10128_s3 + $0x8] sm:$0xff] }
 0x1c7   :  { %v518_v44 = vpop.f32.mrb[89].mxu1  ;;  %1062 = vmatmul.mubr.f32.gmra.mrb[194].mxu1 %v4172_v41  ;;  %5257 = vmatprep.subr.bf16.mxu1 %v5256_v19  ;;  %v5402_v41 = vpack.c.bf16 %v4321_v3, %v4319_v8  ;;  %v4324_v27 = vld [vmem:[%s10128_s3 + $0x588] sm:$0xff]  ;;  %v4323_v3 = vld [vmem:[%s10128_s3 + $0x580] sm:$0xff]  ;;  %v10155_v1 = vmax.f32 %v6926_v18, %v7293_v17 }
 0x1c8   :  { %1066 = vmatprep.mubr.f32.mxu1 %v4175_v31  ;;  %v4177_v44 = vld [vmem:[%s10127_s0 + $0x638] sm:$0xff]  ;;  %5401 = vmatprep.subr.bf16.mxu0 %v5400_v40 }
 0x1c9   :  { %5259 = vmatpush1.bf16.msra.mxu1 %v5258_v43  ;;  %v1162_v31 = vld [vmem:[%s10128_s3 + $0x18] sm:$0xff] }
 0x1ca   :  { %v7327_v62 = vpop.f32.mrb[90].mxu1  ;;  %5403 = vmatpush1.bf16.msra.mxu0 %v5402_v41  ;;  %v5260_v60 = vpack.c.bf16 %v1162_v31, %v1160_v0  ;;  %v4326_v40 = vld [vmem:[%s10128_s3 + $0x598] sm:$0xff]  ;;  %v4176_v41 = vld [vmem:[%s10127_s0 + $0x630] sm:$0xff]  ;;  %v5406_v0 = vpack.c.bf16 %v4325_v45, %v4323_v3  ;;  %v10138_v31 = vmov 0.0  }
 0x1cb   :  { %v523_v43 = vpop.f32.mrb[91].mxu1  ;;  %1067 = vmatmul.mubr.f32.gmra.mrb[196].mxu1 %v4174_v32  ;;  %v5404_v8 = vpack.c.bf16 %v4326_v40, %v4324_v27  ;;  %1781 = vmatprep.mubr.f32.mxu0 %v10138_v31  ;;  %v4328_v27 = vld [vmem:[%s10128_s3 + $0x5a8] sm:$0xff]  ;;  %v4330_v45 = vld [vmem:[%s10128_s3 + $0x5b8] sm:$0xff]  ;;  %v10156_v13 = vmax.f32 %v6934_v25, %v7327_v62 }
 0x1cc   :  { %1071 = vmatprep.mubr.f32.mxu1 %v4177_v44  ;;  %5261 = vmatprep.subr.bf16.mxu1 %v5260_v60  ;;  %v5408_v60 = vpack.c.bf16 %v4330_v45, %v4328_v27  ;;  %v4327_v43 = vld [vmem:[%s10128_s3 + $0x5a0] sm:$0xff]  ;;  %v4334_v45 = vld [vmem:[%s10128_s3 + $0x5d8] sm:$0xff] }
 0x1cd   :  { %5405 = vmatprep.subr.bf16.mxu0 %v5404_v8  ;;  %v4329_v8 = vld [vmem:[%s10128_s3 + $0x5b0] sm:$0xff] }
 0x1ce   :  { %v7344_v32 = vpop.f32.mrb[92].mxu1  ;;  %5407 = vmatpush1.bf16.msra.mxu0 %v5406_v0  ;;  %v5410_v3 = vpack.c.bf16 %v4329_v8, %v4327_v43  ;;  %v4331_v43 = vld [vmem:[%s10128_s3 + $0x5c0] sm:$0xff] }
 0x1cf   :  { %v528_v40 = vpop.f32.mrb[93].mxu1  ;;  %1072 = vmatmul.mubr.f32.gmra.mrb[198].mxu1 %v4176_v41  ;;  %5409 = vmatprep.subr.bf16.mxu0 %v5408_v60  ;;  %v4332_v41 = vld [vmem:[%s10128_s3 + $0x5c8] sm:$0xff]  ;;  %v4333_v60 = vld [vmem:[%s10128_s3 + $0x5d0] sm:$0xff]  ;;  %v10157_v12 = vmax.f32 %v6942_v30, %v7344_v32 }
 0x1d0   :  { %1288 = vmatprep.mubr.f32.mxu1 %v10138_v31  ;;  %v5412_v31 = vpack.c.bf16 %v4334_v45, %v4332_v41  ;;  %v5414_v8 = vpack.c.bf16 %v4333_v60, %v4331_v43  ;;  %v4338_v45 = vld [vmem:[%s10128_s3 + $0x5f8] sm:$0xff]  ;;  %v4335_v43 = vld [vmem:[%s10128_s3 + $0x5e0] sm:$0xff] }
 0x1d2   :  { %v7361_v0 = vpop.f32.mrb[94].mxu1  ;;  %5411 = vmatpush1.bf16.msra.mxu0 %v5410_v3  ;;  %v4336_v3 = vld [vmem:[%s10128_s3 + $0x5e8] sm:$0xff] }
 0x1d3   :  { %v533_v27 = vpop.f32.mrb[95].mxu1  ;;  %5413 = vmatprep.subr.bf16.mxu0 %v5412_v31  ;;  %v5416_v40 = vpack.c.bf16 %v4338_v45, %v4336_v3  ;;  %v4337_v31 = vld [vmem:[%s10128_s3 + $0x5f0] sm:$0xff]  ;;  %v4342_v45 = vld [vmem:[%s10128_s3 + $0x618] sm:$0xff]  ;;  %v10158_v18 = vmax.f32 %v6950_v36, %v7361_v0 }
 0x1d4   :  { %v5418_v60 = vpack.c.bf16 %v4337_v31, %v4335_v43 }
 0x1d6   :  { %v7377_v44 = vpop.f32.mrb[96].mxu1  ;;  %5415 = vmatpush1.bf16.msra.mxu0 %v5414_v8  ;;  %v4340_v8 = vld [vmem:[%s10128_s3 + $0x608] sm:$0xff] }
 0x1d7   :  { %v538_v41 = vpop.f32.mrb[97].mxu1  ;;  %5417 = vmatprep.subr.bf16.mxu0 %v5416_v40  ;;  %v5420_v27 = vpack.c.bf16 %v4342_v45, %v4340_v8  ;;  %v10159_v25 = vmax.f32 %v6958_v37, %v7377_v44  ;;  %v1159_v44 = vld [vmem:[%s10128_s3] sm:$0xff] }
 0x1da   :  { %v7393_v19 = vpop.f32.mrb[98].mxu1  ;;  %5419 = vmatpush1.bf16.msra.mxu0 %v5418_v60 }
 0x1db   :  { %v543_v3 = vpop.f32.mrb[99].mxu1  ;;  %5421 = vmatprep.subr.bf16.mxu0 %v5420_v27  ;;  %v10160_v30 = vmax.f32 %v6966_v48, %v7393_v19  ;;  %v1161_v48 = vld [vmem:[%s10128_s3 + $0x10] sm:$0xff]  ;;  %v7542_v19 = vld [vmem:[%s10129_s2] ss:$0 sm:$0xff] }
 0x1de   :  { %v687_v21 = vpop.f32.mrb[100].mxu1 }
 0x1df   :  { %v7406_v40 = vmax.f32 %v545_v46, %v687_v21  ;;  %v689_v43 = vpop.f32.mrb[101].mxu1 }
 0x1e2   :  { %v692_v31 = vpop.f32.mrb[102].mxu1 }
 0x1e3   :  { %v7411_v41 = vmax.f32 %v546_v59, %v692_v31  ;;  %v694_v60 = vpop.f32.mrb[103].mxu1 }
 0x1e6   :  { %v697_v3 = vpop.f32.mrb[104].mxu1 }
 0x1e7   :  { %v7416_v8 = vmax.f32 %v547_v9, %v697_v3  ;;  %v699_v27 = vpop.f32.mrb[105].mxu1 }
 0x1ea   :  { %v702_v45 = vpop.f32.mrb[106].mxu1 }
 0x1eb   :  { %v7421_v6 = vmax.f32 %v548_v16, %v702_v45  ;;  %v704_v53 = vpop.f32.mrb[107].mxu1 }
 0x1ee   :  { %v707_v46 = vpop.f32.mrb[108].mxu1 }
 0x1ef   :  { %v7426_v49 = vmax.f32 %v10140_v2, %v707_v46  ;;  %v709_v59 = vpop.f32.mrb[109].mxu1 }
 0x1f2   :  { %v712_v21 = vpop.f32.mrb[110].mxu1 }
 0x1f3   :  { %v7431_v63 = vmax.f32 %v10141_v7, %v712_v21  ;;  %v714_v9 = vpop.f32.mrb[111].mxu1 }
 0x1f6   :  { %v717_v43 = vpop.f32.mrb[112].mxu1 }
 0x1f7   :  { %v7436_v10 = vmax.f32 %v10142_v11, %v717_v43  ;;  %v719_v16 = vpop.f32.mrb[113].mxu1 }
 0x1fa   :  { %v722_v31 = vpop.f32.mrb[114].mxu1 }
 0x1fb   :  { %v7441_v22 = vmax.f32 %v10143_v15, %v722_v31  ;;  %v724_v60 = vpop.f32.mrb[115].mxu1 }
 0x1fe   :  { %v727_v3 = vpop.f32.mrb[116].mxu1 }
 0x1ff   :  { %v7446_v28 = vmax.f32 %v10144_v20, %v727_v3  ;;  %v729_v27 = vpop.f32.mrb[117].mxu1 }
 0x202   :  { %v732_v45 = vpop.f32.mrb[118].mxu1 }
 0x203   :  { %v7451_v39 = vmax.f32 %v10145_v24, %v732_v45  ;;  %v734_v53 = vpop.f32.mrb[119].mxu1 }
 0x206   :  { %v737_v46 = vpop.f32.mrb[120].mxu1 }
 0x207   :  { %v7456_v50 = vmax.f32 %v10146_v29, %v737_v46  ;;  %v739_v2 = vpop.f32.mrb[121].mxu1 }
 0x20a   :  { %v742_v59 = vpop.f32.mrb[122].mxu1 }
 0x20b   :  { %v7461_v57 = vmax.f32 %v10147_v33, %v742_v59  ;;  %v744_v21 = vpop.f32.mrb[123].mxu1 }
 0x20e   :  { %v747_v7 = vpop.f32.mrb[124].mxu1 }
 0x20f   :  { %v7466_v5 = vmax.f32 %v10148_v38, %v747_v7  ;;  %v749_v9 = vpop.f32.mrb[125].mxu1 }
 0x212   :  { %v752_v43 = vpop.f32.mrb[126].mxu1 }
 0x213   :  { %v7471_v23 = vmax.f32 %v10149_v42, %v752_v43  ;;  %v754_v11 = vpop.f32.mrb[127].mxu1 }
 0x216   :  { %v757_v16 = vpop.f32.mrb[128].mxu1 }
 0x217   :  { %v7476_v34 = vmax.f32 %v10150_v47, %v757_v16  ;;  %v759_v31 = vpop.f32.mrb[129].mxu1 }
 0x21a   :  { %v762_v15 = vpop.f32.mrb[130].mxu1 }
 0x21b   :  { %v7481_v61 = vmax.f32 %v10151_v51, %v762_v15  ;;  %v764_v60 = vpop.f32.mrb[131].mxu1  ;;  %v1164_v15 = vld [vmem:[%s10128_s3 + $0x28] sm:$0xff] }
 0x21e   :  { %v767_v3 = vpop.f32.mrb[132].mxu1 }
 0x21f   :  { %v7486_v55 = vmax.f32 %v10152_v54, %v767_v3  ;;  %v769_v20 = vpop.f32.mrb[133].mxu1  ;;  %v5262_v3 = vpack.c.bf16 %v1161_v48, %v1159_v44  ;;  %v1177_v44 = vld [vmem:[%s10128_s3 + $0x90] sm:$0xff] }
 0x222   :  { %v772_v27 = vpop.f32.mrb[134].mxu1 }
 0x223   :  { %v7491_v56 = vmax.f32 %v10153_v58, %v772_v27  ;;  %v774_v45 = vpop.f32.mrb[135].mxu1 }
 0x224   :  { %v1163_v45 = vld [vmem:[%s10128_s3 + $0x20] sm:$0xff] }
 0x226   :  { %v777_v24 = vpop.f32.mrb[136].mxu1 }
 0x227   :  { %v7496_v52 = vmax.f32 %v10154_v4, %v777_v24  ;;  %v779_v53 = vpop.f32.mrb[137].mxu1  ;;  %v1165_v24 = vld [vmem:[%s10128_s3 + $0x30] sm:$0xff]  ;;  %v1168_v4 = vld [vmem:[%s10128_s3 + $0x48] sm:$0xff] }
 0x228   :  { %v1170_v53 = vld [vmem:[%s10128_s3 + $0x58] sm:$0xff] }
 0x22a   :  { %v782_v46 = vpop.f32.mrb[138].mxu1 }
 0x22b   :  { %v7501_v35 = vmax.f32 %v10155_v1, %v782_v46  ;;  %v784_v29 = vpop.f32.mrb[139].mxu1  ;;  %v5266_v1 = vpack.c.bf16 %v1165_v24, %v1163_v45 }
 0x22c   :  { %v10161_v29 = vmov 0.0  }
 0x22e   :  { %v787_v2 = vpop.f32.mrb[140].mxu1 }
 0x22f   :  { %v7506_v14 = vmax.f32 %v10156_v13, %v787_v2  ;;  %v789_v59 = vpop.f32.mrb[141].mxu1 }
 0x230   :  { %v5268_v59 = vpack.c.bf16 %v1170_v53, %v1168_v4 }
 0x232   :  { %v792_v33 = vpop.f32.mrb[142].mxu1 }
 0x233   :  { %v7511_v26 = vmax.f32 %v10157_v12, %v792_v33  ;;  %v794_v21 = vpop.f32.mrb[143].mxu1  ;;  %v1167_v33 = vld [vmem:[%s10128_s3 + $0x40] sm:$0xff]  ;;  %v1169_v12 = vld [vmem:[%s10128_s3 + $0x50] sm:$0xff] }
 0x234   :  { %v1172_v21 = vld [vmem:[%s10128_s3 + $0x68] sm:$0xff] }
 0x236   :  { %v797_v7 = vpop.f32.mrb[144].mxu1 }
 0x237   :  { %v7516_v17 = vmax.f32 %v10158_v18, %v797_v7  ;;  %v799_v38 = vpop.f32.mrb[145].mxu1  ;;  %v1174_v7 = vld [vmem:[%s10128_s3 + $0x78] sm:$0xff] }
 0x238   :  { %v5270_v38 = vpack.c.bf16 %v1169_v12, %v1167_v33 }
 0x23a   :  { %v802_v9 = vpop.f32.mrb[146].mxu1 }
 0x23b   :  { %v7521_v62 = vmax.f32 %v10159_v25, %v802_v9  ;;  %v804_v43 = vpop.f32.mrb[147].mxu1 }
 0x23c   :  { %v5272_v43 = vpack.c.bf16 %v1174_v7, %v1172_v21 }
 0x23e   :  { %v807_v42 = vpop.f32.mrb[148].mxu1 }
 0x23f   :  { %v7526_v32 = vmax.f32 %v10160_v30, %v807_v42  ;;  %v809_v11 = vpop.f32.mrb[149].mxu1  ;;  %v1171_v42 = vld [vmem:[%s10128_s3 + $0x60] sm:$0xff]  ;;  %v1173_v30 = vld [vmem:[%s10128_s3 + $0x70] sm:$0xff] }
 0x240   :  { %v1176_v11 = vld [vmem:[%s10128_s3 + $0x88] sm:$0xff] }
 0x242   :  { %v7528_v16 = vpop.f32.mrb[150].mxu1 }
 0x243   :  { %v1077_v36 = vmax.f32 %v7406_v40, %v7528_v16  ;;  %v955_v0 = vpop.f32.mrb[151].mxu1  ;;  %v4216_v40 = vld [vmem:[%s10128_s3 + $0x228] sm:$0xff]  ;;  %v4218_v16 = vld [vmem:[%s10128_s3 + $0x238] sm:$0xff] }
 0x244   :  { %v1178_v0 = vld [vmem:[%s10128_s3 + $0x98] sm:$0xff] }
 0x246   :  { %v958_v47 = vpop.f32.mrb[152].mxu1 }
 0x247   :  { %v1078_v31 = vmax.f32 %v7411_v41, %v958_v47  ;;  %v960_v37 = vpop.f32.mrb[153].mxu1  ;;  %v1166_v41 = vld [vmem:[%s10128_s3 + $0x38] sm:$0xff] }
 0x248   :  { %v5264_v58 = vpack.c.bf16 %v1166_v41, %v1164_v15  ;;  %v1175_v37 = vld [vmem:[%s10128_s3 + $0x80] sm:$0xff]  ;;  %v5276_v41 = vpack.c.bf16 %v1178_v0, %v1176_v11  ;;  %v4350_v11 = vld [vmem:[%s10128_s3 + $0x658] sm:$0xff] }
 0x249   :  { %v1110_v51 = vadd.f32 %v7542_v19, %v1078_v31  ;;  %v5274_v31 = vpack.c.bf16 %v1173_v30, %v1171_v42  ;;  %v5278_v4 = vpack.c.bf16 %v1177_v44, %v1175_v37  ;;  %v1186_v42 = vld [vmem:[%s10128_s3 + $0xd8] sm:$0xff]  ;;  %v4348_v30 = vld [vmem:[%s10128_s3 + $0x648] sm:$0xff]  ;;  %v1183_v37 = vld [vmem:[%s10128_s3 + $0xc0] sm:$0xff] }
 0x24a   :  { %v7551_v60 = vpop.f32.mrb[154].mxu1  ;;  %v1185_v44 = vld [vmem:[%s10128_s3 + $0xd0] sm:$0xff] }
 0x24b   :  { %v1135_v54 = vmax.f32 %v1110_v51, 0.0  ;;  %v1079_v20 = vmax.f32 %v7416_v8, %v7551_v60  ;;  %v965_v27 = vpop.f32.mrb[155].mxu1  ;;  %v4339_v51 = vld [vmem:[%s10128_s3 + $0x600] sm:$0xff]  ;;  %v4248_v8 = vld [vmem:[%s10128_s3 + $0x328] sm:$0xff]  ;;  %v4250_v60 = vld [vmem:[%s10128_s3 + $0x338] sm:$0xff] }
 0x24c   :  { %v1182_v27 = vld [vmem:[%s10128_s3 + $0xb8] sm:$0xff] }
 0x24d   :  { %1289 = vmatmul.mubr.f32.vlgmr.msra.gmra.mrb[200].mxu1 %v1135_v54  ;;  %v1180_v54 = vld [vmem:[%s10128_s3 + $0xa8] sm:$0xff] }
 0x24e   :  { %5263 = vmatpush1.bf16.msra.mxu1 %v5262_v3  ;;  %v7567_v46 = vpop.f32.mrb[156].mxu1  ;;  %1359 = vmatprep.mubr.f32.mxu1 %v10161_v29  ;;  %v4341_v3 = vld [vmem:[%s10128_s3 + $0x610] sm:$0xff]  ;;  %v5280_v21 = vpack.c.bf16 %v1182_v27, %v1180_v54  ;;  %v1188_v27 = vld [vmem:[%s10128_s3 + $0xe8] sm:$0xff] }
 0x24f   :  { %v1080_v2 = vmax.f32 %v7421_v6, %v7567_v46  ;;  %v970_v13 = vpop.f32.mrb[157].mxu1  ;;  %5265 = vmatprep.subr.bf16.mxu1 %v5264_v58  ;;  %v4346_v58 = vld [vmem:[%s10128_s3 + $0x638] sm:$0xff]  ;;  %v5422_v53 = vpack.c.bf16 %v4341_v3, %v4339_v51  ;;  %v5428_v51 = vpack.c.bf16 %v4350_v11, %v4348_v30  ;;  %v4347_v3 = vld [vmem:[%s10128_s3 + $0x640] sm:$0xff]  ;;  %v4349_v54 = vld [vmem:[%s10128_s3 + $0x650] sm:$0xff] }
 0x250   :  { %v1181_v13 = vld [vmem:[%s10128_s3 + $0xb0] sm:$0xff]  ;;  %v4214_v30 = vld [vmem:[%s10128_s3 + $0x218] sm:$0xff]  ;;  %v4356_v11 = vld [vmem:[%s10128_s3 + $0x688] sm:$0xff] }
 0x251   :  { %v4282_v6 = vld [vmem:[%s10128_s3 + $0x438] sm:$0xff]  ;;  %v4424_v46 = vld [vmem:[%s10128_s3 + $0x8a8] sm:$0xff] }
 0x252   :  { %5267 = vmatpush1.bf16.msra.mxu1 %v5266_v1  ;;  %v7584_v18 = vpop.f32.mrb[158].mxu1  ;;  %v1179_v1 = vld [vmem:[%s10128_s3 + $0xa0] sm:$0xff] }
 0x253   :  { %v1081_v9 = vmax.f32 %v7426_v49, %v7584_v18  ;;  %v975_v25 = vpop.f32.mrb[159].mxu1  ;;  %5269 = vmatprep.subr.bf16.mxu1 %v5268_v59  ;;  %v4458_v49 = vld [vmem:[%s10128_s3 + $0x9b8] sm:$0xff] }
 0x254   :  { %v4345_v25 = vld [vmem:[%s10128_s3 + $0x630] sm:$0xff] }
 0x256   :  { %5271 = vmatpush1.bf16.msra.mxu1 %v5270_v38  ;;  %v978_v47 = vpop.f32.mrb[160].mxu1  ;;  %v4343_v38 = vld [vmem:[%s10128_s3 + $0x620] sm:$0xff] }
 0x257   :  { %v1082_v48 = vmax.f32 %v7431_v63, %v978_v47  ;;  %v980_v15 = vpop.f32.mrb[161].mxu1  ;;  %5273 = vmatprep.subr.bf16.mxu1 %v5272_v43  ;;  %v4344_v63 = vld [vmem:[%s10128_s3 + $0x628] sm:$0xff]  ;;  %v5282_v47 = vpack.c.bf16 %v1181_v13, %v1179_v1  ;;  %v5430_v1 = vpack.c.bf16 %v4349_v54, %v4347_v3  ;;  %v1187_v13 = vld [vmem:[%s10128_s3 + $0xe0] sm:$0xff]  ;;  %v1109_v3 = vadd.f32 %v7542_v19, %v1077_v36 }
 0x258   :  { %v5424_v7 = vpack.c.bf16 %v4346_v58, %v4344_v63  ;;  %v1184_v43 = vld [vmem:[%s10128_s3 + $0xc8] sm:$0xff]  ;;  %v1190_v63 = vld [vmem:[%s10128_s3 + $0xf8] sm:$0xff] }
 0x259   :  { %v1114_v45 = vadd.f32 %v7542_v19, %v1082_v48  ;;  %v4352_v58 = vld [vmem:[%s10128_s3 + $0x668] sm:$0xff] }
 0x25a   :  { %5275 = vmatpush1.bf16.msra.mxu1 %v5274_v31  ;;  %v7626_v24 = vpop.f32.mrb[162].mxu1  ;;  %v5426_v31 = vpack.c.bf16 %v4345_v25, %v4343_v38  ;;  %v5288_v38 = vpack.c.bf16 %v1190_v63, %v1188_v27  ;;  %v4360_v36 = vld [vmem:[%s10128_s3 + $0x6a8] sm:$0xff] }
 0x25b   :  { %v1139_v59 = vmax.f32 %v1114_v45, 0.0  ;;  %v1083_v33 = vmax.f32 %v7436_v10, %v7626_v24  ;;  %5277 = vmatprep.subr.bf16.mxu1 %v5276_v41  ;;  %v985_v12 = vpop.f32.mrb[163].mxu1  ;;  %v5284_v41 = vpack.c.bf16 %v1186_v42, %v1184_v43  ;;  %v4354_v45 = vld [vmem:[%s10128_s3 + $0x678] sm:$0xff]  ;;  %v4353_v43 = vld [vmem:[%s10128_s3 + $0x670] sm:$0xff]  ;;  %v4212_v42 = vld [vmem:[%s10128_s3 + $0x208] sm:$0xff] }
 0x25c   :  { %v4351_v12 = vld [vmem:[%s10128_s3 + $0x660] sm:$0xff]  ;;  %v5432_v25 = vpack.c.bf16 %v4354_v45, %v4352_v58  ;;  %v4357_v45 = vld [vmem:[%s10128_s3 + $0x690] sm:$0xff]  ;;  %v4232_v10 = vld [vmem:[%s10128_s3 + $0x2a8] sm:$0xff] }
 0x25d   :  { %1782 = vmatmul.mubr.f32.vlgmr.msra.gmra.mrb[0].mxu0 %v1139_v59  ;;  %v1189_v59 = vld [vmem:[%s10128_s3 + $0xf0] sm:$0xff]  ;;  %v4355_v58 = vld [vmem:[%s10128_s3 + $0x680] sm:$0xff]  ;;  %v4234_v24 = vld [vmem:[%s10128_s3 + $0x2b8] sm:$0xff] }
 0x25e   :  { %5279 = vmatpush1.bf16.msra.mxu1 %v5278_v4  ;;  %5423 = vmatpush1.bf16.msra.mxu0 %v5422_v53  ;;  %v7654_v0 = vpop.f32.mrb[164].mxu1  ;;  %v5286_v53 = vpack.c.bf16 %v1185_v44, %v1183_v37  ;;  %v5290_v37 = vpack.c.bf16 %v1189_v59, %v1187_v13  ;;  %v5434_v44 = vpack.c.bf16 %v4353_v43, %v4351_v12  ;;  %v4215_v12 = vld [vmem:[%s10128_s3 + $0x220] sm:$0xff] }
 0x25f   :  { %v1084_v48 = vmax.f32 %v7441_v22, %v7654_v0  ;;  %5281 = vmatprep.subr.bf16.mxu1 %v5280_v21  ;;  %5425 = vmatprep.subr.bf16.mxu0 %v5424_v7  ;;  %v990_v15 = vpop.f32.mrb[165].mxu1  ;;  %v5438_v59 = vpack.c.bf16 %v4357_v45, %v4355_v58  ;;  %v4221_v58 = vld [vmem:[%s10128_s3 + $0x250] sm:$0xff]  ;;  %v4264_v22 = vld [vmem:[%s10128_s3 + $0x3a8] sm:$0xff]  ;;  %v4266_v0 = vld [vmem:[%s10128_s3 + $0x3b8] sm:$0xff] }
 0x260   :  { %1887 = vmatprep.mubr.f32.mxu0 %v10161_v29  ;;  %v5292_v15 = vpack.c.bf16 %v4214_v30, %v4212_v42  ;;  %v5296_v42 = vpack.c.bf16 %v4218_v16, %v4216_v40 }
 0x262   :  { %5283 = vmatpush1.bf16.msra.mxu1 %v5282_v47  ;;  %5427 = vmatpush1.bf16.msra.mxu0 %v5426_v31  ;;  %v7683_v4 = vpop.f32.mrb[166].mxu1  ;;  %v4358_v47 = vld [vmem:[%s10128_s3 + $0x698] sm:$0xff] }
 0x263   :  { %v1085_v21 = vmax.f32 %v7446_v28, %v7683_v4  ;;  %5285 = vmatprep.subr.bf16.mxu1 %v5284_v41  ;;  %5429 = vmatprep.subr.bf16.mxu0 %v5428_v51  ;;  %v995_v7 = vpop.f32.mrb[167].mxu1  ;;  %v4211_v41 = vld [vmem:[%s10128_s3 + $0x200] sm:$0xff]  ;;  %v4213_v51 = vld [vmem:[%s10128_s3 + $0x210] sm:$0xff]  ;;  %v5436_v63 = vpack.c.bf16 %v4358_v47, %v4356_v11  ;;  %v4298_v28 = vld [vmem:[%s10128_s3 + $0x4b8] sm:$0xff] }
 0x264   :  { %v5294_v13 = vpack.c.bf16 %v4213_v51, %v4211_v41  ;;  %v4217_v7 = vld [vmem:[%s10128_s3 + $0x230] sm:$0xff]  ;;  %v4359_v11 = vld [vmem:[%s10128_s3 + $0x6a0] sm:$0xff]  ;;  %v4366_v41 = vld [vmem:[%s10128_s3 + $0x6d8] sm:$0xff] }
 0x265   :  { %v4361_v47 = vld [vmem:[%s10128_s3 + $0x6b0] sm:$0xff]  ;;  %v4442_v4 = vld [vmem:[%s10128_s3 + $0x938] sm:$0xff] }
 0x266   :  { %5287 = vmatpush1.bf16.msra.mxu1 %v5286_v53  ;;  %5431 = vmatpush1.bf16.msra.mxu0 %v5430_v1  ;;  %v7711_v31 = vpop.f32.mrb[168].mxu1  ;;  %v4362_v53 = vld [vmem:[%s10128_s3 + $0x6b8] sm:$0xff] }
 0x267   :  { %v1086_v54 = vmax.f32 %v7451_v39, %v7711_v31  ;;  %5289 = vmatprep.subr.bf16.mxu1 %v5288_v38  ;;  %5433 = vmatprep.subr.bf16.mxu0 %v5432_v25  ;;  %v1000_v27 = vpop.f32.mrb[169].mxu1  ;;  %v1134_v38 = vmax.f32 %v1109_v3, 0.0  ;;  %v5440_v30 = vpack.c.bf16 %v4362_v53, %v4360_v36  ;;  %v5298_v3 = vpack.c.bf16 %v4217_v7, %v4215_v12  ;;  %v4363_v53 = vld [vmem:[%s10128_s3 + $0x6c0] sm:$0xff]  ;;  %v4226_v12 = vld [vmem:[%s10128_s3 + $0x278] sm:$0xff]  ;;  %v4368_v7 = vld [vmem:[%s10128_s3 + $0x6e8] sm:$0xff] }
 0x268   :  { %v5442_v27 = vpack.c.bf16 %v4361_v47, %v4359_v11  ;;  %v4223_v11 = vld [vmem:[%s10128_s3 + $0x260] sm:$0xff]  ;;  %v4225_v47 = vld [vmem:[%s10128_s3 + $0x270] sm:$0xff]  ;;  %v4474_v39 = vld [vmem:[%s10128_s3 + $0xa38] sm:$0xff] }
 0x26a   :  { %5291 = vmatpush1.bf16.msra.mxu1 %v5290_v37  ;;  %5435 = vmatpush1.bf16.msra.mxu0 %v5434_v44  ;;  %v7743_v1 = vpop.f32.mrb[170].mxu1  ;;  %v4220_v37 = vld [vmem:[%s10128_s3 + $0x248] sm:$0xff]  ;;  %v4222_v44 = vld [vmem:[%s10128_s3 + $0x258] sm:$0xff] }
 0x26b   :  { %v1087_v25 = vmax.f32 %v7456_v50, %v7743_v1  ;;  %5293 = vmatprep.subr.bf16.mxu1 %v5292_v15  ;;  %5437 = vmatprep.subr.bf16.mxu0 %v5436_v63  ;;  %v1005_v43 = vpop.f32.mrb[171].mxu1  ;;  %v4364_v15 = vld [vmem:[%s10128_s3 + $0x6c8] sm:$0xff]  ;;  %v4219_v63 = vld [vmem:[%s10128_s3 + $0x240] sm:$0xff]  ;;  %v5300_v16 = vpack.c.bf16 %v4222_v44, %v4220_v37  ;;  %v1116_v44 = vadd.f32 %v7542_v19, %v1084_v48  ;;  %v4506_v50 = vld [vmem:[%s10128_s3 + $0xb38] sm:$0xff] }
 0x26c   :  { %v5444_v36 = vpack.c.bf16 %v4366_v41, %v4364_v15  ;;  %v4367_v37 = vld [vmem:[%s10128_s3 + $0x6e0] sm:$0xff]  ;;  %v4408_v48 = vld [vmem:[%s10128_s3 + $0x828] sm:$0xff] }
 0x26d   :  { %1360 = vmatmul.mubr.f32.vlgmr.msra.gmra.mrb[200].mxu1 %v1134_v38  ;;  %v4370_v38 = vld [vmem:[%s10128_s3 + $0x6f8] sm:$0xff] }
 0x26e   :  { %5295 = vmatpush1.bf16.msra.mxu1 %v5294_v13  ;;  %5439 = vmatpush1.bf16.msra.mxu0 %v5438_v59  ;;  %v7771_v51 = vpop.f32.mrb[172].mxu1  ;;  %v4365_v13 = vld [vmem:[%s10128_s3 + $0x6d0] sm:$0xff]  ;;  %v4224_v59 = vld [vmem:[%s10128_s3 + $0x268] sm:$0xff] }
 0x26f   :  { %v1088_v45 = vmax.f32 %v7461_v57, %v7771_v51  ;;  %5297 = vmatprep.subr.bf16.mxu1 %v5296_v42  ;;  %5441 = vmatprep.subr.bf16.mxu0 %v5440_v30  ;;  %v1010_v40 = vpop.f32.mrb[173].mxu1  ;;  %v5302_v42 = vpack.c.bf16 %v4221_v58, %v4219_v63  ;;  %v5446_v30 = vpack.c.bf16 %v4365_v13, %v4363_v53  ;;  %v4228_v63 = vld [vmem:[%s10128_s3 + $0x288] sm:$0xff]  ;;  %v4230_v58 = vld [vmem:[%s10128_s3 + $0x298] sm:$0xff] }
 0x270   :  { %1463 = vmatprep.mubr.f32.mxu1 %v10161_v29  ;;  %v5304_v41 = vpack.c.bf16 %v4226_v12, %v4224_v59  ;;  %v4372_v40 = vld [vmem:[%s10128_s3 + $0x708] sm:$0xff]  ;;  %v5306_v53 = vpack.c.bf16 %v4225_v47, %v4223_v11  ;;  %v5308_v59 = vpack.c.bf16 %v4230_v58, %v4228_v63  ;;  %v4227_v12 = vld [vmem:[%s10128_s3 + $0x280] sm:$0xff]  ;;  %v4233_v58 = vld [vmem:[%s10128_s3 + $0x2b0] sm:$0xff] }
 0x271   :  { %v4371_v47 = vld [vmem:[%s10128_s3 + $0x700] sm:$0xff]  ;;  %v4538_v57 = vld [vmem:[%s10128_s3 + $0xc38] sm:$0xff] }
 0x272   :  { %5299 = vmatpush1.bf16.msra.mxu1 %v5298_v3  ;;  %5443 = vmatpush1.bf16.msra.mxu0 %v5442_v27  ;;  %v7800_v43 = vpop.f32.mrb[174].mxu1  ;;  %v5448_v3 = vpack.c.bf16 %v4370_v38, %v4368_v7  ;;  %v4369_v27 = vld [vmem:[%s10128_s3 + $0x6f0] sm:$0xff]  ;;  %v1115_v38 = vadd.f32 %v7542_v19, %v1083_v33  ;;  %v4376_v33 = vld [vmem:[%s10128_s3 + $0x728] sm:$0xff]  ;;  %v4231_v63 = vld [vmem:[%s10128_s3 + $0x2a0] sm:$0xff] }
 0x273   :  { %5301 = vmatprep.subr.bf16.mxu1 %v5300_v16  ;;  %5445 = vmatprep.subr.bf16.mxu0 %v5444_v36  ;;  %v1015_v15 = vpop.f32.mrb[175].mxu1  ;;  %v4374_v16 = vld [vmem:[%s10128_s3 + $0x718] sm:$0xff]  ;;  %v5450_v13 = vpack.c.bf16 %v4369_v27, %v4367_v37  ;;  %v4229_v7 = vld [vmem:[%s10128_s3 + $0x290] sm:$0xff] }
 0x274   :  { %v5452_v11 = vpack.c.bf16 %v4374_v16, %v4372_v40  ;;  %v4373_v37 = vld [vmem:[%s10128_s3 + $0x710] sm:$0xff]  ;;  %v4378_v15 = vld [vmem:[%s10128_s3 + $0x738] sm:$0xff]  ;;  %v1140_v40 = vmax.f32 %v1115_v38, 0.0  ;;  %v4236_v38 = vld [vmem:[%s10128_s3 + $0x2c8] sm:$0xff] }
 0x275   :  { %v5454_v27 = vpack.c.bf16 %v4373_v37, %v4371_v47  ;;  %v4382_v47 = vld [vmem:[%s10128_s3 + $0x758] sm:$0xff] }
 0x276   :  { %5303 = vmatpush1.bf16.msra.mxu1 %v5302_v42  ;;  %5447 = vmatpush1.bf16.msra.mxu0 %v5446_v30  ;;  %v7828_v36 = vpop.f32.mrb[176].mxu1  ;;  %v4246_v16 = vld [vmem:[%s10128_s3 + $0x318] sm:$0xff]  ;;  %v1111_v42 = vadd.f32 %v7542_v19, %v1079_v20  ;;  %v4392_v20 = vld [vmem:[%s10128_s3 + $0x7a8] sm:$0xff] }
 0x277   :  { %5305 = vmatprep.subr.bf16.mxu1 %v5304_v41  ;;  %5449 = vmatprep.subr.bf16.mxu0 %v5448_v3  ;;  %v1020_v30 = vpop.f32.mrb[177].mxu1  ;;  %v5310_v3 = vpack.c.bf16 %v4229_v7, %v4227_v12  ;;  %v4375_v12 = vld [vmem:[%s10128_s3 + $0x720] sm:$0xff]  ;;  %v4377_v7 = vld [vmem:[%s10128_s3 + $0x730] sm:$0xff] }
 0x278   :  { %v5456_v30 = vpack.c.bf16 %v4378_v15, %v4376_v33  ;;  %v4235_v33 = vld [vmem:[%s10128_s3 + $0x2c0] sm:$0xff]  ;;  %v4237_v15 = vld [vmem:[%s10128_s3 + $0x2d0] sm:$0xff] }
 0x27a   :  { %5307 = vmatpush1.bf16.msra.mxu1 %v5306_v53  ;;  %5451 = vmatpush1.bf16.msra.mxu0 %v5450_v13  ;;  %v7860_v41 = vpop.f32.mrb[178].mxu1  ;;  %v5312_v13 = vpack.c.bf16 %v4234_v24, %v4232_v10  ;;  %v5314_v10 = vpack.c.bf16 %v4233_v58, %v4231_v63  ;;  %v5458_v24 = vpack.c.bf16 %v4377_v7, %v4375_v12  ;;  %v4379_v63 = vld [vmem:[%s10128_s3 + $0x740] sm:$0xff]  ;;  %v4381_v58 = vld [vmem:[%s10128_s3 + $0x750] sm:$0xff]  ;;  %v4240_v12 = vld [vmem:[%s10128_s3 + $0x2e8] sm:$0xff] }
 0x27b   :  { %5309 = vmatprep.subr.bf16.mxu1 %v5308_v59  ;;  %5453 = vmatprep.subr.bf16.mxu0 %v5452_v11  ;;  %v1025_v53 = vpop.f32.mrb[179].mxu1  ;;  %v4238_v59 = vld [vmem:[%s10128_s3 + $0x2d8] sm:$0xff]  ;;  %v4380_v11 = vld [vmem:[%s10128_s3 + $0x748] sm:$0xff] }
 0x27c   :  { %v4386_v7 = vld [vmem:[%s10128_s3 + $0x778] sm:$0xff]  ;;  %v4383_v53 = vld [vmem:[%s10128_s3 + $0x760] sm:$0xff] }
 0x27d   :  { %1888 = vmatmul.mubr.f32.vlgmr.msra.gmra.mrb[0].mxu0 %v1140_v40 }
 0x27e   :  { %5311 = vmatpush1.bf16.msra.mxu1 %v5310_v3  ;;  %5455 = vmatpush1.bf16.msra.mxu0 %v5454_v27  ;;  %v7888_v37 = vpop.f32.mrb[180].mxu1  ;;  %v5316_v3 = vpack.c.bf16 %v4238_v59, %v4236_v38  ;;  %v5460_v27 = vpack.c.bf16 %v4382_v47, %v4380_v11  ;;  %v5318_v59 = vpack.c.bf16 %v4237_v15, %v4235_v33  ;;  %v4239_v47 = vld [vmem:[%s10128_s3 + $0x2e0] sm:$0xff] }
 0x27f   :  { %5313 = vmatprep.subr.bf16.mxu1 %v5312_v13  ;;  %5457 = vmatprep.subr.bf16.mxu0 %v5456_v30  ;;  %v1030_v40 = vpop.f32.mrb[181].mxu1  ;;  %v4242_v13 = vld [vmem:[%s10128_s3 + $0x2f8] sm:$0xff]  ;;  %v4384_v30 = vld [vmem:[%s10128_s3 + $0x768] sm:$0xff]  ;;  %v5462_v11 = vpack.c.bf16 %v4381_v58, %v4379_v63  ;;  %v4385_v63 = vld [vmem:[%s10128_s3 + $0x770] sm:$0xff] }
 0x280   :  { %1993 = vmatprep.mubr.f32.mxu0 %v10161_v29  ;;  %v4241_v40 = vld [vmem:[%s10128_s3 + $0x2f0] sm:$0xff]  ;;  %v5320_v33 = vpack.c.bf16 %v4242_v13, %v4240_v12  ;;  %v5464_v15 = vpack.c.bf16 %v4386_v7, %v4384_v30  ;;  %v4244_v58 = vld [vmem:[%s10128_s3 + $0x308] sm:$0xff]  ;;  %v5466_v30 = vpack.c.bf16 %v4385_v63, %v4383_v53 }
 0x281   :  { %v5322_v13 = vpack.c.bf16 %v4241_v40, %v4239_v47  ;;  %v5324_v7 = vpack.c.bf16 %v4246_v16, %v4244_v58  ;;  %v4389_v47 = vld [vmem:[%s10128_s3 + $0x790] sm:$0xff]  ;;  %v4394_v40 = vld [vmem:[%s10128_s3 + $0x7b8] sm:$0xff]  ;;  %v4247_v58 = vld [vmem:[%s10128_s3 + $0x320] sm:$0xff] }
 0x282   :  { %5315 = vmatpush1.bf16.msra.mxu1 %v5314_v10  ;;  %5459 = vmatpush1.bf16.msra.mxu0 %v5458_v24  ;;  %v7917_v38 = vpop.f32.mrb[182].mxu1  ;;  %v4245_v10 = vld [vmem:[%s10128_s3 + $0x310] sm:$0xff] }
 0x283   :  { %5317 = vmatprep.subr.bf16.mxu1 %v5316_v3  ;;  %5461 = vmatprep.subr.bf16.mxu0 %v5460_v27  ;;  %v1035_v24 = vpop.f32.mrb[183].mxu1  ;;  %v4388_v3 = vld [vmem:[%s10128_s3 + $0x788] sm:$0xff]  ;;  %v4390_v27 = vld [vmem:[%s10128_s3 + $0x798] sm:$0xff] }
 0x284   :  { %v4243_v24 = vld [vmem:[%s10128_s3 + $0x300] sm:$0xff]  ;;  %v5468_v16 = vpack.c.bf16 %v4390_v27, %v4388_v3  ;;  %v4249_v3 = vld [vmem:[%s10128_s3 + $0x330] sm:$0xff]  ;;  %v1136_v27 = vmax.f32 %v1111_v42, 0.0  ;;  %v4252_v42 = vld [vmem:[%s10128_s3 + $0x348] sm:$0xff] }
 0x286   :  { %5319 = vmatpush1.bf16.msra.mxu1 %v5318_v59  ;;  %5463 = vmatpush1.bf16.msra.mxu0 %v5462_v11  ;;  %v7945_v12 = vpop.f32.mrb[184].mxu1  ;;  %v4387_v11 = vld [vmem:[%s10128_s3 + $0x780] sm:$0xff]  ;;  %v5472_v59 = vpack.c.bf16 %v4394_v40, %v4392_v20  ;;  %v4253_v40 = vld [vmem:[%s10128_s3 + $0x350] sm:$0xff] }
 0x287   :  { %5321 = vmatprep.subr.bf16.mxu1 %v5320_v33  ;;  %5465 = vmatprep.subr.bf16.mxu0 %v5464_v15  ;;  %v1040_v53 = vpop.f32.mrb[185].mxu1  ;;  %v5326_v15 = vpack.c.bf16 %v4245_v10, %v4243_v24  ;;  %v5470_v63 = vpack.c.bf16 %v4389_v47, %v4387_v11  ;;  %v4391_v10 = vld [vmem:[%s10128_s3 + $0x7a0] sm:$0xff]  ;;  %v4393_v24 = vld [vmem:[%s10128_s3 + $0x7b0] sm:$0xff]  ;;  %v4398_v11 = vld [vmem:[%s10128_s3 + $0x7d8] sm:$0xff] }
 0x288   :  { %v4251_v20 = vld [vmem:[%s10128_s3 + $0x340] sm:$0xff]  ;;  %v4262_v53 = vld [vmem:[%s10128_s3 + $0x398] sm:$0xff] }
 0x28a   :  { %5323 = vmatpush1.bf16.msra.mxu1 %v5322_v13  ;;  %5467 = vmatpush1.bf16.msra.mxu0 %v5466_v30  ;;  %v7977_v33 = vpop.f32.mrb[186].mxu1  ;;  %v5328_v30 = vpack.c.bf16 %v4250_v60, %v4248_v8  ;;  %v5330_v8 = vpack.c.bf16 %v4249_v3, %v4247_v58  ;;  %v5474_v60 = vpack.c.bf16 %v4393_v24, %v4391_v10  ;;  %v4395_v58 = vld [vmem:[%s10128_s3 + $0x7c0] sm:$0xff]  ;;  %v4397_v3 = vld [vmem:[%s10128_s3 + $0x7d0] sm:$0xff]  ;;  %v4256_v10 = vld [vmem:[%s10128_s3 + $0x368] sm:$0xff] }
 0x28b   :  { %5325 = vmatprep.subr.bf16.mxu1 %v5324_v7  ;;  %5469 = vmatprep.subr.bf16.mxu0 %v5468_v16  ;;  %v1045_v13 = vpop.f32.mrb[187].mxu1  ;;  %v4254_v7 = vld [vmem:[%s10128_s3 + $0x358] sm:$0xff]  ;;  %v4396_v16 = vld [vmem:[%s10128_s3 + $0x7c8] sm:$0xff] }
 0x28c   :  { %v4402_v24 = vld [vmem:[%s10128_s3 + $0x7f8] sm:$0xff]  ;;  %v4399_v13 = vld [vmem:[%s10128_s3 + $0x7e0] sm:$0xff] }
 0x28d   :  { %1464 = vmatmul.mubr.f32.vlgmr.msra.gmra.mrb[200].mxu1 %v1136_v27 }
 0x28e   :  { %5327 = vmatpush1.bf16.msra.mxu1 %v5326_v15  ;;  %5471 = vmatpush1.bf16.msra.mxu0 %v5470_v63  ;;  %v8005_v47 = vpop.f32.mrb[188].mxu1  ;;  %v5332_v15 = vpack.c.bf16 %v4254_v7, %v4252_v42  ;;  %v5476_v63 = vpack.c.bf16 %v4398_v11, %v4396_v16  ;;  %v5334_v7 = vpack.c.bf16 %v4253_v40, %v4251_v20  ;;  %v4255_v11 = vld [vmem:[%s10128_s3 + $0x360] sm:$0xff] }
 0x28f   :  { %5329 = vmatprep.subr.bf16.mxu1 %v5328_v30  ;;  %5473 = vmatprep.subr.bf16.mxu0 %v5472_v59  ;;  %v1050_v27 = vpop.f32.mrb[189].mxu1  ;;  %v4258_v30 = vld [vmem:[%s10128_s3 + $0x378] sm:$0xff]  ;;  %v4400_v59 = vld [vmem:[%s10128_s3 + $0x7e8] sm:$0xff]  ;;  %v5478_v16 = vpack.c.bf16 %v4397_v3, %v4395_v58  ;;  %v4401_v58 = vld [vmem:[%s10128_s3 + $0x7f0] sm:$0xff] }
 0x290   :  { %1569 = vmatprep.mubr.f32.mxu1 %v10161_v29  ;;  %v4257_v27 = vld [vmem:[%s10128_s3 + $0x370] sm:$0xff]  ;;  %v5336_v20 = vpack.c.bf16 %v4258_v30, %v4256_v10  ;;  %v5480_v40 = vpack.c.bf16 %v4402_v24, %v4400_v59  ;;  %v4260_v3 = vld [vmem:[%s10128_s3 + $0x388] sm:$0xff]  ;;  %v5482_v59 = vpack.c.bf16 %v4401_v58, %v4399_v13 }
 0x291   :  { %v5338_v30 = vpack.c.bf16 %v4257_v27, %v4255_v11  ;;  %v5340_v24 = vpack.c.bf16 %v4262_v53, %v4260_v3  ;;  %v4405_v11 = vld [vmem:[%s10128_s3 + $0x810] sm:$0xff]  ;;  %v4410_v27 = vld [vmem:[%s10128_s3 + $0x838] sm:$0xff]  ;;  %v4263_v3 = vld [vmem:[%s10128_s3 + $0x3a0] sm:$0xff] }
 0x292   :  { %5331 = vmatpush1.bf16.msra.mxu1 %v5330_v8  ;;  %5475 = vmatpush1.bf16.msra.mxu0 %v5474_v60  ;;  %v8034_v42 = vpop.f32.mrb[190].mxu1  ;;  %v4261_v8 = vld [vmem:[%s10128_s3 + $0x390] sm:$0xff] }
 0x293   :  { %5333 = vmatprep.subr.bf16.mxu1 %v5332_v15  ;;  %5477 = vmatprep.subr.bf16.mxu0 %v5476_v63  ;;  %v1055_v60 = vpop.f32.mrb[191].mxu1  ;;  %v4404_v15 = vld [vmem:[%s10128_s3 + $0x808] sm:$0xff]  ;;  %v4406_v63 = vld [vmem:[%s10128_s3 + $0x818] sm:$0xff] }
 0x294   :  { %v4259_v60 = vld [vmem:[%s10128_s3 + $0x380] sm:$0xff]  ;;  %v5484_v53 = vpack.c.bf16 %v4406_v63, %v4404_v15  ;;  %v4265_v15 = vld [vmem:[%s10128_s3 + $0x3b0] sm:$0xff]  ;;  %v1141_v63 = vmax.f32 %v1116_v44, 0.0  ;;  %v4268_v44 = vld [vmem:[%s10128_s3 + $0x3c8] sm:$0xff] }
 0x296   :  { %5335 = vmatpush1.bf16.msra.mxu1 %v5334_v7  ;;  %5479 = vmatpush1.bf16.msra.mxu0 %v5478_v16  ;;  %v8062_v10 = vpop.f32.mrb[192].mxu1  ;;  %v4403_v16 = vld [vmem:[%s10128_s3 + $0x800] sm:$0xff]  ;;  %v5488_v7 = vpack.c.bf16 %v4410_v27, %v4408_v48  ;;  %v4269_v27 = vld [vmem:[%s10128_s3 + $0x3d0] sm:$0xff] }
 0x297   :  { %5337 = vmatprep.subr.bf16.mxu1 %v5336_v20  ;;  %5481 = vmatprep.subr.bf16.mxu0 %v5480_v40  ;;  %v1060_v13 = vpop.f32.mrb[193].mxu1  ;;  %v5342_v40 = vpack.c.bf16 %v4261_v8, %v4259_v60  ;;  %v5486_v58 = vpack.c.bf16 %v4405_v11, %v4403_v16  ;;  %v4407_v8 = vld [vmem:[%s10128_s3 + $0x820] sm:$0xff]  ;;  %v4409_v60 = vld [vmem:[%s10128_s3 + $0x830] sm:$0xff]  ;;  %v4414_v16 = vld [vmem:[%s10128_s3 + $0x858] sm:$0xff] }
 0x298   :  { %v4267_v48 = vld [vmem:[%s10128_s3 + $0x3c0] sm:$0xff] }
 0x29a   :  { %5339 = vmatpush1.bf16.msra.mxu1 %v5338_v30  ;;  %5483 = vmatpush1.bf16.msra.mxu0 %v5482_v59  ;;  %v8094_v20 = vpop.f32.mrb[194].mxu1  ;;  %v5344_v59 = vpack.c.bf16 %v4266_v0, %v4264_v22  ;;  %v5346_v22 = vpack.c.bf16 %v4265_v15, %v4263_v3  ;;  %v5490_v0 = vpack.c.bf16 %v4409_v60, %v4407_v8  ;;  %v4411_v3 = vld [vmem:[%s10128_s3 + $0x840] sm:$0xff]  ;;  %v4413_v15 = vld [vmem:[%s10128_s3 + $0x850] sm:$0xff]  ;;  %v4272_v8 = vld [vmem:[%s10128_s3 + $0x3e8] sm:$0xff] }
 0x29b   :  { %5341 = vmatprep.subr.bf16.mxu1 %v5340_v24  ;;  %5485 = vmatprep.subr.bf16.mxu0 %v5484_v53  ;;  %v1065_v30 = vpop.f32.mrb[195].mxu1  ;;  %v4270_v24 = vld [vmem:[%s10128_s3 + $0x3d8] sm:$0xff]  ;;  %v4412_v53 = vld [vmem:[%s10128_s3 + $0x848] sm:$0xff] }
 0x29c   :  { %v4418_v60 = vld [vmem:[%s10128_s3 + $0x878] sm:$0xff] }
 0x29d   :  { %1994 = vmatmul.mubr.f32.vlgmr.msra.gmra.mrb[0].mxu0 %v1141_v63 }
 0x29e   :  { %5343 = vmatpush1.bf16.msra.mxu1 %v5342_v40  ;;  %5487 = vmatpush1.bf16.msra.mxu0 %v5486_v58  ;;  %v8122_v11 = vpop.f32.mrb[196].mxu1  ;;  %v5348_v40 = vpack.c.bf16 %v4270_v24, %v4268_v44  ;;  %v5492_v58 = vpack.c.bf16 %v4414_v16, %v4412_v53  ;;  %v5350_v24 = vpack.c.bf16 %v4269_v27, %v4267_v48  ;;  %v4271_v16 = vld [vmem:[%s10128_s3 + $0x3e0] sm:$0xff]  ;;  %v4417_v48 = vld [vmem:[%s10128_s3 + $0x870] sm:$0xff]  ;;  %v4276_v27 = vld [vmem:[%s10128_s3 + $0x408] sm:$0xff] }
 0x29f   :  { %5345 = vmatprep.subr.bf16.mxu1 %v5344_v59  ;;  %5489 = vmatprep.subr.bf16.mxu0 %v5488_v7  ;;  %v1070_v63 = vpop.f32.mrb[197].mxu1  ;;  %v4274_v59 = vld [vmem:[%s10128_s3 + $0x3f8] sm:$0xff]  ;;  %v4416_v7 = vld [vmem:[%s10128_s3 + $0x868] sm:$0xff]  ;;  %v5494_v53 = vpack.c.bf16 %v4413_v15, %v4411_v3 }
 0x2a0   :  { %2099 = vmatprep.mubr.f32.mxu0 %v10161_v29  ;;  %v4273_v63 = vld [vmem:[%s10128_s3 + $0x3f0] sm:$0xff]  ;;  %v5352_v13 = vpack.c.bf16 %v4274_v59, %v4272_v8  ;;  %v4422_v15 = vld [vmem:[%s10128_s3 + $0x898] sm:$0xff] }
 0x2a1   :  { %v5354_v8 = vpack.c.bf16 %v4273_v63, %v4271_v16  ;;  %v4421_v16 = vld [vmem:[%s10128_s3 + $0x890] sm:$0xff]  ;;  %v4280_v63 = vld [vmem:[%s10128_s3 + $0x428] sm:$0xff] }
 0x2a2   :  { %5347 = vmatpush1.bf16.msra.mxu1 %v5346_v22  ;;  %5491 = vmatpush1.bf16.msra.mxu0 %v5490_v0  ;;  %v8151_v44 = vpop.f32.mrb[198].mxu1  ;;  %v5496_v22 = vpack.c.bf16 %v4418_v60, %v4416_v7  ;;  %v4415_v0 = vld [vmem:[%s10128_s3 + $0x860] sm:$0xff]  ;;  %v4277_v60 = vld [vmem:[%s10128_s3 + $0x410] sm:$0xff] }
 0x2a3   :  { %5349 = vmatprep.subr.bf16.mxu1 %v5348_v40  ;;  %5493 = vmatprep.subr.bf16.mxu0 %v5492_v58  ;;  %v1075_v3 = vpop.f32.mrb[199].mxu1  ;;  %v4278_v40 = vld [vmem:[%s10128_s3 + $0x418] sm:$0xff]  ;;  %v4420_v58 = vld [vmem:[%s10128_s3 + $0x888] sm:$0xff]  ;;  %v5498_v59 = vpack.c.bf16 %v4417_v48, %v4415_v0  ;;  %v4275_v7 = vld [vmem:[%s10128_s3 + $0x400] sm:$0xff] }
 0x2a4   :  { %v1112_v3 = vadd.f32 %v7542_v19, %v1080_v2  ;;  %v5356_v30 = vpack.c.bf16 %v4278_v40, %v4276_v27  ;;  %v4426_v2 = vld [vmem:[%s10128_s3 + $0x8b8] sm:$0xff]  ;;  %v4279_v0 = vld [vmem:[%s10128_s3 + $0x420] sm:$0xff]  ;;  %v4281_v48 = vld [vmem:[%s10128_s3 + $0x430] sm:$0xff]  ;;  %v5360_v40 = vpack.c.bf16 %v4282_v6, %v4280_v63 }
 0x2a6   :  { %5351 = vmatpush1.bf16.msra.mxu1 %v5350_v24  ;;  %5495 = vmatpush1.bf16.msra.mxu0 %v5494_v53  ;;  %v5500_v24 = vpack.c.bf16 %v4422_v15, %v4420_v58  ;;  %v4419_v53 = vld [vmem:[%s10128_s3 + $0x880] sm:$0xff]  ;;  %v1137_v27 = vmax.f32 %v1112_v3, 0.0  ;;  %v5504_v58 = vpack.c.bf16 %v4426_v2, %v4424_v46  ;;  %v5362_v3 = vpack.c.bf16 %v4281_v48, %v4279_v0  ;;  %v4429_v2 = vld [vmem:[%s10128_s3 + $0x8d0] sm:$0xff]  ;;  %v4432_v0 = vld [vmem:[%s10128_s3 + $0x8e8] sm:$0xff] }
 0x2a7   :  { %5353 = vmatprep.subr.bf16.mxu1 %v5352_v13  ;;  %5497 = vmatprep.subr.bf16.mxu0 %v5496_v22  ;;  %v5358_v13 = vpack.c.bf16 %v4277_v60, %v4275_v7  ;;  %v5502_v22 = vpack.c.bf16 %v4421_v16, %v4419_v53  ;;  %v4423_v15 = vld [vmem:[%s10128_s3 + $0x8a0] sm:$0xff]  ;;  %v4286_v7 = vld [vmem:[%s10128_s3 + $0x458] sm:$0xff]  ;;  %v4285_v16 = vld [vmem:[%s10128_s3 + $0x450] sm:$0xff] }
 0x2a8   :  { %v4430_v60 = vld [vmem:[%s10128_s3 + $0x8d8] sm:$0xff]  ;;  %v4283_v53 = vld [vmem:[%s10128_s3 + $0x440] sm:$0xff] }
 0x2a9   :  { %v4427_v46 = vld [vmem:[%s10128_s3 + $0x8c0] sm:$0xff]  ;;  %v4434_v48 = vld [vmem:[%s10128_s3 + $0x8f8] sm:$0xff] }
 0x2aa   :  { %5355 = vmatpush1.bf16.msra.mxu1 %v5354_v8  ;;  %5499 = vmatpush1.bf16.msra.mxu0 %v5498_v59  ;;  %v4425_v8 = vld [vmem:[%s10128_s3 + $0x8b0] sm:$0xff]  ;;  %v4284_v59 = vld [vmem:[%s10128_s3 + $0x448] sm:$0xff] }
 0x2ab   :  { %5357 = vmatprep.subr.bf16.mxu1 %v5356_v30  ;;  %5501 = vmatprep.subr.bf16.mxu0 %v5500_v24  ;;  %v4428_v30 = vld [vmem:[%s10128_s3 + $0x8c8] sm:$0xff]  ;;  %v5506_v24 = vpack.c.bf16 %v4425_v8, %v4423_v15  ;;  %v5364_v63 = vpack.c.bf16 %v4286_v7, %v4284_v59  ;;  %v4289_v15 = vld [vmem:[%s10128_s3 + $0x470] sm:$0xff]  ;;  %v5512_v59 = vpack.c.bf16 %v4434_v48, %v4432_v0  ;;  %v4431_v7 = vld [vmem:[%s10128_s3 + $0x8e0] sm:$0xff] }
 0x2ac   :  { %v5508_v6 = vpack.c.bf16 %v4430_v60, %v4428_v30  ;;  %v4433_v30 = vld [vmem:[%s10128_s3 + $0x8f0] sm:$0xff]  ;;  %v4292_v60 = vld [vmem:[%s10128_s3 + $0x488] sm:$0xff]  ;;  %v4435_v0 = vld [vmem:[%s10128_s3 + $0x900] sm:$0xff] }
 0x2ad   :  { %1570 = vmatmul.mubr.f32.vlgmr.msra.gmra.mrb[200].mxu1 %v1137_v27  ;;  %v5366_v27 = vpack.c.bf16 %v4285_v16, %v4283_v53  ;;  %v4438_v53 = vld [vmem:[%s10128_s3 + $0x918] sm:$0xff]  ;;  %v4437_v48 = vld [vmem:[%s10128_s3 + $0x910] sm:$0xff] }
 0x2ae   :  { %5359 = vmatpush1.bf16.msra.mxu1 %v5358_v13  ;;  %5503 = vmatpush1.bf16.msra.mxu0 %v5502_v22  ;;  %v4288_v13 = vld [vmem:[%s10128_s3 + $0x468] sm:$0xff]  ;;  %v4290_v22 = vld [vmem:[%s10128_s3 + $0x478] sm:$0xff] }
 0x2af   :  { %5361 = vmatprep.subr.bf16.mxu1 %v5360_v40  ;;  %5505 = vmatprep.subr.bf16.mxu0 %v5504_v58  ;;  %v5510_v40 = vpack.c.bf16 %v4429_v2, %v4427_v46  ;;  %v4287_v58 = vld [vmem:[%s10128_s3 + $0x460] sm:$0xff]  ;;  %v5368_v8 = vpack.c.bf16 %v4290_v22, %v4288_v13  ;;  %v4293_v46 = vld [vmem:[%s10128_s3 + $0x490] sm:$0xff]  ;;  %v1117_v2 = vadd.f32 %v7542_v19, %v1085_v21  ;;  %v4440_v19 = vld [vmem:[%s10128_s3 + $0x928] sm:$0xff] }
 0x2b0   :  { %1675 = vmatprep.mubr.f32.mxu1 %v10161_v29  ;;  %v5370_v16 = vpack.c.bf16 %v4289_v15, %v4287_v58  ;;  %v4295_v58 = vld [vmem:[%s10128_s3 + $0x4a0] sm:$0xff]  ;;  %v4297_v15 = vld [vmem:[%s10128_s3 + $0x4b0] sm:$0xff] }
 0x2b2   :  { %5363 = vmatpush1.bf16.msra.mxu1 %v5362_v3  ;;  %5507 = vmatpush1.bf16.msra.mxu0 %v5506_v24  ;;  %v4294_v3 = vld [vmem:[%s10128_s3 + $0x498] sm:$0xff]  ;;  %v4436_v24 = vld [vmem:[%s10128_s3 + $0x908] sm:$0xff] }
 0x2b3   :  { %5365 = vmatprep.subr.bf16.mxu1 %v5364_v63  ;;  %5509 = vmatprep.subr.bf16.mxu0 %v5508_v6  ;;  %v5514_v63 = vpack.c.bf16 %v4433_v30, %v4431_v7  ;;  %v4291_v6 = vld [vmem:[%s10128_s3 + $0x480] sm:$0xff]  ;;  %v5372_v13 = vpack.c.bf16 %v4294_v3, %v4292_v60  ;;  %v5516_v22 = vpack.c.bf16 %v4438_v53, %v4436_v24  ;;  %v4441_v60 = vld [vmem:[%s10128_s3 + $0x930] sm:$0xff]  ;;  %v4300_v3 = vld [vmem:[%s10128_s3 + $0x4c8] sm:$0xff] }
 0x2b4   :  { %v5374_v21 = vpack.c.bf16 %v4293_v46, %v4291_v6  ;;  %v5520_v7 = vpack.c.bf16 %v4442_v4, %v4440_v19  ;;  %v4439_v30 = vld [vmem:[%s10128_s3 + $0x920] sm:$0xff]  ;;  %v4302_v24 = vld [vmem:[%s10128_s3 + $0x4d8] sm:$0xff]  ;;  %v4444_v53 = vld [vmem:[%s10128_s3 + $0x948] sm:$0xff] }
 0x2b5   :  { %v5522_v6 = vpack.c.bf16 %v4441_v60, %v4439_v30  ;;  %v4299_v46 = vld [vmem:[%s10128_s3 + $0x4c0] sm:$0xff]  ;;  %v4448_v19 = vld [vmem:[%s10128_s3 + $0x968] sm:$0xff]  ;;  %v4450_v4 = vld [vmem:[%s10128_s3 + $0x978] sm:$0xff] }
 0x2b6   :  { %5367 = vmatpush1.bf16.msra.mxu1 %v5366_v27  ;;  %5511 = vmatpush1.bf16.msra.mxu0 %v5510_v40  ;;  %v4296_v27 = vld [vmem:[%s10128_s3 + $0x4a8] sm:$0xff]  ;;  %v5518_v40 = vpack.c.bf16 %v4437_v48, %v4435_v0  ;;  %v4443_v0 = vld [vmem:[%s10128_s3 + $0x940] sm:$0xff]  ;;  %v4445_v48 = vld [vmem:[%s10128_s3 + $0x950] sm:$0xff] }
 0x2b7   :  { %5369 = vmatprep.subr.bf16.mxu1 %v5368_v8  ;;  %5513 = vmatprep.subr.bf16.mxu0 %v5512_v59  ;;  %v1142_v8 = vmax.f32 %v1117_v2, 0.0  ;;  %v5376_v59 = vpack.c.bf16 %v4298_v28, %v4296_v27  ;;  %v4301_v2 = vld [vmem:[%s10128_s3 + $0x4d0] sm:$0xff]  ;;  %v4304_v27 = vld [vmem:[%s10128_s3 + $0x4e8] sm:$0xff]  ;;  %v4306_v28 = vld [vmem:[%s10128_s3 + $0x4f8] sm:$0xff] }
 0x2b8   :  { %v4449_v30 = vld [vmem:[%s10128_s3 + $0x970] sm:$0xff]  ;;  %v4452_v60 = vld [vmem:[%s10128_s3 + $0x988] sm:$0xff] }
 0x2ba   :  { %5371 = vmatpush1.bf16.msra.mxu1 %v5370_v16  ;;  %5515 = vmatpush1.bf16.msra.mxu0 %v5514_v63  ;;  %v4446_v16 = vld [vmem:[%s10128_s3 + $0x958] sm:$0xff]  ;;  %v5378_v63 = vpack.c.bf16 %v4297_v15, %v4295_v58  ;;  %v4303_v58 = vld [vmem:[%s10128_s3 + $0x4e0] sm:$0xff]  ;;  %v5384_v15 = vpack.c.bf16 %v4306_v28, %v4304_v27  ;;  %v4460_v27 = vld [vmem:[%s10128_s3 + $0x9c8] sm:$0xff] }
 0x2bb   :  { %5373 = vmatprep.subr.bf16.mxu1 %v5372_v13  ;;  %5517 = vmatprep.subr.bf16.mxu0 %v5516_v22  ;;  %v5380_v13 = vpack.c.bf16 %v4302_v24, %v4300_v3  ;;  %v5524_v22 = vpack.c.bf16 %v4446_v16, %v4444_v53  ;;  %v4454_v3 = vld [vmem:[%s10128_s3 + $0x998] sm:$0xff]  ;;  %v8378_v16 = vld [vmem:[%s10129_s2] ss:$0 sm:$0xff] }
 0x2bc   :  { %v4462_v28 = vld [vmem:[%s10128_s3 + $0x9d8] sm:$0xff] }
 0x2bd   :  { %2100 = vmatmul.mubr.f32.vlgmr.msra.gmra.mrb[0].mxu0 %v1142_v8  ;;  %v5528_v8 = vpack.c.bf16 %v4450_v4, %v4448_v19  ;;  %v5540_v4 = vpack.c.bf16 %v4462_v28, %v4460_v27  ;;  %v4475_v27 = vld [vmem:[%s10128_s3 + $0xa40] sm:$0xff]  ;;  %v4477_v28 = vld [vmem:[%s10128_s3 + $0xa50] sm:$0xff] }
 0x2be   :  { %5375 = vmatpush1.bf16.msra.mxu1 %v5374_v21  ;;  %5519 = vmatpush1.bf16.msra.mxu0 %v5518_v40  ;;  %v5382_v21 = vpack.c.bf16 %v4301_v2, %v4299_v46  ;;  %v5526_v40 = vpack.c.bf16 %v4445_v48, %v4443_v0  ;;  %v4451_v46 = vld [vmem:[%s10128_s3 + $0x980] sm:$0xff]  ;;  %v4453_v2 = vld [vmem:[%s10128_s3 + $0x990] sm:$0xff] }
 0x2bf   :  { %5377 = vmatprep.subr.bf16.mxu1 %v5376_v59  ;;  %5521 = vmatprep.subr.bf16.mxu0 %v5520_v7  ;;  %v4305_v59 = vld [vmem:[%s10128_s3 + $0x4f0] sm:$0xff]  ;;  %v4447_v7 = vld [vmem:[%s10128_s3 + $0x960] sm:$0xff]  ;;  %v5534_v18 = vpack.c.bf16 %v4453_v2, %v4451_v46  ;;  %v4472_v2 = vld [vmem:[%s10128_s3 + $0xa28] sm:$0xff] }
 0x2c0   :  { %2205 = vmatprep.mubr.f32.mxu0 %v10161_v29  ;;  %v5386_v24 = vpack.c.bf16 %v4305_v59, %v4303_v58  ;;  %v5530_v53 = vpack.c.bf16 %v4449_v30, %v4447_v7  ;;  %v4455_v0 = vld [vmem:[%s10128_s3 + $0x9a0] sm:$0xff]  ;;  %v4457_v48 = vld [vmem:[%s10128_s3 + $0x9b0] sm:$0xff]  ;;  %v4464_v58 = vld [vmem:[%s10128_s3 + $0x9e8] sm:$0xff] }
 0x2c1   :  { %v5538_v19 = vpack.c.bf16 %v4457_v48, %v4455_v0  ;;  %v4463_v7 = vld [vmem:[%s10128_s3 + $0x9e0] sm:$0xff]  ;;  %v4465_v30 = vld [vmem:[%s10128_s3 + $0x9f0] sm:$0xff] }
 0x2c2   :  { %5379 = vmatpush1.bf16.msra.mxu1 %v5378_v63  ;;  %5523 = vmatpush1.bf16.msra.mxu0 %v5522_v6  ;;  %v1113_v63 = vadd.f32 %v8378_v16, %v1081_v9  ;;  %v5532_v6 = vpack.c.bf16 %v4454_v3, %v4452_v60  ;;  %v4468_v60 = vld [vmem:[%s10128_s3 + $0xa08] sm:$0xff]  ;;  %v4470_v3 = vld [vmem:[%s10128_s3 + $0xa18] sm:$0xff]  ;;  %v4469_v46 = vld [vmem:[%s10128_s3 + $0xa10] sm:$0xff] }
 0x2c3   :  { %5381 = vmatprep.subr.bf16.mxu1 %v5380_v13  ;;  %5525 = vmatprep.subr.bf16.mxu0 %v5524_v22  ;;  %v4456_v13 = vld [vmem:[%s10128_s3 + $0x9a8] sm:$0xff] }
 0x2c4   :  { %v1138_v9 = vmax.f32 %v1113_v63, 0.0  ;;  %v5536_v22 = vpack.c.bf16 %v4458_v49, %v4456_v13  ;;  %v5548_v63 = vpack.c.bf16 %v4470_v3, %v4468_v60  ;;  %v5552_v13 = vpack.c.bf16 %v4474_v39, %v4472_v2  ;;  %v4471_v49 = vld [vmem:[%s10128_s3 + $0xa20] sm:$0xff]  ;;  %v4485_v3 = vld [vmem:[%s10128_s3 + $0xa90] sm:$0xff]  ;;  %v4492_v39 = vld [vmem:[%s10128_s3 + $0xac8] sm:$0xff] }
 0x2c5   :  { %v4483_v60 = vld [vmem:[%s10128_s3 + $0xa80] sm:$0xff]  ;;  %v4489_v2 = vld [vmem:[%s10128_s3 + $0xab0] sm:$0xff] }
 0x2c6   :  { %5383 = vmatpush1.bf16.msra.mxu1 %v5382_v21  ;;  %5527 = vmatpush1.bf16.msra.mxu0 %v5526_v40  ;;  %v4459_v21 = vld [vmem:[%s10128_s3 + $0x9c0] sm:$0xff]  ;;  %v4461_v40 = vld [vmem:[%s10128_s3 + $0x9d0] sm:$0xff] }
 0x2c7   :  { %5385 = vmatprep.subr.bf16.mxu1 %v5384_v15  ;;  %5529 = vmatprep.subr.bf16.mxu0 %v5528_v8  ;;  %v4466_v15 = vld [vmem:[%s10128_s3 + $0x9f8] sm:$0xff]  ;;  %v5542_v8 = vpack.c.bf16 %v4461_v40, %v4459_v21  ;;  %v5558_v21 = vpack.c.bf16 %v4477_v28, %v4475_v27  ;;  %v4495_v27 = vld [vmem:[%s10128_s3 + $0xae0] sm:$0xff]  ;;  %v4497_v28 = vld [vmem:[%s10128_s3 + $0xaf0] sm:$0xff] }
 0x2c8   :  { %v5544_v59 = vpack.c.bf16 %v4466_v15, %v4464_v58  ;;  %v4479_v58 = vld [vmem:[%s10128_s3 + $0xa60] sm:$0xff]  ;;  %v4481_v15 = vld [vmem:[%s10128_s3 + $0xa70] sm:$0xff] }
 0x2ca   :  { %5387 = vmatpush1.bf16.msra.mxu1 %v5386_v24  ;;  %5531 = vmatpush1.bf16.msra.mxu0 %v5530_v53  ;;  %v5546_v24 = vpack.c.bf16 %v4465_v30, %v4463_v7  ;;  %v1118_v53 = vadd.f32 %v8378_v16, %v1086_v54  ;;  %v5562_v7 = vpack.c.bf16 %v4481_v15, %v4479_v58  ;;  %v4499_v15 = vld [vmem:[%s10128_s3 + $0xb00] sm:$0xff] }
 0x2cb   :  { %5533 = vmatprep.subr.bf16.mxu0 %v5532_v6  ;;  %v4467_v6 = vld [vmem:[%s10128_s3 + $0xa00] sm:$0xff] }
 0x2cc   :  { %v5550_v31 = vpack.c.bf16 %v4469_v46, %v4467_v6  ;;  %v1143_v54 = vmax.f32 %v1118_v53, 0.0  ;;  %v4490_v53 = vld [vmem:[%s10128_s3 + $0xab8] sm:$0xff]  ;;  %v4487_v46 = vld [vmem:[%s10128_s3 + $0xaa0] sm:$0xff] }
 0x2cd   :  { %1676 = vmatmul.mubr.f32.vlgmr.msra.gmra.mrb[200].mxu1 %v1138_v9  ;;  %v4476_v9 = vld [vmem:[%s10128_s3 + $0xa48] sm:$0xff] }
 0x2ce   :  { %5535 = vmatpush1.bf16.msra.mxu0 %v5534_v18  ;;  %v4473_v18 = vld [vmem:[%s10128_s3 + $0xa30] sm:$0xff] }
 0x2cf   :  { %5537 = vmatprep.subr.bf16.mxu0 %v5536_v22  ;;  %v4478_v22 = vld [vmem:[%s10128_s3 + $0xa58] sm:$0xff]  ;;  %v5554_v0 = vpack.c.bf16 %v4473_v18, %v4471_v49  ;;  %v4491_v49 = vld [vmem:[%s10128_s3 + $0xac0] sm:$0xff]  ;;  %v4493_v18 = vld [vmem:[%s10128_s3 + $0xad0] sm:$0xff] }
 0x2d0   :  { %v5556_v48 = vpack.c.bf16 %v4478_v22, %v4476_v9  ;;  %v4496_v9 = vld [vmem:[%s10128_s3 + $0xae8] sm:$0xff]  ;;  %v4498_v22 = vld [vmem:[%s10128_s3 + $0xaf8] sm:$0xff] }
 0x2d2   :  { %5539 = vmatpush1.bf16.msra.mxu0 %v5538_v19  ;;  %v4480_v19 = vld [vmem:[%s10128_s3 + $0xa68] sm:$0xff] }
 0x2d3   :  { %5541 = vmatprep.subr.bf16.mxu0 %v5540_v4  ;;  %v4482_v4 = vld [vmem:[%s10128_s3 + $0xa78] sm:$0xff] }
 0x2d4   :  { %v5560_v40 = vpack.c.bf16 %v4482_v4, %v4480_v19  ;;  %v4500_v19 = vld [vmem:[%s10128_s3 + $0xb08] sm:$0xff]  ;;  %v4502_v4 = vld [vmem:[%s10128_s3 + $0xb18] sm:$0xff] }
 0x2d5   :  { %v5580_v58 = vpack.c.bf16 %v4502_v4, %v4500_v19  ;;  %v4522_v19 = vld [vmem:[%s10128_s3 + $0xbb8] sm:$0xff] }
 0x2d6   :  { %5543 = vmatpush1.bf16.msra.mxu0 %v5542_v8  ;;  %v4484_v8 = vld [vmem:[%s10128_s3 + $0xa88] sm:$0xff] }
 0x2d7   :  { %5545 = vmatprep.subr.bf16.mxu0 %v5544_v59  ;;  %v4486_v59 = vld [vmem:[%s10128_s3 + $0xa98] sm:$0xff] }
 0x2d8   :  { %v5564_v30 = vpack.c.bf16 %v4486_v59, %v4484_v8  ;;  %v4501_v8 = vld [vmem:[%s10128_s3 + $0xb10] sm:$0xff]  ;;  %v4504_v59 = vld [vmem:[%s10128_s3 + $0xb28] sm:$0xff] }
 0x2d9   :  { %v5582_v1 = vpack.c.bf16 %v4501_v8, %v4499_v15  ;;  %v4524_v15 = vld [vmem:[%s10128_s3 + $0xbc8] sm:$0xff]  ;;  %v4526_v8 = vld [vmem:[%s10128_s3 + $0xbd8] sm:$0xff] }
 0x2da   :  { %5547 = vmatpush1.bf16.msra.mxu0 %v5546_v24  ;;  %v4488_v24 = vld [vmem:[%s10128_s3 + $0xaa8] sm:$0xff] }
 0x2db   :  { %5549 = vmatprep.subr.bf16.mxu0 %v5548_v63  ;;  %v5566_v63 = vpack.c.bf16 %v4485_v3, %v4483_v60  ;;  %v5568_v6 = vpack.c.bf16 %v4490_v53, %v4488_v24  ;;  %v4505_v60 = vld [vmem:[%s10128_s3 + $0xb30] sm:$0xff]  ;;  %v4508_v3 = vld [vmem:[%s10128_s3 + $0xb48] sm:$0xff]  ;;  %v4510_v24 = vld [vmem:[%s10128_s3 + $0xb58] sm:$0xff] }
 0x2dd   :  { %2206 = vmatmul.mubr.f32.vlgmr.msra.gmra.mrb[0].mxu0 %v1143_v54  ;;  %v5570_v54 = vpack.c.bf16 %v4489_v2, %v4487_v46  ;;  %v4509_v46 = vld [vmem:[%s10128_s3 + $0xb50] sm:$0xff]  ;;  %v4512_v2 = vld [vmem:[%s10128_s3 + $0xb68] sm:$0xff] }
 0x2de   :  { %5551 = vmatpush1.bf16.msra.mxu0 %v5550_v31  ;;  %2311 = vmatprep.mubr.f32.mxu0 %v10161_v29  ;;  %v4494_v31 = vld [vmem:[%s10128_s3 + $0xad8] sm:$0xff] }
 0x2df   :  { %5553 = vmatprep.subr.bf16.mxu0 %v5552_v13  ;;  %v5572_v13 = vpack.c.bf16 %v4494_v31, %v4492_v39  ;;  %v4514_v39 = vld [vmem:[%s10128_s3 + $0xb78] sm:$0xff] }
 0x2e2   :  { %5555 = vmatpush1.bf16.msra.mxu0 %v5554_v0  ;;  %v5574_v0 = vpack.c.bf16 %v4493_v18, %v4491_v49  ;;  %v4513_v49 = vld [vmem:[%s10128_s3 + $0xb70] sm:$0xff]  ;;  %v4516_v18 = vld [vmem:[%s10128_s3 + $0xb88] sm:$0xff] }
 0x2e3   :  { %5557 = vmatprep.subr.bf16.mxu0 %v5556_v48  ;;  %v5576_v48 = vpack.c.bf16 %v4498_v22, %v4496_v9  ;;  %v4518_v9 = vld [vmem:[%s10128_s3 + $0xb98] sm:$0xff] }
 0x2e6   :  { %5559 = vmatpush1.bf16.msra.mxu0 %v5558_v21  ;;  %v5578_v21 = vpack.c.bf16 %v4497_v28, %v4495_v27  ;;  %v4517_v27 = vld [vmem:[%s10128_s3 + $0xb90] sm:$0xff]  ;;  %v4520_v28 = vld [vmem:[%s10128_s3 + $0xba8] sm:$0xff] }
 0x2e7   :  { %5561 = vmatprep.subr.bf16.mxu0 %v5560_v40  ;;  %v1119_v40 = vadd.f32 %v8378_v16, %v1087_v25 }
 0x2e9   :  { %v1144_v25 = vmax.f32 %v1119_v40, 0.0  ;;  %v4519_v40 = vld [vmem:[%s10128_s3 + $0xba0] sm:$0xff] }
 0x2ea   :  { %5563 = vmatpush1.bf16.msra.mxu0 %v5562_v7  ;;  %v5584_v7 = vpack.c.bf16 %v4506_v50, %v4504_v59  ;;  %v5604_v50 = vpack.c.bf16 %v4526_v8, %v4524_v15  ;;  %v4543_v15 = vld [vmem:[%s10128_s3 + $0xc60] sm:$0xff]  ;;  %v4545_v8 = vld [vmem:[%s10128_s3 + $0xc70] sm:$0xff] }
 0x2eb   :  { %5565 = vmatprep.subr.bf16.mxu0 %v5564_v30  ;;  %v4503_v30 = vld [vmem:[%s10128_s3 + $0xb20] sm:$0xff] }
 0x2ec   :  { %v5586_v53 = vpack.c.bf16 %v4505_v60, %v4503_v30  ;;  %v4530_v30 = vld [vmem:[%s10128_s3 + $0xbf8] sm:$0xff] }
 0x2ee   :  { %5567 = vmatpush1.bf16.msra.mxu0 %v5566_v63  ;;  %v5588_v63 = vpack.c.bf16 %v4510_v24, %v4508_v3  ;;  %v4527_v24 = vld [vmem:[%s10128_s3 + $0xbe0] sm:$0xff] }
 0x2ef   :  { %5569 = vmatprep.subr.bf16.mxu0 %v5568_v6  ;;  %v4507_v6 = vld [vmem:[%s10128_s3 + $0xb40] sm:$0xff] }
 0x2f0   :  { %v5590_v31 = vpack.c.bf16 %v4509_v46, %v4507_v6  ;;  %v4534_v6 = vld [vmem:[%s10128_s3 + $0xc18] sm:$0xff] }
 0x2f2   :  { %5571 = vmatpush1.bf16.msra.mxu0 %v5570_v54  ;;  %v5592_v54 = vpack.c.bf16 %v4514_v39, %v4512_v2  ;;  %v1120_v2 = vadd.f32 %v8378_v16, %v1088_v45 }
 0x2f3   :  { %5573 = vmatprep.subr.bf16.mxu0 %v5572_v13  ;;  %v4511_v13 = vld [vmem:[%s10128_s3 + $0xb60] sm:$0xff] }
 0x2f4   :  { %v5594_v22 = vpack.c.bf16 %v4513_v49, %v4511_v13  ;;  %v4536_v13 = vld [vmem:[%s10128_s3 + $0xc28] sm:$0xff]  ;;  %v1145_v45 = vmax.f32 %v1120_v2, 0.0  ;;  %v4558_v2 = vld [vmem:[%s10128_s3 + $0xcd8] sm:$0xff] }
 0x2f5   :  { %v5616_v49 = vpack.c.bf16 %v4538_v57, %v4536_v13  ;;  %v4557_v13 = vld [vmem:[%s10128_s3 + $0xcd0] sm:$0xff]  ;;  %v4560_v57 = vld [vmem:[%s10128_s3 + $0xce8] sm:$0xff] }
 0x2f6   :  { %5575 = vmatpush1.bf16.msra.mxu0 %v5574_v0  ;;  %v5596_v0 = vpack.c.bf16 %v4518_v9, %v4516_v18  ;;  %v4535_v18 = vld [vmem:[%s10128_s3 + $0xc20] sm:$0xff]  ;;  %v4537_v9 = vld [vmem:[%s10128_s3 + $0xc30] sm:$0xff] }
 0x2f7   :  { %5577 = vmatprep.subr.bf16.mxu0 %v5576_v48  ;;  %v4515_v48 = vld [vmem:[%s10128_s3 + $0xb80] sm:$0xff] }
 0x2f8   :  { %v5598_v4 = vpack.c.bf16 %v4517_v27, %v4515_v48  ;;  %v5618_v48 = vpack.c.bf16 %v4537_v9, %v4535_v18  ;;  %v4559_v18 = vld [vmem:[%s10128_s3 + $0xce0] sm:$0xff]  ;;  %v4561_v9 = vld [vmem:[%s10128_s3 + $0xcf0] sm:$0xff] }
 0x2fa   :  { %5579 = vmatpush1.bf16.msra.mxu0 %v5578_v21  ;;  %v5600_v21 = vpack.c.bf16 %v4522_v19, %v4520_v28  ;;  %v4539_v28 = vld [vmem:[%s10128_s3 + $0xc40] sm:$0xff]  ;;  %v4541_v19 = vld [vmem:[%s10128_s3 + $0xc50] sm:$0xff] }
 0x2fb   :  { %5581 = vmatprep.subr.bf16.mxu0 %v5580_v58  ;;  %v4521_v58 = vld [vmem:[%s10128_s3 + $0xbb0] sm:$0xff] }
 0x2fc   :  { %v5602_v59 = vpack.c.bf16 %v4521_v58, %v4519_v40  ;;  %v5622_v40 = vpack.c.bf16 %v4541_v19, %v4539_v28 }
 0x2fd   :  { %2312 = vmatmul.mubr.f32.vlgmr.msra.gmra.mrb[0].mxu0 %v1144_v25  ;;  %v4525_v25 = vld [vmem:[%s10128_s3 + $0xbd0] sm:$0xff] }
 0x2fe   :  { %5583 = vmatpush1.bf16.msra.mxu0 %v5582_v1  ;;  %2417 = vmatprep.mubr.f32.mxu0 %v10161_v29  ;;  %v4523_v1 = vld [vmem:[%s10128_s3 + $0xbc0] sm:$0xff] }
 0x2ff   :  { %5585 = vmatprep.subr.bf16.mxu0 %v5584_v7  ;;  %v4528_v7 = vld [vmem:[%s10128_s3 + $0xbe8] sm:$0xff]  ;;  %v5606_v60 = vpack.c.bf16 %v4525_v25, %v4523_v1  ;;  %v5626_v1 = vpack.c.bf16 %v4545_v8, %v4543_v15  ;;  %v4567_v8 = vld [vmem:[%s10128_s3 + $0xd20] sm:$0xff] }
 0x300   :  { %v5608_v3 = vpack.c.bf16 %v4530_v30, %v4528_v7  ;;  %v4547_v7 = vld [vmem:[%s10128_s3 + $0xc80] sm:$0xff]  ;;  %v4549_v30 = vld [vmem:[%s10128_s3 + $0xc90] sm:$0xff] }
 0x302   :  { %5587 = vmatpush1.bf16.msra.mxu0 %v5586_v53  ;;  %v4529_v53 = vld [vmem:[%s10128_s3 + $0xbf0] sm:$0xff] }
 0x303   :  { %5589 = vmatprep.subr.bf16.mxu0 %v5588_v63  ;;  %v4532_v63 = vld [vmem:[%s10128_s3 + $0xc08] sm:$0xff]  ;;  %v5610_v46 = vpack.c.bf16 %v4529_v53, %v4527_v24  ;;  %v5630_v24 = vpack.c.bf16 %v4549_v30, %v4547_v7  ;;  %v4571_v30 = vld [vmem:[%s10128_s3 + $0xd40] sm:$0xff] }
 0x304   :  { %v5612_v39 = vpack.c.bf16 %v4534_v6, %v4532_v63  ;;  %v4551_v63 = vld [vmem:[%s10128_s3 + $0xca0] sm:$0xff]  ;;  %v4553_v6 = vld [vmem:[%s10128_s3 + $0xcb0] sm:$0xff] }
 0x306   :  { %5591 = vmatpush1.bf16.msra.mxu0 %v5590_v31  ;;  %v4531_v31 = vld [vmem:[%s10128_s3 + $0xc00] sm:$0xff] }
 0x307   :  { %5593 = vmatprep.subr.bf16.mxu0 %v5592_v54  ;;  %v4533_v54 = vld [vmem:[%s10128_s3 + $0xc10] sm:$0xff] }
 0x308   :  { %v5614_v51 = vpack.c.bf16 %v4533_v54, %v4531_v31  ;;  %v4555_v54 = vld [vmem:[%s10128_s3 + $0xcc0] sm:$0xff] }
 0x30a   :  { %5595 = vmatpush1.bf16.msra.mxu0 %v5594_v22  ;;  %v4540_v22 = vld [vmem:[%s10128_s3 + $0xc48] sm:$0xff] }
 0x30b   :  { %5597 = vmatprep.subr.bf16.mxu0 %v5596_v0  ;;  %v4542_v0 = vld [vmem:[%s10128_s3 + $0xc58] sm:$0xff] }
 0x30c   :  { %v5620_v27 = vpack.c.bf16 %v4542_v0, %v4540_v22  ;;  %v4564_v22 = vld [vmem:[%s10128_s3 + $0xd08] sm:$0xff]  ;;  %v4566_v0 = vld [vmem:[%s10128_s3 + $0xd18] sm:$0xff] }
 0x30d   :  { %v5644_v19 = vpack.c.bf16 %v4566_v0, %v4564_v22  ;;  %v4585_v22 = vld [vmem:[%s10128_s3 + $0xdb0] sm:$0xff]  ;;  %v4588_v0 = vld [vmem:[%s10128_s3 + $0xdc8] sm:$0xff] }
 0x30e   :  { %5599 = vmatpush1.bf16.msra.mxu0 %v5598_v4  ;;  %v4544_v4 = vld [vmem:[%s10128_s3 + $0xc68] sm:$0xff] }
 0x30f   :  { %5601 = vmatprep.subr.bf16.mxu0 %v5600_v21  ;;  %v4546_v21 = vld [vmem:[%s10128_s3 + $0xc78] sm:$0xff] }
 0x310   :  { %v5624_v58 = vpack.c.bf16 %v4546_v21, %v4544_v4  ;;  %v4563_v4 = vld [vmem:[%s10128_s3 + $0xd00] sm:$0xff]  ;;  %v4565_v21 = vld [vmem:[%s10128_s3 + $0xd10] sm:$0xff] }
 0x312   :  { %5603 = vmatpush1.bf16.msra.mxu0 %v5602_v59  ;;  %v4548_v59 = vld [vmem:[%s10128_s3 + $0xc88] sm:$0xff] }
 0x313   :  { %5605 = vmatprep.subr.bf16.mxu0 %v5604_v50  ;;  %v4550_v50 = vld [vmem:[%s10128_s3 + $0xc98] sm:$0xff] }
 0x314   :  { %v5628_v25 = vpack.c.bf16 %v4550_v50, %v4548_v59  ;;  %v4569_v59 = vld [vmem:[%s10128_s3 + $0xd30] sm:$0xff]  ;;  %v4572_v50 = vld [vmem:[%s10128_s3 + $0xd48] sm:$0xff] }
 0x316   :  { %5607 = vmatpush1.bf16.msra.mxu0 %v5606_v60  ;;  %v4552_v60 = vld [vmem:[%s10128_s3 + $0xca8] sm:$0xff] }
 0x317   :  { %5609 = vmatprep.subr.bf16.mxu0 %v5608_v3  ;;  %v4554_v3 = vld [vmem:[%s10128_s3 + $0xcb8] sm:$0xff] }
 0x318   :  { %v5632_v53 = vpack.c.bf16 %v4554_v3, %v4552_v60  ;;  %v4573_v60 = vld [vmem:[%s10128_s3 + $0xd50] sm:$0xff]  ;;  %v4576_v3 = vld [vmem:[%s10128_s3 + $0xd68] sm:$0xff] }
 0x31a   :  { %5611 = vmatpush1.bf16.msra.mxu0 %v5610_v46  ;;  %v4556_v46 = vld [vmem:[%s10128_s3 + $0xcc8] sm:$0xff] }
 0x31b   :  { %5613 = vmatprep.subr.bf16.mxu0 %v5612_v39  ;;  %v5634_v39 = vpack.c.bf16 %v4553_v6, %v4551_v63  ;;  %v5636_v31 = vpack.c.bf16 %v4558_v2, %v4556_v46  ;;  %v4575_v6 = vld [vmem:[%s10128_s3 + $0xd60] sm:$0xff]  ;;  %v4577_v46 = vld [vmem:[%s10128_s3 + $0xd70] sm:$0xff]  ;;  %v4580_v2 = vld [vmem:[%s10128_s3 + $0xd88] sm:$0xff] }
 0x31d   :  { %2418 = vmatmul.mubr.f32.vlgmr.msra.gmra.mrb[0].mxu0 %v1145_v45  ;;  %v5638_v45 = vpack.c.bf16 %v4557_v13, %v4555_v54  ;;  %v4579_v13 = vld [vmem:[%s10128_s3 + $0xd80] sm:$0xff] }
 0x31e   :  { %5615 = vmatpush1.bf16.msra.mxu0 %v5614_v51  ;;  %2523 = vmatprep.mubr.f32.mxu0 %v10161_v29  ;;  %v4562_v51 = vld [vmem:[%s10128_s3 + $0xcf8] sm:$0xff] }
 0x31f   :  { %5617 = vmatprep.subr.bf16.mxu0 %v5616_v49  ;;  %v5640_v49 = vpack.c.bf16 %v4562_v51, %v4560_v57  ;;  %v4581_v57 = vld [vmem:[%s10128_s3 + $0xd90] sm:$0xff]  ;;  %v4584_v51 = vld [vmem:[%s10128_s3 + $0xda8] sm:$0xff] }
 0x322   :  { %5619 = vmatpush1.bf16.msra.mxu0 %v5618_v48  ;;  %v5642_v48 = vpack.c.bf16 %v4561_v9, %v4559_v18  ;;  %v4583_v9 = vld [vmem:[%s10128_s3 + $0xda0] sm:$0xff] }
 0x323   :  { %5621 = vmatprep.subr.bf16.mxu0 %v5620_v27  ;;  %v10162_v27 = vmax.f32 %v7466_v5, %v7800_v43  ;;  %v4570_v5 = vld [vmem:[%s10128_s3 + $0xd38] sm:$0xff]  ;;  %v5646_v43 = vpack.c.bf16 %v4565_v21, %v4563_v4  ;;  %v4589_v4 = vld [vmem:[%s10128_s3 + $0xdd0] sm:$0xff]  ;;  %v4592_v21 = vld [vmem:[%s10128_s3 + $0xde8] sm:$0xff] }
 0x325   :  { %v1121_v28 = vadd.f32 %v8378_v16, %v10162_v27  ;;  %v5666_v27 = vpack.c.bf16 %v4585_v22, %v4583_v9  ;;  %v4609_v9 = vld [vmem:[%s10128_s3 + $0xe70] sm:$0xff]  ;;  %v4612_v22 = vld [vmem:[%s10128_s3 + $0xe88] sm:$0xff] }
 0x326   :  { %5623 = vmatpush1.bf16.msra.mxu0 %v5622_v40  ;;  %v4568_v40 = vld [vmem:[%s10128_s3 + $0xd28] sm:$0xff] }
 0x327   :  { %5625 = vmatprep.subr.bf16.mxu0 %v5624_v58  ;;  %v1146_v58 = vmax.f32 %v1121_v28, 0.0  ;;  %v5648_v15 = vpack.c.bf16 %v4570_v5, %v4568_v40  ;;  %v4594_v40 = vld [vmem:[%s10128_s3 + $0xdf8] sm:$0xff] }
 0x32a   :  { %5627 = vmatpush1.bf16.msra.mxu0 %v5626_v1  ;;  %v4574_v1 = vld [vmem:[%s10128_s3 + $0xd58] sm:$0xff] }
 0x32b   :  { %5629 = vmatprep.subr.bf16.mxu0 %v5628_v25  ;;  %v5650_v25 = vpack.c.bf16 %v4569_v59, %v4567_v8  ;;  %v5652_v7 = vpack.c.bf16 %v4574_v1, %v4572_v50  ;;  %v4596_v8 = vld [vmem:[%s10128_s3 + $0xe08] sm:$0xff]  ;;  %v4598_v59 = vld [vmem:[%s10128_s3 + $0xe18] sm:$0xff]  ;;  %v10163_v1 = vmax.f32 %v7471_v23, %v7828_v36 }
 0x32c   :  { %v4602_v23 = vld [vmem:[%s10128_s3 + $0xe38] sm:$0xff] }
 0x32e   :  { %5631 = vmatpush1.bf16.msra.mxu0 %v5630_v24  ;;  %v4578_v24 = vld [vmem:[%s10128_s3 + $0xd78] sm:$0xff] }
 0x32f   :  { %5633 = vmatprep.subr.bf16.mxu0 %v5632_v53  ;;  %v5654_v53 = vpack.c.bf16 %v4573_v60, %v4571_v30  ;;  %v5656_v63 = vpack.c.bf16 %v4578_v24, %v4576_v3  ;;  %v4595_v30 = vld [vmem:[%s10128_s3 + $0xe00] sm:$0xff]  ;;  %v4597_v60 = vld [vmem:[%s10128_s3 + $0xe10] sm:$0xff]  ;;  %v4600_v3 = vld [vmem:[%s10128_s3 + $0xe28] sm:$0xff] }
 0x330   :  { %v5678_v36 = vpack.c.bf16 %v4597_v60, %v4595_v30  ;;  %v4626_v30 = vld [vmem:[%s10128_s3 + $0xef8] sm:$0xff] }
 0x332   :  { %5635 = vmatpush1.bf16.msra.mxu0 %v5634_v39  ;;  %v4582_v39 = vld [vmem:[%s10128_s3 + $0xd98] sm:$0xff] }
 0x333   :  { %5637 = vmatprep.subr.bf16.mxu0 %v5636_v31  ;;  %v5658_v31 = vpack.c.bf16 %v4577_v46, %v4575_v6  ;;  %v5660_v54 = vpack.c.bf16 %v4582_v39, %v4580_v2  ;;  %v4601_v6 = vld [vmem:[%s10128_s3 + $0xe30] sm:$0xff]  ;;  %v4604_v46 = vld [vmem:[%s10128_s3 + $0xe48] sm:$0xff]  ;;  %v4606_v2 = vld [vmem:[%s10128_s3 + $0xe58] sm:$0xff] }
 0x336   :  { %5639 = vmatpush1.bf16.msra.mxu0 %v5638_v45  ;;  %v4586_v45 = vld [vmem:[%s10128_s3 + $0xdb8] sm:$0xff] }
 0x337   :  { %5641 = vmatprep.subr.bf16.mxu0 %v5640_v49  ;;  %v5662_v49 = vpack.c.bf16 %v4581_v57, %v4579_v13  ;;  %v5664_v18 = vpack.c.bf16 %v4586_v45, %v4584_v51  ;;  %v4605_v13 = vld [vmem:[%s10128_s3 + $0xe50] sm:$0xff]  ;;  %v4608_v57 = vld [vmem:[%s10128_s3 + $0xe68] sm:$0xff]  ;;  %v4610_v51 = vld [vmem:[%s10128_s3 + $0xe78] sm:$0xff] }
 0x33a   :  { %5643 = vmatpush1.bf16.msra.mxu0 %v5642_v48  ;;  %v4590_v48 = vld [vmem:[%s10128_s3 + $0xdd8] sm:$0xff] }
 0x33b   :  { %5645 = vmatprep.subr.bf16.mxu0 %v5644_v19  ;;  %v5668_v28 = vpack.c.bf16 %v4590_v48, %v4588_v0  ;;  %v4587_v19 = vld [vmem:[%s10128_s3 + $0xdc0] sm:$0xff]  ;;  %v4614_v0 = vld [vmem:[%s10128_s3 + $0xe98] sm:$0xff] }
 0x33c   :  { %v5670_v5 = vpack.c.bf16 %v4589_v4, %v4587_v19  ;;  %v4613_v19 = vld [vmem:[%s10128_s3 + $0xe90] sm:$0xff]  ;;  %v4616_v4 = vld [vmem:[%s10128_s3 + $0xea8] sm:$0xff] }
 0x33d   :  { %2524 = vmatmul.mubr.f32.vlgmr.msra.gmra.mrb[0].mxu0 %v1146_v58  ;;  %v4591_v58 = vld [vmem:[%s10128_s3 + $0xde0] sm:$0xff] }
 0x33e   :  { %5647 = vmatpush1.bf16.msra.mxu0 %v5646_v43  ;;  %2629 = vmatprep.mubr.f32.mxu0 %v10161_v29  ;;  %v5672_v43 = vpack.c.bf16 %v4594_v40, %v4592_v21  ;;  %v4618_v21 = vld [vmem:[%s10128_s3 + $0xeb8] sm:$0xff] }
 0x33f   :  { %5649 = vmatprep.subr.bf16.mxu0 %v5648_v15  ;;  %v4593_v15 = vld [vmem:[%s10128_s3 + $0xdf0] sm:$0xff] }
 0x340   :  { %v5674_v50 = vpack.c.bf16 %v4593_v15, %v4591_v58  ;;  %v4617_v58 = vld [vmem:[%s10128_s3 + $0xeb0] sm:$0xff]  ;;  %v4620_v15 = vld [vmem:[%s10128_s3 + $0xec8] sm:$0xff] }
 0x342   :  { %5651 = vmatpush1.bf16.msra.mxu0 %v5650_v25  ;;  %v1122_v25 = vadd.f32 %v8378_v16, %v10163_v1  ;;  %v4619_v1 = vld [vmem:[%s10128_s3 + $0xec0] sm:$0xff] }
 0x343   :  { %5653 = vmatprep.subr.bf16.mxu0 %v5652_v7  ;;  %v5676_v7 = vpack.c.bf16 %v4598_v59, %v4596_v8  ;;  %v4622_v8 = vld [vmem:[%s10128_s3 + $0xed8] sm:$0xff] }
 0x344   :  { %v1147_v24 = vmax.f32 %v1122_v25, 0.0  ;;  %v4621_v25 = vld [vmem:[%s10128_s3 + $0xed0] sm:$0xff] }
 0x345   :  { %v5702_v60 = vpack.c.bf16 %v4621_v25, %v4619_v1  ;;  %v4650_v1 = vld [vmem:[%s10128_s3 + $0xfb8] sm:$0xff] }
 0x346   :  { %5655 = vmatpush1.bf16.msra.mxu0 %v5654_v53  ;;  %v5680_v53 = vpack.c.bf16 %v4602_v23, %v4600_v3  ;;  %v4623_v23 = vld [vmem:[%s10128_s3 + $0xee0] sm:$0xff] }
 0x347   :  { %5657 = vmatprep.subr.bf16.mxu0 %v5656_v63  ;;  %v4599_v63 = vld [vmem:[%s10128_s3 + $0xe20] sm:$0xff] }
 0x348   :  { %v5682_v39 = vpack.c.bf16 %v4601_v6, %v4599_v63  ;;  %v10164_v6 = vmax.f32 %v7476_v34, %v7860_v41  ;;  %v4634_v34 = vld [vmem:[%s10128_s3 + $0xf38] sm:$0xff] }
 0x34a   :  { %5659 = vmatpush1.bf16.msra.mxu0 %v5658_v31  ;;  %v5684_v31 = vpack.c.bf16 %v4606_v2, %v4604_v46  ;;  %v1123_v46 = vadd.f32 %v8378_v16, %v10164_v6  ;;  %v4656_v6 = vld [vmem:[%s10128_s3 + $0xfe8] sm:$0xff] }
 0x34b   :  { %5661 = vmatprep.subr.bf16.mxu0 %v5660_v54  ;;  %v4603_v54 = vld [vmem:[%s10128_s3 + $0xe40] sm:$0xff] }
 0x34c   :  { %v5686_v45 = vpack.c.bf16 %v4605_v13, %v4603_v54  ;;  %v4632_v54 = vld [vmem:[%s10128_s3 + $0xf28] sm:$0xff]  ;;  %v1148_v13 = vmax.f32 %v1123_v46, 0.0  ;;  %v4658_v46 = vld [vmem:[%s10128_s3 + $0xff8] sm:$0xff] }
 0x34e   :  { %5663 = vmatpush1.bf16.msra.mxu0 %v5662_v49  ;;  %v5688_v49 = vpack.c.bf16 %v4610_v51, %v4608_v57  ;;  %v5712_v57 = vpack.c.bf16 %v4634_v34, %v4632_v54  ;;  %v4631_v51 = vld [vmem:[%s10128_s3 + $0xf20] sm:$0xff]  ;;  %v4657_v54 = vld [vmem:[%s10128_s3 + $0xff0] sm:$0xff]  ;;  %v4660_v34 = vld [vmem:[%s10128_s3 + $0x1008] sm:$0xff] }
 0x34f   :  { %5665 = vmatprep.subr.bf16.mxu0 %v5664_v18  ;;  %v4607_v18 = vld [vmem:[%s10128_s3 + $0xe60] sm:$0xff] }
 0x350   :  { %v5690_v48 = vpack.c.bf16 %v4609_v9, %v4607_v18  ;;  %v4638_v18 = vld [vmem:[%s10128_s3 + $0xf58] sm:$0xff] }
 0x352   :  { %5667 = vmatpush1.bf16.msra.mxu0 %v5666_v27  ;;  %v5692_v27 = vpack.c.bf16 %v4614_v0, %v4612_v22  ;;  %v4635_v0 = vld [vmem:[%s10128_s3 + $0xf40] sm:$0xff] }
 0x353   :  { %5669 = vmatprep.subr.bf16.mxu0 %v5668_v28  ;;  %v4611_v28 = vld [vmem:[%s10128_s3 + $0xe80] sm:$0xff] }
 0x354   :  { %v5694_v40 = vpack.c.bf16 %v4613_v19, %v4611_v28  ;;  %v4642_v28 = vld [vmem:[%s10128_s3 + $0xf78] sm:$0xff] }
 0x356   :  { %5671 = vmatpush1.bf16.msra.mxu0 %v5670_v5  ;;  %v5696_v5 = vpack.c.bf16 %v4618_v21, %v4616_v4  ;;  %v4639_v21 = vld [vmem:[%s10128_s3 + $0xf60] sm:$0xff] }
 0x357   :  { %5673 = vmatprep.subr.bf16.mxu0 %v5672_v43  ;;  %v4615_v43 = vld [vmem:[%s10128_s3 + $0xea0] sm:$0xff] }
 0x358   :  { %v5698_v59 = vpack.c.bf16 %v4617_v58, %v4615_v43  ;;  %v4646_v43 = vld [vmem:[%s10128_s3 + $0xf98] sm:$0xff] }
 0x35a   :  { %5675 = vmatpush1.bf16.msra.mxu0 %v5674_v50  ;;  %v5700_v50 = vpack.c.bf16 %v4622_v8, %v4620_v15  ;;  %v4643_v8 = vld [vmem:[%s10128_s3 + $0xf80] sm:$0xff] }
 0x35b   :  { %5677 = vmatprep.subr.bf16.mxu0 %v5676_v7  ;;  %v4624_v7 = vld [vmem:[%s10128_s3 + $0xee8] sm:$0xff] }
 0x35c   :  { %v5704_v3 = vpack.c.bf16 %v4626_v30, %v4624_v7  ;;  %v4647_v30 = vld [vmem:[%s10128_s3 + $0xfa0] sm:$0xff] }
 0x35d   :  { %2630 = vmatmul.mubr.f32.vlgmr.msra.gmra.mrb[0].mxu0 %v1147_v24  ;;  %v4628_v24 = vld [vmem:[%s10128_s3 + $0xf08] sm:$0xff] }
 0x35e   :  { %5679 = vmatpush1.bf16.msra.mxu0 %v5678_v36  ;;  %2735 = vmatprep.mubr.f32.mxu0 %v10161_v29  ;;  %v4625_v36 = vld [vmem:[%s10128_s3 + $0xef0] sm:$0xff] }
 0x35f   :  { %5681 = vmatprep.subr.bf16.mxu0 %v5680_v53  ;;  %v4630_v53 = vld [vmem:[%s10128_s3 + $0xf18] sm:$0xff]  ;;  %v5706_v63 = vpack.c.bf16 %v4625_v36, %v4623_v23 }
 0x360   :  { %v5708_v2 = vpack.c.bf16 %v4630_v53, %v4628_v24  ;;  %v4654_v23 = vld [vmem:[%s10128_s3 + $0xfd8] sm:$0xff]  ;;  %v4651_v53 = vld [vmem:[%s10128_s3 + $0xfc0] sm:$0xff] }
 0x362   :  { %5683 = vmatpush1.bf16.msra.mxu0 %v5682_v39  ;;  %v4627_v39 = vld [vmem:[%s10128_s3 + $0xf00] sm:$0xff] }
 0x363   :  { %5685 = vmatprep.subr.bf16.mxu0 %v5684_v31  ;;  %v4629_v31 = vld [vmem:[%s10128_s3 + $0xf10] sm:$0xff] }
 0x364   :  { %v5710_v41 = vpack.c.bf16 %v4629_v31, %v4627_v39  ;;  %v5736_v39 = vpack.c.bf16 %v4658_v46, %v4656_v6  ;;  %v4655_v31 = vld [vmem:[%s10128_s3 + $0xfe0] sm:$0xff]  ;;  %v4681_v46 = vld [vmem:[%s10128_s3 + $0x10b0] sm:$0xff] }
 0x365   :  { %v4679_v6 = vld [vmem:[%s10128_s3 + $0x10a0] sm:$0xff] }
 0x366   :  { %5687 = vmatpush1.bf16.msra.mxu0 %v5686_v45  ;;  %v4633_v45 = vld [vmem:[%s10128_s3 + $0xf30] sm:$0xff] }
 0x367   :  { %5689 = vmatprep.subr.bf16.mxu0 %v5688_v49  ;;  %v4636_v49 = vld [vmem:[%s10128_s3 + $0xf48] sm:$0xff]  ;;  %v5714_v9 = vpack.c.bf16 %v4633_v45, %v4631_v51 }
 0x368   :  { %v5716_v22 = vpack.c.bf16 %v4638_v18, %v4636_v49  ;;  %v4659_v49 = vld [vmem:[%s10128_s3 + $0x1000] sm:$0xff]  ;;  %v4661_v18 = vld [vmem:[%s10128_s3 + $0x1010] sm:$0xff] }
 0x36a   :  { %5691 = vmatpush1.bf16.msra.mxu0 %v5690_v48  ;;  %v4637_v48 = vld [vmem:[%s10128_s3 + $0xf50] sm:$0xff] }
 0x36b   :  { %5693 = vmatprep.subr.bf16.mxu0 %v5692_v27  ;;  %v4640_v27 = vld [vmem:[%s10128_s3 + $0xf68] sm:$0xff]  ;;  %v5718_v19 = vpack.c.bf16 %v4637_v48, %v4635_v0  ;;  %v4663_v0 = vld [vmem:[%s10128_s3 + $0x1020] sm:$0xff]  ;;  %v4665_v48 = vld [vmem:[%s10128_s3 + $0x1030] sm:$0xff] }
 0x36c   :  { %v5720_v4 = vpack.c.bf16 %v4642_v28, %v4640_v27  ;;  %v4668_v27 = vld [vmem:[%s10128_s3 + $0x1048] sm:$0xff]  ;;  %v4670_v28 = vld [vmem:[%s10128_s3 + $0x1058] sm:$0xff] }
 0x36e   :  { %5695 = vmatpush1.bf16.msra.mxu0 %v5694_v40  ;;  %v4641_v40 = vld [vmem:[%s10128_s3 + $0xf70] sm:$0xff] }
 0x36f   :  { %5697 = vmatprep.subr.bf16.mxu0 %v5696_v5  ;;  %v4644_v5 = vld [vmem:[%s10128_s3 + $0xf88] sm:$0xff]  ;;  %v5722_v58 = vpack.c.bf16 %v4641_v40, %v4639_v21  ;;  %v4667_v21 = vld [vmem:[%s10128_s3 + $0x1040] sm:$0xff]  ;;  %v4669_v40 = vld [vmem:[%s10128_s3 + $0x1050] sm:$0xff] }
 0x370   :  { %v5724_v15 = vpack.c.bf16 %v4646_v43, %v4644_v5  ;;  %v4672_v43 = vld [vmem:[%s10128_s3 + $0x1068] sm:$0xff] }
 0x372   :  { %5699 = vmatpush1.bf16.msra.mxu0 %v5698_v59  ;;  %v4645_v59 = vld [vmem:[%s10128_s3 + $0xf90] sm:$0xff] }
 0x373   :  { %5701 = vmatprep.subr.bf16.mxu0 %v5700_v50  ;;  %v4648_v50 = vld [vmem:[%s10128_s3 + $0xfa8] sm:$0xff]  ;;  %v5726_v25 = vpack.c.bf16 %v4645_v59, %v4643_v8  ;;  %v5750_v8 = vpack.c.bf16 %v4669_v40, %v4667_v21  ;;  %v4695_v40 = vld [vmem:[%s10128_s3 + $0x1120] sm:$0xff] }
 0x374   :  { %v5728_v7 = vpack.c.bf16 %v4650_v1, %v4648_v50  ;;  %v4671_v50 = vld [vmem:[%s10128_s3 + $0x1060] sm:$0xff]  ;;  %v4673_v1 = vld [vmem:[%s10128_s3 + $0x1070] sm:$0xff] }
 0x376   :  { %5703 = vmatpush1.bf16.msra.mxu0 %v5702_v60  ;;  %v4649_v60 = vld [vmem:[%s10128_s3 + $0xfb0] sm:$0xff] }
 0x377   :  { %5705 = vmatprep.subr.bf16.mxu0 %v5704_v3  ;;  %v4652_v3 = vld [vmem:[%s10128_s3 + $0xfc8] sm:$0xff]  ;;  %v5730_v36 = vpack.c.bf16 %v4649_v60, %v4647_v30  ;;  %v5754_v30 = vpack.c.bf16 %v4673_v1, %v4671_v50  ;;  %v4699_v1 = vld [vmem:[%s10128_s3 + $0x1140] sm:$0xff] }
 0x378   :  { %v5732_v24 = vpack.c.bf16 %v4654_v23, %v4652_v3  ;;  %v4675_v3 = vld [vmem:[%s10128_s3 + $0x1080] sm:$0xff]  ;;  %v4677_v23 = vld [vmem:[%s10128_s3 + $0x1090] sm:$0xff] }
 0x37a   :  { %5707 = vmatpush1.bf16.msra.mxu0 %v5706_v63  ;;  %v4653_v63 = vld [vmem:[%s10128_s3 + $0xfd0] sm:$0xff] }
 0x37b   :  { %5709 = vmatprep.subr.bf16.mxu0 %v5708_v2  ;;  %v5734_v2 = vpack.c.bf16 %v4653_v63, %v4651_v53  ;;  %v5758_v53 = vpack.c.bf16 %v4677_v23, %v4675_v3  ;;  %v4703_v23 = vld [vmem:[%s10128_s3 + $0x1160] sm:$0xff] }
 0x37d   :  { %2736 = vmatmul.mubr.f32.vlgmr.msra.gmra.mrb[0].mxu0 %v1148_v13  ;;  %v5738_v13 = vpack.c.bf16 %v4657_v54, %v4655_v31  ;;  %v5762_v31 = vpack.c.bf16 %v4681_v46, %v4679_v6  ;;  %v4707_v46 = vld [vmem:[%s10128_s3 + $0x1180] sm:$0xff] }
 0x37e   :  { %5711 = vmatpush1.bf16.msra.mxu0 %v5710_v41  ;;  %2841 = vmatprep.mubr.f32.mxu0 %v10161_v29  ;;  %v4662_v41 = vld [vmem:[%s10128_s3 + $0x1018] sm:$0xff] }
 0x37f   :  { %5713 = vmatprep.subr.bf16.mxu0 %v5712_v57  ;;  %v10165_v57 = vmax.f32 %v7481_v61, %v7888_v37  ;;  %v5740_v45 = vpack.c.bf16 %v4662_v41, %v4660_v34  ;;  %v4666_v61 = vld [vmem:[%s10128_s3 + $0x1038] sm:$0xff]  ;;  %v5742_v37 = vpack.c.bf16 %v4661_v18, %v4659_v49  ;;  %v4683_v34 = vld [vmem:[%s10128_s3 + $0x10c0] sm:$0xff]  ;;  %v4685_v41 = vld [vmem:[%s10128_s3 + $0x10d0] sm:$0xff] }
 0x380   :  { %v4687_v49 = vld [vmem:[%s10128_s3 + $0x10e0] sm:$0xff]  ;;  %v4689_v18 = vld [vmem:[%s10128_s3 + $0x10f0] sm:$0xff] }
 0x381   :  { %v1124_v51 = vadd.f32 %v8378_v16, %v10165_v57  ;;  %v4690_v57 = vld [vmem:[%s10128_s3 + $0x10f8] sm:$0xff] }
 0x382   :  { %5715 = vmatpush1.bf16.msra.mxu0 %v5714_v9  ;;  %v4664_v9 = vld [vmem:[%s10128_s3 + $0x1028] sm:$0xff] }
 0x383   :  { %5717 = vmatprep.subr.bf16.mxu0 %v5716_v22  ;;  %v1149_v16 = vmax.f32 %v1124_v51, 0.0  ;;  %v5744_v22 = vpack.c.bf16 %v4666_v61, %v4664_v9  ;;  %v5766_v51 = vpack.c.bf16 %v4685_v41, %v4683_v34  ;;  %v4692_v9 = vld [vmem:[%s10128_s3 + $0x1108] sm:$0xff]  ;;  %v4694_v61 = vld [vmem:[%s10128_s3 + $0x1118] sm:$0xff]  ;;  %v4711_v41 = vld [vmem:[%s10128_s3 + $0x11a0] sm:$0xff] }
 0x386   :  { %5719 = vmatpush1.bf16.msra.mxu0 %v5718_v19  ;;  %v5746_v19 = vpack.c.bf16 %v4665_v48, %v4663_v0  ;;  %v5772_v48 = vpack.c.bf16 %v4694_v61, %v4692_v9  ;;  %v4717_v9 = vld [vmem:[%s10128_s3 + $0x11d0] sm:$0xff]  ;;  %v4720_v61 = vld [vmem:[%s10128_s3 + $0x11e8] sm:$0xff] }
 0x387   :  { %5721 = vmatprep.subr.bf16.mxu0 %v5720_v4  ;;  %v5748_v4 = vpack.c.bf16 %v4670_v28, %v4668_v27  ;;  %v4691_v27 = vld [vmem:[%s10128_s3 + $0x1100] sm:$0xff]  ;;  %v4693_v28 = vld [vmem:[%s10128_s3 + $0x1110] sm:$0xff] }
 0x38a   :  { %5723 = vmatpush1.bf16.msra.mxu0 %v5722_v58  ;;  %v4674_v58 = vld [vmem:[%s10128_s3 + $0x1078] sm:$0xff] }
 0x38b   :  { %5725 = vmatprep.subr.bf16.mxu0 %v5724_v15  ;;  %v5752_v59 = vpack.c.bf16 %v4674_v58, %v4672_v43  ;;  %v4697_v43 = vld [vmem:[%s10128_s3 + $0x1130] sm:$0xff]  ;;  %v4700_v58 = vld [vmem:[%s10128_s3 + $0x1148] sm:$0xff] }
 0x38e   :  { %5727 = vmatpush1.bf16.msra.mxu0 %v5726_v25  ;;  %v4676_v25 = vld [vmem:[%s10128_s3 + $0x1088] sm:$0xff] }
 0x38f   :  { %5729 = vmatprep.subr.bf16.mxu0 %v5728_v7  ;;  %v4678_v7 = vld [vmem:[%s10128_s3 + $0x1098] sm:$0xff] }
 0x390   :  { %v5756_v60 = vpack.c.bf16 %v4678_v7, %v4676_v25  ;;  %v4701_v25 = vld [vmem:[%s10128_s3 + $0x1150] sm:$0xff]  ;;  %v4704_v7 = vld [vmem:[%s10128_s3 + $0x1168] sm:$0xff] }
 0x392   :  { %5731 = vmatpush1.bf16.msra.mxu0 %v5730_v36  ;;  %v4680_v36 = vld [vmem:[%s10128_s3 + $0x10a8] sm:$0xff] }
 0x393   :  { %5733 = vmatprep.subr.bf16.mxu0 %v5732_v24  ;;  %v4682_v24 = vld [vmem:[%s10128_s3 + $0x10b8] sm:$0xff] }
 0x394   :  { %v5760_v63 = vpack.c.bf16 %v4682_v24, %v4680_v36  ;;  %v4705_v36 = vld [vmem:[%s10128_s3 + $0x1170] sm:$0xff]  ;;  %v4708_v24 = vld [vmem:[%s10128_s3 + $0x1188] sm:$0xff] }
 0x396   :  { %5735 = vmatpush1.bf16.msra.mxu0 %v5734_v2  ;;  %v4684_v2 = vld [vmem:[%s10128_s3 + $0x10c8] sm:$0xff] }
 0x397   :  { %5737 = vmatprep.subr.bf16.mxu0 %v5736_v39  ;;  %v4686_v39 = vld [vmem:[%s10128_s3 + $0x10d8] sm:$0xff] }
 0x398   :  { %v5764_v54 = vpack.c.bf16 %v4686_v39, %v4684_v2  ;;  %v4709_v2 = vld [vmem:[%s10128_s3 + $0x1190] sm:$0xff]  ;;  %v4712_v39 = vld [vmem:[%s10128_s3 + $0x11a8] sm:$0xff] }
 0x39a   :  { %5739 = vmatpush1.bf16.msra.mxu0 %v5738_v13  ;;  %v4688_v13 = vld [vmem:[%s10128_s3 + $0x10e8] sm:$0xff] }
 0x39b   :  { %5741 = vmatprep.subr.bf16.mxu0 %v5740_v45  ;;  %v5768_v45 = vpack.c.bf16 %v4690_v57, %v4688_v13  ;;  %v4713_v13 = vld [vmem:[%s10128_s3 + $0x11b0] sm:$0xff]  ;;  %v4716_v57 = vld [vmem:[%s10128_s3 + $0x11c8] sm:$0xff] }
 0x39d   :  { %2842 = vmatmul.mubr.f32.vlgmr.msra.gmra.mrb[0].mxu0 %v1149_v16  ;;  %v9146_v16 = vld [vmem:[%s10129_s2] ss:$0 sm:$0xff] }
 0x39e   :  { %5743 = vmatpush1.bf16.msra.mxu0 %v5742_v37  ;;  %2947 = vmatprep.mubr.f32.mxu0 %v10161_v29  ;;  %v5770_v37 = vpack.c.bf16 %v4689_v18, %v4687_v49  ;;  %v4715_v18 = vld [vmem:[%s10128_s3 + $0x11c0] sm:$0xff] }
 0x39f   :  { %5745 = vmatprep.subr.bf16.mxu0 %v5744_v22  ;;  %v10166_v22 = vmax.f32 %v7486_v55, %v7917_v38  ;;  %v4698_v55 = vld [vmem:[%s10128_s3 + $0x1138] sm:$0xff]  ;;  %v5774_v38 = vpack.c.bf16 %v4693_v28, %v4691_v27  ;;  %v4721_v27 = vld [vmem:[%s10128_s3 + $0x11f0] sm:$0xff]  ;;  %v4724_v28 = vld [vmem:[%s10128_s3 + $0x1208] sm:$0xff] }
 0x3a0   :  { %v9073_v5 = vpop.f32.mrb[200].mxu1 }
 0x3a1   :  { %v9081_v15 = vpop.f32.mrb[201].mxu1  ;;  %v1125_v0 = vadd.f32 %v9146_v16, %v10166_v22  ;;  %v5798_v22 = vpack.c.bf16 %v4717_v9, %v4715_v18  ;;  %v4745_v18 = vld [vmem:[%s10128_s3 + $0x12b0] sm:$0xff]  ;;  %v4748_v9 = vld [vmem:[%s10128_s3 + $0x12c8] sm:$0xff] }
 0x3a2   :  { %5747 = vmatpush1.bf16.msra.mxu0 %v5746_v19  ;;  %v4696_v19 = vld [vmem:[%s10128_s3 + $0x1128] sm:$0xff] }
 0x3a3   :  { %5749 = vmatprep.subr.bf16.mxu0 %v5748_v4  ;;  %v1150_v4 = vmax.f32 %v1125_v0, 0.0  ;;  %v5776_v21 = vpack.c.bf16 %v4698_v55, %v4696_v19  ;;  %v4726_v19 = vld [vmem:[%s10128_s3 + $0x1218] sm:$0xff] }
 0x3a6   :  { %5751 = vmatpush1.bf16.msra.mxu0 %v5750_v8  ;;  %v4702_v8 = vld [vmem:[%s10128_s3 + $0x1158] sm:$0xff] }
 0x3a7   :  { %5753 = vmatprep.subr.bf16.mxu0 %v5752_v59  ;;  %v5778_v59 = vpack.c.bf16 %v4697_v43, %v4695_v40  ;;  %v5780_v50 = vpack.c.bf16 %v4702_v8, %v4700_v58  ;;  %v4723_v40 = vld [vmem:[%s10128_s3 + $0x1200] sm:$0xff]  ;;  %v4725_v43 = vld [vmem:[%s10128_s3 + $0x1210] sm:$0xff]  ;;  %v4728_v58 = vld [vmem:[%s10128_s3 + $0x1228] sm:$0xff] }
 0x3aa   :  { %5755 = vmatpush1.bf16.msra.mxu0 %v5754_v30  ;;  %v4706_v30 = vld [vmem:[%s10128_s3 + $0x1178] sm:$0xff] }
 0x3ab   :  { %5757 = vmatprep.subr.bf16.mxu0 %v5756_v60  ;;  %v5782_v60 = vpack.c.bf16 %v4701_v25, %v4699_v1  ;;  %v5784_v3 = vpack.c.bf16 %v4706_v30, %v4704_v7  ;;  %v4729_v1 = vld [vmem:[%s10128_s3 + $0x1230] sm:$0xff]  ;;  %v4732_v25 = vld [vmem:[%s10128_s3 + $0x1248] sm:$0xff]  ;;  %v4734_v7 = vld [vmem:[%s10128_s3 + $0x1258] sm:$0xff] }
 0x3ae   :  { %5759 = vmatpush1.bf16.msra.mxu0 %v5758_v53  ;;  %v4710_v53 = vld [vmem:[%s10128_s3 + $0x1198] sm:$0xff] }
 0x3af   :  { %5761 = vmatprep.subr.bf16.mxu0 %v5760_v63  ;;  %v5786_v63 = vpack.c.bf16 %v4705_v36, %v4703_v23  ;;  %v5788_v6 = vpack.c.bf16 %v4710_v53, %v4708_v24  ;;  %v4733_v23 = vld [vmem:[%s10128_s3 + $0x1250] sm:$0xff]  ;;  %v4736_v36 = vld [vmem:[%s10128_s3 + $0x1268] sm:$0xff]  ;;  %v4738_v24 = vld [vmem:[%s10128_s3 + $0x1278] sm:$0xff] }
 0x3b2   :  { %5763 = vmatpush1.bf16.msra.mxu0 %v5762_v31  ;;  %v4714_v31 = vld [vmem:[%s10128_s3 + $0x11b8] sm:$0xff] }
 0x3b3   :  { %5765 = vmatprep.subr.bf16.mxu0 %v5764_v54  ;;  %v5790_v54 = vpack.c.bf16 %v4709_v2, %v4707_v46  ;;  %v5792_v34 = vpack.c.bf16 %v4714_v31, %v4712_v39  ;;  %v4737_v46 = vld [vmem:[%s10128_s3 + $0x1270] sm:$0xff]  ;;  %v4740_v2 = vld [vmem:[%s10128_s3 + $0x1288] sm:$0xff]  ;;  %v4742_v39 = vld [vmem:[%s10128_s3 + $0x1298] sm:$0xff] }
 0x3b6   :  { %5767 = vmatpush1.bf16.msra.mxu0 %v5766_v51  ;;  %v4718_v51 = vld [vmem:[%s10128_s3 + $0x11d8] sm:$0xff] }
 0x3b7   :  { %5769 = vmatprep.subr.bf16.mxu0 %v5768_v45  ;;  %v5794_v45 = vpack.c.bf16 %v4713_v13, %v4711_v41  ;;  %v5796_v49 = vpack.c.bf16 %v4718_v51, %v4716_v57  ;;  %v4741_v41 = vld [vmem:[%s10128_s3 + $0x1290] sm:$0xff]  ;;  %v4744_v13 = vld [vmem:[%s10128_s3 + $0x12a8] sm:$0xff]  ;;  %v4746_v57 = vld [vmem:[%s10128_s3 + $0x12b8] sm:$0xff] }
 0x3ba   :  { %5771 = vmatpush1.bf16.msra.mxu0 %v5770_v37  ;;  %v4722_v37 = vld [vmem:[%s10128_s3 + $0x11f8] sm:$0xff] }
 0x3bb   :  { %5773 = vmatprep.subr.bf16.mxu0 %v5772_v48  ;;  %v5800_v0 = vpack.c.bf16 %v4722_v37, %v4720_v61  ;;  %v4719_v48 = vld [vmem:[%s10128_s3 + $0x11e0] sm:$0xff]  ;;  %v4750_v61 = vld [vmem:[%s10128_s3 + $0x12d8] sm:$0xff] }
 0x3bc   :  { %v5802_v55 = vpack.c.bf16 %v4721_v27, %v4719_v48  ;;  %v4749_v48 = vld [vmem:[%s10128_s3 + $0x12d0] sm:$0xff]  ;;  %v4752_v27 = vld [vmem:[%s10128_s3 + $0x12e8] sm:$0xff] }
 0x3bd   :  { %2948 = vmatmul.mubr.f32.vlgmr.msra.gmra.mrb[0].mxu0 %v1150_v4 }
 0x3be   :  { %5775 = vmatpush1.bf16.msra.mxu0 %v5774_v38  ;;  %3053 = vmatprep.mubr.f32.mxu0 %v10161_v29  ;;  %v10167_v38 = vmax.f32 %v7491_v56, %v7945_v12  ;;  %v4730_v56 = vld [vmem:[%s10128_s3 + $0x1238] sm:$0xff]  ;;  %v5806_v12 = vpack.c.bf16 %v4725_v43, %v4723_v40 }
 0x3bf   :  { %5777 = vmatprep.subr.bf16.mxu0 %v5776_v21  ;;  %v5804_v21 = vpack.c.bf16 %v4726_v19, %v4724_v28  ;;  %v4754_v28 = vld [vmem:[%s10128_s3 + $0x12f8] sm:$0xff] }
 0x3c0   :  { %v1126_v4 = vadd.f32 %v9146_v16, %v10167_v38  ;;  %v4751_v38 = vld [vmem:[%s10128_s3 + $0x12e0] sm:$0xff]  ;;  %v4758_v40 = vld [vmem:[%s10128_s3 + $0x1318] sm:$0xff] }
 0x3c2   :  { %5779 = vmatpush1.bf16.msra.mxu0 %v5778_v59  ;;  %v1151_v8 = vmax.f32 %v1126_v4, 0.0  ;;  %v5808_v59 = vpack.c.bf16 %v4730_v56, %v4728_v58  ;;  %v4753_v4 = vld [vmem:[%s10128_s3 + $0x12f0] sm:$0xff]  ;;  %v10168_v58 = vmax.f32 %v7496_v52, %v7977_v33  ;;  %v4762_v52 = vld [vmem:[%s10128_s3 + $0x1338] sm:$0xff] }
 0x3c3   :  { %5781 = vmatprep.subr.bf16.mxu0 %v5780_v50  ;;  %v4727_v50 = vld [vmem:[%s10128_s3 + $0x1220] sm:$0xff]  ;;  %v5834_v43 = vpack.c.bf16 %v4753_v4, %v4751_v38  ;;  %v4786_v38 = vld [vmem:[%s10128_s3 + $0x13f8] sm:$0xff] }
 0x3c4   :  { %v5810_v30 = vpack.c.bf16 %v4729_v1, %v4727_v50  ;;  %v1127_v56 = vadd.f32 %v9146_v16, %v10168_v58  ;;  %v4760_v50 = vld [vmem:[%s10128_s3 + $0x1328] sm:$0xff] }
 0x3c5   :  { %v4788_v58 = vld [vmem:[%s10128_s3 + $0x1408] sm:$0xff] }
 0x3c6   :  { %5783 = vmatpush1.bf16.msra.mxu0 %v5782_v60  ;;  %v5812_v60 = vpack.c.bf16 %v4734_v7, %v4732_v25  ;;  %v1152_v1 = vmax.f32 %v1127_v56, 0.0  ;;  %v5840_v25 = vpack.c.bf16 %v4762_v52, %v4760_v50  ;;  %v4759_v7 = vld [vmem:[%s10128_s3 + $0x1320] sm:$0xff]  ;;  %v4790_v56 = vld [vmem:[%s10128_s3 + $0x1418] sm:$0xff] }
 0x3c7   :  { %5785 = vmatprep.subr.bf16.mxu0 %v5784_v3  ;;  %v4731_v3 = vld [vmem:[%s10128_s3 + $0x1240] sm:$0xff]  ;;  %v5868_v50 = vpack.c.bf16 %v4790_v56, %v4788_v58  ;;  %v4817_v58 = vld [vmem:[%s10128_s3 + $0x14f0] sm:$0xff]  ;;  %v4820_v56 = vld [vmem:[%s10128_s3 + $0x1508] sm:$0xff] }
 0x3c8   :  { %v5814_v53 = vpack.c.bf16 %v4733_v23, %v4731_v3  ;;  %v4766_v3 = vld [vmem:[%s10128_s3 + $0x1358] sm:$0xff]  ;;  %v4787_v52 = vld [vmem:[%s10128_s3 + $0x1400] sm:$0xff] }
 0x3ca   :  { %5787 = vmatpush1.bf16.msra.mxu0 %v5786_v63  ;;  %v5816_v63 = vpack.c.bf16 %v4738_v24, %v4736_v36  ;;  %v4763_v24 = vld [vmem:[%s10128_s3 + $0x1340] sm:$0xff] }
 0x3cb   :  { %5789 = vmatprep.subr.bf16.mxu0 %v5788_v6  ;;  %v4735_v6 = vld [vmem:[%s10128_s3 + $0x1260] sm:$0xff] }
 0x3cc   :  { %v5818_v31 = vpack.c.bf16 %v4737_v46, %v4735_v6  ;;  %v4770_v6 = vld [vmem:[%s10128_s3 + $0x1378] sm:$0xff] }
 0x3ce   :  { %5791 = vmatpush1.bf16.msra.mxu0 %v5790_v54  ;;  %v5820_v54 = vpack.c.bf16 %v4742_v39, %v4740_v2  ;;  %v4767_v39 = vld [vmem:[%s10128_s3 + $0x1360] sm:$0xff] }
 0x3cf   :  { %5793 = vmatprep.subr.bf16.mxu0 %v5792_v34  ;;  %v4739_v34 = vld [vmem:[%s10128_s3 + $0x1280] sm:$0xff] }
 0x3d0   :  { %v5822_v51 = vpack.c.bf16 %v4741_v41, %v4739_v34  ;;  %v4774_v34 = vld [vmem:[%s10128_s3 + $0x1398] sm:$0xff] }
 0x3d2   :  { %5795 = vmatpush1.bf16.msra.mxu0 %v5794_v45  ;;  %v5824_v45 = vpack.c.bf16 %v4746_v57, %v4744_v13  ;;  %v4771_v57 = vld [vmem:[%s10128_s3 + $0x1380] sm:$0xff] }
 0x3d3   :  { %5797 = vmatprep.subr.bf16.mxu0 %v5796_v49  ;;  %v4743_v49 = vld [vmem:[%s10128_s3 + $0x12a0] sm:$0xff] }
 0x3d4   :  { %v5826_v37 = vpack.c.bf16 %v4745_v18, %v4743_v49  ;;  %v4778_v49 = vld [vmem:[%s10128_s3 + $0x13b8] sm:$0xff] }
 0x3d6   :  { %5799 = vmatpush1.bf16.msra.mxu0 %v5798_v22  ;;  %v5828_v22 = vpack.c.bf16 %v4750_v61, %v4748_v9  ;;  %v4775_v61 = vld [vmem:[%s10128_s3 + $0x13a0] sm:$0xff] }
 0x3d7   :  { %5801 = vmatprep.subr.bf16.mxu0 %v5800_v0  ;;  %v4747_v0 = vld [vmem:[%s10128_s3 + $0x12c0] sm:$0xff] }
 0x3d8   :  { %v5830_v19 = vpack.c.bf16 %v4749_v48, %v4747_v0  ;;  %v4782_v0 = vld [vmem:[%s10128_s3 + $0x13d8] sm:$0xff] }
 0x3da   :  { %5803 = vmatpush1.bf16.msra.mxu0 %v5802_v55  ;;  %v5832_v55 = vpack.c.bf16 %v4754_v28, %v4752_v27  ;;  %v4779_v28 = vld [vmem:[%s10128_s3 + $0x13c0] sm:$0xff] }
 0x3db   :  { %5805 = vmatprep.subr.bf16.mxu0 %v5804_v21  ;;  %v4756_v21 = vld [vmem:[%s10128_s3 + $0x1308] sm:$0xff] }
 0x3dd   :  { %3054 = vmatmul.mubr.f32.vlgmr.msra.gmra.mrb[0].mxu0 %v1151_v8  ;;  %v4755_v8 = vld [vmem:[%s10128_s3 + $0x1300] sm:$0xff] }
 0x3de   :  { %5807 = vmatpush1.bf16.msra.mxu0 %v5806_v12  ;;  %3159 = vmatprep.mubr.f32.mxu0 %v10161_v29  ;;  %v5836_v12 = vpack.c.bf16 %v4758_v40, %v4756_v21  ;;  %v4783_v40 = vld [vmem:[%s10128_s3 + $0x13e0] sm:$0xff] }
 0x3df   :  { %5809 = vmatprep.subr.bf16.mxu0 %v5808_v59  ;;  %v4757_v59 = vld [vmem:[%s10128_s3 + $0x1310] sm:$0xff] }
 0x3e0   :  { %v5838_v33 = vpack.c.bf16 %v4757_v59, %v4755_v8  ;;  %v10169_v8 = vmax.f32 %v7501_v35, %v8005_v47  ;;  %v4794_v35 = vld [vmem:[%s10128_s3 + $0x1438] sm:$0xff] }
 0x3e2   :  { %5811 = vmatpush1.bf16.msra.mxu0 %v5810_v30  ;;  %v4761_v30 = vld [vmem:[%s10128_s3 + $0x1330] sm:$0xff]  ;;  %v1128_v59 = vadd.f32 %v9146_v16, %v10169_v8 }
 0x3e3   :  { %5813 = vmatprep.subr.bf16.mxu0 %v5812_v60  ;;  %v4764_v60 = vld [vmem:[%s10128_s3 + $0x1348] sm:$0xff]  ;;  %v5842_v23 = vpack.c.bf16 %v4761_v30, %v4759_v7  ;;  %v4791_v30 = vld [vmem:[%s10128_s3 + $0x1420] sm:$0xff] }
 0x3e4   :  { %v5844_v36 = vpack.c.bf16 %v4766_v3, %v4764_v60  ;;  %v4793_v60 = vld [vmem:[%s10128_s3 + $0x1430] sm:$0xff]  ;;  %v4796_v3 = vld [vmem:[%s10128_s3 + $0x1448] sm:$0xff] }
 0x3e6   :  { %5815 = vmatpush1.bf16.msra.mxu0 %v5814_v53  ;;  %v4765_v53 = vld [vmem:[%s10128_s3 + $0x1350] sm:$0xff] }
 0x3e7   :  { %5817 = vmatprep.subr.bf16.mxu0 %v5816_v63  ;;  %v4768_v63 = vld [vmem:[%s10128_s3 + $0x1368] sm:$0xff]  ;;  %v5846_v46 = vpack.c.bf16 %v4765_v53, %v4763_v24  ;;  %v4795_v53 = vld [vmem:[%s10128_s3 + $0x1440] sm:$0xff] }
 0x3e8   :  { %v5848_v2 = vpack.c.bf16 %v4770_v6, %v4768_v63  ;;  %v4797_v63 = vld [vmem:[%s10128_s3 + $0x1450] sm:$0xff]  ;;  %v4800_v6 = vld [vmem:[%s10128_s3 + $0x1468] sm:$0xff] }
 0x3ea   :  { %5819 = vmatpush1.bf16.msra.mxu0 %v5818_v31  ;;  %v4769_v31 = vld [vmem:[%s10128_s3 + $0x1370] sm:$0xff] }
 0x3eb   :  { %5821 = vmatprep.subr.bf16.mxu0 %v5820_v54  ;;  %v4772_v54 = vld [vmem:[%s10128_s3 + $0x1388] sm:$0xff]  ;;  %v5850_v41 = vpack.c.bf16 %v4769_v31, %v4767_v39  ;;  %v4799_v31 = vld [vmem:[%s10128_s3 + $0x1460] sm:$0xff] }
 0x3ec   :  { %v5852_v13 = vpack.c.bf16 %v4774_v34, %v4772_v54  ;;  %v4801_v54 = vld [vmem:[%s10128_s3 + $0x1470] sm:$0xff]  ;;  %v4804_v34 = vld [vmem:[%s10128_s3 + $0x1488] sm:$0xff] }
 0x3ee   :  { %5823 = vmatpush1.bf16.msra.mxu0 %v5822_v51  ;;  %v4773_v51 = vld [vmem:[%s10128_s3 + $0x1390] sm:$0xff] }
 0x3ef   :  { %5825 = vmatprep.subr.bf16.mxu0 %v5824_v45  ;;  %v4776_v45 = vld [vmem:[%s10128_s3 + $0x13a8] sm:$0xff]  ;;  %v5854_v18 = vpack.c.bf16 %v4773_v51, %v4771_v57  ;;  %v4803_v51 = vld [vmem:[%s10128_s3 + $0x1480] sm:$0xff] }
 0x3f0   :  { %v5856_v9 = vpack.c.bf16 %v4778_v49, %v4776_v45  ;;  %v4805_v45 = vld [vmem:[%s10128_s3 + $0x1490] sm:$0xff]  ;;  %v4808_v49 = vld [vmem:[%s10128_s3 + $0x14a8] sm:$0xff] }
 0x3f2   :  { %5827 = vmatpush1.bf16.msra.mxu0 %v5826_v37  ;;  %v4777_v37 = vld [vmem:[%s10128_s3 + $0x13b0] sm:$0xff] }
 0x3f3   :  { %5829 = vmatprep.subr.bf16.mxu0 %v5828_v22  ;;  %v4780_v22 = vld [vmem:[%s10128_s3 + $0x13c8] sm:$0xff]  ;;  %v5858_v48 = vpack.c.bf16 %v4777_v37, %v4775_v61  ;;  %v4807_v37 = vld [vmem:[%s10128_s3 + $0x14a0] sm:$0xff] }
 0x3f4   :  { %v5860_v27 = vpack.c.bf16 %v4782_v0, %v4780_v22  ;;  %v4809_v22 = vld [vmem:[%s10128_s3 + $0x14b0] sm:$0xff]  ;;  %v4812_v0 = vld [vmem:[%s10128_s3 + $0x14c8] sm:$0xff] }
 0x3f6   :  { %5831 = vmatpush1.bf16.msra.mxu0 %v5830_v19  ;;  %v4781_v19 = vld [vmem:[%s10128_s3 + $0x13d0] sm:$0xff] }
 0x3f7   :  { %5833 = vmatprep.subr.bf16.mxu0 %v5832_v55  ;;  %v4784_v55 = vld [vmem:[%s10128_s3 + $0x13e8] sm:$0xff]  ;;  %v5862_v4 = vpack.c.bf16 %v4781_v19, %v4779_v28  ;;  %v4811_v19 = vld [vmem:[%s10128_s3 + $0x14c0] sm:$0xff] }
 0x3f8   :  { %v5864_v21 = vpack.c.bf16 %v4786_v38, %v4784_v55  ;;  %v4813_v55 = vld [vmem:[%s10128_s3 + $0x14d0] sm:$0xff]  ;;  %v4816_v38 = vld [vmem:[%s10128_s3 + $0x14e8] sm:$0xff] }
 0x3fa   :  { %5835 = vmatpush1.bf16.msra.mxu0 %v5834_v43  ;;  %v4785_v43 = vld [vmem:[%s10128_s3 + $0x13f0] sm:$0xff] }
 0x3fb   :  { %5837 = vmatprep.subr.bf16.mxu0 %v5836_v12  ;;  %v5866_v12 = vpack.c.bf16 %v4785_v43, %v4783_v40  ;;  %v4815_v43 = vld [vmem:[%s10128_s3 + $0x14e0] sm:$0xff] }
 0x3fc   :  { %v5898_v8 = vpack.c.bf16 %v4817_v58, %v4815_v43  ;;  %v4837_v43 = vld [vmem:[%s10128_s3 + $0x1590] sm:$0xff] }
 0x3fd   :  { %3160 = vmatmul.mubr.f32.vlgmr.msra.gmra.mrb[0].mxu0 %v1152_v1  ;;  %v4792_v1 = vld [vmem:[%s10128_s3 + $0x1428] sm:$0xff] }
 0x3fe   :  { %5839 = vmatpush1.bf16.msra.mxu0 %v5838_v33  ;;  %3265 = vmatprep.mubr.f32.mxu0 %v10161_v29  ;;  %v4789_v33 = vld [vmem:[%s10128_s3 + $0x1410] sm:$0xff]  ;;  %v5872_v7 = vpack.c.bf16 %v4794_v35, %v4792_v1  ;;  %v4824_v35 = vld [vmem:[%s10128_s3 + $0x1528] sm:$0xff] }
 0x3ff   :  { %5841 = vmatprep.subr.bf16.mxu0 %v5840_v25  ;;  %v5870_v47 = vpack.c.bf16 %v4789_v33, %v4787_v52  ;;  %v1153_v25 = vmax.f32 %v1128_v59, 0.0  ;;  %v10170_v59 = vmax.f32 %v7506_v14, %v8034_v42  ;;  %v4819_v33 = vld [vmem:[%s10128_s3 + $0x1500] sm:$0xff]  ;;  %v4821_v1 = vld [vmem:[%s10128_s3 + $0x1510] sm:$0xff]  ;;  %v4826_v14 = vld [vmem:[%s10128_s3 + $0x1538] sm:$0xff] }
 0x400   :  { %v5902_v42 = vpack.c.bf16 %v4821_v1, %v4819_v33  ;;  %v3844_v33 = vld [vmem:[%s10130_s5 + $0xc0] sm:$0xff]  ;;  %v3845_v1 = vld [vmem:[%s10130_s5 + $0xc8] sm:$0xff] }
 0x402   :  { %5843 = vmatpush1.bf16.msra.mxu0 %v5842_v23  ;;  %v4798_v23 = vld [vmem:[%s10128_s3 + $0x1458] sm:$0xff] }
 0x403   :  { %5845 = vmatprep.subr.bf16.mxu0 %v5844_v36  ;;  %v5874_v36 = vpack.c.bf16 %v4793_v60, %v4791_v30  ;;  %v5876_v24 = vpack.c.bf16 %v4798_v23, %v4796_v3  ;;  %v4825_v30 = vld [vmem:[%s10128_s3 + $0x1530] sm:$0xff]  ;;  %v4828_v60 = vld [vmem:[%s10128_s3 + $0x1548] sm:$0xff]  ;;  %v4830_v3 = vld [vmem:[%s10128_s3 + $0x1558] sm:$0xff] }
 0x404   :  { %v4827_v23 = vld [vmem:[%s10128_s3 + $0x1540] sm:$0xff] }
 0x406   :  { %5847 = vmatpush1.bf16.msra.mxu0 %v5846_v46  ;;  %v4802_v46 = vld [vmem:[%s10128_s3 + $0x1478] sm:$0xff] }
 0x407   :  { %5849 = vmatprep.subr.bf16.mxu0 %v5848_v2  ;;  %v5878_v2 = vpack.c.bf16 %v4797_v63, %v4795_v53  ;;  %v5880_v39 = vpack.c.bf16 %v4802_v46, %v4800_v6  ;;  %v4832_v53 = vld [vmem:[%s10128_s3 + $0x1568] sm:$0xff]  ;;  %v4834_v63 = vld [vmem:[%s10128_s3 + $0x1578] sm:$0xff]  ;;  %v3836_v6 = vld [vmem:[%s10130_s5 + $0x80] sm:$0xff] }
 0x408   :  { %v3837_v46 = vld [vmem:[%s10130_s5 + $0x88] sm:$0xff] }
 0x40a   :  { %5851 = vmatpush1.bf16.msra.mxu0 %v5850_v41  ;;  %v4806_v41 = vld [vmem:[%s10128_s3 + $0x1498] sm:$0xff] }
 0x40b   :  { %5853 = vmatprep.subr.bf16.mxu0 %v5852_v13  ;;  %v5882_v13 = vpack.c.bf16 %v4801_v54, %v4799_v31  ;;  %v5884_v57 = vpack.c.bf16 %v4806_v41, %v4804_v34  ;;  %v6028_v31 = vpack.c.bf16 %v3837_v46, %v3836_v6  ;;  %v3821_v54 = vld [vmem:[%s10130_s5 + $0x8] sm:$0xff]  ;;  %v3838_v34 = vld [vmem:[%s10130_s5 + $0x90] sm:$0xff]  ;;  %v3839_v41 = vld [vmem:[%s10130_s5 + $0x98] sm:$0xff] }
 0x40d   :  { %6029 = vmatprep.subr.bf16.mxu1 %v6028_v31  ;;  %v3830_v31 = vld [vmem:[%s10130_s5 + $0x50] sm:$0xff] }
 0x40e   :  { %5855 = vmatpush1.bf16.msra.mxu0 %v5854_v18  ;;  %v4810_v18 = vld [vmem:[%s10128_s3 + $0x14b8] sm:$0xff] }
 0x40f   :  { %5857 = vmatprep.subr.bf16.mxu0 %v5856_v9  ;;  %v5886_v9 = vpack.c.bf16 %v4805_v45, %v4803_v51  ;;  %v5888_v61 = vpack.c.bf16 %v4810_v18, %v4808_v49  ;;  %v3822_v51 = vld [vmem:[%s10130_s5 + $0x10] sm:$0xff]  ;;  %v3823_v45 = vld [vmem:[%s10130_s5 + $0x18] sm:$0xff]  ;;  %v3840_v49 = vld [vmem:[%s10130_s5 + $0xa0] sm:$0xff] }
 0x410   :  { %v3841_v18 = vld [vmem:[%s10130_s5 + $0xa8] sm:$0xff] }
 0x412   :  { %5859 = vmatpush1.bf16.msra.mxu0 %v5858_v48  ;;  %v4814_v48 = vld [vmem:[%s10128_s3 + $0x14d8] sm:$0xff] }
 0x413   :  { %5861 = vmatprep.subr.bf16.mxu0 %v5860_v27  ;;  %v5890_v27 = vpack.c.bf16 %v4809_v22, %v4807_v37  ;;  %v5892_v28 = vpack.c.bf16 %v4814_v48, %v4812_v0  ;;  %v4833_v37 = vld [vmem:[%s10128_s3 + $0x1570] sm:$0xff]  ;;  %v6034_v22 = vpack.c.bf16 %v3823_v45, %v3822_v51  ;;  %v5912_v0 = vpack.c.bf16 %v4834_v63, %v4832_v53  ;;  %v4836_v48 = vld [vmem:[%s10128_s3 + $0x1588] sm:$0xff]  ;;  %v4843_v63 = vld [vmem:[%s10128_s3 + $0x15c0] sm:$0xff] }
 0x414   :  { %v4847_v45 = vld [vmem:[%s10128_s3 + $0x15e0] sm:$0xff] }
 0x416   :  { %5863 = vmatpush1.bf16.msra.mxu0 %v5862_v4  ;;  %v4818_v4 = vld [vmem:[%s10128_s3 + $0x14f8] sm:$0xff] }
 0x417   :  { %5865 = vmatprep.subr.bf16.mxu0 %v5864_v21  ;;  %v5894_v21 = vpack.c.bf16 %v4813_v55, %v4811_v19  ;;  %v5896_v40 = vpack.c.bf16 %v4818_v4, %v4816_v38  ;;  %v3825_v19 = vld [vmem:[%s10130_s5 + $0x28] sm:$0xff]  ;;  %v4838_v55 = vld [vmem:[%s10128_s3 + $0x1598] sm:$0xff]  ;;  %v3842_v38 = vld [vmem:[%s10130_s5 + $0xb0] sm:$0xff] }
 0x418   :  { %v3843_v4 = vld [vmem:[%s10130_s5 + $0xb8] sm:$0xff] }
 0x41a   :  { %5867 = vmatpush1.bf16.msra.mxu0 %v5866_v12  ;;  %v4822_v12 = vld [vmem:[%s10128_s3 + $0x1518] sm:$0xff] }
 0x41b   :  { %5869 = vmatprep.subr.bf16.mxu0 %v5868_v50  ;;  %v1129_v50 = vadd.f32 %v9146_v16, %v10170_v59  ;;  %v5900_v52 = vpack.c.bf16 %v4822_v12, %v4820_v56  ;;  %v5916_v56 = vpack.c.bf16 %v4838_v55, %v4836_v48  ;;  %v4840_v12 = vld [vmem:[%s10128_s3 + $0x15a8] sm:$0xff]  ;;  %v3826_v59 = vld [vmem:[%s10130_s5 + $0x30] sm:$0xff]  ;;  %v4851_v48 = vld [vmem:[%s10128_s3 + $0x1600] sm:$0xff] }
 0x41d   :  { %3266 = vmatmul.mubr.f32.vlgmr.msra.gmra.mrb[0].mxu0 %v1153_v25  ;;  %v5904_v25 = vpack.c.bf16 %v4826_v14, %v4824_v35  ;;  %v4839_v14 = vld [vmem:[%s10128_s3 + $0x15a0] sm:$0xff] }
 0x41e   :  { %5871 = vmatpush1.bf16.msra.mxu0 %v5870_v47  ;;  %3371 = vmatprep.mubr.f32.mxu0 %v10161_v29  ;;  %v1154_v47 = vmax.f32 %v1129_v50, 0.0  ;;  %v3827_v50 = vld [vmem:[%s10130_s5 + $0x38] sm:$0xff] }
 0x41f   :  { %5873 = vmatprep.subr.bf16.mxu0 %v5872_v7  ;;  %v4823_v7 = vld [vmem:[%s10128_s3 + $0x1520] sm:$0xff] }
 0x422   :  { %5875 = vmatpush1.bf16.msra.mxu0 %v5874_v36  ;;  %v4829_v36 = vld [vmem:[%s10128_s3 + $0x1550] sm:$0xff] }
 0x423   :  { %5877 = vmatprep.subr.bf16.mxu0 %v5876_v24  ;;  %v5906_v24 = vpack.c.bf16 %v4825_v30, %v4823_v7  ;;  %v4844_v7 = vld [vmem:[%s10128_s3 + $0x15c8] sm:$0xff]  ;;  %v6044_v30 = vpack.c.bf16 %v3845_v1, %v3844_v33  ;;  %v4863_v33 = vld [vmem:[%s10128_s3 + $0x1660] sm:$0xff]  ;;  %v4865_v1 = vld [vmem:[%s10128_s3 + $0x1670] sm:$0xff] }
 0x426   :  { %5879 = vmatpush1.bf16.msra.mxu0 %v5878_v2  ;;  %v3820_v2 = vld [vmem:[%s10130_s5] sm:$0xff] }
 0x427   :  { %5881 = vmatprep.subr.bf16.mxu0 %v5880_v39  ;;  %v5908_v39 = vpack.c.bf16 %v4830_v3, %v4828_v60  ;;  %v3828_v60 = vld [vmem:[%s10130_s5 + $0x40] sm:$0xff]  ;;  %v3829_v3 = vld [vmem:[%s10130_s5 + $0x48] sm:$0xff] }
 0x428   :  { %v6046_v6 = vpack.c.bf16 %v3829_v3, %v3828_v60  ;;  %v4874_v60 = vld [vmem:[%s10128_s3 + $0x16b8] sm:$0xff] }
 0x42a   :  { %5883 = vmatpush1.bf16.msra.mxu0 %v5882_v13  ;;  %v6030_v13 = vpack.c.bf16 %v3821_v54, %v3820_v2  ;;  %v4845_v2 = vld [vmem:[%s10128_s3 + $0x15d0] sm:$0xff]  ;;  %v3831_v54 = vld [vmem:[%s10130_s5 + $0x58] sm:$0xff] }
 0x42b   :  { %5885 = vmatprep.subr.bf16.mxu0 %v5884_v57  ;;  %v6032_v57 = vpack.c.bf16 %v3839_v41, %v3838_v34  ;;  %v4848_v34 = vld [vmem:[%s10128_s3 + $0x15e8] sm:$0xff]  ;;  %v4850_v41 = vld [vmem:[%s10128_s3 + $0x15f8] sm:$0xff] }
 0x42c   :  { %6031 = vmatpush3.bf16.msra.mxu1 %v6030_v13  ;;  %v5926_v13 = vpack.c.bf16 %v4845_v2, %v4843_v63  ;;  %v5928_v51 = vpack.c.bf16 %v4850_v41, %v4848_v34  ;;  %v4878_v63 = vld [vmem:[%s10128_s3 + $0x16d8] sm:$0xff]  ;;  %v4875_v2 = vld [vmem:[%s10128_s3 + $0x16c0] sm:$0xff] }
 0x42d   :  { %6033 = vmatprep.subr.bf16.mxu1 %v6032_v57  ;;  %v6050_v57 = vpack.c.bf16 %v3831_v54, %v3830_v31  ;;  %v4880_v31 = vld [vmem:[%s10128_s3 + $0x16e8] sm:$0xff]  ;;  %v4882_v54 = vld [vmem:[%s10128_s3 + $0x16f8] sm:$0xff] }
 0x42e   :  { %5887 = vmatpush1.bf16.msra.mxu0 %v5886_v9  ;;  %v5910_v9 = vpack.c.bf16 %v4829_v36, %v4827_v23  ;;  %v4846_v23 = vld [vmem:[%s10128_s3 + $0x15d8] sm:$0xff]  ;;  %v3846_v36 = vld [vmem:[%s10130_s5 + $0xd0] sm:$0xff]  ;;  %v5960_v41 = vpack.c.bf16 %v4882_v54, %v4880_v31  ;;  %v4916_v31 = vld [vmem:[%s10128_s3 + $0x1808] sm:$0xff] }
 0x42f   :  { %5889 = vmatprep.subr.bf16.mxu0 %v5888_v61  ;;  %v4831_v61 = vld [vmem:[%s10128_s3 + $0x1560] sm:$0xff]  ;;  %v5924_v46 = vpack.c.bf16 %v4846_v23, %v4844_v7  ;;  %v4869_v7 = vld [vmem:[%s10128_s3 + $0x1690] sm:$0xff]  ;;  %v4918_v54 = vld [vmem:[%s10128_s3 + $0x1818] sm:$0xff] }
 0x430   :  { %6035 = vmatpush3.bf16.msra.mxu1 %v6034_v22 }
 0x432   :  { %5891 = vmatpush1.bf16.msra.mxu0 %v5890_v27  ;;  %v6036_v27 = vpack.c.bf16 %v3841_v18, %v3840_v49  ;;  %v4849_v49 = vld [vmem:[%s10128_s3 + $0x15f0] sm:$0xff]  ;;  %v4852_v18 = vld [vmem:[%s10128_s3 + $0x1608] sm:$0xff] }
 0x433   :  { %5893 = vmatprep.subr.bf16.mxu0 %v5892_v28  ;;  %v3824_v28 = vld [vmem:[%s10130_s5 + $0x20] sm:$0xff] }
 0x434   :  { %v6038_v58 = vpack.c.bf16 %v3825_v19, %v3824_v28  ;;  %6037 = vmatprep.subr.bf16.mxu1 %v6036_v27  ;;  %v4853_v27 = vld [vmem:[%s10128_s3 + $0x1610] sm:$0xff]  ;;  %v4856_v28 = vld [vmem:[%s10128_s3 + $0x1628] sm:$0xff] }
 0x436   :  { %5895 = vmatpush1.bf16.msra.mxu0 %v5894_v21  ;;  %v5914_v21 = vpack.c.bf16 %v4833_v37, %v4831_v61  ;;  %6039 = vmatpush3.bf16.msra.mxu1 %v6038_v58  ;;  %v5930_v61 = vpack.c.bf16 %v4849_v49, %v4847_v45  ;;  %v10171_v37 = vmax.f32 %v7511_v26, %v8062_v10  ;;  %v4858_v26 = vld [vmem:[%s10128_s3 + $0x1638] sm:$0xff] }
 0x437   :  { %5897 = vmatprep.subr.bf16.mxu0 %v5896_v40  ;;  %v4835_v40 = vld [vmem:[%s10128_s3 + $0x1580] sm:$0xff]  ;;  %v5934_v10 = vpack.c.bf16 %v4853_v27, %v4851_v48  ;;  %v5936_v55 = vpack.c.bf16 %v4858_v26, %v4856_v28  ;;  %v4886_v45 = vld [vmem:[%s10128_s3 + $0x1718] sm:$0xff]  ;;  %v4889_v28 = vld [vmem:[%s10128_s3 + $0x1730] sm:$0xff] }
 0x438   :  { %v5918_v35 = vpack.c.bf16 %v4837_v43, %v4835_v40  ;;  %v1130_v22 = vadd.f32 %v9146_v16, %v10171_v37  ;;  %v4862_v40 = vld [vmem:[%s10128_s3 + $0x1658] sm:$0xff]  ;;  %v4883_v37 = vld [vmem:[%s10128_s3 + $0x1700] sm:$0xff]  ;;  %v4892_v26 = vld [vmem:[%s10128_s3 + $0x1748] sm:$0xff] }
 0x439   :  { %v4887_v27 = vld [vmem:[%s10128_s3 + $0x1720] sm:$0xff] }
 0x43a   :  { %5899 = vmatpush1.bf16.msra.mxu0 %v5898_v8  ;;  %v6040_v8 = vpack.c.bf16 %v3843_v4, %v3842_v38  ;;  %v1155_v19 = vmax.f32 %v1130_v22, 0.0  ;;  %v4855_v38 = vld [vmem:[%s10128_s3 + $0x1620] sm:$0xff]  ;;  %v4857_v4 = vld [vmem:[%s10128_s3 + $0x1630] sm:$0xff] }
 0x43b   :  { %5901 = vmatprep.subr.bf16.mxu0 %v5900_v52  ;;  %v4842_v52 = vld [vmem:[%s10128_s3 + $0x15b8] sm:$0xff]  ;;  %v5938_v43 = vpack.c.bf16 %v4857_v4, %v4855_v38  ;;  %v4885_v22 = vld [vmem:[%s10128_s3 + $0x1710] sm:$0xff]  ;;  %v4891_v38 = vld [vmem:[%s10128_s3 + $0x1740] sm:$0xff] }
 0x43c   :  { %6041 = vmatprep.subr.bf16.mxu1 %v6040_v8  ;;  %v4864_v8 = vld [vmem:[%s10128_s3 + $0x1668] sm:$0xff]  ;;  %v4893_v4 = vld [vmem:[%s10128_s3 + $0x1750] sm:$0xff] }
 0x43d   :  { %3372 = vmatmul.mubr.f32.vlgmr.msra.gmra.mrb[0].mxu0 %v1154_v47  ;;  %v6042_v47 = vpack.c.bf16 %v3827_v50, %v3826_v59  ;;  %v4866_v59 = vld [vmem:[%s10128_s3 + $0x1678] sm:$0xff] }
 0x43e   :  { %5903 = vmatpush1.bf16.msra.mxu0 %v5902_v42  ;;  %3477 = vmatprep.mubr.f32.mxu0 %v10161_v29  ;;  %v4841_v42 = vld [vmem:[%s10128_s3 + $0x15b0] sm:$0xff] }
 0x43f   :  { %5905 = vmatprep.subr.bf16.mxu0 %v5904_v25  ;;  %v5920_v25 = vpack.c.bf16 %v4842_v52, %v4840_v12  ;;  %v5922_v53 = vpack.c.bf16 %v4841_v42, %v4839_v14  ;;  %6043 = vmatpush3.bf16.msra.mxu1 %v6042_v47  ;;  %v4861_v12 = vld [vmem:[%s10128_s3 + $0x1650] sm:$0xff]  ;;  %v5944_v52 = vpack.c.bf16 %v4866_v59, %v4864_v8  ;;  %v4870_v14 = vld [vmem:[%s10128_s3 + $0x1698] sm:$0xff]  ;;  %v4900_v8 = vld [vmem:[%s10128_s3 + $0x1788] sm:$0xff] }
 0x440   :  { %6045 = vmatprep.subr.bf16.mxu1 %v6044_v30  ;;  %v5946_v42 = vpack.c.bf16 %v4865_v1, %v4863_v33  ;;  %v4872_v30 = vld [vmem:[%s10128_s3 + $0x16a8] sm:$0xff]  ;;  %v4902_v59 = vld [vmem:[%s10128_s3 + $0x1798] sm:$0xff]  ;;  %v4899_v33 = vld [vmem:[%s10128_s3 + $0x1780] sm:$0xff] }
 0x441   :  { %v5952_v23 = vpack.c.bf16 %v4874_v60, %v4872_v30  ;;  %v4901_v1 = vld [vmem:[%s10128_s3 + $0x1790] sm:$0xff]  ;;  %v4908_v30 = vld [vmem:[%s10128_s3 + $0x17c8] sm:$0xff]  ;;  %v4910_v60 = vld [vmem:[%s10128_s3 + $0x17d8] sm:$0xff] }
 0x442   :  { %5907 = vmatpush1.bf16.msra.mxu0 %v5906_v24  ;;  %v3847_v24 = vld [vmem:[%s10130_s5 + $0xd8] sm:$0xff] }
 0x443   :  { %5909 = vmatprep.subr.bf16.mxu0 %v5908_v39  ;;  %v6048_v39 = vpack.c.bf16 %v3847_v24, %v3846_v36  ;;  %6047 = vmatpush3.bf16.msra.mxu1 %v6046_v6  ;;  %v4871_v36 = vld [vmem:[%s10128_s3 + $0x16a0] sm:$0xff]  ;;  %v4873_v24 = vld [vmem:[%s10128_s3 + $0x16b0] sm:$0xff] }
 0x444   :  { %v5954_v6 = vpack.c.bf16 %v4873_v24, %v4871_v36  ;;  %v4907_v36 = vld [vmem:[%s10128_s3 + $0x17c0] sm:$0xff]  ;;  %v4909_v24 = vld [vmem:[%s10128_s3 + $0x17d0] sm:$0xff] }
 0x445   :  { %6049 = vmatprep.subr.bf16.mxu1 %v6048_v39  ;;  %v4877_v39 = vld [vmem:[%s10128_s3 + $0x16d0] sm:$0xff] }
 0x446   :  { %5911 = vmatpush1.bf16.msra.mxu0 %v5910_v9  ;;  %v4854_v9 = vld [vmem:[%s10128_s3 + $0x1618] sm:$0xff]  ;;  %v5958_v34 = vpack.c.bf16 %v4877_v39, %v4875_v2  ;;  %v4911_v2 = vld [vmem:[%s10128_s3 + $0x17e0] sm:$0xff]  ;;  %v4913_v39 = vld [vmem:[%s10128_s3 + $0x17f0] sm:$0xff] }
 0x447   :  { %5913 = vmatprep.subr.bf16.mxu0 %v5912_v0  ;;  %6051 = vmatpush3.bf16.msra.mxu1 %v6050_v57  ;;  %v5932_v0 = vpack.c.bf16 %v4854_v9, %v4852_v18  ;;  %v4881_v57 = vld [vmem:[%s10128_s3 + $0x16f0] sm:$0xff]  ;;  %v10172_v18 = vmax.f32 %v7516_v17, %v8094_v20  ;;  %v4890_v17 = vld [vmem:[%s10128_s3 + $0x1738] sm:$0xff]  ;;  %v5966_v20 = vpack.c.bf16 %v4885_v22, %v4883_v37  ;;  %v4919_v37 = vld [vmem:[%s10128_s3 + $0x1820] sm:$0xff] }
 0x448   :  { %v4921_v22 = vld [vmem:[%s10128_s3 + $0x1830] sm:$0xff] }
 0x449   :  { %v1131_v9 = vadd.f32 %v9146_v16, %v10172_v18  ;;  %v4920_v18 = vld [vmem:[%s10128_s3 + $0x1828] sm:$0xff] }
 0x44a   :  { %5915 = vmatpush1.bf16.msra.mxu0 %v5914_v21  ;;  %v4860_v21 = vld [vmem:[%s10128_s3 + $0x1648] sm:$0xff] }
 0x44b   :  { %5917 = vmatprep.subr.bf16.mxu0 %v5916_v56  ;;  %v5940_v58 = vpack.c.bf16 %v4862_v40, %v4860_v21  ;;  %v4859_v56 = vld [vmem:[%s10128_s3 + $0x1640] sm:$0xff]  ;;  %v1156_v16 = vmax.f32 %v1131_v9, 0.0  ;;  %v4896_v21 = vld [vmem:[%s10128_s3 + $0x1768] sm:$0xff]  ;;  %v4898_v40 = vld [vmem:[%s10128_s3 + $0x1778] sm:$0xff] }
 0x44c   :  { %v5942_v50 = vpack.c.bf16 %v4861_v12, %v4859_v56  ;;  %v4895_v56 = vld [vmem:[%s10128_s3 + $0x1760] sm:$0xff]  ;;  %v4897_v12 = vld [vmem:[%s10128_s3 + $0x1770] sm:$0xff] }
 0x44e   :  { %5919 = vmatpush1.bf16.msra.mxu0 %v5918_v35  ;;  %v4868_v35 = vld [vmem:[%s10128_s3 + $0x1688] sm:$0xff] }
 0x44f   :  { %5921 = vmatprep.subr.bf16.mxu0 %v5920_v25  ;;  %v5948_v47 = vpack.c.bf16 %v4870_v14, %v4868_v35  ;;  %v4867_v25 = vld [vmem:[%s10128_s3 + $0x1680] sm:$0xff]  ;;  %v4904_v35 = vld [vmem:[%s10128_s3 + $0x17a8] sm:$0xff]  ;;  %v4906_v14 = vld [vmem:[%s10128_s3 + $0x17b8] sm:$0xff] }
 0x450   :  { %v5950_v3 = vpack.c.bf16 %v4869_v7, %v4867_v25  ;;  %v4903_v25 = vld [vmem:[%s10128_s3 + $0x17a0] sm:$0xff]  ;;  %v4905_v7 = vld [vmem:[%s10128_s3 + $0x17b0] sm:$0xff] }
 0x452   :  { %5923 = vmatpush1.bf16.msra.mxu0 %v5922_v53  ;;  %v4876_v53 = vld [vmem:[%s10128_s3 + $0x16c8] sm:$0xff] }
 0x453   :  { %5925 = vmatprep.subr.bf16.mxu0 %v5924_v46  ;;  %v5956_v46 = vpack.c.bf16 %v4878_v63, %v4876_v53  ;;  %v4912_v53 = vld [vmem:[%s10128_s3 + $0x17e8] sm:$0xff]  ;;  %v4914_v63 = vld [vmem:[%s10128_s3 + $0x17f8] sm:$0xff] }
 0x456   :  { %5927 = vmatpush1.bf16.msra.mxu0 %v5926_v13  ;;  %v4879_v13 = vld [vmem:[%s10128_s3 + $0x16e0] sm:$0xff] }
 0x457   :  { %5929 = vmatprep.subr.bf16.mxu0 %v5928_v51  ;;  %v4884_v51 = vld [vmem:[%s10128_s3 + $0x1708] sm:$0xff]  ;;  %v5962_v49 = vpack.c.bf16 %v4881_v57, %v4879_v13  ;;  %v10173_v13 = vmax.f32 %v7521_v62, %v8122_v11  ;;  %v4922_v62 = vld [vmem:[%s10128_s3 + $0x1838] sm:$0xff] }
 0x45a   :  { %5931 = vmatpush1.bf16.msra.mxu0 %v5930_v61  ;;  %v5964_v61 = vpack.c.bf16 %v4886_v45, %v4884_v51  ;;  %v5996_v51 = vpack.c.bf16 %v4918_v54, %v4916_v31  ;;  %v4915_v45 = vld [vmem:[%s10128_s3 + $0x1800] sm:$0xff]  ;;  %v3850_v54 = vld [vmem:[%s10130_s5 + $0xf0] sm:$0xff] }
 0x45b   :  { %5933 = vmatprep.subr.bf16.mxu0 %v5932_v0  ;;  %v4888_v0 = vld [vmem:[%s10128_s3 + $0x1728] sm:$0xff]  ;;  %v3832_v31 = vld [vmem:[%s10130_s5 + $0x60] sm:$0xff] }
 0x45c   :  { %v5968_v48 = vpack.c.bf16 %v4890_v17, %v4888_v0  ;;  %v4924_v0 = vld [vmem:[%s10128_s3 + $0x1848] sm:$0xff]  ;;  %v4926_v17 = vld [vmem:[%s10128_s3 + $0x1858] sm:$0xff] }
 0x45d   :  { %3478 = vmatmul.mubr.f32.vlgmr.msra.gmra.mrb[0].mxu0 %v1155_v19  ;;  %v5970_v19 = vpack.c.bf16 %v4889_v28, %v4887_v27  ;;  %v4925_v27 = vld [vmem:[%s10128_s3 + $0x1850] sm:$0xff]  ;;  %v4928_v28 = vld [vmem:[%s10128_s3 + $0x1868] sm:$0xff] }
 0x45e   :  { %5935 = vmatpush1.bf16.msra.mxu0 %v5934_v10  ;;  %3583 = vmatprep.mubr.f32.mxu0 %v10161_v29  ;;  %v4894_v10 = vld [vmem:[%s10128_s3 + $0x1758] sm:$0xff] }
 0x45f   :  { %5937 = vmatprep.subr.bf16.mxu0 %v5936_v55  ;;  %v5972_v55 = vpack.c.bf16 %v4894_v10, %v4892_v26  ;;  %v4930_v26 = vld [vmem:[%s10128_s3 + $0x1878] sm:$0xff] }
 0x462   :  { %5939 = vmatpush1.bf16.msra.mxu0 %v5938_v43  ;;  %v5974_v43 = vpack.c.bf16 %v4893_v4, %v4891_v38  ;;  %v4929_v38 = vld [vmem:[%s10128_s3 + $0x1870] sm:$0xff]  ;;  %v4932_v4 = vld [vmem:[%s10128_s3 + $0x1888] sm:$0xff] }
 0x463   :  { %5941 = vmatprep.subr.bf16.mxu0 %v5940_v58  ;;  %v5976_v58 = vpack.c.bf16 %v4898_v40, %v4896_v21  ;;  %v4934_v21 = vld [vmem:[%s10128_s3 + $0x1898] sm:$0xff] }
 0x466   :  { %5943 = vmatpush1.bf16.msra.mxu0 %v5942_v50  ;;  %v5978_v50 = vpack.c.bf16 %v4897_v12, %v4895_v56  ;;  %v4933_v56 = vld [vmem:[%s10128_s3 + $0x1890] sm:$0xff]  ;;  %v4936_v12 = vld [vmem:[%s10128_s3 + $0x18a8] sm:$0xff] }
 0x467   :  { %5945 = vmatprep.subr.bf16.mxu0 %v5944_v52  ;;  %v5980_v52 = vpack.c.bf16 %v4902_v59, %v4900_v8  ;;  %v4938_v8 = vld [vmem:[%s10128_s3 + $0x18b8] sm:$0xff] }
 0x46a   :  { %5947 = vmatpush1.bf16.msra.mxu0 %v5946_v42  ;;  %v5982_v42 = vpack.c.bf16 %v4901_v1, %v4899_v33  ;;  %v4937_v33 = vld [vmem:[%s10128_s3 + $0x18b0] sm:$0xff]  ;;  %v4940_v1 = vld [vmem:[%s10128_s3 + $0x18c8] sm:$0xff] }
 0x46b   :  { %5949 = vmatprep.subr.bf16.mxu0 %v5948_v47  ;;  %v5984_v47 = vpack.c.bf16 %v4906_v14, %v4904_v35  ;;  %v4942_v35 = vld [vmem:[%s10128_s3 + $0x18d8] sm:$0xff] }
 0x46e   :  { %5951 = vmatpush1.bf16.msra.mxu0 %v5950_v3  ;;  %v5986_v3 = vpack.c.bf16 %v4905_v7, %v4903_v25  ;;  %v4941_v25 = vld [vmem:[%s10128_s3 + $0x18d0] sm:$0xff]  ;;  %v4944_v7 = vld [vmem:[%s10128_s3 + $0x18e8] sm:$0xff] }
 0x46f   :  { %5953 = vmatprep.subr.bf16.mxu0 %v5952_v23  ;;  %v5988_v23 = vpack.c.bf16 %v4910_v60, %v4908_v30  ;;  %v4946_v30 = vld [vmem:[%s10128_s3 + $0x18f8] sm:$0xff] }
 0x472   :  { %5955 = vmatpush1.bf16.msra.mxu0 %v5954_v6  ;;  %v5990_v6 = vpack.c.bf16 %v4909_v24, %v4907_v36  ;;  %v4945_v36 = vld [vmem:[%s10128_s3 + $0x18f0] sm:$0xff] }
 0x473   :  { %5957 = vmatprep.subr.bf16.mxu0 %v5956_v46  ;;  %v5992_v46 = vpack.c.bf16 %v4914_v63, %v4912_v53  ;;  %v10174_v53 = vmax.f32 %v7526_v32, %v8151_v44  ;;  %v3833_v32 = vld [vmem:[%s10130_s5 + $0x68] sm:$0xff] }
 0x474   :  { %v6054_v44 = vpack.c.bf16 %v3833_v32, %v3832_v31 }
 0x476   :  { %5959 = vmatpush1.bf16.msra.mxu0 %v5958_v34  ;;  %v5994_v34 = vpack.c.bf16 %v4913_v39, %v4911_v2  ;;  %v3849_v2 = vld [vmem:[%s10130_s5 + $0xe8] sm:$0xff] }
 0x477   :  { %5961 = vmatprep.subr.bf16.mxu0 %v5960_v41  ;;  %v9930_v41 = vld [vmem:[%s10129_s2] ss:$0 sm:$0xff] }
 0x478   :  { %v1132_v57 = vadd.f32 %v9930_v41, %v10173_v13  ;;  %v1133_v63 = vadd.f32 %v9930_v41, %v10174_v53  ;;  %v3834_v13 = vld [vmem:[%s10130_s5 + $0x70] sm:$0xff] }
 0x47a   :  { %5963 = vmatpush1.bf16.msra.mxu0 %v5962_v49  ;;  %v4917_v49 = vld [vmem:[%s10128_s3 + $0x1810] sm:$0xff]  ;;  %v1157_v9 = vmax.f32 %v1132_v57, 0.0  ;;  %v3835_v57 = vld [vmem:[%s10130_s5 + $0x78] sm:$0xff] }
 0x47b   :  { %5965 = vmatprep.subr.bf16.mxu0 %v5964_v61  ;;  %v5998_v11 = vpack.c.bf16 %v4917_v49, %v4915_v45  ;;  %v6000_v61 = vpack.c.bf16 %v4922_v62, %v4920_v18  ;;  %v10175_v45 = vmov 0.0|0.0   ;;  %v3806_v49 = vlaneseq }
 0x47d   :  { %3584 = vmatmul.mubr.f32.vlgmr.msra.gmra.mrb[0].mxu0 %v1156_v16  ;;  %v6004_v16 = vpack.c.bf16 %v4926_v17, %v4924_v0  ;;  %v3807_v18 = vshrl.u32 %v3806_v49, 7 }
 0x47e   :  { %5967 = vmatpush1.bf16.msra.mxu0 %v5966_v20  ;;  %3689 = vmatprep.mubr.f32.mxu0 %v10161_v29  ;;  %v6002_v20 = vpack.c.bf16 %v4921_v22, %v4919_v37 }
 0x47f   :  { %5969 = vmatprep.subr.bf16.mxu0 %v5968_v48  ;;  %v4923_v48 = vld [vmem:[%s10128_s3 + $0x1840] sm:$0xff]  ;;  %v3808_v62 = vsub.s32 0, %v3807_v18 }
 0x480   :  { %v6006_v10 = vpack.c.bf16 %v4925_v27, %v4923_v48  ;;  %v3930_v48 = vld [vmem:[%s10132_s7] sm:$0xff]  ;;  %v3931_v27 = vld [vmem:[%s10132_s7 + $0x8] sm:$0xff] }
 0x482   :  { %5971 = vmatpush1.bf16.msra.mxu0 %v5970_v19  ;;  %v6008_v19 = vpack.c.bf16 %v4930_v26, %v4928_v28 }
 0x483   :  { %5973 = vmatprep.subr.bf16.mxu0 %v5972_v55  ;;  %v4927_v55 = vld [vmem:[%s10128_s3 + $0x1860] sm:$0xff] }
 0x484   :  { %v6010_v40 = vpack.c.bf16 %v4929_v38, %v4927_v55  ;;  %v3934_v38 = vld [vmem:[%s10132_s7 + $0x20] sm:$0xff] }
 0x486   :  { %5975 = vmatpush1.bf16.msra.mxu0 %v5974_v43  ;;  %v6012_v43 = vpack.c.bf16 %v4934_v21, %v4932_v4  ;;  %v3935_v4 = vld [vmem:[%s10132_s7 + $0x28] sm:$0xff] }
 0x487   :  { %5977 = vmatprep.subr.bf16.mxu0 %v5976_v58  ;;  %v4931_v58 = vld [vmem:[%s10128_s3 + $0x1880] sm:$0xff]  ;;  %v6067_v21 = vpack.c.bf16 %v3935_v4, %v3934_v38 }
 0x488   :  { %v6014_v59 = vpack.c.bf16 %v4933_v56, %v4931_v58  ;;  %v3938_v56 = vld [vmem:[%s10132_s7 + $0x40] sm:$0xff] }
 0x48a   :  { %5979 = vmatpush1.bf16.msra.mxu0 %v5978_v50  ;;  %v6016_v50 = vpack.c.bf16 %v4938_v8, %v4936_v12  ;;  %v3939_v12 = vld [vmem:[%s10132_s7 + $0x48] sm:$0xff] }
 0x48b   :  { %5981 = vmatprep.subr.bf16.mxu0 %v5980_v52  ;;  %v4935_v52 = vld [vmem:[%s10128_s3 + $0x18a0] sm:$0xff]  ;;  %v6073_v8 = vpack.c.bf16 %v3939_v12, %v3938_v56 }
 0x48c   :  { %v6018_v14 = vpack.c.bf16 %v4937_v33, %v4935_v52  ;;  %v3942_v33 = vld [vmem:[%s10132_s7 + $0x60] sm:$0xff] }
 0x48e   :  { %5983 = vmatpush1.bf16.msra.mxu0 %v5982_v42  ;;  %v6020_v42 = vpack.c.bf16 %v4942_v35, %v4940_v1  ;;  %v3943_v1 = vld [vmem:[%s10132_s7 + $0x68] sm:$0xff] }
 0x48f   :  { %5985 = vmatprep.subr.bf16.mxu0 %v5984_v47  ;;  %v4939_v47 = vld [vmem:[%s10128_s3 + $0x18c0] sm:$0xff]  ;;  %v6079_v35 = vpack.c.bf16 %v3943_v1, %v3942_v33 }
 0x490   :  { %v6022_v60 = vpack.c.bf16 %v4941_v25, %v4939_v47 }
 0x492   :  { %5987 = vmatpush1.bf16.msra.mxu0 %v5986_v3  ;;  %v6024_v3 = vpack.c.bf16 %v4946_v30, %v4944_v7  ;;  %v4947_v7 = vld [vmem:[%s10133_s6] ss:$0 sm:$0xff] }
 0x493   :  { %5989 = vmatprep.subr.bf16.mxu0 %v5988_v23  ;;  %v4943_v23 = vld [vmem:[%s10128_s3 + $0x18e0] sm:$0xff] }
 0x494   :  { %v6026_v24 = vpack.c.bf16 %v4945_v36, %v4943_v23  ;;  %v4948_v36 = vld [vmem:[%s10134_s8] ss:$0 sm:$0xff] }
 0x496   :  { %5991 = vmatpush1.bf16.msra.mxu0 %v5990_v6  ;;  %v1158_v6 = vmax.f32 %v1133_v63, 0.0 }
 0x497   :  { %5993 = vmatprep.subr.bf16.mxu0 %v5992_v46  ;;  %v3848_v46 = vld [vmem:[%s10130_s5 + $0xe0] sm:$0xff] }
 0x498   :  { %v6052_v39 = vpack.c.bf16 %v3849_v2, %v3848_v46 }
 0x49a   :  { %5995 = vmatpush1.bf16.msra.mxu0 %v5994_v34  ;;  %6053 = vmatprep.subr.bf16.mxu1 %v6052_v39  ;;  %v3851_v34 = vld [vmem:[%s10130_s5 + $0xf8] sm:$0xff] }
 0x49b   :  { %5997 = vmatprep.subr.bf16.mxu0 %v5996_v51  ;;  %6055 = vmatpush3.bf16.msra.mxu1 %v6054_v44  ;;  %v6056_v41 = vpack.c.bf16 %v3851_v34, %v3850_v54  ;;  %v6058_v51 = vpack.c.bf16 %v3835_v57, %v3834_v13 }
 0x49d   :  { %3690 = vmatmul.mubr.f32.vlgmr.msra.gmra.mrb[0].mxu0 %v1157_v9  ;;  %6057 = vmatprep.subr.bf16.mxu1 %v6056_v41  ;;  %v3812_v9 = vsub.s32 1, %v3807_v18 }
 0x49e   :  { %5999 = vmatpush1.bf16.msra.mxu0 %v5998_v11  ;;  %3795 = vmatprep.mubr.f32.mxu0 %v10161_v29  ;;  %v3804_v11 = vld [vmem:[%s10131_s4] sm:$0x3] }
 0x49f   :  { %6001 = vmatprep.subr.bf16.mxu0 %v6000_v61  ;;  %6059 = vmatpush3.bf16.msra.mxu1 %v6058_v51  ;;  %v3809_v61 = vrot.slane %v3804_v11, %v3808_v62  ;;  %v3813_v22 = vrot.slane %v3804_v11, %v3812_v9 }
 0x4a0   :  { %6060 = vmatprep.subr.bf16.mxu1 %v10175_v45 }
 0x4a2   :  { %6003 = vmatpush1.bf16.msra.mxu0 %v6002_v20 }
 0x4a3   :  { %6005 = vmatprep.subr.bf16.mxu0 %v6004_v16 }
 0x4a6   :  { %6007 = vmatpush1.bf16.msra.mxu0 %v6006_v10  ;;  %v6061_v10 = vpack.c.bf16 %v3931_v27, %v3930_v48 }
 0x4a7   :  { %6009 = vmatprep.subr.bf16.mxu0 %v6008_v19 }
 0x4aa   :  { %6011 = vmatpush1.bf16.msra.mxu0 %v6010_v40  ;;  %v3936_v40 = vld [vmem:[%s10132_s7 + $0x30] sm:$0xff] }
 0x4ab   :  { %6013 = vmatprep.subr.bf16.mxu0 %v6012_v43  ;;  %v3937_v43 = vld [vmem:[%s10132_s7 + $0x38] sm:$0xff] }
 0x4ac   :  { %v6070_v58 = vpack.c.bf16 %v3937_v43, %v3936_v40 }
 0x4ae   :  { %6015 = vmatpush1.bf16.msra.mxu0 %v6014_v59  ;;  %v3940_v59 = vld [vmem:[%s10132_s7 + $0x50] sm:$0xff] }
 0x4af   :  { %6017 = vmatprep.subr.bf16.mxu0 %v6016_v50  ;;  %v3941_v50 = vld [vmem:[%s10132_s7 + $0x58] sm:$0xff] }
 0x4b0   :  { %v6076_v52 = vpack.c.bf16 %v3941_v50, %v3940_v59 }
 0x4b2   :  { %6019 = vmatpush1.bf16.msra.mxu0 %v6018_v14  ;;  %v3944_v14 = vld [vmem:[%s10132_s7 + $0x70] sm:$0xff] }
 0x4b3   :  { %6021 = vmatprep.subr.bf16.mxu0 %v6020_v42  ;;  %v3945_v42 = vld [vmem:[%s10132_s7 + $0x78] sm:$0xff] }
 0x4b4   :  { %v6082_v47 = vpack.c.bf16 %v3945_v42, %v3944_v14 }
 0x4b6   :  { %6023 = vmatpush1.bf16.msra.mxu0 %v6022_v60 }
 0x4b7   :  { %6025 = vmatprep.subr.bf16.mxu0 %v6024_v3 }
 0x4ba   :  { %6027 = vmatpush1.bf16.msra.mxu0 %v6026_v24 }
 0x4bd   :  { %3796 = vmatmul.mubr.f32.vlgmr.msra.gmra.mrb[0].mxu0 %v1158_v6 }
 0x590   :  { %v3797_v37 = vpop.f32.mrb[0].mxu0 }
 0x591   :  { %v6084_v0 = vadd.f32 %v3797_v37, %v9073_v5  ;;  %v3799_v17 = vpop.f32.mrb[1].mxu0  ;;  %v3932_v5 = vld [vmem:[%s10132_s7 + $0x10] sm:$0xff] }
 0x592   :  { %v6085_v20 = vadd.f32 %v3799_v17, %v9081_v15  ;;  %v3933_v15 = vld [vmem:[%s10132_s7 + $0x18] sm:$0xff] }
 0x593   :  { %v3816_v16 = vadd.f32 %v6084_v0, %v3809_v61  ;;  %v6064_v55 = vpack.c.bf16 %v3933_v15, %v3932_v5 }
 0x594   :  { %v3817_v28 = vadd.f32 %v6085_v20, %v3813_v22 }
 0x595   :  { %v3818_v19 = vmax.f32 %v3816_v16, 0.0 }
 0x596   :  { %v3819_v26 = vmax.f32 %v3817_v28, 0.0 }
 0x598   :  { %3923 = vmatprep.mubr.f32.mxu1 %v3819_v26 }
 0x599   :  { %3924 = vmatmul.mubr.f32.vlgmr.msra.gmra.mrb[202].mxu1 %v3818_v19 }
 0x59a   :  { %6062 = vmatpush3.bf16.msra.mxu1 %v6061_v10  ;;  %5033 = vmatprep.mubr.msk.f32.mxu1 %vm6140_vm0, %v10161_v29 }
 0x59b   :  { %6063 = vmatprep.subr.bf16.mxu1 %v10175_v45 }
 0x59e   :  { %6065 = vmatpush3.bf16.msra.mxu1 %v6064_v55 }
 0x59f   :  { %6066 = vmatprep.subr.bf16.mxu1 %v10175_v45 }
 0x5a2   :  { %6068 = vmatpush3.bf16.msra.mxu1 %v6067_v21 }
 0x5a3   :  { %6069 = vmatprep.subr.bf16.mxu1 %v10175_v45 }
 0x5a6   :  { %6071 = vmatpush3.bf16.msra.mxu1 %v6070_v58 }
 0x5a7   :  { %6072 = vmatprep.subr.bf16.mxu1 %v10175_v45 }
 0x5aa   :  { %6074 = vmatpush3.bf16.msra.mxu1 %v6073_v8 }
 0x5ab   :  { %6075 = vmatprep.subr.bf16.mxu1 %v10175_v45 }
 0x5ae   :  { %6077 = vmatpush3.bf16.msra.mxu1 %v6076_v52 }
 0x5af   :  { %6078 = vmatprep.subr.bf16.mxu1 %v10175_v45 }
 0x5b2   :  { %6080 = vmatpush3.bf16.msra.mxu1 %v6079_v35 }
 0x5b3   :  { %6081 = vmatprep.subr.bf16.mxu1 %v10175_v45 }
 0x5b6   :  { %6083 = vmatpush3.bf16.msra.mxu1 %v6082_v47 }
 0x66c   :  { %v4981_v25 = vpop.f32.mrb[202].mxu1 }
 0x66d   :  { %v4982_v30 = vpop.f32.mrb[203].mxu1 }
 0x66e   :  { %v4983_v60 = vadd.f32 %v4982_v30, %v4981_v25 }
 0x670   :  { %v3926_v3 = vadd.f32 %v4983_v60, %v4947_v7 }
 0x672   :  { %v3929_v23 = vmax.f32 %v3926_v3, 0.0 }
 0x674   :  { %5034 = vmatmul.mubr.f32.vlgmr.msra.gmra.mrb[204].mxu1 %v3929_v23 }
 0x747   :  { %v4019_v24 = vpop.f32.mrb[204].mxu1 }
 0x748   :  { %v4020_v53 = vadd.f32 %v4948_v36, %v4019_v24  ;;  %v5035_v63 = vpop.f32.mrb[205].mxu1 }
 0x74a   :  { %4023 = vst [vmem:[%s10135_s9] sm:$0xff] %v4020_v53 }

</bundles_post_ra>
